<compile_context>
chip_gen: v7x
topology: tpu7x:2x2x1
jax: 0.10.0
libtpu: 0.0.40
codegen_flags: <defaults>
</compile_context>

<pallas_src>
import jax
import jax.numpy as jnp
from jax.experimental import pallas as pl
from jax.experimental.pallas import tpu as pltpu


TB = 16            # batch tile per grid step (multiple of 8; rows = h*TB + b)
_BF16 = jnp.bfloat16
_F32 = jnp.float32


# ----------------------------------------------------------------------------
# The fused whole-network kernel (one batch tile of TB samples per grid step)
# ----------------------------------------------------------------------------
def _net_kernel(x_ref,
                w1_ref, b1_ref, w2_ref, b2_ref,
                wf1_ref, bf1_ref, wf2_ref, bf2_ref, wf3_ref, bf3_ref,
                out_ref,
                wp1_ref, p1_ref, wp2_ref, p2_ref):
    # ---------- conv1: 1 -> 6, 5x5 VALID, + bias + ReLU ----------------------
    # One matmul per kernel row; all 5 width-taps are folded into w1_ref[kh].
    # acc1: (24*TB, 24*6) f32, rows = h*TB + b, lanes = w*6 + c
    acc1 = None
    for kh in range(5):
        d = jnp.dot(x_ref[kh * TB:(kh + 24) * TB, :], w1_ref[kh],
                    preferred_element_type=_F32)
        acc1 = d if acc1 is None else acc1 + d
    y1 = jnp.maximum(acc1 + b1_ref[...], 0.0)

    # ---------- maxpool 2x2 (W via lane blocks, H via row blocks) ------------
    for w in range(12):
        wp1_ref[:, w * 6:(w + 1) * 6] = jnp.maximum(
            y1[:, (2 * w) * 6:(2 * w + 1) * 6],
            y1[:, (2 * w + 1) * 6:(2 * w + 2) * 6])
    for h in range(12):
        p1_ref[h * TB:(h + 1) * TB, :] = jnp.maximum(
            wp1_ref[(2 * h) * TB:(2 * h + 1) * TB, :],
            wp1_ref[(2 * h + 1) * TB:(2 * h + 2) * TB, :]).astype(_BF16)

    # ---------- conv2: 6 -> 16, 5x5 VALID, + bias + ReLU ---------------------
    # acc2: (8*TB, 8*16) f32; again one matmul per kernel row (width folded).
    acc2 = None
    for kh in range(5):
        d = jnp.dot(p1_ref[kh * TB:(kh + 8) * TB, :], w2_ref[kh],
                    preferred_element_type=_F32)
        acc2 = d if acc2 is None else acc2 + d
    y2 = jnp.maximum(acc2 + b2_ref[...], 0.0)

    # ---------- maxpool 2x2, result laid out (TB, 256): lanes = h*64+w*16+c --
    for w in range(4):
        wp2_ref[:, w * 16:(w + 1) * 16] = jnp.maximum(
            y2[:, (2 * w) * 16:(2 * w + 1) * 16],
            y2[:, (2 * w + 1) * 16:(2 * w + 2) * 16])
    for h in range(4):
        p2_ref[:, h * 64:(h + 1) * 64] = jnp.maximum(
            wp2_ref[(2 * h) * TB:(2 * h + 1) * TB, :],
            wp2_ref[(2 * h + 1) * TB:(2 * h + 2) * TB, :]).astype(_BF16)

    # ---------- fc1: 256 -> 256 + ReLU (single MXU matmul) -------------------
    h1 = jnp.maximum(
        jnp.dot(p2_ref[...], wf1_ref[...], preferred_element_type=_F32)
        + bf1_ref[...], 0.0)

    # ---------- fc2: 256 -> 84 (padded to 128 lanes) + ReLU ------------------
    h2 = jnp.maximum(
        jnp.dot(h1.astype(_BF16), wf2_ref[...], preferred_element_type=_F32)
        + bf2_ref[...], 0.0)

    # ---------- fc3: 84 -> 10 (padded to 128 lanes, lane-dense store) --------
    out_ref[...] = (
        jnp.dot(h2.astype(_BF16), wf3_ref[...], preferred_element_type=_F32)
        + bf3_ref[...]).astype(out_ref.dtype)


# ----------------------------------------------------------------------------
# One-time weight preprocessing (PyTorch layouts -> kernel layouts, bf16, pad)
# ----------------------------------------------------------------------------
def prepare_params(p):
    w1, b1 = p["w1"], p["b1"]        # (6,1,5,5), (6,)
    w2, b2 = p["w2"], p["b2"]        # (16,6,5,5), (16,)
    wf1, bf1 = p["wf1"], p["bf1"]    # (256,256), (256,)
    wf2, bf2 = p["wf2"], p["bf2"]    # (84,256),  (84,)
    wf3, bf3 = p["wf3"], p["bf3"]    # (10,84),   (10,)

    # conv1, per kernel-row kh: (28, 144) matrix with all 5 width taps folded:
    # entry [w_out + kw, w_out*6 + c] = w1[c, 0, kh, kw]
    eye24 = jnp.eye(24, dtype=_F32)
    w1rows = []
    for kh in range(5):
        m = jnp.zeros((28, 144), _F32)
        for kw in range(5):
            m = m.at[kw:kw + 24, :].add(
                jnp.kron(eye24, w1[:, 0, kh, kw].reshape(1, 6)))
        w1rows.append(m)
    w1big = jnp.stack(w1rows, axis=0).astype(_BF16)           # (5, 28, 144)
    b1row = jnp.tile(b1, 24).reshape(1, 144).astype(_F32)

    # conv2, per kernel-row kh: (72, 128) matrix with width taps folded:
    # entry [(w_out+kw)*6 + ci, w_out*16 + co] = w2[co, ci, kh, kw]
    eye8 = jnp.eye(8, dtype=_F32)
    w2rows = []
    for kh in range(5):
        m = jnp.zeros((72, 128), _F32)
        for kw in range(5):
            m = m.at[kw * 6:kw * 6 + 48, :].add(
                jnp.kron(eye8, w2[:, :, kh, kw].T))
        w2rows.append(m)
    w2big = jnp.stack(w2rows, axis=0).astype(_BF16)            # (5, 72, 128)
    b2row = jnp.tile(b2, 8).reshape(1, 128).astype(_F32)

    # fc1: torch feature order c*16+h*4+w -> kernel lane order h*64+w*16+c.
    wf1p = (wf1.reshape(256, 16, 4, 4).transpose(2, 3, 1, 0)
            .reshape(256, 256).astype(_BF16))
    bf1row = bf1.reshape(1, 256).astype(_F32)

    # fc2/fc3: pre-transposed and zero-padded to 128 lanes (lane-dense).
    wf2p = jnp.zeros((256, 128), _F32).at[:, :84].set(wf2.T).astype(_BF16)
    bf2row = jnp.zeros((1, 128), _F32).at[0, :84].set(bf2)
    wf3p = jnp.zeros((128, 128), _F32).at[:84, :10].set(wf3.T).astype(_BF16)
    bf3row = jnp.zeros((1, 128), _F32).at[0, :10].set(bf3)

    return (w1big, b1row, w2big, b2row,
            wf1p, bf1row, wf2p, bf2row, wf3p, bf3row)


def _const_spec(arr):
    zeros = (0,) * arr.ndim
    return pl.BlockSpec(arr.shape, lambda g, _z=zeros: _z)


# ----------------------------------------------------------------------------
# Forward pass wrapper (NCHW f32 input, PyTorch semantics)
# ----------------------------------------------------------------------------
def net_forward(x_nchw, prepped):
    N = x_nchw.shape[0]
    G = (N + TB - 1) // TB
    Np = G * TB

    x = x_nchw.reshape(N, 28, 28)
    if Np != N:
        x = jnp.pad(x, ((0, Np - N), (0, 0), (0, 0)))
    # Per tile, rows ordered h*TB + b so conv taps / pools are contiguous
    # row slices inside the kernel.  bf16 to halve activation HBM traffic.
    x2d = (x.reshape(G, TB, 28, 28).transpose(0, 2, 1, 3)
           .reshape(G * 28 * TB, 28)).astype(_BF16)

    flops_per_tile = (
        5 * 2 * (24 * TB) * 28 * 144 +   # conv1 (width taps folded)
        5 * 2 * (8 * TB) * 72 * 128 +    # conv2 (width taps folded)
        2 * TB * 256 * 256 +             # fc1
        2 * TB * 256 * 128 +             # fc2 (padded)
        2 * TB * 128 * 128)              # fc3 (padded)
    bytes_accessed = int(
        x2d.size * 2 + Np * 128 * 4 +
        sum(int(w.size) * w.dtype.itemsize for w in prepped))

    out = pl.pallas_call(
        _net_kernel,
        out_shape=jax.ShapeDtypeStruct((Np, 128), jnp.float32),
        grid_spec=pltpu.PrefetchScalarGridSpec(
            num_scalar_prefetch=0,
            grid=(G,),
            in_specs=[pl.BlockSpec((28 * TB, 28), lambda g: (g, 0))]
                     + [_const_spec(w) for w in prepped],
            out_specs=pl.BlockSpec((TB, 128), lambda g: (g, 0)),
            scratch_shapes=[
                pltpu.VMEM((24 * TB, 72), jnp.float32),   # W-pooled conv1
                pltpu.VMEM((12 * TB, 72), _BF16),         # pooled conv1
                pltpu.VMEM((8 * TB, 64), jnp.float32),    # W-pooled conv2
                pltpu.VMEM((TB, 256), _BF16),             # pooled conv2 (fc1 in)
            ]),
        compiler_params=pltpu.CompilerParams(
            dimension_semantics=("parallel",),
            vmem_limit_bytes=32 * 1024 * 1024),
        cost_estimate=pl.CostEstimate(
            flops=int(flops_per_tile) * G,
            transcendentals=0,
            bytes_accessed=bytes_accessed),
    )(x2d, *prepped)

    return out[:N, :10]


# ----------------------------------------------------------------------------
# Pure-JAX references (validation only)
# ----------------------------------------------------------------------------
def reference_forward_f32(x, p):
    def conv(v, w, b):
        y = jax.lax.conv_general_dilated(
            v, w, (1, 1), "VALID",
            dimension_numbers=("NCHW", "OIHW", "NCHW"))
        return y + b[None, :, None, None]

    def pool(v):
        n, c, hh, ww = v.shape
        return v.reshape(n, c, hh // 2, 2, ww // 2, 2).max(axis=(3, 5))

    y = pool(jax.nn.relu(conv(x, p["w1"], p["b1"])))
    y = pool(jax.nn.relu(conv(y, p["w2"], p["b2"])))
    y = y.reshape(y.shape[0], -1)
    y = jax.nn.relu(y @ p["wf1"].T + p["bf1"])
    y = jax.nn.relu(y @ p["wf2"].T + p["bf2"])
    return y @ p["wf3"].T + p["bf3"]


def reference_forward_bf16(x, p):
    """Same math with the kernel's precision policy (bf16 matmul inputs,
    f32 accumulation) -> lets the Pallas kernel be checked tightly."""
    def conv(v, w, b):
        y = jax.lax.conv_general_dilated(
            v.astype(_BF16), w.astype(_BF16), (1, 1), "VALID",
            dimension_numbers=("NCHW", "OIHW", "NCHW"),
            preferred_element_type=_F32)
        return y + b[None, :, None, None]

    def pool(v):
        n, c, hh, ww = v.shape
        return v.reshape(n, c, hh // 2, 2, ww // 2, 2).max(axis=(3, 5))

    def fc(v, w, b, relu):
        o = jnp.dot(v.astype(_BF16), w.T.astype(_BF16),
                    preferred_element_type=_F32) + b
        return jax.nn.relu(o) if relu else o

    y = pool(jax.nn.relu(conv(x, p["w1"], p["b1"])))
    y = pool(jax.nn.relu(conv(y, p["w2"], p["b2"])))
    y = y.reshape(y.shape[0], -1)
    y = fc(y, p["wf1"], p["bf1"], True)
    y = fc(y, p["wf2"], p["bf2"], True)
    return fc(y, p["wf3"], p["bf3"], False)


# ----------------------------------------------------------------------------
# Deterministic synthetic parameters (mirrors nn.init.normal_(std=0.1))
# ----------------------------------------------------------------------------
def init_params(key):
    ks = jax.random.split(key, 10)
    n = lambda k, shape: 0.1 * jax.random.normal(k, shape, jnp.float32)
    return {
        "w1": n(ks[0], (6, 1, 5, 5)),   "b1": n(ks[1], (6,)),
        "w2": n(ks[2], (16, 6, 5, 5)),  "b2": n(ks[3], (16,)),
        "wf1": n(ks[4], (256, 256)),    "bf1": n(ks[5], (256,)),
        "wf2": n(ks[6], (84, 256)),     "bf2": n(ks[7], (84,)),
        "wf3": n(ks[8], (10, 84)),      "bf3": n(ks[9], (10,)),
    }


if __name__ == "__main__":
    key = jax.random.PRNGKey(0)
    pkey, xkey = jax.random.split(key)
    params = init_params(pkey)
    prepped = prepare_params(params)

    # Input consistent with fc1 = Linear(16*4*4, 256): 28x28, single channel.
    x = jax.random.normal(xkey, (2, 1, 28, 28), jnp.float32)

    out = jax.block_until_ready(jax.jit(net_forward)(x, prepped))
    assert out.shape == (2, 10), out.shape

    ref_bf16 = jax.block_until_ready(jax.jit(reference_forward_bf16)(x, params))
    ref_f32 = jax.block_until_ready(jax.jit(reference_forward_f32)(x, params))

    # Tight check vs a reference with the same bf16-matmul precision policy.
    assert jnp.allclose(out, ref_bf16, atol=2e-2, rtol=2e-2), (
        float(jnp.max(jnp.abs(out - ref_bf16))))
    # Sanity check vs the pure-f32 model (looser: bf16 MXU inputs).
    assert jnp.allclose(out, ref_f32, atol=1e-1, rtol=1e-1), (
        float(jnp.max(jnp.abs(out - ref_f32))))

    print("KERNEL_OK")
</pallas_src>

<mosaic_0001>
module attributes {stable_mosaic.version = 11 : i64} {
  func.func @_net_kernel(%arg0: i32, %arg1: memref<448x28xbf16, #tpu.memory_space<vmem>>, %arg2: memref<5x28x144xbf16, #tpu.memory_space<vmem>>, %arg3: memref<1x144xf32, #tpu.memory_space<vmem>>, %arg4: memref<5x72x128xbf16, #tpu.memory_space<vmem>>, %arg5: memref<1x128xf32, #tpu.memory_space<vmem>>, %arg6: memref<256x256xbf16, #tpu.memory_space<vmem>>, %arg7: memref<1x256xf32, #tpu.memory_space<vmem>>, %arg8: memref<256x128xbf16, #tpu.memory_space<vmem>>, %arg9: memref<1x128xf32, #tpu.memory_space<vmem>>, %arg10: memref<128x128xbf16, #tpu.memory_space<vmem>>, %arg11: memref<1x128xf32, #tpu.memory_space<vmem>>, %arg12: memref<16x128xf32, #tpu.memory_space<vmem>>, %arg13: memref<384x72xf32, #tpu.memory_space<vmem>>, %arg14: memref<192x72xbf16, #tpu.memory_space<vmem>>, %arg15: memref<128x64xf32, #tpu.memory_space<vmem>>, %arg16: memref<16x256xbf16, #tpu.memory_space<vmem>>) attributes {dimension_semantics = [#tpu.dimension_semantics<parallel>], iteration_bounds = array<i64: 1>, scalar_prefetch = 0 : i64, scratch_operands = 4 : i64, tpu.core_type = #tpu.core_type<tc>, window_params = [{transform_indices = @transform_0, window_bounds = array<i64: 448, 28>}, {pipeline_mode = #tpu.pipeline_mode<synchronous>, transform_indices = @transform_1, window_bounds = array<i64: 5, 28, 144>}, {pipeline_mode = #tpu.pipeline_mode<synchronous>, transform_indices = @transform_2, window_bounds = array<i64: 1, 144>}, {pipeline_mode = #tpu.pipeline_mode<synchronous>, transform_indices = @transform_3, window_bounds = array<i64: 5, 72, 128>}, {pipeline_mode = #tpu.pipeline_mode<synchronous>, transform_indices = @transform_4, window_bounds = array<i64: 1, 128>}, {pipeline_mode = #tpu.pipeline_mode<synchronous>, transform_indices = @transform_5, window_bounds = array<i64: 256, 256>}, {pipeline_mode = #tpu.pipeline_mode<synchronous>, transform_indices = @transform_6, window_bounds = array<i64: 1, 256>}, {pipeline_mode = #tpu.pipeline_mode<synchronous>, transform_indices = @transform_7, window_bounds = array<i64: 256, 128>}, {pipeline_mode = #tpu.pipeline_mode<synchronous>, transform_indices = @transform_8, window_bounds = array<i64: 1, 128>}, {pipeline_mode = #tpu.pipeline_mode<synchronous>, transform_indices = @transform_9, window_bounds = array<i64: 128, 128>}, {pipeline_mode = #tpu.pipeline_mode<synchronous>, transform_indices = @transform_10, window_bounds = array<i64: 1, 128>}, {transform_indices = @transform_11, window_bounds = array<i64: 16, 128>}]} {
    %c0 = arith.constant 0 : index
    %c0_0 = arith.constant 0 : index
    %0 = vector.load %arg1[%c0, %c0_0] : memref<448x28xbf16, #tpu.memory_space<vmem>>, vector<384x28xbf16>
    %c0_1 = arith.constant 0 : index
    %c0_2 = arith.constant 0 : index
    %c0_3 = arith.constant 0 : index
    %1 = vector.load %arg2[%c0_1, %c0_2, %c0_3] : memref<5x28x144xbf16, #tpu.memory_space<vmem>>, vector<1x28x144xbf16>
    %2 = vector.shape_cast %1 : vector<1x28x144xbf16> to vector<28x144xbf16>
    %cst = arith.constant dense<0.000000e+00> : vector<384x144xf32>
    %3 = tpu.matmul %0, %2, %cst {dimension_numbers = #tpu.dot_dimension_numbers<[1], [0], [0], [1], [0, 0, 1, 1], [], []>} : vector<384x28xbf16>, vector<28x144xbf16>, vector<384x144xf32> -> vector<384x144xf32>
    %c16 = arith.constant 16 : index
    %c0_4 = arith.constant 0 : index
    %4 = vector.load %arg1[%c16, %c0_4] : memref<448x28xbf16, #tpu.memory_space<vmem>>, vector<384x28xbf16>
    %c1 = arith.constant 1 : index
    %c0_5 = arith.constant 0 : index
    %c0_6 = arith.constant 0 : index
    %5 = vector.load %arg2[%c1, %c0_5, %c0_6] : memref<5x28x144xbf16, #tpu.memory_space<vmem>>, vector<1x28x144xbf16>
    %6 = vector.shape_cast %5 : vector<1x28x144xbf16> to vector<28x144xbf16>
    %cst_7 = arith.constant dense<0.000000e+00> : vector<384x144xf32>
    %7 = tpu.matmul %4, %6, %cst_7 {dimension_numbers = #tpu.dot_dimension_numbers<[1], [0], [0], [1], [0, 0, 1, 1], [], []>} : vector<384x28xbf16>, vector<28x144xbf16>, vector<384x144xf32> -> vector<384x144xf32>
    %8 = arith.addf %3, %7 : vector<384x144xf32>
    %c32 = arith.constant 32 : index
    %c0_8 = arith.constant 0 : index
    %9 = vector.load %arg1[%c32, %c0_8] : memref<448x28xbf16, #tpu.memory_space<vmem>>, vector<384x28xbf16>
    %c2 = arith.constant 2 : index
    %c0_9 = arith.constant 0 : index
    %c0_10 = arith.constant 0 : index
    %10 = vector.load %arg2[%c2, %c0_9, %c0_10] : memref<5x28x144xbf16, #tpu.memory_space<vmem>>, vector<1x28x144xbf16>
    %11 = vector.shape_cast %10 : vector<1x28x144xbf16> to vector<28x144xbf16>
    %cst_11 = arith.constant dense<0.000000e+00> : vector<384x144xf32>
    %12 = tpu.matmul %9, %11, %cst_11 {dimension_numbers = #tpu.dot_dimension_numbers<[1], [0], [0], [1], [0, 0, 1, 1], [], []>} : vector<384x28xbf16>, vector<28x144xbf16>, vector<384x144xf32> -> vector<384x144xf32>
    %13 = arith.addf %8, %12 : vector<384x144xf32>
    %c48 = arith.constant 48 : index
    %c0_12 = arith.constant 0 : index
    %14 = vector.load %arg1[%c48, %c0_12] : memref<448x28xbf16, #tpu.memory_space<vmem>>, vector<384x28xbf16>
    %c3 = arith.constant 3 : index
    %c0_13 = arith.constant 0 : index
    %c0_14 = arith.constant 0 : index
    %15 = vector.load %arg2[%c3, %c0_13, %c0_14] : memref<5x28x144xbf16, #tpu.memory_space<vmem>>, vector<1x28x144xbf16>
    %16 = vector.shape_cast %15 : vector<1x28x144xbf16> to vector<28x144xbf16>
    %cst_15 = arith.constant dense<0.000000e+00> : vector<384x144xf32>
    %17 = tpu.matmul %14, %16, %cst_15 {dimension_numbers = #tpu.dot_dimension_numbers<[1], [0], [0], [1], [0, 0, 1, 1], [], []>} : vector<384x28xbf16>, vector<28x144xbf16>, vector<384x144xf32> -> vector<384x144xf32>
    %18 = arith.addf %13, %17 : vector<384x144xf32>
    %c64 = arith.constant 64 : index
    %c0_16 = arith.constant 0 : index
    %19 = vector.load %arg1[%c64, %c0_16] : memref<448x28xbf16, #tpu.memory_space<vmem>>, vector<384x28xbf16>
    %c4 = arith.constant 4 : index
    %c0_17 = arith.constant 0 : index
    %c0_18 = arith.constant 0 : index
    %20 = vector.load %arg2[%c4, %c0_17, %c0_18] : memref<5x28x144xbf16, #tpu.memory_space<vmem>>, vector<1x28x144xbf16>
    %21 = vector.shape_cast %20 : vector<1x28x144xbf16> to vector<28x144xbf16>
    %cst_19 = arith.constant dense<0.000000e+00> : vector<384x144xf32>
    %22 = tpu.matmul %19, %21, %cst_19 {dimension_numbers = #tpu.dot_dimension_numbers<[1], [0], [0], [1], [0, 0, 1, 1], [], []>} : vector<384x28xbf16>, vector<28x144xbf16>, vector<384x144xf32> -> vector<384x144xf32>
    %23 = arith.addf %18, %22 : vector<384x144xf32>
    %c0_20 = arith.constant 0 : index
    %c0_21 = arith.constant 0 : index
    %24 = vector.load %arg3[%c0_20, %c0_21] : memref<1x144xf32, #tpu.memory_space<vmem>>, vector<1x144xf32>
    %25 = vector.broadcast %24 : vector<1x144xf32> to vector<384x144xf32>
    %26 = arith.addf %23, %25 : vector<384x144xf32>
    %cst_22 = arith.constant 0.000000e+00 : f32
    %27 = vector.broadcast %cst_22 : f32 to vector<384x144xf32>
    %28 = arith.maximumf %26, %27 : vector<384x144xf32>
    %29 = vector.extract_strided_slice %28 {offsets = [0, 0], sizes = [384, 6], strides = [1, 1]} : vector<384x144xf32> to vector<384x6xf32>
    %30 = vector.extract_strided_slice %28 {offsets = [0, 6], sizes = [384, 6], strides = [1, 1]} : vector<384x144xf32> to vector<384x6xf32>
    %31 = arith.maximumf %29, %30 : vector<384x6xf32>
    %c0_23 = arith.constant 0 : index
    %c0_24 = arith.constant 0 : index
    %32 = vector.load %arg13[%c0_23, %c0_24] : memref<384x72xf32, #tpu.memory_space<vmem>>, vector<384x6xf32>
    tpu.vector_store %arg13[%c0_23, %c0_24], %31 {strides = array<i32>} : memref<384x72xf32, #tpu.memory_space<vmem>>, vector<384x6xf32>,
    %33 = vector.extract_strided_slice %28 {offsets = [0, 12], sizes = [384, 6], strides = [1, 1]} : vector<384x144xf32> to vector<384x6xf32>
    %34 = vector.extract_strided_slice %28 {offsets = [0, 18], sizes = [384, 6], strides = [1, 1]} : vector<384x144xf32> to vector<384x6xf32>
    %35 = arith.maximumf %33, %34 : vector<384x6xf32>
    %c0_25 = arith.constant 0 : index
    %c6 = arith.constant 6 : index
    %36 = vector.load %arg13[%c0_25, %c6] : memref<384x72xf32, #tpu.memory_space<vmem>>, vector<384x6xf32>
    tpu.vector_store %arg13[%c0_25, %c6], %35 {strides = array<i32>} : memref<384x72xf32, #tpu.memory_space<vmem>>, vector<384x6xf32>,
    %37 = vector.extract_strided_slice %28 {offsets = [0, 24], sizes = [384, 6], strides = [1, 1]} : vector<384x144xf32> to vector<384x6xf32>
    %38 = vector.extract_strided_slice %28 {offsets = [0, 30], sizes = [384, 6], strides = [1, 1]} : vector<384x144xf32> to vector<384x6xf32>
    %39 = arith.maximumf %37, %38 : vector<384x6xf32>
    %c0_26 = arith.constant 0 : index
    %c12 = arith.constant 12 : index
    %40 = vector.load %arg13[%c0_26, %c12] : memref<384x72xf32, #tpu.memory_space<vmem>>, vector<384x6xf32>
    tpu.vector_store %arg13[%c0_26, %c12], %39 {strides = array<i32>} : memref<384x72xf32, #tpu.memory_space<vmem>>, vector<384x6xf32>,
    %41 = vector.extract_strided_slice %28 {offsets = [0, 36], sizes = [384, 6], strides = [1, 1]} : vector<384x144xf32> to vector<384x6xf32>
    %42 = vector.extract_strided_slice %28 {offsets = [0, 42], sizes = [384, 6], strides = [1, 1]} : vector<384x144xf32> to vector<384x6xf32>
    %43 = arith.maximumf %41, %42 : vector<384x6xf32>
    %c0_27 = arith.constant 0 : index
    %c18 = arith.constant 18 : index
    %44 = vector.load %arg13[%c0_27, %c18] : memref<384x72xf32, #tpu.memory_space<vmem>>, vector<384x6xf32>
    tpu.vector_store %arg13[%c0_27, %c18], %43 {strides = array<i32>} : memref<384x72xf32, #tpu.memory_space<vmem>>, vector<384x6xf32>,
    %45 = vector.extract_strided_slice %28 {offsets = [0, 48], sizes = [384, 6], strides = [1, 1]} : vector<384x144xf32> to vector<384x6xf32>
    %46 = vector.extract_strided_slice %28 {offsets = [0, 54], sizes = [384, 6], strides = [1, 1]} : vector<384x144xf32> to vector<384x6xf32>
    %47 = arith.maximumf %45, %46 : vector<384x6xf32>
    %c0_28 = arith.constant 0 : index
    %c24 = arith.constant 24 : index
    %48 = vector.load %arg13[%c0_28, %c24] : memref<384x72xf32, #tpu.memory_space<vmem>>, vector<384x6xf32>
    tpu.vector_store %arg13[%c0_28, %c24], %47 {strides = array<i32>} : memref<384x72xf32, #tpu.memory_space<vmem>>, vector<384x6xf32>,
    %49 = vector.extract_strided_slice %28 {offsets = [0, 60], sizes = [384, 6], strides = [1, 1]} : vector<384x144xf32> to vector<384x6xf32>
    %50 = vector.extract_strided_slice %28 {offsets = [0, 66], sizes = [384, 6], strides = [1, 1]} : vector<384x144xf32> to vector<384x6xf32>
    %51 = arith.maximumf %49, %50 : vector<384x6xf32>
    %c0_29 = arith.constant 0 : index
    %c30 = arith.constant 30 : index
    %52 = vector.load %arg13[%c0_29, %c30] : memref<384x72xf32, #tpu.memory_space<vmem>>, vector<384x6xf32>
    tpu.vector_store %arg13[%c0_29, %c30], %51 {strides = array<i32>} : memref<384x72xf32, #tpu.memory_space<vmem>>, vector<384x6xf32>,
    %53 = vector.extract_strided_slice %28 {offsets = [0, 72], sizes = [384, 6], strides = [1, 1]} : vector<384x144xf32> to vector<384x6xf32>
    %54 = vector.extract_strided_slice %28 {offsets = [0, 78], sizes = [384, 6], strides = [1, 1]} : vector<384x144xf32> to vector<384x6xf32>
    %55 = arith.maximumf %53, %54 : vector<384x6xf32>
    %c0_30 = arith.constant 0 : index
    %c36 = arith.constant 36 : index
    %56 = vector.load %arg13[%c0_30, %c36] : memref<384x72xf32, #tpu.memory_space<vmem>>, vector<384x6xf32>
    tpu.vector_store %arg13[%c0_30, %c36], %55 {strides = array<i32>} : memref<384x72xf32, #tpu.memory_space<vmem>>, vector<384x6xf32>,
    %57 = vector.extract_strided_slice %28 {offsets = [0, 84], sizes = [384, 6], strides = [1, 1]} : vector<384x144xf32> to vector<384x6xf32>
    %58 = vector.extract_strided_slice %28 {offsets = [0, 90], sizes = [384, 6], strides = [1, 1]} : vector<384x144xf32> to vector<384x6xf32>
    %59 = arith.maximumf %57, %58 : vector<384x6xf32>
    %c0_31 = arith.constant 0 : index
    %c42 = arith.constant 42 : index
    %60 = vector.load %arg13[%c0_31, %c42] : memref<384x72xf32, #tpu.memory_space<vmem>>, vector<384x6xf32>
    tpu.vector_store %arg13[%c0_31, %c42], %59 {strides = array<i32>} : memref<384x72xf32, #tpu.memory_space<vmem>>, vector<384x6xf32>,
    %61 = vector.extract_strided_slice %28 {offsets = [0, 96], sizes = [384, 6], strides = [1, 1]} : vector<384x144xf32> to vector<384x6xf32>
    %62 = vector.extract_strided_slice %28 {offsets = [0, 102], sizes = [384, 6], strides = [1, 1]} : vector<384x144xf32> to vector<384x6xf32>
    %63 = arith.maximumf %61, %62 : vector<384x6xf32>
    %c0_32 = arith.constant 0 : index
    %c48_33 = arith.constant 48 : index
    %64 = vector.load %arg13[%c0_32, %c48_33] : memref<384x72xf32, #tpu.memory_space<vmem>>, vector<384x6xf32>
    tpu.vector_store %arg13[%c0_32, %c48_33], %63 {strides = array<i32>} : memref<384x72xf32, #tpu.memory_space<vmem>>, vector<384x6xf32>,
    %65 = vector.extract_strided_slice %28 {offsets = [0, 108], sizes = [384, 6], strides = [1, 1]} : vector<384x144xf32> to vector<384x6xf32>
    %66 = vector.extract_strided_slice %28 {offsets = [0, 114], sizes = [384, 6], strides = [1, 1]} : vector<384x144xf32> to vector<384x6xf32>
    %67 = arith.maximumf %65, %66 : vector<384x6xf32>
    %c0_34 = arith.constant 0 : index
    %c54 = arith.constant 54 : index
    %68 = vector.load %arg13[%c0_34, %c54] : memref<384x72xf32, #tpu.memory_space<vmem>>, vector<384x6xf32>
    tpu.vector_store %arg13[%c0_34, %c54], %67 {strides = array<i32>} : memref<384x72xf32, #tpu.memory_space<vmem>>, vector<384x6xf32>,
    %69 = vector.extract_strided_slice %28 {offsets = [0, 120], sizes = [384, 6], strides = [1, 1]} : vector<384x144xf32> to vector<384x6xf32>
    %70 = vector.extract_strided_slice %28 {offsets = [0, 126], sizes = [384, 6], strides = [1, 1]} : vector<384x144xf32> to vector<384x6xf32>
    %71 = arith.maximumf %69, %70 : vector<384x6xf32>
    %c0_35 = arith.constant 0 : index
    %c60 = arith.constant 60 : index
    %72 = vector.load %arg13[%c0_35, %c60] : memref<384x72xf32, #tpu.memory_space<vmem>>, vector<384x6xf32>
    tpu.vector_store %arg13[%c0_35, %c60], %71 {strides = array<i32>} : memref<384x72xf32, #tpu.memory_space<vmem>>, vector<384x6xf32>,
    %73 = vector.extract_strided_slice %28 {offsets = [0, 132], sizes = [384, 6], strides = [1, 1]} : vector<384x144xf32> to vector<384x6xf32>
    %74 = vector.extract_strided_slice %28 {offsets = [0, 138], sizes = [384, 6], strides = [1, 1]} : vector<384x144xf32> to vector<384x6xf32>
    %75 = arith.maximumf %73, %74 : vector<384x6xf32>
    %c0_36 = arith.constant 0 : index
    %c66 = arith.constant 66 : index
    %76 = vector.load %arg13[%c0_36, %c66] : memref<384x72xf32, #tpu.memory_space<vmem>>, vector<384x6xf32>
    tpu.vector_store %arg13[%c0_36, %c66], %75 {strides = array<i32>} : memref<384x72xf32, #tpu.memory_space<vmem>>, vector<384x6xf32>,
    %c0_37 = arith.constant 0 : index
    %c0_38 = arith.constant 0 : index
    %77 = vector.load %arg13[%c0_37, %c0_38] : memref<384x72xf32, #tpu.memory_space<vmem>>, vector<16x72xf32>
    %c16_39 = arith.constant 16 : index
    %c0_40 = arith.constant 0 : index
    %78 = vector.load %arg13[%c16_39, %c0_40] : memref<384x72xf32, #tpu.memory_space<vmem>>, vector<16x72xf32>
    %79 = arith.maximumf %77, %78 : vector<16x72xf32>
    %80 = arith.truncf %79 : vector<16x72xf32> to vector<16x72xbf16>
    %c0_41 = arith.constant 0 : index
    %c0_42 = arith.constant 0 : index
    %81 = vector.load %arg14[%c0_41, %c0_42] : memref<192x72xbf16, #tpu.memory_space<vmem>>, vector<16x72xbf16>
    tpu.vector_store %arg14[%c0_41, %c0_42], %80 {strides = array<i32>} : memref<192x72xbf16, #tpu.memory_space<vmem>>, vector<16x72xbf16>,
    %c32_43 = arith.constant 32 : index
    %c0_44 = arith.constant 0 : index
    %82 = vector.load %arg13[%c32_43, %c0_44] : memref<384x72xf32, #tpu.memory_space<vmem>>, vector<16x72xf32>
    %c48_45 = arith.constant 48 : index
    %c0_46 = arith.constant 0 : index
    %83 = vector.load %arg13[%c48_45, %c0_46] : memref<384x72xf32, #tpu.memory_space<vmem>>, vector<16x72xf32>
    %84 = arith.maximumf %82, %83 : vector<16x72xf32>
    %85 = arith.truncf %84 : vector<16x72xf32> to vector<16x72xbf16>
    %c16_47 = arith.constant 16 : index
    %c0_48 = arith.constant 0 : index
    %86 = vector.load %arg14[%c16_47, %c0_48] : memref<192x72xbf16, #tpu.memory_space<vmem>>, vector<16x72xbf16>
    tpu.vector_store %arg14[%c16_47, %c0_48], %85 {strides = array<i32>} : memref<192x72xbf16, #tpu.memory_space<vmem>>, vector<16x72xbf16>,
    %c64_49 = arith.constant 64 : index
    %c0_50 = arith.constant 0 : index
    %87 = vector.load %arg13[%c64_49, %c0_50] : memref<384x72xf32, #tpu.memory_space<vmem>>, vector<16x72xf32>
    %c80 = arith.constant 80 : index
    %c0_51 = arith.constant 0 : index
    %88 = vector.load %arg13[%c80, %c0_51] : memref<384x72xf32, #tpu.memory_space<vmem>>, vector<16x72xf32>
    %89 = arith.maximumf %87, %88 : vector<16x72xf32>
    %90 = arith.truncf %89 : vector<16x72xf32> to vector<16x72xbf16>
    %c32_52 = arith.constant 32 : index
    %c0_53 = arith.constant 0 : index
    %91 = vector.load %arg14[%c32_52, %c0_53] : memref<192x72xbf16, #tpu.memory_space<vmem>>, vector<16x72xbf16>
    tpu.vector_store %arg14[%c32_52, %c0_53], %90 {strides = array<i32>} : memref<192x72xbf16, #tpu.memory_space<vmem>>, vector<16x72xbf16>,
    %c96 = arith.constant 96 : index
    %c0_54 = arith.constant 0 : index
    %92 = vector.load %arg13[%c96, %c0_54] : memref<384x72xf32, #tpu.memory_space<vmem>>, vector<16x72xf32>
    %c112 = arith.constant 112 : index
    %c0_55 = arith.constant 0 : index
    %93 = vector.load %arg13[%c112, %c0_55] : memref<384x72xf32, #tpu.memory_space<vmem>>, vector<16x72xf32>
    %94 = arith.maximumf %92, %93 : vector<16x72xf32>
    %95 = arith.truncf %94 : vector<16x72xf32> to vector<16x72xbf16>
    %c48_56 = arith.constant 48 : index
    %c0_57 = arith.constant 0 : index
    %96 = vector.load %arg14[%c48_56, %c0_57] : memref<192x72xbf16, #tpu.memory_space<vmem>>, vector<16x72xbf16>
    tpu.vector_store %arg14[%c48_56, %c0_57], %95 {strides = array<i32>} : memref<192x72xbf16, #tpu.memory_space<vmem>>, vector<16x72xbf16>,
    %c128 = arith.constant 128 : index
    %c0_58 = arith.constant 0 : index
    %97 = vector.load %arg13[%c128, %c0_58] : memref<384x72xf32, #tpu.memory_space<vmem>>, vector<16x72xf32>
    %c144 = arith.constant 144 : index
    %c0_59 = arith.constant 0 : index
    %98 = vector.load %arg13[%c144, %c0_59] : memref<384x72xf32, #tpu.memory_space<vmem>>, vector<16x72xf32>
    %99 = arith.maximumf %97, %98 : vector<16x72xf32>
    %100 = arith.truncf %99 : vector<16x72xf32> to vector<16x72xbf16>
    %c64_60 = arith.constant 64 : index
    %c0_61 = arith.constant 0 : index
    %101 = vector.load %arg14[%c64_60, %c0_61] : memref<192x72xbf16, #tpu.memory_space<vmem>>, vector<16x72xbf16>
    tpu.vector_store %arg14[%c64_60, %c0_61], %100 {strides = array<i32>} : memref<192x72xbf16, #tpu.memory_space<vmem>>, vector<16x72xbf16>,
    %c160 = arith.constant 160 : index
    %c0_62 = arith.constant 0 : index
    %102 = vector.load %arg13[%c160, %c0_62] : memref<384x72xf32, #tpu.memory_space<vmem>>, vector<16x72xf32>
    %c176 = arith.constant 176 : index
    %c0_63 = arith.constant 0 : index
    %103 = vector.load %arg13[%c176, %c0_63] : memref<384x72xf32, #tpu.memory_space<vmem>>, vector<16x72xf32>
    %104 = arith.maximumf %102, %103 : vector<16x72xf32>
    %105 = arith.truncf %104 : vector<16x72xf32> to vector<16x72xbf16>
    %c80_64 = arith.constant 80 : index
    %c0_65 = arith.constant 0 : index
    %106 = vector.load %arg14[%c80_64, %c0_65] : memref<192x72xbf16, #tpu.memory_space<vmem>>, vector<16x72xbf16>
    tpu.vector_store %arg14[%c80_64, %c0_65], %105 {strides = array<i32>} : memref<192x72xbf16, #tpu.memory_space<vmem>>, vector<16x72xbf16>,
    %c192 = arith.constant 192 : index
    %c0_66 = arith.constant 0 : index
    %107 = vector.load %arg13[%c192, %c0_66] : memref<384x72xf32, #tpu.memory_space<vmem>>, vector<16x72xf32>
    %c208 = arith.constant 208 : index
    %c0_67 = arith.constant 0 : index
    %108 = vector.load %arg13[%c208, %c0_67] : memref<384x72xf32, #tpu.memory_space<vmem>>, vector<16x72xf32>
    %109 = arith.maximumf %107, %108 : vector<16x72xf32>
    %110 = arith.truncf %109 : vector<16x72xf32> to vector<16x72xbf16>
    %c96_68 = arith.constant 96 : index
    %c0_69 = arith.constant 0 : index
    %111 = vector.load %arg14[%c96_68, %c0_69] : memref<192x72xbf16, #tpu.memory_space<vmem>>, vector<16x72xbf16>
    tpu.vector_store %arg14[%c96_68, %c0_69], %110 {strides = array<i32>} : memref<192x72xbf16, #tpu.memory_space<vmem>>, vector<16x72xbf16>,
    %c224 = arith.constant 224 : index
    %c0_70 = arith.constant 0 : index
    %112 = vector.load %arg13[%c224, %c0_70] : memref<384x72xf32, #tpu.memory_space<vmem>>, vector<16x72xf32>
    %c240 = arith.constant 240 : index
    %c0_71 = arith.constant 0 : index
    %113 = vector.load %arg13[%c240, %c0_71] : memref<384x72xf32, #tpu.memory_space<vmem>>, vector<16x72xf32>
    %114 = arith.maximumf %112, %113 : vector<16x72xf32>
    %115 = arith.truncf %114 : vector<16x72xf32> to vector<16x72xbf16>
    %c112_72 = arith.constant 112 : index
    %c0_73 = arith.constant 0 : index
    %116 = vector.load %arg14[%c112_72, %c0_73] : memref<192x72xbf16, #tpu.memory_space<vmem>>, vector<16x72xbf16>
    tpu.vector_store %arg14[%c112_72, %c0_73], %115 {strides = array<i32>} : memref<192x72xbf16, #tpu.memory_space<vmem>>, vector<16x72xbf16>,
    %c256 = arith.constant 256 : index
    %c0_74 = arith.constant 0 : index
    %117 = vector.load %arg13[%c256, %c0_74] : memref<384x72xf32, #tpu.memory_space<vmem>>, vector<16x72xf32>
    %c272 = arith.constant 272 : index
    %c0_75 = arith.constant 0 : index
    %118 = vector.load %arg13[%c272, %c0_75] : memref<384x72xf32, #tpu.memory_space<vmem>>, vector<16x72xf32>
    %119 = arith.maximumf %117, %118 : vector<16x72xf32>
    %120 = arith.truncf %119 : vector<16x72xf32> to vector<16x72xbf16>
    %c128_76 = arith.constant 128 : index
    %c0_77 = arith.constant 0 : index
    %121 = vector.load %arg14[%c128_76, %c0_77] : memref<192x72xbf16, #tpu.memory_space<vmem>>, vector<16x72xbf16>
    tpu.vector_store %arg14[%c128_76, %c0_77], %120 {strides = array<i32>} : memref<192x72xbf16, #tpu.memory_space<vmem>>, vector<16x72xbf16>,
    %c288 = arith.constant 288 : index
    %c0_78 = arith.constant 0 : index
    %122 = vector.load %arg13[%c288, %c0_78] : memref<384x72xf32, #tpu.memory_space<vmem>>, vector<16x72xf32>
    %c304 = arith.constant 304 : index
    %c0_79 = arith.constant 0 : index
    %123 = vector.load %arg13[%c304, %c0_79] : memref<384x72xf32, #tpu.memory_space<vmem>>, vector<16x72xf32>
    %124 = arith.maximumf %122, %123 : vector<16x72xf32>
    %125 = arith.truncf %124 : vector<16x72xf32> to vector<16x72xbf16>
    %c144_80 = arith.constant 144 : index
    %c0_81 = arith.constant 0 : index
    %126 = vector.load %arg14[%c144_80, %c0_81] : memref<192x72xbf16, #tpu.memory_space<vmem>>, vector<16x72xbf16>
    tpu.vector_store %arg14[%c144_80, %c0_81], %125 {strides = array<i32>} : memref<192x72xbf16, #tpu.memory_space<vmem>>, vector<16x72xbf16>,
    %c320 = arith.constant 320 : index
    %c0_82 = arith.constant 0 : index
    %127 = vector.load %arg13[%c320, %c0_82] : memref<384x72xf32, #tpu.memory_space<vmem>>, vector<16x72xf32>
    %c336 = arith.constant 336 : index
    %c0_83 = arith.constant 0 : index
    %128 = vector.load %arg13[%c336, %c0_83] : memref<384x72xf32, #tpu.memory_space<vmem>>, vector<16x72xf32>
    %129 = arith.maximumf %127, %128 : vector<16x72xf32>
    %130 = arith.truncf %129 : vector<16x72xf32> to vector<16x72xbf16>
    %c160_84 = arith.constant 160 : index
    %c0_85 = arith.constant 0 : index
    %131 = vector.load %arg14[%c160_84, %c0_85] : memref<192x72xbf16, #tpu.memory_space<vmem>>, vector<16x72xbf16>
    tpu.vector_store %arg14[%c160_84, %c0_85], %130 {strides = array<i32>} : memref<192x72xbf16, #tpu.memory_space<vmem>>, vector<16x72xbf16>,
    %c352 = arith.constant 352 : index
    %c0_86 = arith.constant 0 : index
    %132 = vector.load %arg13[%c352, %c0_86] : memref<384x72xf32, #tpu.memory_space<vmem>>, vector<16x72xf32>
    %c368 = arith.constant 368 : index
    %c0_87 = arith.constant 0 : index
    %133 = vector.load %arg13[%c368, %c0_87] : memref<384x72xf32, #tpu.memory_space<vmem>>, vector<16x72xf32>
    %134 = arith.maximumf %132, %133 : vector<16x72xf32>
    %135 = arith.truncf %134 : vector<16x72xf32> to vector<16x72xbf16>
    %c176_88 = arith.constant 176 : index
    %c0_89 = arith.constant 0 : index
    %136 = vector.load %arg14[%c176_88, %c0_89] : memref<192x72xbf16, #tpu.memory_space<vmem>>, vector<16x72xbf16>
    tpu.vector_store %arg14[%c176_88, %c0_89], %135 {strides = array<i32>} : memref<192x72xbf16, #tpu.memory_space<vmem>>, vector<16x72xbf16>,
    %c0_90 = arith.constant 0 : index
    %c0_91 = arith.constant 0 : index
    %137 = vector.load %arg14[%c0_90, %c0_91] : memref<192x72xbf16, #tpu.memory_space<vmem>>, vector<128x72xbf16>
    %c0_92 = arith.constant 0 : index
    %c0_93 = arith.constant 0 : index
    %c0_94 = arith.constant 0 : index
    %138 = vector.load %arg4[%c0_92, %c0_93, %c0_94] : memref<5x72x128xbf16, #tpu.memory_space<vmem>>, vector<1x72x128xbf16>
    %139 = vector.shape_cast %138 : vector<1x72x128xbf16> to vector<72x128xbf16>
    %cst_95 = arith.constant dense<0.000000e+00> : vector<128x128xf32>
    %140 = tpu.matmul %137, %139, %cst_95 {dimension_numbers = #tpu.dot_dimension_numbers<[1], [0], [0], [1], [0, 0, 1, 1], [], []>} : vector<128x72xbf16>, vector<72x128xbf16>, vector<128x128xf32> -> vector<128x128xf32>
    %c16_96 = arith.constant 16 : index
    %c0_97 = arith.constant 0 : index
    %141 = vector.load %arg14[%c16_96, %c0_97] : memref<192x72xbf16, #tpu.memory_space<vmem>>, vector<128x72xbf16>
    %c1_98 = arith.constant 1 : index
    %c0_99 = arith.constant 0 : index
    %c0_100 = arith.constant 0 : index
    %142 = vector.load %arg4[%c1_98, %c0_99, %c0_100] : memref<5x72x128xbf16, #tpu.memory_space<vmem>>, vector<1x72x128xbf16>
    %143 = vector.shape_cast %142 : vector<1x72x128xbf16> to vector<72x128xbf16>
    %cst_101 = arith.constant dense<0.000000e+00> : vector<128x128xf32>
    %144 = tpu.matmul %141, %143, %cst_101 {dimension_numbers = #tpu.dot_dimension_numbers<[1], [0], [0], [1], [0, 0, 1, 1], [], []>} : vector<128x72xbf16>, vector<72x128xbf16>, vector<128x128xf32> -> vector<128x128xf32>
    %145 = arith.addf %140, %144 : vector<128x128xf32>
    %c32_102 = arith.constant 32 : index
    %c0_103 = arith.constant 0 : index
    %146 = vector.load %arg14[%c32_102, %c0_103] : memref<192x72xbf16, #tpu.memory_space<vmem>>, vector<128x72xbf16>
    %c2_104 = arith.constant 2 : index
    %c0_105 = arith.constant 0 : index
    %c0_106 = arith.constant 0 : index
    %147 = vector.load %arg4[%c2_104, %c0_105, %c0_106] : memref<5x72x128xbf16, #tpu.memory_space<vmem>>, vector<1x72x128xbf16>
    %148 = vector.shape_cast %147 : vector<1x72x128xbf16> to vector<72x128xbf16>
    %cst_107 = arith.constant dense<0.000000e+00> : vector<128x128xf32>
    %149 = tpu.matmul %146, %148, %cst_107 {dimension_numbers = #tpu.dot_dimension_numbers<[1], [0], [0], [1], [0, 0, 1, 1], [], []>} : vector<128x72xbf16>, vector<72x128xbf16>, vector<128x128xf32> -> vector<128x128xf32>
    %150 = arith.addf %145, %149 : vector<128x128xf32>
    %c48_108 = arith.constant 48 : index
    %c0_109 = arith.constant 0 : index
    %151 = vector.load %arg14[%c48_108, %c0_109] : memref<192x72xbf16, #tpu.memory_space<vmem>>, vector<128x72xbf16>
    %c3_110 = arith.constant 3 : index
    %c0_111 = arith.constant 0 : index
    %c0_112 = arith.constant 0 : index
    %152 = vector.load %arg4[%c3_110, %c0_111, %c0_112] : memref<5x72x128xbf16, #tpu.memory_space<vmem>>, vector<1x72x128xbf16>
    %153 = vector.shape_cast %152 : vector<1x72x128xbf16> to vector<72x128xbf16>
    %cst_113 = arith.constant dense<0.000000e+00> : vector<128x128xf32>
    %154 = tpu.matmul %151, %153, %cst_113 {dimension_numbers = #tpu.dot_dimension_numbers<[1], [0], [0], [1], [0, 0, 1, 1], [], []>} : vector<128x72xbf16>, vector<72x128xbf16>, vector<128x128xf32> -> vector<128x128xf32>
    %155 = arith.addf %150, %154 : vector<128x128xf32>
    %c64_114 = arith.constant 64 : index
    %c0_115 = arith.constant 0 : index
    %156 = vector.load %arg14[%c64_114, %c0_115] : memref<192x72xbf16, #tpu.memory_space<vmem>>, vector<128x72xbf16>
    %c4_116 = arith.constant 4 : index
    %c0_117 = arith.constant 0 : index
    %c0_118 = arith.constant 0 : index
    %157 = vector.load %arg4[%c4_116, %c0_117, %c0_118] : memref<5x72x128xbf16, #tpu.memory_space<vmem>>, vector<1x72x128xbf16>
    %158 = vector.shape_cast %157 : vector<1x72x128xbf16> to vector<72x128xbf16>
    %cst_119 = arith.constant dense<0.000000e+00> : vector<128x128xf32>
    %159 = tpu.matmul %156, %158, %cst_119 {dimension_numbers = #tpu.dot_dimension_numbers<[1], [0], [0], [1], [0, 0, 1, 1], [], []>} : vector<128x72xbf16>, vector<72x128xbf16>, vector<128x128xf32> -> vector<128x128xf32>
    %160 = arith.addf %155, %159 : vector<128x128xf32>
    %c0_120 = arith.constant 0 : index
    %c0_121 = arith.constant 0 : index
    %161 = vector.load %arg5[%c0_120, %c0_121] : memref<1x128xf32, #tpu.memory_space<vmem>>, vector<1x128xf32>
    %162 = vector.broadcast %161 : vector<1x128xf32> to vector<128x128xf32>
    %163 = arith.addf %160, %162 : vector<128x128xf32>
    %cst_122 = arith.constant 0.000000e+00 : f32
    %164 = vector.broadcast %cst_122 : f32 to vector<128x128xf32>
    %165 = arith.maximumf %163, %164 : vector<128x128xf32>
    %166 = vector.extract_strided_slice %165 {offsets = [0, 0], sizes = [128, 16], strides = [1, 1]} : vector<128x128xf32> to vector<128x16xf32>
    %167 = vector.extract_strided_slice %165 {offsets = [0, 16], sizes = [128, 16], strides = [1, 1]} : vector<128x128xf32> to vector<128x16xf32>
    %168 = arith.maximumf %166, %167 : vector<128x16xf32>
    %c0_123 = arith.constant 0 : index
    %c0_124 = arith.constant 0 : index
    %169 = vector.load %arg15[%c0_123, %c0_124] : memref<128x64xf32, #tpu.memory_space<vmem>>, vector<128x16xf32>
    tpu.vector_store %arg15[%c0_123, %c0_124], %168 {strides = array<i32>} : memref<128x64xf32, #tpu.memory_space<vmem>>, vector<128x16xf32>,
    %170 = vector.extract_strided_slice %165 {offsets = [0, 32], sizes = [128, 16], strides = [1, 1]} : vector<128x128xf32> to vector<128x16xf32>
    %171 = vector.extract_strided_slice %165 {offsets = [0, 48], sizes = [128, 16], strides = [1, 1]} : vector<128x128xf32> to vector<128x16xf32>
    %172 = arith.maximumf %170, %171 : vector<128x16xf32>
    %c0_125 = arith.constant 0 : index
    %c16_126 = arith.constant 16 : index
    %173 = vector.load %arg15[%c0_125, %c16_126] : memref<128x64xf32, #tpu.memory_space<vmem>>, vector<128x16xf32>
    tpu.vector_store %arg15[%c0_125, %c16_126], %172 {strides = array<i32>} : memref<128x64xf32, #tpu.memory_space<vmem>>, vector<128x16xf32>,
    %174 = vector.extract_strided_slice %165 {offsets = [0, 64], sizes = [128, 16], strides = [1, 1]} : vector<128x128xf32> to vector<128x16xf32>
    %175 = vector.extract_strided_slice %165 {offsets = [0, 80], sizes = [128, 16], strides = [1, 1]} : vector<128x128xf32> to vector<128x16xf32>
    %176 = arith.maximumf %174, %175 : vector<128x16xf32>
    %c0_127 = arith.constant 0 : index
    %c32_128 = arith.constant 32 : index
    %177 = vector.load %arg15[%c0_127, %c32_128] : memref<128x64xf32, #tpu.memory_space<vmem>>, vector<128x16xf32>
    tpu.vector_store %arg15[%c0_127, %c32_128], %176 {strides = array<i32>} : memref<128x64xf32, #tpu.memory_space<vmem>>, vector<128x16xf32>,
    %178 = vector.extract_strided_slice %165 {offsets = [0, 96], sizes = [128, 16], strides = [1, 1]} : vector<128x128xf32> to vector<128x16xf32>
    %179 = vector.extract_strided_slice %165 {offsets = [0, 112], sizes = [128, 16], strides = [1, 1]} : vector<128x128xf32> to vector<128x16xf32>
    %180 = arith.maximumf %178, %179 : vector<128x16xf32>
    %c0_129 = arith.constant 0 : index
    %c48_130 = arith.constant 48 : index
    %181 = vector.load %arg15[%c0_129, %c48_130] : memref<128x64xf32, #tpu.memory_space<vmem>>, vector<128x16xf32>
    tpu.vector_store %arg15[%c0_129, %c48_130], %180 {strides = array<i32>} : memref<128x64xf32, #tpu.memory_space<vmem>>, vector<128x16xf32>,
    %c0_131 = arith.constant 0 : index
    %c0_132 = arith.constant 0 : index
    %182 = vector.load %arg15[%c0_131, %c0_132] : memref<128x64xf32, #tpu.memory_space<vmem>>, vector<16x64xf32>
    %c16_133 = arith.constant 16 : index
    %c0_134 = arith.constant 0 : index
    %183 = vector.load %arg15[%c16_133, %c0_134] : memref<128x64xf32, #tpu.memory_space<vmem>>, vector<16x64xf32>
    %184 = arith.maximumf %182, %183 : vector<16x64xf32>
    %185 = arith.truncf %184 : vector<16x64xf32> to vector<16x64xbf16>
    %c0_135 = arith.constant 0 : index
    %c0_136 = arith.constant 0 : index
    %186 = vector.load %arg16[%c0_135, %c0_136] : memref<16x256xbf16, #tpu.memory_space<vmem>>, vector<16x64xbf16>
    tpu.vector_store %arg16[%c0_135, %c0_136], %185 {strides = array<i32>} : memref<16x256xbf16, #tpu.memory_space<vmem>>, vector<16x64xbf16>,
    %c32_137 = arith.constant 32 : index
    %c0_138 = arith.constant 0 : index
    %187 = vector.load %arg15[%c32_137, %c0_138] : memref<128x64xf32, #tpu.memory_space<vmem>>, vector<16x64xf32>
    %c48_139 = arith.constant 48 : index
    %c0_140 = arith.constant 0 : index
    %188 = vector.load %arg15[%c48_139, %c0_140] : memref<128x64xf32, #tpu.memory_space<vmem>>, vector<16x64xf32>
    %189 = arith.maximumf %187, %188 : vector<16x64xf32>
    %190 = arith.truncf %189 : vector<16x64xf32> to vector<16x64xbf16>
    %c0_141 = arith.constant 0 : index
    %c64_142 = arith.constant 64 : index
    %191 = vector.load %arg16[%c0_141, %c64_142] : memref<16x256xbf16, #tpu.memory_space<vmem>>, vector<16x64xbf16>
    tpu.vector_store %arg16[%c0_141, %c64_142], %190 {strides = array<i32>} : memref<16x256xbf16, #tpu.memory_space<vmem>>, vector<16x64xbf16>,
    %c64_143 = arith.constant 64 : index
    %c0_144 = arith.constant 0 : index
    %192 = vector.load %arg15[%c64_143, %c0_144] : memref<128x64xf32, #tpu.memory_space<vmem>>, vector<16x64xf32>
    %c80_145 = arith.constant 80 : index
    %c0_146 = arith.constant 0 : index
    %193 = vector.load %arg15[%c80_145, %c0_146] : memref<128x64xf32, #tpu.memory_space<vmem>>, vector<16x64xf32>
    %194 = arith.maximumf %192, %193 : vector<16x64xf32>
    %195 = arith.truncf %194 : vector<16x64xf32> to vector<16x64xbf16>
    %c0_147 = arith.constant 0 : index
    %c128_148 = arith.constant 128 : index
    %196 = vector.load %arg16[%c0_147, %c128_148] : memref<16x256xbf16, #tpu.memory_space<vmem>>, vector<16x64xbf16>
    tpu.vector_store %arg16[%c0_147, %c128_148], %195 {strides = array<i32>} : memref<16x256xbf16, #tpu.memory_space<vmem>>, vector<16x64xbf16>,
    %c96_149 = arith.constant 96 : index
    %c0_150 = arith.constant 0 : index
    %197 = vector.load %arg15[%c96_149, %c0_150] : memref<128x64xf32, #tpu.memory_space<vmem>>, vector<16x64xf32>
    %c112_151 = arith.constant 112 : index
    %c0_152 = arith.constant 0 : index
    %198 = vector.load %arg15[%c112_151, %c0_152] : memref<128x64xf32, #tpu.memory_space<vmem>>, vector<16x64xf32>
    %199 = arith.maximumf %197, %198 : vector<16x64xf32>
    %200 = arith.truncf %199 : vector<16x64xf32> to vector<16x64xbf16>
    %c0_153 = arith.constant 0 : index
    %c192_154 = arith.constant 192 : index
    %201 = vector.load %arg16[%c0_153, %c192_154] : memref<16x256xbf16, #tpu.memory_space<vmem>>, vector<16x64xbf16>
    tpu.vector_store %arg16[%c0_153, %c192_154], %200 {strides = array<i32>} : memref<16x256xbf16, #tpu.memory_space<vmem>>, vector<16x64xbf16>,
    %c0_155 = arith.constant 0 : index
    %c0_156 = arith.constant 0 : index
    %202 = vector.load %arg16[%c0_155, %c0_156] : memref<16x256xbf16, #tpu.memory_space<vmem>>, vector<16x256xbf16>
    %c0_157 = arith.constant 0 : index
    %c0_158 = arith.constant 0 : index
    %203 = vector.load %arg6[%c0_157, %c0_158] : memref<256x256xbf16, #tpu.memory_space<vmem>>, vector<256x256xbf16>
    %cst_159 = arith.constant dense<0.000000e+00> : vector<16x256xf32>
    %204 = tpu.matmul %202, %203, %cst_159 {dimension_numbers = #tpu.dot_dimension_numbers<[1], [0], [0], [1], [0, 0, 1, 1], [], []>} : vector<16x256xbf16>, vector<256x256xbf16>, vector<16x256xf32> -> vector<16x256xf32>
    %c0_160 = arith.constant 0 : index
    %c0_161 = arith.constant 0 : index
    %205 = vector.load %arg7[%c0_160, %c0_161] : memref<1x256xf32, #tpu.memory_space<vmem>>, vector<1x256xf32>
    %206 = vector.broadcast %205 : vector<1x256xf32> to vector<16x256xf32>
    %207 = arith.addf %204, %206 : vector<16x256xf32>
    %cst_162 = arith.constant 0.000000e+00 : f32
    %208 = vector.broadcast %cst_162 : f32 to vector<16x256xf32>
    %209 = arith.maximumf %207, %208 : vector<16x256xf32>
    %210 = arith.truncf %209 : vector<16x256xf32> to vector<16x256xbf16>
    %c0_163 = arith.constant 0 : index
    %c0_164 = arith.constant 0 : index
    %211 = vector.load %arg8[%c0_163, %c0_164] : memref<256x128xbf16, #tpu.memory_space<vmem>>, vector<256x128xbf16>
    %cst_165 = arith.constant dense<0.000000e+00> : vector<16x128xf32>
    %212 = tpu.matmul %210, %211, %cst_165 {dimension_numbers = #tpu.dot_dimension_numbers<[1], [0], [0], [1], [0, 0, 1, 1], [], []>} : vector<16x256xbf16>, vector<256x128xbf16>, vector<16x128xf32> -> vector<16x128xf32>
    %c0_166 = arith.constant 0 : index
    %c0_167 = arith.constant 0 : index
    %213 = vector.load %arg9[%c0_166, %c0_167] : memref<1x128xf32, #tpu.memory_space<vmem>>, vector<1x128xf32>
    %214 = vector.broadcast %213 : vector<1x128xf32> to vector<16x128xf32>
    %215 = arith.addf %212, %214 : vector<16x128xf32>
    %cst_168 = arith.constant 0.000000e+00 : f32
    %216 = vector.broadcast %cst_168 : f32 to vector<16x128xf32>
    %217 = arith.maximumf %215, %216 : vector<16x128xf32>
    %218 = arith.truncf %217 : vector<16x128xf32> to vector<16x128xbf16>
    %c0_169 = arith.constant 0 : index
    %c0_170 = arith.constant 0 : index
    %219 = vector.load %arg10[%c0_169, %c0_170] : memref<128x128xbf16, #tpu.memory_space<vmem>>, vector<128x128xbf16>
    %cst_171 = arith.constant dense<0.000000e+00> : vector<16x128xf32>
    %220 = tpu.matmul %218, %219, %cst_171 {dimension_numbers = #tpu.dot_dimension_numbers<[1], [0], [0], [1], [0, 0, 1, 1], [], []>} : vector<16x128xbf16>, vector<128x128xbf16>, vector<16x128xf32> -> vector<16x128xf32>
    %c0_172 = arith.constant 0 : index
    %c0_173 = arith.constant 0 : index
    %221 = vector.load %arg11[%c0_172, %c0_173] : memref<1x128xf32, #tpu.memory_space<vmem>>, vector<1x128xf32>
    %222 = vector.broadcast %221 : vector<1x128xf32> to vector<16x128xf32>
    %223 = arith.addf %220, %222 : vector<16x128xf32>
    %c0_174 = arith.constant 0 : index
    %c0_175 = arith.constant 0 : index
    %224 = vector.load %arg12[%c0_174, %c0_175] : memref<16x128xf32, #tpu.memory_space<vmem>>, vector<16x128xf32>
    tpu.vector_store %arg12[%c0_174, %c0_175], %223 {strides = array<i32>} : memref<16x128xf32, #tpu.memory_space<vmem>>, vector<16x128xf32>,
    return
  }
  func.func @transform_0(%arg0: i32) -> (i32, i32) {
    %c0_i32 = arith.constant 0 : i32
    %c0_i32_0 = arith.constant 0 : i32
    return %arg0, %c0_i32 : i32, i32
  }
  func.func @transform_1(%arg0: i32) -> (i32, i32, i32) {
    %c0_i32 = arith.constant 0 : i32
    %c0_i32_0 = arith.constant 0 : i32
    %c0_i32_1 = arith.constant 0 : i32
    %c0_i32_2 = arith.constant 0 : i32
    return %c0_i32, %c0_i32_0, %c0_i32_1 : i32, i32, i32
  }
  func.func @transform_2(%arg0: i32) -> (i32, i32) {
    %c0_i32 = arith.constant 0 : i32
    %c0_i32_0 = arith.constant 0 : i32
    %c0_i32_1 = arith.constant 0 : i32
    return %c0_i32, %c0_i32_0 : i32, i32
  }
  func.func @transform_3(%arg0: i32) -> (i32, i32, i32) {
    %c0_i32 = arith.constant 0 : i32
    %c0_i32_0 = arith.constant 0 : i32
    %c0_i32_1 = arith.constant 0 : i32
    %c0_i32_2 = arith.constant 0 : i32
    return %c0_i32, %c0_i32_0, %c0_i32_1 : i32, i32, i32
  }
  func.func @transform_4(%arg0: i32) -> (i32, i32) {
    %c0_i32 = arith.constant 0 : i32
    %c0_i32_0 = arith.constant 0 : i32
    %c0_i32_1 = arith.constant 0 : i32
    return %c0_i32, %c0_i32_0 : i32, i32
  }
  func.func @transform_5(%arg0: i32) -> (i32, i32) {
    %c0_i32 = arith.constant 0 : i32
    %c0_i32_0 = arith.constant 0 : i32
    %c0_i32_1 = arith.constant 0 : i32
    return %c0_i32, %c0_i32_0 : i32, i32
  }
  func.func @transform_6(%arg0: i32) -> (i32, i32) {
    %c0_i32 = arith.constant 0 : i32
    %c0_i32_0 = arith.constant 0 : i32
    %c0_i32_1 = arith.constant 0 : i32
    return %c0_i32, %c0_i32_0 : i32, i32
  }
  func.func @transform_7(%arg0: i32) -> (i32, i32) {
    %c0_i32 = arith.constant 0 : i32
    %c0_i32_0 = arith.constant 0 : i32
    %c0_i32_1 = arith.constant 0 : i32
    return %c0_i32, %c0_i32_0 : i32, i32
  }
  func.func @transform_8(%arg0: i32) -> (i32, i32) {
    %c0_i32 = arith.constant 0 : i32
    %c0_i32_0 = arith.constant 0 : i32
    %c0_i32_1 = arith.constant 0 : i32
    return %c0_i32, %c0_i32_0 : i32, i32
  }
  func.func @transform_9(%arg0: i32) -> (i32, i32) {
    %c0_i32 = arith.constant 0 : i32
    %c0_i32_0 = arith.constant 0 : i32
    %c0_i32_1 = arith.constant 0 : i32
    return %c0_i32, %c0_i32_0 : i32, i32
  }
  func.func @transform_10(%arg0: i32) -> (i32, i32) {
    %c0_i32 = arith.constant 0 : i32
    %c0_i32_0 = arith.constant 0 : i32
    %c0_i32_1 = arith.constant 0 : i32
    return %c0_i32, %c0_i32_0 : i32, i32
  }
  func.func @transform_11(%arg0: i32) -> (i32, i32) {
    %c0_i32 = arith.constant 0 : i32
    %c0_i32_0 = arith.constant 0 : i32
    return %arg0, %c0_i32 : i32, i32
  }
}

</mosaic_0001>

<bundles_post_ra>
// kernel: net_forward.1
= control target key start
LH: loop header
LB: loop body
LE: loop exit
PB: predicated region body
PF: predicated region fallthrough
CT: control target
= control target key end

     0   :  { %16 = vsyncpa [#allocation7], 0  ;;  %s13921_s0 = inlined_call_operand.vmem [shape: bf16[448,28], index: 0, kind: input, shape index: {}]   ;;  %s13922_s1 = inlined_call_operand.hbm [shape: bf16[5,28,144], index: 1, kind: input, shape index: {}]   ;;  %s13923_s2 = inlined_call_operand.vmem [shape: f32[1,144], index: 2, kind: input, shape index: {}]   ;;  %s13924_s3 = inlined_call_operand.vmem [shape: bf16[5,72,128], index: 3, kind: input, shape index: {}]   ;;  %s13925_s4 = inlined_call_operand.vmem [shape: f32[1,128], index: 4, kind: input, shape index: {}]   ;;  %s13926_s5 = inlined_call_operand.vmem [shape: bf16[256,256], index: 5, kind: input, shape index: {}]   ;;  %s13927_s6 = inlined_call_operand.vmem [shape: f32[1,256], index: 6, kind: input, shape index: {}]   ;;  %s13928_s7 = inlined_call_operand.hbm [shape: bf16[256,128], index: 7, kind: input, shape index: {}]   ;;  %s13929_s8 = inlined_call_operand.vmem [shape: f32[1,128], index: 8, kind: input, shape index: {}]   ;;  %s13930_s9 = inlined_call_operand.hbm [shape: bf16[128,128], index: 9, kind: input, shape index: {}]   ;;  %s13931_s10 = inlined_call_operand.vmem [shape: f32[1,128], index: 10, kind: input, shape index: {}]   ;;  %s13932_s11 = inlined_call_operand.vmem [shape: f32[16,128], index: 11, kind: output, shape index: {}]  }
   0x1   :  { %17 = vsyncpa [#allocation9], 0  ;;  %s9327_s17 = smov [#allocation8]   ;;  %s9257_s21 = scalar_lea.hbm %s13928_s7, 2048 }
   0x2   :  { %s47_s18 = sshll.u32 %s9327_s17, 4  ;;  %p9258_p0 = scmp.ne.s32.totalorder %s13928_s7, %s9257_s21  ;;  %s48_s18 = int_to_ptr.vmem [resolvable:$true] %s47_s18 }
   0x3   :  { %p9261_p1 = scmp.lt.u32.totalorder %s9257_s21, %s13928_s7 }
   0x5   :  { %p9263_p2 = pnand %p9261_p1, %p9258_p0 }
   0x7   :  { %9266 = shalt.err (!%p9263_p2)
}
   0x8   :  { %s9267_s26 = scalar_lea.vmem %s48_s18, 2048  ;;  %p9272_p4 = scmp.lt.s32.totalorder %s48_s18, %s48_s18 }
   0x9   :  { %p9268_p3 = scmp.ne.s32.totalorder %s48_s18, %s9267_s26  ;;  %p9273_p5 = scmp.lt.s32.totalorder %s9267_s26, %s9267_s26 }
   0xb   :  { %p9274_p6 = por %p9273_p5, %p9272_p4 }
   0xd   :  { %p9275_p7 = pnand %p9274_p6, %p9268_p3 }
   0xf   :  { %9278 = shalt.err (!%p9275_p7)
}
  0x10   :  { %s9328_s27 = smov 64   ;;  %s9329_s28 = smov 4  }
  0x11   :  { %53 = dma.hbm_to_vmem [thread:$0]  %s13928_s7, 2048, %s48_s18, [#allocation9], %s9328_s27, %s9328_s27, %s9329_s28  }
  0x12   :  { %s9330_s12 = smov [#allocation6]   ;;  %s9279_s16 = scalar_lea.hbm %s13922_s1, 2560 }
  0x13   :  { %s25_s13 = sshll.u32 %s9330_s12, 4  ;;  %p9280_p8 = scmp.ne.s32.totalorder %s13922_s1, %s9279_s16  ;;  %s26_s13 = int_to_ptr.vmem [resolvable:$true] %s25_s13 }
  0x14   :  { %p9283_p9 = scmp.lt.u32.totalorder %s9279_s16, %s13922_s1 }
  0x16   :  { %p9285_p10 = pnand %p9283_p9, %p9280_p8 }
  0x18   :  { %9288 = shalt.err (!%p9285_p10)
}
  0x19   :  { %s9289_s22 = scalar_lea.vmem %s26_s13, 2560  ;;  %p9294_p12 = scmp.lt.s32.totalorder %s26_s13, %s26_s13 }
  0x1a   :  { %p9290_p11 = scmp.ne.s32.totalorder %s26_s13, %s9289_s22  ;;  %p9295_p13 = scmp.lt.s32.totalorder %s9289_s22, %s9289_s22 }
  0x1c   :  { %p9296_p0 = por %p9295_p13, %p9294_p12 }
  0x1e   :  { %p9297_p1 = pnand %p9296_p0, %p9290_p11 }
  0x20   :  { %9300 = shalt.err (!%p9297_p1)
}
  0x21   :  { %s9331_s7 = smov 128   ;;  %s9332_s18 = smov 8  }
  0x22   :  { %31 = dma.hbm_to_vmem [thread:$0]  %s13922_s1, 2560, %s26_s13, [#allocation7], %s9331_s7, %s9331_s7, %s9332_s18  }
  0x23   :  { %s9333_s25 = smov [#allocation10]   ;;  %s9301_s12 = scalar_lea.hbm %s13930_s9, 1024 }
  0x24   :  { %s61_s26 = sshll.u32 %s9333_s25, 4  ;;  %p9302_p2 = scmp.ne.s32.totalorder %s13930_s9, %s9301_s12  ;;  %s62_s26 = int_to_ptr.vmem [resolvable:$true] %s61_s26 }
  0x25   :  { %p9305_p3 = scmp.lt.u32.totalorder %s9301_s12, %s13930_s9 }
  0x27   :  { %p9307_p4 = pnand %p9305_p3, %p9302_p2 }
  0x29   :  { %9310 = shalt.err (!%p9307_p4)
}
  0x2a   :  { %s9311_s19 = scalar_lea.vmem %s62_s26, 1024  ;;  %p9316_p6 = scmp.lt.s32.totalorder %s62_s26, %s62_s26 }
  0x2b   :  { %p9312_p5 = scmp.ne.s32.totalorder %s62_s26, %s9311_s19  ;;  %p9317_p7 = scmp.lt.s32.totalorder %s9311_s19, %s9311_s19 }
  0x2d   :  { %p9318_p8 = por %p9317_p7, %p9316_p6 }
  0x2f   :  { %p9319_p9 = pnand %p9318_p8, %p9312_p5 }
  0x31   :  { %9322 = shalt.err (!%p9319_p9)
}
  0x32   :  { %67 = dma.hbm_to_vmem [thread:$0]  %s13930_s9, 1024, %s62_s26, [#allocation9], %s9328_s27, %s9328_s27, %s9329_s28  }
  0x33   :  { %9323 = dma.done.wait [#allocation7], 2560  }
  0x34   :  { %9324 = vsyncadd [#allocation7], 4294964736 }
  0x35   :  { %9325 = dma.done.wait [#allocation9], 3072  }
  0x36   :  { %9326 = vsyncadd [#allocation9], 4294964224  ;;  %v9334_v0 = vmov 0   ;;  %v9027_v1 = vld [vmem:[#allocation6 + $0x4] ss:$8 sps:$4 sm:$0xff]   ;;  %vm350_vm0 = vcmask 1045504  }
  0x37   :  { %694 = vmatprep.mubr.bf16.mxu0 %v9334_v0  ;;  %389 = vmatprep.mubr.bf16.mxu1 %v9334_v0  ;;  %v9029_v2 = vld [vmem:[#allocation6] ss:$8 sps:$4 sm:$0xff]   ;;  %v9030_v3 = vld [vmem:[#allocation6 + $0x14] ss:$8 sps:$4 sm:$0x3f]   ;;  %vm277_vm1 = vcmask 228352  }
  0x38   :  { %662 = vmatprep.subr.bf16.mxu0 %v9027_v1  ;;  %v9032_v4 = vld [vmem:[#allocation6 + $0x10] ss:$8 sps:$4 sm:$0x3f]   ;;  %v9036_v6 = vld [vmem:[#allocation6 + $0x44] ss:$8 sps:$4 sm:$0xff]   ;;  %vm3293_vm2 = vcmask 48128  }
  0x39   :  { %663 = vmatpush1.bf16.msra.mxu0 %v9029_v2  ;;  %v657_v5 = vsel %vm350_vm0, %v9032_v4, 0  ;;  %v9033_v7 = vld [vmem:[%s13921_s0] sm:$0xff]   ;;  %v9034_v8 = vld [vmem:[#allocation6 + $0x40] ss:$8 sps:$4 sm:$0xff]   ;;  %v9047_v12 = vld [vmem:[#allocation6 + $0x64] ss:$8 sps:$4 sm:$0xff]  }
  0x3a   :  { %7957 = vmatprep.subr.msk.bf16.mxu0 %vm350_vm0, %v9030_v3  ;;  %v9039_v9 = vld [vmem:[#allocation6 + $0x54] ss:$8 sps:$4 sm:$0x3f]   ;;  %v9041_v10 = vld [vmem:[#allocation6 + $0x50] ss:$8 sps:$4 sm:$0x3f]  }
  0x3b   :  { %v1199_v11 = vsel %vm350_vm0, %v9041_v10, 0  ;;  %v9037_v13 = vld [vmem:[%s13921_s0 + $0x8] sm:$0xff]   ;;  %v9038_v14 = vld [vmem:[%s13921_s0 + $0x10] sm:$0xff]   ;;  %v9042_v20 = vld [vmem:[%s13921_s0 + $0x18] sm:$0xff]   ;;  %s9337_s23 = smov 110   ;;  %s9338_s24 = smov 104  }
  0x3c   :  { %v9056_v15 = vld [vmem:[#allocation6 + $0x24] ss:$8 sps:$4 sm:$0xff]   ;;  %v9059_v16 = vld [vmem:[#allocation6 + $0x20] ss:$8 sps:$4 sm:$0xff]   ;;  %v9043_v21 = vld [vmem:[%s13921_s0 + $0x20] sm:$0xff]   ;;  %s9339_s25 = smov 98  }
  0x3d   :  { %665 = vmatpush1.bf16.msra.mxu0 %v657_v5  ;;  %357 = vmatprep.subr.bf16.mxu1 %v9056_v15  ;;  %v9060_v17 = vld [vmem:[#allocation6 + $0x34] ss:$8 sps:$4 sm:$0x3f]   ;;  %v9062_v18 = vld [vmem:[#allocation6 + $0x30] ss:$8 sps:$4 sm:$0x3f]  }
  0x3e   :  { %1204 = vmatprep.subr.bf16.mxu0 %v9036_v6  ;;  %358 = vmatpush1.bf16.msra.mxu1 %v9059_v16  ;;  %v352_v19 = vsel %vm350_vm0, %v9062_v18, 0  ;;  %v9044_v22 = vld [vmem:[%s13921_s0 + $0x10] sm:$0xff]   ;;  %v9068_v24 = vld [vmem:[#allocation6 + $0x70] ss:$8 sps:$4 sm:$0x3f]   ;;  %v9048_v27 = vld [vmem:[%s13921_s0 + $0x18] sm:$0xff]  }
  0x3f   :  { %7927 = vmatprep.subr.msk.bf16.mxu1 %vm350_vm0, %v9060_v17  ;;  %v9045_v23 = vld [vmem:[#allocation6 + $0x60] ss:$8 sps:$4 sm:$0xff]   ;;  %v9066_v25 = vld [vmem:[#allocation6 + $0x74] ss:$8 sps:$4 sm:$0x3f]   ;;  %v1837_v26 = vsel %vm350_vm0, %v9068_v24, 0 }
  0x40   :  { %7958 = vmatmul.mubr.msk.bf16.vlgmr.msra.gmra.mrb[0].mxu0 %vm277_vm1, %v9033_v7  ;;  %v9509_v28 = vld [vmem:[%s13921_s0 + $0x28] sm:$0xff]   ;;  %v9049_v29 = vld [vmem:[%s13921_s0 + $0x20] sm:$0xff]   ;;  %v9522_v30 = vld [vmem:[%s13921_s0 + $0x30] sm:$0xff]   ;;  %s9340_s26 = smov 92   ;;  %s9341_s29 = smov 86   ;;  %vm5271_vm3 = vcmask 998400  }
  0x41   :  { %1205 = vmatpush1.bf16.msra.mxu0 %v9034_v8  ;;  %704 = vmatprep.mubr.bf16.mxu0 %v9334_v0  ;;  %v9050_v31 = vld [vmem:[%s13921_s0 + $0x28] sm:$0xff]   ;;  %v9535_v32 = vld [vmem:[%s13921_s0 + $0x38] sm:$0xff]   ;;  %v9051_v33 = vld [vmem:[%s13921_s0 + $0x30] sm:$0xff]   ;;  %s9342_s30 = smov 80   ;;  %s9343_s12 = smov 74   ;;  %vm3534_vm4 = vcmask 97328  }
  0x42   :  { %8010 = vmatprep.subr.msk.bf16.mxu0 %vm350_vm0, %v9039_v9  ;;  %360 = vmatpush1.bf16.msra.mxu1 %v352_v19  ;;  %v9548_v34 = vld [vmem:[%s13921_s0 + $0x40] sm:$0xff]   ;;  %v9052_v35 = vld [vmem:[%s13921_s0 + $0x38] sm:$0xff]   ;;  %v9561_v36 = vld [vmem:[%s13921_s0 + $0x48] sm:$0xff]   ;;  %s9344_s14 = smov 62   ;;  %s9345_s15 = smov 68   ;;  %vm3727_vm5 = vcmask 146528  }
  0x43   :  { %8547 = vmatprep.subr.bf16.mxu1 %v9027_v1  ;;  %v9053_v37 = vld [vmem:[%s13921_s0 + $0x40] sm:$0xff]   ;;  %v9574_v38 = vld [vmem:[%s13921_s0 + $0x50] sm:$0xff]   ;;  %v9054_v39 = vld [vmem:[%s13921_s0 + $0x48] sm:$0xff]   ;;  %vm3920_vm6 = vcmask 195728   ;;  %vm4113_vm7 = vcmask 244928   ;;  %vm4306_vm8 = vcmask 294128  }
  0x44   :  { %v9587_v40 = vld [vmem:[%s13921_s0 + $0x58] sm:$0xff]   ;;  %v9055_v41 = vld [vmem:[%s13921_s0 + $0x50] sm:$0xff]   ;;  %v9600_v43 = vld [vmem:[%s13921_s0 + $0x60] sm:$0xff]   ;;  %vm4499_vm9 = vcmask 343328   ;;  %vm4692_vm10 = vcmask 392528   ;;  %vm4885_vm11 = vcmask 441728  }
  0x45   :  { %1207 = vmatpush1.bf16.msra.mxu0 %v1199_v11  ;;  %7928 = vmatmul.mubr.msk.bf16.vlgmr.msra.gmra.mrb[0].mxu1 %vm277_vm1, %v9037_v13  ;;  %v9094_v42 = vld [vmem:[#allocation6 + $0x84] ss:$8 sps:$4 sm:$0xff]   ;;  %v9613_v45 = vld [vmem:[%s13921_s0 + $0x68] sm:$0xff]   ;;  %v9063_v46 = vld [vmem:[%s13921_s0 + $0x60] sm:$0xff]   ;;  %vm5078_vm12 = vcmask 490928   ;;  %vm5608_vm13 = vcmask 540128  }
  0x46   :  { %1842 = vmatprep.subr.bf16.mxu0 %v9047_v12  ;;  %399 = vmatprep.mubr.bf16.mxu1 %v9334_v0  ;;  %v9058_v44 = vld [vmem:[%s13921_s0 + $0x58] sm:$0xff]   ;;  %v9626_v47 = vld [vmem:[%s13921_s0 + $0x70] sm:$0xff]   ;;  %v9064_v48 = vld [vmem:[%s13921_s0 + $0x68] sm:$0xff]   ;;  %vm5945_vm14 = vcmask 589328   ;;  %vm6170_vm15 = vcmask 1043456  }
  0x47   :  { %8549 = vmatpush1.bf16.msra.mxu1 %v9029_v2  ;;  %v9639_v49 = vld [vmem:[%s13921_s0 + $0x78] sm:$0xff]   ;;  %v9065_v50 = vld [vmem:[%s13921_s0 + $0x70] sm:$0xff]   ;;  %v9652_v51 = vld [vmem:[%s13921_s0 + $0x80] sm:$0xff]  }
  0x48   :  { %7959 = vmatmul.mubr.msk.bf16.gmra.mrb[4].mxu0 %vm277_vm1, %v9037_v13  ;;  %8548 = vmatprep.subr.msk.bf16.mxu1 %vm350_vm0, %v9030_v3  ;;  %v9069_v52 = vld [vmem:[%s13921_s0 + $0x78] sm:$0xff]   ;;  %v9665_v53 = vld [vmem:[%s13921_s0 + $0x88] sm:$0xff]   ;;  %v9071_v54 = vld [vmem:[%s13921_s0 + $0x80] sm:$0xff]  }
  0x49   :  { %714 = vmatprep.mubr.bf16.mxu0 %v9334_v0  ;;  %v9678_v55 = vld [vmem:[%s13921_s0 + $0x90] sm:$0xff]   ;;  %v9073_v56 = vld [vmem:[%s13921_s0 + $0x88] sm:$0xff]   ;;  %v9691_v57 = vld [vmem:[%s13921_s0 + $0x98] sm:$0xff]  }
  0x4a   :  { %v9075_v58 = vld [vmem:[%s13921_s0 + $0x90] sm:$0xff]   ;;  %v9704_v59 = vld [vmem:[%s13921_s0 + $0xa0] sm:$0xff]   ;;  %v9077_v60 = vld [vmem:[%s13921_s0 + $0x98] sm:$0xff]  }
  0x4b   :  { %8550 = vmatpush1.bf16.msra.mxu1 %v657_v5  ;;  %v9717_v61 = vld [vmem:[%s13921_s0 + $0xa8] sm:$0xff]   ;;  %v9079_v62 = vld [vmem:[%s13921_s0 + $0xa0] sm:$0xff]   ;;  %v9730_v63 = vld [vmem:[%s13921_s0 + $0xb0] sm:$0xff]  }
  0x4c   :  { %v9081_v1 = vld [vmem:[%s13921_s0 + $0xa8] sm:$0xff]   ;;  %v9743_v2 = vld [vmem:[%s13921_s0 + $0xb8] sm:$0xff]   ;;  %v9083_v3 = vld [vmem:[%s13921_s0 + $0xb0] sm:$0xff]  }
  0x4d   :  { %7929 = vmatmul.mubr.msk.bf16.gmra.mrb[4].mxu1 %vm277_vm1, %v9038_v14  ;;  %v9111_v4 = vld [vmem:[%s13921_s0 + $0xc0] sm:$0xff]   ;;  %v9085_v5 = vld [vmem:[%s13921_s0 + $0xb8] sm:$0xff]   ;;  %v9089_v7 = vld [vmem:[%s13921_s0 + $0xc8] sm:$0xff]  }
  0x4e   :  { %409 = vmatprep.mubr.bf16.mxu1 %v9334_v0  ;;  %v9087_v6 = vld [vmem:[%s13921_s0 + $0xc0] sm:$0xff]   ;;  %v9091_v8 = vld [vmem:[%s13921_s0 + $0x18] sm:$0xff]   ;;  %v9100_v15 = vld [vmem:[%s13921_s0 + $0x30] sm:$0xff]  }
  0x4f   :  { %v9092_v9 = vld [vmem:[#allocation6 + $0x80] ss:$8 sps:$4 sm:$0xff]   ;;  %v9116_v10 = vld [vmem:[#allocation6 + $0x94] ss:$8 sps:$4 sm:$0x3f]  }
  0x50   :  { %7960 = vmatmul.mubr.msk.bf16.gmra.mrb[8].mxu0 %vm277_vm1, %v9038_v14  ;;  %v9118_v11 = vld [vmem:[#allocation6 + $0x90] ss:$8 sps:$4 sm:$0x3f]   ;;  %v9102_v16 = vld [vmem:[%s13921_s0 + $0x38] sm:$0xff]   ;;  %v9108_v19 = vld [vmem:[%s13921_s0 + $0x50] sm:$0xff]  }
  0x51   :  { %724 = vmatprep.mubr.bf16.mxu0 %v9334_v0  ;;  %v2475_v12 = vsel %vm350_vm0, %v9118_v11, 0  ;;  %v9096_v13 = vld [vmem:[%s13921_s0 + $0x20] sm:$0xff]   ;;  %v9098_v14 = vld [vmem:[%s13921_s0 + $0x28] sm:$0xff]   ;;  %v9115_v24 = vld [vmem:[%s13921_s0 + $0x78] sm:$0xff]  }
  0x52   :  { %v9104_v17 = vld [vmem:[%s13921_s0 + $0x40] sm:$0xff]   ;;  %v9106_v18 = vld [vmem:[%s13921_s0 + $0x48] sm:$0xff]  }
  0x55   :  { %7930 = vmatmul.mubr.msk.bf16.gmra.mrb[8].mxu1 %vm277_vm1, %v9042_v20 }
  0x56   :  { %419 = vmatprep.mubr.bf16.mxu1 %v9334_v0 }
  0x58   :  { %7961 = vmatmul.mubr.msk.bf16.gmra.mrb[12].mxu0 %vm277_vm1, %v9042_v20  ;;  %v9110_v20 = vld [vmem:[%s13921_s0 + $0x58] sm:$0xff]  }
  0x59   :  { %734 = vmatprep.mubr.bf16.mxu0 %v9334_v0 }
  0x5d   :  { %7931 = vmatmul.mubr.msk.bf16.gmra.mrb[12].mxu1 %vm277_vm1, %v9043_v21 }
  0x5e   :  { %429 = vmatprep.mubr.bf16.mxu1 %v9334_v0 }
  0x60   :  { %7962 = vmatmul.mubr.msk.bf16.gmra.mrb[16].mxu0 %vm277_vm1, %v9043_v21  ;;  %v9112_v21 = vld [vmem:[%s13921_s0 + $0x60] sm:$0xff]  }
  0x61   :  { %1236 = vmatprep.mubr.bf16.mxu0 %v9334_v0 }
  0x65   :  { %7932 = vmatmul.mubr.msk.bf16.gmra.mrb[16].mxu1 %vm277_vm1, %v9509_v28 }
  0x66   :  { %439 = vmatprep.mubr.bf16.mxu1 %v9334_v0 }
  0x68   :  { %8011 = vmatmul.mubr.msk.bf16.vlgmr.msra.gmra.mrb[0].mxu0 %vm277_vm1, %v9044_v22  ;;  %v9113_v22 = vld [vmem:[%s13921_s0 + $0x68] sm:$0xff]  }
  0x69   :  { %1843 = vmatpush1.bf16.msra.mxu0 %v9045_v23  ;;  %1246 = vmatprep.mubr.bf16.mxu0 %v9334_v0  ;;  %v9114_v23 = vld [vmem:[%s13921_s0 + $0x70] sm:$0xff]  }
  0x6a   :  { %8063 = vmatprep.subr.msk.bf16.mxu0 %vm350_vm0, %v9066_v25  ;;  %v9119_v25 = vld [vmem:[%s13921_s0 + $0x80] sm:$0xff]  }
  0x6d   :  { %1845 = vmatpush1.bf16.msra.mxu0 %v1837_v26  ;;  %7933 = vmatmul.mubr.msk.bf16.gmra.mrb[20].mxu1 %vm277_vm1, %v9522_v30  ;;  %v9120_v26 = vld [vmem:[%s13921_s0 + $0x88] sm:$0xff]  }
  0x6e   :  { %449 = vmatprep.mubr.bf16.mxu1 %v9334_v0  ;;  %2480 = vmatprep.subr.bf16.mxu0 %v9094_v42  ;;  %v9124_v42 = vld [vmem:[%s13921_s0 + $0xa8] sm:$0xff]  }
  0x70   :  { %8012 = vmatmul.mubr.msk.bf16.gmra.mrb[4].mxu0 %vm277_vm1, %v9048_v27  ;;  %v9121_v27 = vld [vmem:[%s13921_s0 + $0x90] sm:$0xff]  }
  0x71   :  { %1256 = vmatprep.mubr.bf16.mxu0 %v9334_v0 }
  0x75   :  { %7934 = vmatmul.mubr.msk.bf16.gmra.mrb[24].mxu1 %vm277_vm1, %v9535_v32 }
  0x76   :  { %459 = vmatprep.mubr.bf16.mxu1 %v9334_v0 }
  0x78   :  { %8013 = vmatmul.mubr.msk.bf16.gmra.mrb[8].mxu0 %vm277_vm1, %v9049_v29 }
  0x79   :  { %1266 = vmatprep.mubr.bf16.mxu0 %v9334_v0 }
  0x7d   :  { %7935 = vmatmul.mubr.msk.bf16.gmra.mrb[28].mxu1 %vm277_vm1, %v9548_v34 }
  0x7e   :  { %469 = vmatprep.mubr.bf16.mxu1 %v9334_v0 }
  0x80   :  { %8014 = vmatmul.mubr.msk.bf16.gmra.mrb[12].mxu0 %vm277_vm1, %v9050_v31 }
  0x81   :  { %1276 = vmatprep.mubr.bf16.mxu0 %v9334_v0 }
  0x85   :  { %7936 = vmatmul.mubr.msk.bf16.gmra.mrb[32].mxu1 %vm277_vm1, %v9561_v36 }
  0x86   :  { %479 = vmatprep.mubr.bf16.mxu1 %v9334_v0 }
  0x88   :  { %8015 = vmatmul.mubr.msk.bf16.gmra.mrb[16].mxu0 %vm277_vm1, %v9051_v33 }
  0x89   :  { %1286 = vmatprep.mubr.bf16.mxu0 %v9334_v0 }
  0x8d   :  { %7937 = vmatmul.mubr.msk.bf16.gmra.mrb[36].mxu1 %vm277_vm1, %v9574_v38 }
  0x8e   :  { %489 = vmatprep.mubr.bf16.mxu1 %v9334_v0 }
  0x90   :  { %8016 = vmatmul.mubr.msk.bf16.gmra.mrb[20].mxu0 %vm277_vm1, %v9052_v35 }
  0x91   :  { %1296 = vmatprep.mubr.bf16.mxu0 %v9334_v0 }
  0x95   :  { %7938 = vmatmul.mubr.msk.bf16.gmra.mrb[40].mxu1 %vm277_vm1, %v9587_v40 }
  0x96   :  { %499 = vmatprep.mubr.bf16.mxu1 %v9334_v0 }
  0x98   :  { %8017 = vmatmul.mubr.msk.bf16.gmra.mrb[24].mxu0 %vm277_vm1, %v9053_v37  ;;  %v9123_v37 = vld [vmem:[%s13921_s0 + $0xa0] sm:$0xff]  }
  0x99   :  { %1306 = vmatprep.mubr.bf16.mxu0 %v9334_v0 }
  0x9d   :  { %7939 = vmatmul.mubr.msk.bf16.gmra.mrb[44].mxu1 %vm277_vm1, %v9600_v43 }
  0x9e   :  { %509 = vmatprep.mubr.bf16.mxu1 %v9334_v0 }
  0xa0   :  { %8018 = vmatmul.mubr.msk.bf16.gmra.mrb[28].mxu0 %vm277_vm1, %v9054_v39 }
  0xa1   :  { %1316 = vmatprep.mubr.bf16.mxu0 %v9334_v0 }
  0xa5   :  { %7940 = vmatmul.mubr.msk.bf16.gmra.mrb[48].mxu1 %vm277_vm1, %v9613_v45 }
  0xa6   :  { %519 = vmatprep.mubr.bf16.mxu1 %v9334_v0 }
  0xa8   :  { %8019 = vmatmul.mubr.msk.bf16.gmra.mrb[32].mxu0 %vm277_vm1, %v9055_v41 }
  0xa9   :  { %1326 = vmatprep.mubr.bf16.mxu0 %v9334_v0 }
  0xad   :  { %7941 = vmatmul.mubr.msk.bf16.gmra.mrb[52].mxu1 %vm277_vm1, %v9626_v47 }
  0xae   :  { %529 = vmatprep.mubr.bf16.mxu1 %v9334_v0 }
  0xb0   :  { %8020 = vmatmul.mubr.msk.bf16.gmra.mrb[36].mxu0 %vm277_vm1, %v9058_v44 }
  0xb1   :  { %1336 = vmatprep.mubr.bf16.mxu0 %v9334_v0 }
  0xb5   :  { %7942 = vmatmul.mubr.msk.bf16.gmra.mrb[56].mxu1 %vm277_vm1, %v9639_v49 }
  0xb6   :  { %539 = vmatprep.mubr.bf16.mxu1 %v9334_v0 }
  0xb8   :  { %8021 = vmatmul.mubr.msk.bf16.gmra.mrb[40].mxu0 %vm277_vm1, %v9063_v46 }
  0xb9   :  { %1346 = vmatprep.mubr.bf16.mxu0 %v9334_v0 }
  0xbd   :  { %7943 = vmatmul.mubr.msk.bf16.gmra.mrb[60].mxu1 %vm277_vm1, %v9652_v51 }
  0xbe   :  { %549 = vmatprep.mubr.bf16.mxu1 %v9334_v0 }
  0xc0   :  { %8022 = vmatmul.mubr.msk.bf16.gmra.mrb[44].mxu0 %vm277_vm1, %v9064_v48 }
  0xc1   :  { %1356 = vmatprep.mubr.bf16.mxu0 %v9334_v0 }
  0xc5   :  { %7944 = vmatmul.mubr.msk.bf16.gmra.mrb[64].mxu1 %vm277_vm1, %v9665_v53 }
  0xc6   :  { %559 = vmatprep.mubr.bf16.mxu1 %v9334_v0 }
  0xc8   :  { %8023 = vmatmul.mubr.msk.bf16.gmra.mrb[48].mxu0 %vm277_vm1, %v9065_v50 }
  0xc9   :  { %1366 = vmatprep.mubr.bf16.mxu0 %v9334_v0 }
  0xcd   :  { %7945 = vmatmul.mubr.msk.bf16.gmra.mrb[68].mxu1 %vm277_vm1, %v9678_v55 }
  0xce   :  { %569 = vmatprep.mubr.bf16.mxu1 %v9334_v0 }
  0xd0   :  { %8024 = vmatmul.mubr.msk.bf16.gmra.mrb[52].mxu0 %vm277_vm1, %v9069_v52  ;;  %v9126_v52 = vld [vmem:[%s13921_s0 + $0xb8] sm:$0xff]  }
  0xd1   :  { %1376 = vmatprep.mubr.bf16.mxu0 %v9334_v0 }
  0xd5   :  { %7946 = vmatmul.mubr.msk.bf16.gmra.mrb[72].mxu1 %vm277_vm1, %v9691_v57 }
  0xd6   :  { %579 = vmatprep.mubr.bf16.mxu1 %v9334_v0 }
  0xd8   :  { %8025 = vmatmul.mubr.msk.bf16.gmra.mrb[56].mxu0 %vm277_vm1, %v9071_v54  ;;  %v9128_v54 = vld [vmem:[%s13921_s0 + $0xc8] sm:$0xff]  }
  0xd9   :  { %1386 = vmatprep.mubr.bf16.mxu0 %v9334_v0 }
  0xdd   :  { %7947 = vmatmul.mubr.msk.bf16.gmra.mrb[76].mxu1 %vm277_vm1, %v9704_v59 }
  0xde   :  { %589 = vmatprep.mubr.bf16.mxu1 %v9334_v0 }
  0xe0   :  { %8026 = vmatmul.mubr.msk.bf16.gmra.mrb[60].mxu0 %vm277_vm1, %v9073_v56  ;;  %v9130_v56 = vld [vmem:[%s13921_s0 + $0x20] sm:$0xff]  }
  0xe1   :  { %1396 = vmatprep.mubr.bf16.mxu0 %v9334_v0 }
  0xe5   :  { %7948 = vmatmul.mubr.msk.bf16.gmra.mrb[80].mxu1 %vm277_vm1, %v9717_v61 }
  0xe6   :  { %599 = vmatprep.mubr.bf16.mxu1 %v9334_v0 }
  0xe8   :  { %8027 = vmatmul.mubr.msk.bf16.gmra.mrb[64].mxu0 %vm277_vm1, %v9075_v58 }
  0xe9   :  { %1406 = vmatprep.mubr.bf16.mxu0 %v9334_v0 }
  0xed   :  { %7949 = vmatmul.mubr.msk.bf16.gmra.mrb[84].mxu1 %vm277_vm1, %v9730_v63 }
  0xee   :  { %609 = vmatprep.mubr.bf16.mxu1 %v9334_v0 }
  0xf0   :  { %8028 = vmatmul.mubr.msk.bf16.gmra.mrb[68].mxu0 %vm277_vm1, %v9077_v60  ;;  %v9131_v60 = vld [vmem:[%s13921_s0 + $0x28] sm:$0xff]  }
  0xf1   :  { %1416 = vmatprep.mubr.bf16.mxu0 %v9334_v0 }
  0xf5   :  { %7950 = vmatmul.mubr.msk.bf16.gmra.mrb[88].mxu1 %vm277_vm1, %v9743_v2 }
  0xf6   :  { %619 = vmatprep.mubr.bf16.mxu1 %v9334_v0 }
  0xf8   :  { %8029 = vmatmul.mubr.msk.bf16.gmra.mrb[72].mxu0 %vm277_vm1, %v9079_v62 }
  0xf9   :  { %1426 = vmatprep.mubr.bf16.mxu0 %v9334_v0 }
  0xfd   :  { %7951 = vmatmul.mubr.msk.bf16.gmra.mrb[92].mxu1 %vm277_vm1, %v9111_v4 }
  0xfe   :  { %744 = vmatprep.mubr.bf16.mxu1 %v9334_v0 }
 0x100   :  { %8030 = vmatmul.mubr.msk.bf16.gmra.mrb[76].mxu0 %vm277_vm1, %v9081_v1 }
 0x101   :  { %1436 = vmatprep.mubr.bf16.mxu0 %v9334_v0 }
 0x105   :  { %7963 = vmatmul.mubr.msk.bf16.vlgmr.msra.gmra.mrb[20].mxu1 %vm277_vm1, %v9509_v28 }
 0x106   :  { %754 = vmatprep.mubr.bf16.mxu1 %v9334_v0 }
 0x108   :  { %8031 = vmatmul.mubr.msk.bf16.gmra.mrb[80].mxu0 %vm277_vm1, %v9083_v3 }
 0x109   :  { %1446 = vmatprep.mubr.bf16.mxu0 %v9334_v0 }
 0x10d   :  { %7964 = vmatmul.mubr.msk.bf16.gmra.mrb[24].mxu1 %vm277_vm1, %v9522_v30 }
 0x10e   :  { %764 = vmatprep.mubr.bf16.mxu1 %v9334_v0 }
 0x110   :  { %8032 = vmatmul.mubr.msk.bf16.gmra.mrb[84].mxu0 %vm277_vm1, %v9085_v5 }
 0x111   :  { %1456 = vmatprep.mubr.bf16.mxu0 %v9334_v0 }
 0x115   :  { %7965 = vmatmul.mubr.msk.bf16.gmra.mrb[28].mxu1 %vm277_vm1, %v9535_v32  ;;  %v9122_v32 = vld [vmem:[%s13921_s0 + $0x98] sm:$0xff]  }
 0x116   :  { %774 = vmatprep.mubr.bf16.mxu1 %v9334_v0 }
 0x118   :  { %8033 = vmatmul.mubr.msk.bf16.gmra.mrb[88].mxu0 %vm277_vm1, %v9087_v6  ;;  %v9908_v28 = vpop.f32.mrb[0].mxu1 }
 0x119   :  { %1466 = vmatprep.mubr.bf16.mxu0 %v9334_v0  ;;  %v9911_v29 = vpop.f32.mrb[1].mxu1 }
 0x11a   :  { %v9913_v30 = vpop.f32.mrb[2].mxu1 }
 0x11b   :  { %v9915_v31 = vpop.f32.mrb[3].mxu1 }
 0x11d   :  { %7966 = vmatmul.mubr.msk.bf16.gmra.mrb[32].mxu1 %vm277_vm1, %v9548_v34 }
 0x11e   :  { %784 = vmatprep.mubr.bf16.mxu1 %v9334_v0 }
 0x120   :  { %8034 = vmatmul.mubr.msk.bf16.gmra.mrb[92].mxu0 %vm277_vm1, %v9089_v7  ;;  %v9923_v33 = vpop.f32.mrb[4].mxu1  ;;  %v9133_v7 = vld [vmem:[%s13921_s0 + $0x38] sm:$0xff]  }
 0x121   :  { %1874 = vmatprep.mubr.bf16.mxu0 %v9334_v0  ;;  %v9926_v34 = vpop.f32.mrb[5].mxu1 }
 0x122   :  { %v9928_v35 = vpop.f32.mrb[6].mxu1 }
 0x125   :  { %7967 = vmatmul.mubr.msk.bf16.gmra.mrb[36].mxu1 %vm277_vm1, %v9561_v36  ;;  %v9930_v36 = vpop.f32.mrb[7].mxu1 }
 0x126   :  { %794 = vmatprep.mubr.bf16.mxu1 %v9334_v0 }
 0x128   :  { %8064 = vmatmul.mubr.msk.bf16.vlgmr.msra.gmra.mrb[0].mxu0 %vm277_vm1, %v9091_v8 }
 0x129   :  { %2481 = vmatpush1.bf16.msra.mxu0 %v9092_v9  ;;  %1884 = vmatprep.mubr.bf16.mxu0 %v9334_v0 }
 0x12a   :  { %8116 = vmatprep.subr.msk.bf16.mxu0 %vm350_vm0, %v9116_v10  ;;  %vm6001_vm0 = vcmask 588800  }
 0x12d   :  { %2483 = vmatpush1.bf16.msra.mxu0 %v2475_v12  ;;  %7968 = vmatmul.mubr.msk.bf16.gmra.mrb[40].mxu1 %vm277_vm1, %v9574_v38  ;;  %v9936_v38 = vpop.f32.mrb[8].mxu1  ;;  %v9134_v12 = vld [vmem:[%s13921_s0 + $0x40] sm:$0xff]  }
 0x12e   :  { %804 = vmatprep.mubr.bf16.mxu1 %v9334_v0  ;;  %v9939_v39 = vpop.f32.mrb[9].mxu1 }
 0x130   :  { %8065 = vmatmul.mubr.msk.bf16.gmra.mrb[4].mxu0 %vm277_vm1, %v9096_v13 }
 0x131   :  { %1894 = vmatprep.mubr.bf16.mxu0 %v9334_v0 }
 0x135   :  { %7969 = vmatmul.mubr.msk.bf16.gmra.mrb[44].mxu1 %vm277_vm1, %v9587_v40  ;;  %v9941_v40 = vpop.f32.mrb[10].mxu1 }
 0x136   :  { %814 = vmatprep.mubr.bf16.mxu1 %v9334_v0  ;;  %v9943_v41 = vpop.f32.mrb[11].mxu1 }
 0x138   :  { %8066 = vmatmul.mubr.msk.bf16.gmra.mrb[8].mxu0 %vm277_vm1, %v9098_v14 }
 0x139   :  { %1904 = vmatprep.mubr.bf16.mxu0 %v9334_v0 }
 0x13d   :  { %7970 = vmatmul.mubr.msk.bf16.gmra.mrb[48].mxu1 %vm277_vm1, %v9600_v43  ;;  %v9949_v43 = vpop.f32.mrb[12].mxu1 }
 0x13e   :  { %824 = vmatprep.mubr.bf16.mxu1 %v9334_v0  ;;  %v9952_v44 = vpop.f32.mrb[13].mxu1 }
 0x140   :  { %8067 = vmatmul.mubr.msk.bf16.gmra.mrb[12].mxu0 %vm277_vm1, %v9100_v15 }
 0x141   :  { %1914 = vmatprep.mubr.bf16.mxu0 %v9334_v0 }
 0x145   :  { %7971 = vmatmul.mubr.msk.bf16.gmra.mrb[52].mxu1 %vm277_vm1, %v9613_v45  ;;  %v9954_v45 = vpop.f32.mrb[14].mxu1 }
 0x146   :  { %834 = vmatprep.mubr.bf16.mxu1 %v9334_v0  ;;  %v9956_v46 = vpop.f32.mrb[15].mxu1 }
 0x147   :  { %v9962_v48 = vpop.f32.mrb[16].mxu1 }
 0x148   :  { %8068 = vmatmul.mubr.msk.bf16.gmra.mrb[16].mxu0 %vm277_vm1, %v9102_v16 }
 0x149   :  { %1924 = vmatprep.mubr.bf16.mxu0 %v9334_v0 }
 0x14d   :  { %7972 = vmatmul.mubr.msk.bf16.gmra.mrb[56].mxu1 %vm277_vm1, %v9626_v47  ;;  %v9125_v47 = vld [vmem:[%s13921_s0 + $0xb0] sm:$0xff]  }
 0x14e   :  { %844 = vmatprep.mubr.bf16.mxu1 %v9334_v0 }
 0x150   :  { %8069 = vmatmul.mubr.msk.bf16.gmra.mrb[20].mxu0 %vm277_vm1, %v9104_v17  ;;  %v9135_v17 = vld [vmem:[%s13921_s0 + $0x48] sm:$0xff]  }
 0x151   :  { %1934 = vmatprep.mubr.bf16.mxu0 %v9334_v0 }
 0x155   :  { %7973 = vmatmul.mubr.msk.bf16.gmra.mrb[60].mxu1 %vm277_vm1, %v9639_v49  ;;  %v9965_v49 = vpop.f32.mrb[17].mxu1 }
 0x156   :  { %854 = vmatprep.mubr.bf16.mxu1 %v9334_v0  ;;  %v9967_v50 = vpop.f32.mrb[18].mxu1 }
 0x158   :  { %8070 = vmatmul.mubr.msk.bf16.gmra.mrb[24].mxu0 %vm277_vm1, %v9106_v18 }
 0x159   :  { %1944 = vmatprep.mubr.bf16.mxu0 %v9334_v0 }
 0x15d   :  { %7974 = vmatmul.mubr.msk.bf16.gmra.mrb[64].mxu1 %vm277_vm1, %v9652_v51  ;;  %v9969_v51 = vpop.f32.mrb[19].mxu1 }
 0x15e   :  { %864 = vmatprep.mubr.bf16.mxu1 %v9334_v0 }
 0x160   :  { %8071 = vmatmul.mubr.msk.bf16.gmra.mrb[28].mxu0 %vm277_vm1, %v9108_v19 }
 0x161   :  { %1954 = vmatprep.mubr.bf16.mxu0 %v9334_v0 }
 0x165   :  { %7975 = vmatmul.mubr.msk.bf16.gmra.mrb[68].mxu1 %vm277_vm1, %v9665_v53  ;;  %v9127_v53 = vld [vmem:[%s13921_s0 + $0xc0] sm:$0xff]  }
 0x166   :  { %874 = vmatprep.mubr.bf16.mxu1 %v9334_v0 }
 0x168   :  { %8072 = vmatmul.mubr.msk.bf16.gmra.mrb[32].mxu0 %vm277_vm1, %v9110_v20 }
 0x169   :  { %1964 = vmatprep.mubr.bf16.mxu0 %v9334_v0 }
 0x16d   :  { %7976 = vmatmul.mubr.msk.bf16.gmra.mrb[72].mxu1 %vm277_vm1, %v9678_v55  ;;  %v9129_v55 = vld [vmem:[%s13921_s0 + $0xd0] sm:$0xff]  }
 0x16e   :  { %884 = vmatprep.mubr.bf16.mxu1 %v9334_v0 }
 0x170   :  { %8073 = vmatmul.mubr.msk.bf16.gmra.mrb[36].mxu0 %vm277_vm1, %v9112_v21 }
 0x171   :  { %1974 = vmatprep.mubr.bf16.mxu0 %v9334_v0 }
 0x175   :  { %7977 = vmatmul.mubr.msk.bf16.gmra.mrb[76].mxu1 %vm277_vm1, %v9691_v57 }
 0x176   :  { %894 = vmatprep.mubr.bf16.mxu1 %v9334_v0 }
 0x178   :  { %8074 = vmatmul.mubr.msk.bf16.gmra.mrb[40].mxu0 %vm277_vm1, %v9113_v22  ;;  %v9136_v22 = vld [vmem:[%s13921_s0 + $0x50] sm:$0xff]  }
 0x179   :  { %1984 = vmatprep.mubr.bf16.mxu0 %v9334_v0 }
 0x17d   :  { %7978 = vmatmul.mubr.msk.bf16.gmra.mrb[80].mxu1 %vm277_vm1, %v9704_v59 }
 0x17e   :  { %904 = vmatprep.mubr.bf16.mxu1 %v9334_v0 }
 0x180   :  { %8075 = vmatmul.mubr.msk.bf16.gmra.mrb[44].mxu0 %vm277_vm1, %v9114_v23 }
 0x181   :  { %1994 = vmatprep.mubr.bf16.mxu0 %v9334_v0 }
 0x185   :  { %7979 = vmatmul.mubr.msk.bf16.gmra.mrb[84].mxu1 %vm277_vm1, %v9717_v61 }
 0x186   :  { %914 = vmatprep.mubr.bf16.mxu1 %v9334_v0 }
 0x188   :  { %8076 = vmatmul.mubr.msk.bf16.gmra.mrb[48].mxu0 %vm277_vm1, %v9115_v24 }
 0x189   :  { %2004 = vmatprep.mubr.bf16.mxu0 %v9334_v0 }
 0x18d   :  { %7980 = vmatmul.mubr.msk.bf16.gmra.mrb[88].mxu1 %vm277_vm1, %v9730_v63 }
 0x18e   :  { %924 = vmatprep.mubr.bf16.mxu1 %v9334_v0 }
 0x190   :  { %8077 = vmatmul.mubr.msk.bf16.gmra.mrb[52].mxu0 %vm277_vm1, %v9119_v25 }
 0x191   :  { %2014 = vmatprep.mubr.bf16.mxu0 %v9334_v0 }
 0x195   :  { %7981 = vmatmul.mubr.msk.bf16.gmra.mrb[92].mxu1 %vm277_vm1, %v9743_v2  ;;  %v9132_v2 = vld [vmem:[%s13921_s0 + $0x30] sm:$0xff]  }
 0x198   :  { %8078 = vmatmul.mubr.msk.bf16.gmra.mrb[56].mxu0 %vm277_vm1, %v9120_v26 }
 0x199   :  { %2024 = vmatprep.mubr.bf16.mxu0 %v9334_v0 }
 0x1a0   :  { %8079 = vmatmul.mubr.msk.bf16.gmra.mrb[60].mxu0 %vm277_vm1, %v9121_v27  ;;  %v9137_v27 = vld [vmem:[%s13921_s0 + $0x58] sm:$0xff]  }
 0x1a1   :  { %2034 = vmatprep.mubr.bf16.mxu0 %v9334_v0 }
 0x1a8   :  { %8080 = vmatmul.mubr.msk.bf16.gmra.mrb[64].mxu0 %vm277_vm1, %v9122_v32 }
 0x1a9   :  { %2044 = vmatprep.mubr.bf16.mxu0 %v9334_v0 }
 0x1b0   :  { %8081 = vmatmul.mubr.msk.bf16.gmra.mrb[68].mxu0 %vm277_vm1, %v9123_v37 }
 0x1b1   :  { %2054 = vmatprep.mubr.bf16.mxu0 %v9334_v0 }
 0x1b8   :  { %8082 = vmatmul.mubr.msk.bf16.gmra.mrb[72].mxu0 %vm277_vm1, %v9124_v42 }
 0x1b9   :  { %2064 = vmatprep.mubr.bf16.mxu0 %v9334_v0 }
 0x1c0   :  { %8083 = vmatmul.mubr.msk.bf16.gmra.mrb[76].mxu0 %vm277_vm1, %v9125_v47 }
 0x1c1   :  { %2074 = vmatprep.mubr.bf16.mxu0 %v9334_v0 }
 0x1c8   :  { %8084 = vmatmul.mubr.msk.bf16.gmra.mrb[80].mxu0 %vm277_vm1, %v9126_v52  ;;  %v9138_v52 = vld [vmem:[%s13921_s0 + $0x60] sm:$0xff]  }
 0x1c9   :  { %2084 = vmatprep.mubr.bf16.mxu0 %v9334_v0 }
 0x1d0   :  { %8085 = vmatmul.mubr.msk.bf16.gmra.mrb[84].mxu0 %vm277_vm1, %v9127_v53 }
 0x1d1   :  { %2094 = vmatprep.mubr.bf16.mxu0 %v9334_v0 }
 0x1d8   :  { %8086 = vmatmul.mubr.msk.bf16.gmra.mrb[88].mxu0 %vm277_vm1, %v9128_v54  ;;  %v9996_v57 = vpop.f32.mrb[20].mxu1 }
 0x1d9   :  { %2104 = vmatprep.mubr.bf16.mxu0 %v9334_v0  ;;  %v9998_v58 = vpop.f32.mrb[21].mxu1 }
 0x1da   :  { %v10000_v59 = vpop.f32.mrb[22].mxu1 }
 0x1db   :  { %v10005_v61 = vpop.f32.mrb[23].mxu1 }
 0x1e0   :  { %8087 = vmatmul.mubr.msk.bf16.gmra.mrb[92].mxu0 %vm277_vm1, %v9129_v55  ;;  %v10009_v62 = vpop.f32.mrb[24].mxu1 }
 0x1e1   :  { %2512 = vmatprep.mubr.bf16.mxu0 %v9334_v0  ;;  %v10011_v63 = vpop.f32.mrb[25].mxu1 }
 0x1e2   :  { %v10013_v1 = vpop.f32.mrb[26].mxu1 }
 0x1e3   :  { %v10018_v3 = vpop.f32.mrb[27].mxu1 }
 0x1e8   :  { %8117 = vmatmul.mubr.msk.bf16.vlgmr.msra.gmra.mrb[0].mxu0 %vm277_vm1, %v9130_v56  ;;  %v10022_v4 = vpop.f32.mrb[28].mxu1 }
 0x1e9   :  { %2522 = vmatprep.mubr.bf16.mxu0 %v9334_v0  ;;  %v10024_v5 = vpop.f32.mrb[29].mxu1 }
 0x1ea   :  { %v10026_v6 = vpop.f32.mrb[30].mxu1 }
 0x1eb   :  { %v10031_v8 = vpop.f32.mrb[31].mxu1 }
 0x1f0   :  { %8118 = vmatmul.mubr.msk.bf16.gmra.mrb[4].mxu0 %vm277_vm1, %v9131_v60  ;;  %v10035_v9 = vpop.f32.mrb[32].mxu1  ;;  %v9139_v60 = vld [vmem:[%s13921_s0 + $0x68] sm:$0xff]  }
 0x1f1   :  { %2532 = vmatprep.mubr.bf16.mxu0 %v9334_v0  ;;  %v10037_v10 = vpop.f32.mrb[33].mxu1 }
 0x1f2   :  { %v10039_v11 = vpop.f32.mrb[34].mxu1 }
 0x1f3   :  { %v10044_v13 = vpop.f32.mrb[35].mxu1 }
 0x1f8   :  { %8119 = vmatmul.mubr.msk.bf16.gmra.mrb[8].mxu0 %vm277_vm1, %v9132_v2  ;;  %v10048_v14 = vpop.f32.mrb[36].mxu1 }
 0x1f9   :  { %2542 = vmatprep.mubr.bf16.mxu0 %v9334_v0  ;;  %v10050_v15 = vpop.f32.mrb[37].mxu1 }
 0x1fa   :  { %v10052_v16 = vpop.f32.mrb[38].mxu1 }
 0x1fb   :  { %v10057_v18 = vpop.f32.mrb[39].mxu1 }
 0x200   :  { %8120 = vmatmul.mubr.msk.bf16.gmra.mrb[12].mxu0 %vm277_vm1, %v9133_v7  ;;  %v10061_v19 = vpop.f32.mrb[40].mxu1 }
 0x201   :  { %2552 = vmatprep.mubr.bf16.mxu0 %v9334_v0  ;;  %v10063_v20 = vpop.f32.mrb[41].mxu1 }
 0x202   :  { %v10065_v21 = vpop.f32.mrb[42].mxu1 }
 0x203   :  { %v10070_v23 = vpop.f32.mrb[43].mxu1 }
 0x208   :  { %8121 = vmatmul.mubr.msk.bf16.gmra.mrb[16].mxu0 %vm277_vm1, %v9134_v12  ;;  %v10074_v24 = vpop.f32.mrb[44].mxu1 }
 0x209   :  { %2562 = vmatprep.mubr.bf16.mxu0 %v9334_v0  ;;  %v10076_v25 = vpop.f32.mrb[45].mxu1 }
 0x20a   :  { %v10078_v26 = vpop.f32.mrb[46].mxu1 }
 0x20b   :  { %v10083_v32 = vpop.f32.mrb[47].mxu1 }
 0x210   :  { %8122 = vmatmul.mubr.msk.bf16.gmra.mrb[20].mxu0 %vm277_vm1, %v9135_v17  ;;  %v10087_v37 = vpop.f32.mrb[48].mxu1 }
 0x211   :  { %2572 = vmatprep.mubr.bf16.mxu0 %v9334_v0  ;;  %14112 = vst [vmem:[#allocation13_spill] sm:$0xff] %v10087_v37  ;;  %v10089_v42 = vpop.f32.mrb[49].mxu1 }
 0x212   :  { %14113 = vst [vmem:[#allocation14_spill] sm:$0xff] %v10089_v42  ;;  %v10091_v47 = vpop.f32.mrb[50].mxu1 }
 0x213   :  { %14114 = vst [vmem:[#allocation15_spill] sm:$0xff] %v10091_v47  ;;  %v10096_v53 = vpop.f32.mrb[51].mxu1 }
 0x214   :  { %14115 = vst [vmem:[#allocation16_spill] sm:$0xff] %v10096_v53 }
 0x218   :  { %8123 = vmatmul.mubr.msk.bf16.gmra.mrb[24].mxu0 %vm277_vm1, %v9136_v22  ;;  %v10100_v54 = vpop.f32.mrb[52].mxu1  ;;  %v9140_v22 = vld [vmem:[%s13921_s0 + $0x70] sm:$0xff]  }
 0x219   :  { %2582 = vmatprep.mubr.bf16.mxu0 %v9334_v0  ;;  %14116 = vst [vmem:[#allocation17_spill] sm:$0xff] %v10100_v54  ;;  %v10102_v55 = vpop.f32.mrb[53].mxu1 }
 0x21a   :  { %14117 = vst [vmem:[#allocation18_spill] sm:$0xff] %v10102_v55  ;;  %v10104_v56 = vpop.f32.mrb[54].mxu1 }
 0x21b   :  { %14118 = vst [vmem:[#allocation19_spill] sm:$0xff] %v10104_v56  ;;  %v10109_v2 = vpop.f32.mrb[55].mxu1 }
 0x21c   :  { %14119 = vst [vmem:[#allocation20_spill] sm:$0xff] %v10109_v2 }
 0x220   :  { %8124 = vmatmul.mubr.msk.bf16.gmra.mrb[28].mxu0 %vm277_vm1, %v9137_v27  ;;  %v10113_v7 = vpop.f32.mrb[56].mxu1 }
 0x221   :  { %2592 = vmatprep.mubr.bf16.mxu0 %v9334_v0  ;;  %14120 = vst [vmem:[#allocation21_spill] sm:$0xff] %v10113_v7  ;;  %v10115_v12 = vpop.f32.mrb[57].mxu1 }
 0x222   :  { %14121 = vst [vmem:[#allocation22_spill] sm:$0xff] %v10115_v12  ;;  %v10117_v17 = vpop.f32.mrb[58].mxu1 }
 0x223   :  { %14122 = vst [vmem:[#allocation23_spill] sm:$0xff] %v10117_v17  ;;  %v10122_v27 = vpop.f32.mrb[59].mxu1  ;;  %v9141_v17 = vld [vmem:[%s13921_s0 + $0x78] sm:$0xff]  }
 0x224   :  { %14123 = vst [vmem:[#allocation24_spill] sm:$0xff] %v10122_v27 }
 0x228   :  { %8125 = vmatmul.mubr.msk.bf16.gmra.mrb[32].mxu0 %vm277_vm1, %v9138_v52  ;;  %v10126_v52 = vpop.f32.mrb[60].mxu1 }
 0x229   :  { %2602 = vmatprep.mubr.bf16.mxu0 %v9334_v0  ;;  %14124 = vst [vmem:[#allocation25_spill] sm:$0xff] %v10126_v52 }
 0x230   :  { %8126 = vmatmul.mubr.msk.bf16.gmra.mrb[36].mxu0 %vm277_vm1, %v9139_v60  ;;  %v10128_v60 = vpop.f32.mrb[61].mxu1 }
 0x231   :  { %2612 = vmatprep.mubr.bf16.mxu0 %v9334_v0  ;;  %14125 = vst [vmem:[#allocation26_spill] sm:$0xff] %v10128_v60  ;;  %v10130_v2 = vpop.f32.mrb[62].mxu1 }
 0x232   :  { %14126 = vst [vmem:[#allocation27_spill] sm:$0xff] %v10130_v2  ;;  %v10135_v12 = vpop.f32.mrb[63].mxu1  ;;  %v9142_v2 = vld [vmem:[%s13921_s0 + $0x80] sm:$0xff]  }
 0x233   :  { %14127 = vst [vmem:[#allocation28_spill] sm:$0xff] %v10135_v12  ;;  %v10139_v27 = vpop.f32.mrb[64].mxu1 }
 0x234   :  { %14128 = vst [vmem:[#allocation29_spill] sm:$0xff] %v10139_v27 }
 0x238   :  { %8127 = vmatmul.mubr.msk.bf16.gmra.mrb[40].mxu0 %vm277_vm1, %v9140_v22  ;;  %v10141_v22 = vpop.f32.mrb[65].mxu1 }
 0x239   :  { %2622 = vmatprep.mubr.bf16.mxu0 %v9334_v0  ;;  %14129 = vst [vmem:[#allocation30_spill] sm:$0xff] %v10141_v22  ;;  %v10143_v7 = vpop.f32.mrb[66].mxu1 }
 0x23a   :  { %14130 = vst [vmem:[#allocation31_spill] sm:$0xff] %v10143_v7  ;;  %v10148_v60 = vpop.f32.mrb[67].mxu1  ;;  %v9143_v7 = vld [vmem:[%s13921_s0 + $0x88] sm:$0xff]  }
 0x23b   :  { %14131 = vst [vmem:[#allocation32_spill] sm:$0xff] %v10148_v60  ;;  %v10152_v12 = vpop.f32.mrb[68].mxu1 }
 0x23c   :  { %14132 = vst [vmem:[#allocation33_spill] sm:$0xff] %v10152_v12 }
 0x240   :  { %8128 = vmatmul.mubr.msk.bf16.gmra.mrb[44].mxu0 %vm277_vm1, %v9141_v17  ;;  %v10154_v17 = vpop.f32.mrb[69].mxu1 }
 0x241   :  { %2632 = vmatprep.mubr.bf16.mxu0 %v9334_v0  ;;  %14133 = vst [vmem:[#allocation34_spill] sm:$0xff] %v10154_v17  ;;  %v10156_v52 = vpop.f32.mrb[70].mxu1 }
 0x242   :  { %14134 = vst [vmem:[#allocation35_spill] sm:$0xff] %v10156_v52  ;;  %v10161_v22 = vpop.f32.mrb[71].mxu1  ;;  %v9144_v52 = vld [vmem:[%s13921_s0 + $0x90] sm:$0xff]  }
 0x243   :  { %14135 = vst [vmem:[#allocation36_spill] sm:$0xff] %v10161_v22  ;;  %v10165_v60 = vpop.f32.mrb[72].mxu1 }
 0x244   :  { %14136 = vst [vmem:[#allocation37_spill] sm:$0xff] %v10165_v60 }
 0x248   :  { %8129 = vmatmul.mubr.msk.bf16.gmra.mrb[48].mxu0 %vm277_vm1, %v9142_v2  ;;  %v10167_v2 = vpop.f32.mrb[73].mxu1 }
 0x249   :  { %2642 = vmatprep.mubr.bf16.mxu0 %v9334_v0  ;;  %14137 = vst [vmem:[#allocation38_spill] sm:$0xff] %v10167_v2  ;;  %v10169_v27 = vpop.f32.mrb[74].mxu1 }
 0x24a   :  { %14138 = vst [vmem:[#allocation39_spill] sm:$0xff] %v10169_v27  ;;  %v10174_v17 = vpop.f32.mrb[75].mxu1  ;;  %v9145_v27 = vld [vmem:[%s13921_s0 + $0x98] sm:$0xff]  }
 0x24b   :  { %14139 = vst [vmem:[#allocation40_spill] sm:$0xff] %v10174_v17  ;;  %v10178_v22 = vpop.f32.mrb[76].mxu1 }
 0x24c   :  { %14140 = vst [vmem:[#allocation41_spill] sm:$0xff] %v10178_v22 }
 0x250   :  { %8130 = vmatmul.mubr.msk.bf16.gmra.mrb[52].mxu0 %vm277_vm1, %v9143_v7  ;;  %v10180_v7 = vpop.f32.mrb[77].mxu1 }
 0x251   :  { %2652 = vmatprep.mubr.bf16.mxu0 %v9334_v0  ;;  %14141 = vst [vmem:[#allocation42_spill] sm:$0xff] %v10180_v7  ;;  %v10182_v12 = vpop.f32.mrb[78].mxu1 }
 0x252   :  { %14142 = vst [vmem:[#allocation43_spill] sm:$0xff] %v10182_v12  ;;  %v10187_v2 = vpop.f32.mrb[79].mxu1  ;;  %v9146_v12 = vld [vmem:[%s13921_s0 + $0xa0] sm:$0xff]  }
 0x253   :  { %14143 = vst [vmem:[#allocation44_spill] sm:$0xff] %v10187_v2  ;;  %v10191_v17 = vpop.f32.mrb[80].mxu1 }
 0x254   :  { %14144 = vst [vmem:[#allocation45_spill] sm:$0xff] %v10191_v17 }
 0x258   :  { %8131 = vmatmul.mubr.msk.bf16.gmra.mrb[56].mxu0 %vm277_vm1, %v9144_v52  ;;  %v10193_v52 = vpop.f32.mrb[81].mxu1 }
 0x259   :  { %2662 = vmatprep.mubr.bf16.mxu0 %v9334_v0  ;;  %14145 = vst [vmem:[#allocation46_spill] sm:$0xff] %v10193_v52  ;;  %v10195_v60 = vpop.f32.mrb[82].mxu1 }
 0x25a   :  { %14146 = vst [vmem:[#allocation47_spill] sm:$0xff] %v10195_v60  ;;  %v10200_v7 = vpop.f32.mrb[83].mxu1  ;;  %v9147_v60 = vld [vmem:[%s13921_s0 + $0xa8] sm:$0xff]  }
 0x25b   :  { %14147 = vst [vmem:[#allocation48_spill] sm:$0xff] %v10200_v7  ;;  %v10204_v2 = vpop.f32.mrb[84].mxu1 }
 0x25c   :  { %14148 = vst [vmem:[#allocation49_spill] sm:$0xff] %v10204_v2 }
 0x260   :  { %8132 = vmatmul.mubr.msk.bf16.gmra.mrb[60].mxu0 %vm277_vm1, %v9145_v27  ;;  %v10206_v27 = vpop.f32.mrb[85].mxu1 }
 0x261   :  { %2672 = vmatprep.mubr.bf16.mxu0 %v9334_v0  ;;  %14149 = vst [vmem:[#allocation50_spill] sm:$0xff] %v10206_v27  ;;  %v10208_v22 = vpop.f32.mrb[86].mxu1 }
 0x262   :  { %14150 = vst [vmem:[#allocation51_spill] sm:$0xff] %v10208_v22  ;;  %v10213_v52 = vpop.f32.mrb[87].mxu1  ;;  %v9148_v22 = vld [vmem:[%s13921_s0 + $0xb0] sm:$0xff]  }
 0x263   :  { %14151 = vst [vmem:[#allocation52_spill] sm:$0xff] %v10213_v52  ;;  %v10217_v7 = vpop.f32.mrb[88].mxu1 }
 0x264   :  { %14152 = vst [vmem:[#allocation53_spill] sm:$0xff] %v10217_v7 }
 0x268   :  { %8133 = vmatmul.mubr.msk.bf16.gmra.mrb[64].mxu0 %vm277_vm1, %v9146_v12  ;;  %v10219_v12 = vpop.f32.mrb[89].mxu1 }
 0x269   :  { %2682 = vmatprep.mubr.bf16.mxu0 %v9334_v0  ;;  %14153 = vst [vmem:[#allocation54_spill] sm:$0xff] %v10219_v12  ;;  %v10221_v17 = vpop.f32.mrb[90].mxu1 }
 0x26a   :  { %14154 = vst [vmem:[#allocation55_spill] sm:$0xff] %v10221_v17  ;;  %v10226_v27 = vpop.f32.mrb[91].mxu1  ;;  %v9149_v17 = vld [vmem:[%s13921_s0 + $0xb8] sm:$0xff]  }
 0x26b   :  { %14155 = vst [vmem:[#allocation56_spill] sm:$0xff] %v10226_v27  ;;  %v10230_v52 = vpop.f32.mrb[92].mxu1 }
 0x26c   :  { %14156 = vst [vmem:[#allocation57_spill] sm:$0xff] %v10230_v52  ;;  %v2849_v52 = vld [vmem:[%s13923_s2] sm:$0x3]  ;;  %s9336_s2 = smov 116  }
 0x270   :  { %8134 = vmatmul.mubr.msk.bf16.gmra.mrb[68].mxu0 %vm277_vm1, %v9147_v60  ;;  %v10232_v60 = vpop.f32.mrb[93].mxu1 }
 0x271   :  { %2692 = vmatprep.mubr.bf16.mxu0 %v9334_v0  ;;  %14157 = vst [vmem:[#allocation58_spill] sm:$0xff] %v10232_v60  ;;  %v10234_v2 = vpop.f32.mrb[94].mxu1 }
 0x272   :  { %14158 = vst [vmem:[#allocation59_spill] sm:$0xff] %v10234_v2  ;;  %v10239_v12 = vpop.f32.mrb[95].mxu1  ;;  %v9151_v2 = vld [vmem:[%s13921_s0 + $0xc8] sm:$0xff]  }
 0x273   :  { %14159 = vst [vmem:[#allocation60_spill] sm:$0xff] %v10239_v12  ;;  %v2851_v12 = vlaneseq }
 0x275   :  { %v10262_v60 = vshrl.u32 %v2851_v12, 7 }
 0x277   :  { %14160 = vst [vmem:[#allocation61_spill] sm:$0xff] %v10262_v60  ;;  %v13934_v27 = vsub.s32 1, %v10262_v60 }
 0x278   :  { %8135 = vmatmul.mubr.msk.bf16.gmra.mrb[72].mxu0 %vm277_vm1, %v9148_v22  ;;  %v9150_v22 = vld [vmem:[%s13921_s0 + $0xc0] sm:$0xff]  }
 0x279   :  { %2702 = vmatprep.mubr.bf16.mxu0 %v9334_v0  ;;  %v10276_v12 = vrot.slane %v2849_v52, %v13934_v27 }
 0x27b   :  { %14162 = vst [vmem:[#allocation63_spill] sm:$0xff] %v10276_v12 }
 0x280   :  { %8136 = vmatmul.mubr.msk.bf16.gmra.mrb[76].mxu0 %vm277_vm1, %v9149_v17  ;;  %v9152_v17 = vld [vmem:[%s13921_s0 + $0xd0] sm:$0xff]  }
 0x281   :  { %2712 = vmatprep.mubr.bf16.mxu0 %v9334_v0 }
 0x288   :  { %8137 = vmatmul.mubr.msk.bf16.gmra.mrb[80].mxu0 %vm277_vm1, %v9150_v22  ;;  %v9153_v22 = vld [vmem:[%s13921_s0 + $0xd8] sm:$0xff]   ;;  %s9335_s0 = smov 122  }
 0x289   :  { %2722 = vmatprep.mubr.bf16.mxu0 %v9334_v0 }
 0x290   :  { %8138 = vmatmul.mubr.msk.bf16.gmra.mrb[84].mxu0 %vm277_vm1, %v9151_v2  ;;  %v13933_v2 = vsub.s32 0, %v10262_v60 }
 0x291   :  { %2732 = vmatprep.mubr.bf16.mxu0 %v9334_v0 }
 0x298   :  { %8139 = vmatmul.mubr.msk.bf16.gmra.mrb[88].mxu0 %vm277_vm1, %v9152_v17 }
 0x299   :  { %2742 = vmatprep.mubr.bf16.mxu0 %v9334_v0  ;;  %v10271_v0 = vrot.slane %v2849_v52, %v13933_v2 }
 0x29b   :  { %14161 = vst [vmem:[#allocation62_spill] sm:$0xff] %v10271_v0 }
 0x2a0   :  { %8140 = vmatmul.mubr.msk.bf16.gmra.mrb[92].mxu0 %vm277_vm1, %v9153_v22  ;;  %vm7075_vm1 = vcmask 130048  }
 0x2bb   :  { %v2514_v17 = vpop.f32.mrb[0].mxu0 }
 0x2bc   :  { %v8551_v7 = vadd.f32 %v2514_v17, %v9908_v28  ;;  %v2516_v56 = vpop.f32.mrb[1].mxu0 }
 0x2bd   :  { %v8552_v22 = vadd.f32 %v2516_v56, %v9911_v29  ;;  %v2518_v55 = vpop.f32.mrb[2].mxu0 }
 0x2be   :  { %v2861_v54 = vadd.f32 %v8551_v7, %v10271_v0  ;;  %v8553_v53 = vadd.f32 %v2518_v55, %v9913_v30  ;;  %v2520_v47 = vpop.f32.mrb[3].mxu0 }
 0x2bf   :  { %v8554_v42 = vadd.f32 %v2520_v47, %v9915_v31  ;;  %v10285_v37 = vadd.f32 %v8552_v22, %v10276_v12 }
 0x2c0   :  { %v10282_v2 = vmax.f32 %v2861_v54, 0.0  ;;  %v2863_v28 = vadd.f32 %v8553_v53, %v10271_v0 }
 0x2c1   :  { %14164 = vst [vmem:[#allocation65_spill] sm:$0xff] %v10285_v37  ;;  %v10291_v52 = vadd.f32 %v8554_v42, %v10276_v12  ;;  %v13938_v30 = vmax.f32 %v10285_v37, 0.0 }
 0x2c2   :  { %14163 = vst [vmem:[#allocation64_spill] sm:$0xff] %v10282_v2  ;;  %v10288_v17 = vmax.f32 %v2863_v28, 0.0  ;;  %3101 = vrot.lane.b32.xlu0 %v10282_v2, %s9335_s0 }
 0x2c3   :  { %14166 = vst [vmem:[#allocation67_spill] sm:$0xff] %v10291_v52  ;;  %v2524_v29 = vpop.f32.mrb[4].mxu0  ;;  %v13936_v55 = vmax.f32 %v10291_v52, 0.0 }
 0x2c4   :  { %14165 = vst [vmem:[#allocation66_spill] sm:$0xff] %v10288_v17  ;;  %v8555_v31 = vadd.f32 %v2524_v29, %v9923_v33  ;;  %3103 = vrot.lane.b32.xlu1 %v10288_v17, %s9335_s0  ;;  %v2526_v47 = vpop.f32.mrb[5].mxu0 }
 0x2c5   :  { %v8556_v53 = vadd.f32 %v2526_v47, %v9926_v34  ;;  %v2528_v54 = vpop.f32.mrb[6].mxu0 }
 0x2c6   :  { %v2865_v42 = vadd.f32 %v8555_v31, %v10271_v0  ;;  %v8557_v56 = vadd.f32 %v2528_v54, %v9928_v35  ;;  %5175 = vrot.lane.b32.xlu0 %v13938_v30, %s9335_s0  ;;  %v2530_v7 = vpop.f32.mrb[7].mxu0 }
 0x2c7   :  { %v8558_v33 = vadd.f32 %v2530_v7, %v9930_v36  ;;  %v10310_v28 = vadd.f32 %v8556_v53, %v10276_v12 }
 0x2c8   :  { %v10307_v22 = vmax.f32 %v2865_v42, 0.0  ;;  %v2867_v34 = vadd.f32 %v8557_v56, %v10271_v0  ;;  %5177 = vrot.lane.b32.xlu1 %v13936_v55, %s9335_s0 }
 0x2c9   :  { %14168 = vst [vmem:[#allocation69_spill] sm:$0xff] %v10310_v28  ;;  %v10319_v35 = vadd.f32 %v8558_v33, %v10276_v12  ;;  %v13937_v31 = vmax.f32 %v10310_v28, 0.0 }
 0x2ca   :  { %14167 = vst [vmem:[#allocation68_spill] sm:$0xff] %v10307_v22  ;;  %v10316_v29 = vmax.f32 %v2867_v34, 0.0  ;;  %3105 = vrot.lane.b32.xlu0 %v10307_v22, %s9335_s0 }
 0x2cb   :  { %14170 = vst [vmem:[#allocation71_spill] sm:$0xff] %v10319_v35  ;;  %v2534_v36 = vpop.f32.mrb[8].mxu0  ;;  %v13935_v56 = vmax.f32 %v10319_v35, 0.0 }
 0x2cc   :  { %14169 = vst [vmem:[#allocation70_spill] sm:$0xff] %v10316_v29  ;;  %v8559_v47 = vadd.f32 %v2534_v36, %v9936_v38  ;;  %3107 = vrot.lane.b32.xlu1 %v10316_v29, %s9335_s0  ;;  %v2536_v53 = vpop.f32.mrb[9].mxu0 }
 0x2cd   :  { %v8560_v54 = vadd.f32 %v2536_v53, %v9939_v39  ;;  %v2538_v42 = vpop.f32.mrb[10].mxu0 }
 0x2ce   :  { %v2869_v7 = vadd.f32 %v8559_v47, %v10271_v0  ;;  %v8561_v33 = vadd.f32 %v2538_v42, %v9941_v40  ;;  %5179 = vrot.lane.b32.xlu0 %v13937_v31, %s9335_s0  ;;  %v2540_v34 = vpop.f32.mrb[11].mxu0 }
 0x2cf   :  { %v8562_v38 = vadd.f32 %v2540_v34, %v9943_v41  ;;  %v10338_v27 = vadd.f32 %v8560_v54, %v10276_v12 }
 0x2d0   :  { %v10335_v36 = vmax.f32 %v2869_v7, 0.0  ;;  %5181 = vrot.lane.b32.xlu1 %v13935_v56, %s9335_s0  ;;  %v2871_v53 = vadd.f32 %v8561_v33, %v10271_v0 }
 0x2d1   :  { %v10344_v39 = vadd.f32 %v8562_v38, %v10276_v12  ;;  %v13956_v41 = vmax.f32 %v10338_v27, 0.0 }
 0x2d2   :  { %3109 = vrot.lane.b32.xlu0 %v10335_v36, %s9335_s0 }
 0x2d3   :  { %v13954_v40 = vmax.f32 %v10344_v39, 0.0  ;;  %v2544_v47 = vpop.f32.mrb[12].mxu0 }
 0x2d4   :  { %v8563_v54 = vadd.f32 %v2544_v47, %v9949_v43  ;;  %v2546_v42 = vpop.f32.mrb[13].mxu0  ;;  %v10362_v43 = vmax.f32 %v2871_v53, 0.0 }
 0x2d5   :  { %v8564_v7 = vadd.f32 %v2546_v42, %v9952_v44  ;;  %5185 = vrot.lane.b32.xlu1 %v13954_v40, %s9335_s0  ;;  %v2548_v34 = vpop.f32.mrb[14].mxu0 }
 0x2d6   :  { %v2873_v38 = vadd.f32 %v8563_v54, %v10271_v0  ;;  %v8565_v56 = vadd.f32 %v2548_v34, %v9954_v45  ;;  %5183 = vrot.lane.b32.xlu0 %v13956_v41, %s9335_s0  ;;  %v2550_v55 = vpop.f32.mrb[15].mxu0 }
 0x2d7   :  { %v8566_v33 = vadd.f32 %v2550_v55, %v9956_v46  ;;  %v10367_v44 = vadd.f32 %v8564_v7, %v10276_v12 }
 0x2d8   :  { %v10364_v47 = vmax.f32 %v2873_v38, 0.0  ;;  %v2875_v42 = vadd.f32 %v8565_v56, %v10271_v0 }
 0x2d9   :  { %v13953_v54 = vmax.f32 %v10367_v44, 0.0  ;;  %v10378_v46 = vadd.f32 %v8566_v33, %v10276_v12 }
 0x2da   :  { %14171 = vst [vmem:[#allocation72_spill] sm:$0xff] %v10364_v47  ;;  %3111 = vrot.lane.b32.xlu0 %v10362_v43, %s9335_s0  ;;  %3113 = vrot.lane.b32.xlu1 %v10364_v47, %s9335_s0  ;;  %v10375_v34 = vmax.f32 %v2875_v42, 0.0 }
 0x2db   :  { %v2554_v45 = vpop.f32.mrb[16].mxu0  ;;  %14173 = vst [vmem:[#allocation74_spill] sm:$0xff] %v10378_v46 }
 0x2dc   :  { %14172 = vst [vmem:[#allocation73_spill] sm:$0xff] %v10375_v34  ;;  %v8567_v55 = vadd.f32 %v2554_v45, %v9962_v48  ;;  %v2556_v53 = vpop.f32.mrb[17].mxu0  ;;  %v13939_v48 = vmax.f32 %v10378_v46, 0.0 }
 0x2dd   :  { %v8568_v7 = vadd.f32 %v2556_v53, %v9965_v49  ;;  %v2558_v56 = vpop.f32.mrb[18].mxu0 }
 0x2de   :  { %v2877_v38 = vadd.f32 %v8567_v55, %v10271_v0  ;;  %v8569_v31 = vadd.f32 %v2558_v56, %v9967_v50  ;;  %5187 = vrot.lane.b32.xlu0 %v13953_v54, %s9335_s0  ;;  %3115 = vrot.lane.b32.xlu1 %v10375_v34, %s9335_s0  ;;  %v2560_v42 = vpop.f32.mrb[19].mxu0 }
 0x2df   :  { %v8570_v33 = vadd.f32 %v2560_v42, %v9969_v51  ;;  %v10394_v49 = vadd.f32 %v8568_v7, %v10276_v12 }
 0x2e0   :  { %v10391_v45 = vmax.f32 %v2877_v38, 0.0  ;;  %v2879_v55 = vadd.f32 %v8569_v31, %v10271_v0 }
 0x2e1   :  { %14175 = vst [vmem:[#allocation76_spill] sm:$0xff] %v10394_v49  ;;  %v13940_v53 = vmax.f32 %v10394_v49, 0.0  ;;  %v10406_v56 = vadd.f32 %v8570_v33, %v10276_v12 }
 0x2e2   :  { %14174 = vst [vmem:[#allocation75_spill] sm:$0xff] %v10391_v45  ;;  %5189 = vrot.lane.b32.xlu1 %v13939_v48, %s9335_s0  ;;  %3117 = vrot.lane.b32.xlu0 %v10391_v45, %s9335_s0  ;;  %v10403_v51 = vmax.f32 %v2879_v55, 0.0 }
 0x2e3   :  { %v2564_v50 = vpop.f32.mrb[20].mxu0  ;;  %14177 = vst [vmem:[#allocation78_spill] sm:$0xff] %v10406_v56 }
 0x2e4   :  { %14176 = vst [vmem:[#allocation77_spill] sm:$0xff] %v10403_v51  ;;  %v8571_v7 = vadd.f32 %v2564_v50, %v9996_v57  ;;  %v2566_v38 = vpop.f32.mrb[21].mxu0  ;;  %v13941_v57 = vmax.f32 %v10406_v56, 0.0 }
 0x2e5   :  { %v8572_v31 = vadd.f32 %v2566_v38, %v9998_v58  ;;  %v2568_v42 = vpop.f32.mrb[22].mxu0 }
 0x2e6   :  { %v2881_v30 = vadd.f32 %v8571_v7, %v10271_v0  ;;  %v8573_v48 = vadd.f32 %v2568_v42, %v10000_v59  ;;  %5191 = vrot.lane.b32.xlu0 %v13940_v53, %s9335_s0  ;;  %3119 = vrot.lane.b32.xlu1 %v10403_v51, %s9335_s0  ;;  %v2570_v55 = vpop.f32.mrb[23].mxu0 }
 0x2e7   :  { %v8574_v33 = vadd.f32 %v2570_v55, %v10005_v61  ;;  %v10422_v58 = vadd.f32 %v8572_v31, %v10276_v12 }
 0x2e8   :  { %v10419_v50 = vmax.f32 %v2881_v30, 0.0  ;;  %v2883_v7 = vadd.f32 %v8573_v48, %v10271_v0 }
 0x2e9   :  { %14179 = vst [vmem:[#allocation80_spill] sm:$0xff] %v10422_v58  ;;  %v13942_v38 = vmax.f32 %v10422_v58, 0.0  ;;  %v10434_v30 = vadd.f32 %v8574_v33, %v10276_v12 }
 0x2ea   :  { %14178 = vst [vmem:[#allocation79_spill] sm:$0xff] %v10419_v50  ;;  %5193 = vrot.lane.b32.xlu1 %v13941_v57, %s9335_s0  ;;  %3121 = vrot.lane.b32.xlu0 %v10419_v50, %s9335_s0  ;;  %v10431_v61 = vmax.f32 %v2883_v7, 0.0 }
 0x2eb   :  { %v2574_v59 = vpop.f32.mrb[24].mxu0  ;;  %14181 = vst [vmem:[#allocation82_spill] sm:$0xff] %v10434_v30 }
 0x2ec   :  { %14180 = vst [vmem:[#allocation81_spill] sm:$0xff] %v10431_v61  ;;  %v8575_v31 = vadd.f32 %v2574_v59, %v10009_v62  ;;  %v2576_v42 = vpop.f32.mrb[25].mxu0  ;;  %v13943_v62 = vmax.f32 %v10434_v30, 0.0  ;;  %v14254_v30 = vld [vmem:[#allocation38_spill] sm:$0xff] }
 0x2ed   :  { %v8576_v48 = vadd.f32 %v2576_v42, %v10011_v63  ;;  %v2578_v55 = vpop.f32.mrb[26].mxu0 }
 0x2ee   :  { %v2885_v53 = vadd.f32 %v8575_v31, %v10271_v0  ;;  %v8577_v57 = vadd.f32 %v2578_v55, %v10013_v1  ;;  %5195 = vrot.lane.b32.xlu0 %v13942_v38, %s9335_s0  ;;  %3123 = vrot.lane.b32.xlu1 %v10431_v61, %s9335_s0  ;;  %v2580_v7 = vpop.f32.mrb[27].mxu0 }
 0x2ef   :  { %v8578_v33 = vadd.f32 %v2580_v7, %v10018_v3  ;;  %v10450_v63 = vadd.f32 %v8576_v48, %v10276_v12 }
 0x2f0   :  { %v10447_v59 = vmax.f32 %v2885_v53, 0.0  ;;  %v2887_v31 = vadd.f32 %v8577_v57, %v10271_v0 }
 0x2f1   :  { %14183 = vst [vmem:[#allocation84_spill] sm:$0xff] %v10450_v63  ;;  %v13944_v42 = vmax.f32 %v10450_v63, 0.0  ;;  %v10462_v53 = vadd.f32 %v8578_v33, %v10276_v12 }
 0x2f2   :  { %14182 = vst [vmem:[#allocation83_spill] sm:$0xff] %v10447_v59  ;;  %5197 = vrot.lane.b32.xlu1 %v13943_v62, %s9335_s0  ;;  %3125 = vrot.lane.b32.xlu0 %v10447_v59, %s9335_s0  ;;  %v10459_v3 = vmax.f32 %v2887_v31, 0.0 }
 0x2f3   :  { %v2584_v1 = vpop.f32.mrb[28].mxu0  ;;  %14185 = vst [vmem:[#allocation86_spill] sm:$0xff] %v10462_v53 }
 0x2f4   :  { %14184 = vst [vmem:[#allocation85_spill] sm:$0xff] %v10459_v3  ;;  %v8579_v48 = vadd.f32 %v2584_v1, %v10022_v4  ;;  %v2586_v55 = vpop.f32.mrb[29].mxu0  ;;  %v13945_v4 = vmax.f32 %v10462_v53, 0.0 }
 0x2f5   :  { %v8580_v57 = vadd.f32 %v2586_v55, %v10024_v5  ;;  %v2588_v7 = vpop.f32.mrb[30].mxu0 }
 0x2f6   :  { %v2889_v38 = vadd.f32 %v8579_v48, %v10271_v0  ;;  %v8581_v62 = vadd.f32 %v2588_v7, %v10026_v6  ;;  %5199 = vrot.lane.b32.xlu0 %v13944_v42, %s9335_s0  ;;  %3127 = vrot.lane.b32.xlu1 %v10459_v3, %s9335_s0  ;;  %v2590_v31 = vpop.f32.mrb[31].mxu0 }
 0x2f7   :  { %v8582_v33 = vadd.f32 %v2590_v31, %v10031_v8  ;;  %v10478_v5 = vadd.f32 %v8580_v57, %v10276_v12 }
 0x2f8   :  { %v10475_v1 = vmax.f32 %v2889_v38, 0.0  ;;  %v2891_v48 = vadd.f32 %v8581_v62, %v10271_v0 }
 0x2f9   :  { %14187 = vst [vmem:[#allocation88_spill] sm:$0xff] %v10478_v5  ;;  %v13946_v55 = vmax.f32 %v10478_v5, 0.0  ;;  %v10490_v38 = vadd.f32 %v8582_v33, %v10276_v12 }
 0x2fa   :  { %14186 = vst [vmem:[#allocation87_spill] sm:$0xff] %v10475_v1  ;;  %5201 = vrot.lane.b32.xlu1 %v13945_v4, %s9335_s0  ;;  %3129 = vrot.lane.b32.xlu0 %v10475_v1, %s9335_s0  ;;  %v10487_v8 = vmax.f32 %v2891_v48, 0.0 }
 0x2fb   :  { %v2594_v6 = vpop.f32.mrb[32].mxu0  ;;  %14189 = vst [vmem:[#allocation90_spill] sm:$0xff] %v10490_v38 }
 0x2fc   :  { %14188 = vst [vmem:[#allocation89_spill] sm:$0xff] %v10487_v8  ;;  %v8583_v57 = vadd.f32 %v2594_v6, %v10035_v9  ;;  %v2596_v7 = vpop.f32.mrb[33].mxu0  ;;  %v13947_v9 = vmax.f32 %v10490_v38, 0.0 }
 0x2fd   :  { %v8584_v62 = vadd.f32 %v2596_v7, %v10037_v10  ;;  %v2598_v31 = vpop.f32.mrb[34].mxu0 }
 0x2fe   :  { %v2893_v42 = vadd.f32 %v8583_v57, %v10271_v0  ;;  %v8585_v4 = vadd.f32 %v2598_v31, %v10039_v11  ;;  %5203 = vrot.lane.b32.xlu0 %v13946_v55, %s9335_s0  ;;  %3131 = vrot.lane.b32.xlu1 %v10487_v8, %s9335_s0  ;;  %v2600_v48 = vpop.f32.mrb[35].mxu0 }
 0x2ff   :  { %v8586_v33 = vadd.f32 %v2600_v48, %v10044_v13  ;;  %v10506_v10 = vadd.f32 %v8584_v62, %v10276_v12 }
 0x300   :  { %v10503_v6 = vmax.f32 %v2893_v42, 0.0  ;;  %v2895_v57 = vadd.f32 %v8585_v4, %v10271_v0 }
 0x301   :  { %14191 = vst [vmem:[#allocation92_spill] sm:$0xff] %v10506_v10  ;;  %v13948_v7 = vmax.f32 %v10506_v10, 0.0  ;;  %v10518_v42 = vadd.f32 %v8586_v33, %v10276_v12 }
 0x302   :  { %14190 = vst [vmem:[#allocation91_spill] sm:$0xff] %v10503_v6  ;;  %5205 = vrot.lane.b32.xlu1 %v13947_v9, %s9335_s0  ;;  %3133 = vrot.lane.b32.xlu0 %v10503_v6, %s9335_s0  ;;  %v10515_v13 = vmax.f32 %v2895_v57, 0.0 }
 0x303   :  { %v2604_v11 = vpop.f32.mrb[36].mxu0  ;;  %14192 = vst [vmem:[#allocation93_spill] sm:$0xff] %v10518_v42 }
 0x304   :  { %v8587_v62 = vadd.f32 %v2604_v11, %v10048_v14  ;;  %v2606_v31 = vpop.f32.mrb[37].mxu0  ;;  %v13949_v14 = vmax.f32 %v10518_v42, 0.0 }
 0x305   :  { %v8588_v4 = vadd.f32 %v2606_v31, %v10050_v15  ;;  %v2608_v48 = vpop.f32.mrb[38].mxu0 }
 0x306   :  { %v2897_v55 = vadd.f32 %v8587_v62, %v10271_v0  ;;  %v8589_v9 = vadd.f32 %v2608_v48, %v10052_v16  ;;  %5207 = vrot.lane.b32.xlu0 %v13948_v7, %s9335_s0  ;;  %3135 = vrot.lane.b32.xlu1 %v10515_v13, %s9335_s0  ;;  %v2610_v57 = vpop.f32.mrb[39].mxu0 }
 0x307   :  { %v8590_v33 = vadd.f32 %v2610_v57, %v10057_v18  ;;  %v10534_v15 = vadd.f32 %v8588_v4, %v10276_v12 }
 0x308   :  { %v10531_v11 = vmax.f32 %v2897_v55, 0.0  ;;  %v2899_v62 = vadd.f32 %v8589_v9, %v10271_v0 }
 0x309   :  { %14193 = vst [vmem:[#allocation94_spill] sm:$0xff] %v10534_v15  ;;  %v13950_v31 = vmax.f32 %v10534_v15, 0.0  ;;  %v10546_v55 = vadd.f32 %v8590_v33, %v10276_v12  ;;  %v14249_v15 = vld [vmem:[#allocation35_spill] sm:$0xff] }
 0x30a   :  { %5209 = vrot.lane.b32.xlu1 %v13949_v14, %s9335_s0  ;;  %3137 = vrot.lane.b32.xlu0 %v10531_v11, %s9335_s0  ;;  %v10543_v18 = vmax.f32 %v2899_v62, 0.0 }
 0x30b   :  { %v2614_v16 = vpop.f32.mrb[40].mxu0  ;;  %14195 = vst [vmem:[#allocation96_spill] sm:$0xff] %v10546_v55 }
 0x30c   :  { %14194 = vst [vmem:[#allocation95_spill] sm:$0xff] %v10543_v18  ;;  %v8591_v4 = vadd.f32 %v2614_v16, %v10061_v19  ;;  %v2616_v48 = vpop.f32.mrb[41].mxu0  ;;  %v13951_v19 = vmax.f32 %v10546_v55, 0.0 }
 0x30d   :  { %v8592_v9 = vadd.f32 %v2616_v48, %v10063_v20  ;;  %v2618_v57 = vpop.f32.mrb[42].mxu0 }
 0x30e   :  { %v2901_v7 = vadd.f32 %v8591_v4, %v10271_v0  ;;  %v8593_v14 = vadd.f32 %v2618_v57, %v10065_v21  ;;  %5211 = vrot.lane.b32.xlu0 %v13950_v31, %s9335_s0  ;;  %3139 = vrot.lane.b32.xlu1 %v10543_v18, %s9335_s0  ;;  %v2620_v62 = vpop.f32.mrb[43].mxu0 }
 0x30f   :  { %v8594_v33 = vadd.f32 %v2620_v62, %v10070_v23  ;;  %v10562_v20 = vadd.f32 %v8592_v9, %v10276_v12 }
 0x310   :  { %v10559_v16 = vmax.f32 %v2901_v7, 0.0  ;;  %v2903_v4 = vadd.f32 %v8593_v14, %v10271_v0 }
 0x311   :  { %14197 = vst [vmem:[#allocation98_spill] sm:$0xff] %v10562_v20  ;;  %v13952_v48 = vmax.f32 %v10562_v20, 0.0  ;;  %v10574_v7 = vadd.f32 %v8594_v33, %v10276_v12  ;;  %v14241_v20 = vld [vmem:[#allocation31_spill] sm:$0xff] }
 0x312   :  { %14196 = vst [vmem:[#allocation97_spill] sm:$0xff] %v10559_v16  ;;  %5213 = vrot.lane.b32.xlu1 %v13951_v19, %s9335_s0  ;;  %3141 = vrot.lane.b32.xlu0 %v10559_v16, %s9335_s0  ;;  %v10571_v23 = vmax.f32 %v2903_v4, 0.0 }
 0x313   :  { %v2624_v21 = vpop.f32.mrb[44].mxu0  ;;  %14199 = vst [vmem:[#allocation100_spill] sm:$0xff] %v10574_v7 }
 0x314   :  { %14198 = vst [vmem:[#allocation99_spill] sm:$0xff] %v10571_v23  ;;  %v8595_v9 = vadd.f32 %v2624_v21, %v10074_v24  ;;  %v2626_v57 = vpop.f32.mrb[45].mxu0  ;;  %v13955_v24 = vmax.f32 %v10574_v7, 0.0 }
 0x315   :  { %v8596_v14 = vadd.f32 %v2626_v57, %v10076_v25  ;;  %v2628_v62 = vpop.f32.mrb[46].mxu0 }
 0x316   :  { %v2905_v31 = vadd.f32 %v8595_v9, %v10271_v0  ;;  %v8597_v19 = vadd.f32 %v2628_v62, %v10078_v26  ;;  %5215 = vrot.lane.b32.xlu0 %v13952_v48, %s9335_s0  ;;  %3143 = vrot.lane.b32.xlu1 %v10571_v23, %s9335_s0  ;;  %v2630_v4 = vpop.f32.mrb[47].mxu0  ;;  %v14204_v62 = vld [vmem:[#allocation13_spill] sm:$0xff]  ;;  %v14205_v48 = vld [vmem:[#allocation14_spill] sm:$0xff] }
 0x317   :  { %v8598_v33 = vadd.f32 %v2630_v4, %v10083_v32  ;;  %v10590_v25 = vadd.f32 %v8596_v14, %v10276_v12 }
 0x318   :  { %v10587_v21 = vmax.f32 %v2905_v31, 0.0  ;;  %v2907_v9 = vadd.f32 %v8597_v19, %v10271_v0 }
 0x319   :  { %14201 = vst [vmem:[#allocation102_spill] sm:$0xff] %v10590_v25  ;;  %v13959_v57 = vmax.f32 %v10590_v25, 0.0  ;;  %v10602_v31 = vadd.f32 %v8598_v33, %v10276_v12  ;;  %v14207_v33 = vld [vmem:[#allocation16_spill] sm:$0xff] }
 0x31a   :  { %14200 = vst [vmem:[#allocation101_spill] sm:$0xff] %v10587_v21  ;;  %5217 = vrot.lane.b32.xlu1 %v13955_v24, %s9335_s0  ;;  %3145 = vrot.lane.b32.xlu0 %v10587_v21, %s9335_s0  ;;  %v10599_v32 = vmax.f32 %v2907_v9, 0.0  ;;  %v14206_v24 = vld [vmem:[#allocation15_spill] sm:$0xff] }
 0x31b   :  { %v2634_v26 = vpop.f32.mrb[48].mxu0  ;;  %14203 = vst [vmem:[#allocation104_spill] sm:$0xff] %v10602_v31 }
 0x31c   :  { %14202 = vst [vmem:[#allocation103_spill] sm:$0xff] %v10599_v32  ;;  %v8599_v14 = vadd.f32 %v2634_v26, %v14204_v62  ;;  %v2636_v4 = vpop.f32.mrb[49].mxu0  ;;  %v13962_v26 = vmax.f32 %v10602_v31, 0.0 }
 0x31d   :  { %v8600_v19 = vadd.f32 %v2636_v4, %v14205_v48  ;;  %v2638_v54 = vpop.f32.mrb[50].mxu0 }
 0x31e   :  { %v2909_v40 = vadd.f32 %v8599_v14, %v10271_v0  ;;  %v8601_v41 = vadd.f32 %v2638_v54, %v14206_v24  ;;  %5219 = vrot.lane.b32.xlu0 %v13959_v57, %s9335_s0  ;;  %3147 = vrot.lane.b32.xlu1 %v10599_v32, %s9335_s0  ;;  %v2640_v9 = vpop.f32.mrb[51].mxu0  ;;  %v14213_v57 = vld [vmem:[#allocation18_spill] sm:$0xff] }
 0x31f   :  { %v8602_v60 = vadd.f32 %v2640_v9, %v14207_v33  ;;  %v10618_v48 = vadd.f32 %v8600_v19, %v10276_v12  ;;  %v14212_v9 = vld [vmem:[#allocation17_spill] sm:$0xff] }
 0x320   :  { %v10615_v62 = vmax.f32 %v2909_v40, 0.0  ;;  %v2911_v14 = vadd.f32 %v8601_v41, %v10271_v0 }
 0x321   :  { %14209 = vst [vmem:[#allocation14_spill] sm:$0xff] %v10618_v48  ;;  %v13965_v24 = vmax.f32 %v10618_v48, 0.0  ;;  %v10630_v40 = vadd.f32 %v8602_v60, %v10276_v12  ;;  %v14215_v60 = vld [vmem:[#allocation20_spill] sm:$0xff] }
 0x322   :  { %14208 = vst [vmem:[#allocation13_spill] sm:$0xff] %v10615_v62  ;;  %5221 = vrot.lane.b32.xlu1 %v13962_v26, %s9335_s0  ;;  %3149 = vrot.lane.b32.xlu0 %v10615_v62, %s9335_s0  ;;  %v10627_v4 = vmax.f32 %v2911_v14, 0.0  ;;  %v14214_v26 = vld [vmem:[#allocation19_spill] sm:$0xff] }
 0x323   :  { %v2644_v54 = vpop.f32.mrb[52].mxu0  ;;  %14211 = vst [vmem:[#allocation16_spill] sm:$0xff] %v10630_v40 }
 0x324   :  { %14210 = vst [vmem:[#allocation15_spill] sm:$0xff] %v10627_v4  ;;  %v8603_v19 = vadd.f32 %v2644_v54, %v14212_v9  ;;  %v2646_v33 = vpop.f32.mrb[53].mxu0  ;;  %v13968_v54 = vmax.f32 %v10630_v40, 0.0 }
 0x325   :  { %v8604_v41 = vadd.f32 %v2646_v33, %v14213_v57  ;;  %v2648_v35 = vpop.f32.mrb[54].mxu0 }
 0x326   :  { %v2913_v52 = vadd.f32 %v8603_v19, %v10271_v0  ;;  %v8605_v28 = vadd.f32 %v2648_v35, %v14214_v26  ;;  %5223 = vrot.lane.b32.xlu0 %v13965_v24, %s9335_s0  ;;  %3151 = vrot.lane.b32.xlu1 %v10627_v4, %s9335_s0  ;;  %v2650_v14 = vpop.f32.mrb[55].mxu0  ;;  %v14221_v24 = vld [vmem:[#allocation22_spill] sm:$0xff] }
 0x327   :  { %v8606_v37 = vadd.f32 %v2650_v14, %v14215_v60  ;;  %v10646_v57 = vadd.f32 %v8604_v41, %v10276_v12  ;;  %v14220_v14 = vld [vmem:[#allocation21_spill] sm:$0xff] }
 0x328   :  { %v10643_v9 = vmax.f32 %v2913_v52, 0.0  ;;  %v2915_v19 = vadd.f32 %v8605_v28, %v10271_v0 }
 0x329   :  { %14217 = vst [vmem:[#allocation18_spill] sm:$0xff] %v10646_v57  ;;  %v13972_v26 = vmax.f32 %v10646_v57, 0.0  ;;  %v10658_v52 = vadd.f32 %v8606_v37, %v10276_v12  ;;  %v14223_v37 = vld [vmem:[#allocation24_spill] sm:$0xff] }
 0x32a   :  { %14216 = vst [vmem:[#allocation17_spill] sm:$0xff] %v10643_v9  ;;  %5225 = vrot.lane.b32.xlu1 %v13968_v54, %s9335_s0  ;;  %3153 = vrot.lane.b32.xlu0 %v10643_v9, %s9335_s0  ;;  %v10655_v33 = vmax.f32 %v2915_v19, 0.0  ;;  %v14222_v54 = vld [vmem:[#allocation23_spill] sm:$0xff] }
 0x32b   :  { %v2654_v35 = vpop.f32.mrb[56].mxu0  ;;  %14219 = vst [vmem:[#allocation20_spill] sm:$0xff] %v10658_v52 }
 0x32c   :  { %14218 = vst [vmem:[#allocation19_spill] sm:$0xff] %v10655_v33  ;;  %v8607_v41 = vadd.f32 %v2654_v35, %v14220_v14  ;;  %v2656_v60 = vpop.f32.mrb[57].mxu0  ;;  %v13971_v35 = vmax.f32 %v10658_v52, 0.0 }
 0x32d   :  { %v8608_v28 = vadd.f32 %v2656_v60, %v14221_v24  ;;  %v2658_v48 = vpop.f32.mrb[58].mxu0 }
 0x32e   :  { %v2917_v40 = vadd.f32 %v8607_v41, %v10271_v0  ;;  %v8609_v31 = vadd.f32 %v2658_v48, %v14222_v54  ;;  %5227 = vrot.lane.b32.xlu0 %v13972_v26, %s9335_s0  ;;  %3155 = vrot.lane.b32.xlu1 %v10655_v33, %s9335_s0  ;;  %v2660_v19 = vpop.f32.mrb[59].mxu0  ;;  %v14229_v26 = vld [vmem:[#allocation26_spill] sm:$0xff]  ;;  %v14230_v54 = vld [vmem:[#allocation27_spill] sm:$0xff] }
 0x32f   :  { %v8610_v25 = vadd.f32 %v2660_v19, %v14223_v37  ;;  %v10674_v24 = vadd.f32 %v8608_v28, %v10276_v12  ;;  %v14226_v28 = vld [vmem:[#allocation25_spill] sm:$0xff] }
 0x330   :  { %v10671_v14 = vmax.f32 %v2917_v40, 0.0  ;;  %v2919_v41 = vadd.f32 %v8609_v31, %v10271_v0 }
 0x331   :  { %14224 = vst [vmem:[#allocation21_spill] sm:$0xff] %v10674_v24  ;;  %v10686_v40 = vadd.f32 %v8610_v25, %v10276_v12  ;;  %v14232_v25 = vmax.f32 %v10674_v24, 0.0 }
 0x332   :  { %5229 = vrot.lane.b32.xlu1 %v13971_v35, %s9335_s0  ;;  %3157 = vrot.lane.b32.xlu0 %v10671_v14, %s9335_s0  ;;  %v10683_v60 = vmax.f32 %v2919_v41, 0.0 }
 0x333   :  { %v2664_v48 = vpop.f32.mrb[60].mxu0  ;;  %14225 = vst [vmem:[#allocation22_spill] sm:$0xff] %v10686_v40 }
 0x334   :  { %v10689_v19 = vadd.f32 %v2664_v48, %v14226_v28  ;;  %v10691_v31 = vpop.permute.xlu0 %3101  ;;  %v2666_v37 = vpop.f32.mrb[61].mxu0 }
 0x335   :  { %14227 = vst [vmem:[#allocation23_spill] sm:$0xff] %v10691_v31  ;;  %v10695_v35 = vmax.f32 %v10282_v2, %v10691_v31  ;;  %v10698_v52 = vadd.f32 %v2666_v37, %v14229_v26  ;;  %v2668_v57 = vpop.f32.mrb[62].mxu0  ;;  %v14234_v26 = vld [vmem:[#allocation28_spill] sm:$0xff] }
 0x336   :  { %v10701_v41 = vadd.f32 %v2668_v57, %v14230_v54  ;;  %v10703_v7 = vpop.permute.xlu1 %3103  ;;  %5231 = vrot.lane.b32.xlu0 %v14232_v25, %s9335_s0  ;;  %3159 = vrot.lane.b32.xlu1 %v10683_v60, %s9335_s0  ;;  %v2670_v48 = vpop.f32.mrb[63].mxu0  ;;  %v13986_v57 = vmax.f32 %v10686_v40, 0.0 }
 0x337   :  { %14228 = vst [vmem:[#allocation24_spill] sm:$0xff] %v10695_v35  ;;  %14231 = vst [vmem:[#allocation25_spill] sm:$0xff] %v10703_v7  ;;  %v10712_v28 = vmax.f32 %v10288_v17, %v10703_v7  ;;  %v10715_v37 = vadd.f32 %v2670_v48, %v14234_v26  ;;  %v14237_v26 = vld [vmem:[#allocation29_spill] sm:$0xff] }
 0x338   :  { %3294 = vst.msk [vmem:[#allocation2] sm:$0xff] %vm3293_vm2, %v10695_v35  ;;  %v10720_v54 = vpop.permute.xlu0 %5175 }
 0x339   :  { %14233 = vst [vmem:[#allocation26_spill] sm:$0xff] %v10712_v28  ;;  %14235 = vst [vmem:[#allocation27_spill] sm:$0xff] %v10720_v54  ;;  %v14240_v54 = vld [vmem:[#allocation30_spill] sm:$0xff] }
 0x33a   :  { %3295 = vst.msk [vmem:[#allocation2 + $0x8] sm:$0xff] %vm3293_vm2, %v10712_v28  ;;  %v10724_v25 = vpop.permute.xlu1 %5177  ;;  %3390 = vrot.lane.b32.xlu0 %v10695_v35, %s9335_s0  ;;  %5233 = vrot.lane.b32.xlu1 %v13986_v57, %s9335_s0 }
 0x33b   :  { %14236 = vst [vmem:[#allocation28_spill] sm:$0xff] %v10724_v25  ;;  %v2674_v48 = vpop.f32.mrb[64].mxu0 }
 0x33c   :  { %v10732_v17 = vadd.f32 %v2674_v48, %v14237_v26  ;;  %v10734_v7 = vpop.permute.xlu0 %3105  ;;  %v2676_v2 = vpop.f32.mrb[65].mxu0 }
 0x33d   :  { %14238 = vst [vmem:[#allocation29_spill] sm:$0xff] %v10734_v7  ;;  %v10738_v31 = vmax.f32 %v10307_v22, %v10734_v7  ;;  %v10741_v25 = vadd.f32 %v2676_v2, %v14240_v54  ;;  %v2678_v24 = vpop.f32.mrb[66].mxu0  ;;  %v14244_v2 = vld [vmem:[#allocation32_spill] sm:$0xff]  ;;  %v14248_v7 = vld [vmem:[#allocation34_spill] sm:$0xff] }
 0x33e   :  { %v10744_v55 = vadd.f32 %v2678_v24, %v14241_v20  ;;  %v10746_v40 = vpop.permute.xlu1 %3107  ;;  %3583 = vrot.lane.b32.xlu0 %v10695_v35, %s9336_s2  ;;  %3392 = vrot.lane.b32.xlu1 %v10712_v28, %s9335_s0  ;;  %v2680_v48 = vpop.f32.mrb[67].mxu0 }
 0x33f   :  { %14239 = vst [vmem:[#allocation105_spill] sm:$0xff] %v10738_v31  ;;  %14242 = vst [vmem:[#allocation30_spill] sm:$0xff] %v10746_v40  ;;  %v10754_v26 = vmax.f32 %v10316_v29, %v10746_v40  ;;  %v10757_v54 = vadd.f32 %v2680_v48, %v14244_v2  ;;  %v14247_v48 = vld [vmem:[#allocation33_spill] sm:$0xff] }
 0x340   :  { %3296 = vst.msk [vmem:[#allocation2 + $0x10] sm:$0xff] %vm3293_vm2, %v10738_v31  ;;  %v10761_v20 = vpop.permute.xlu0 %5179 }
 0x341   :  { %14243 = vst [vmem:[#allocation31_spill] sm:$0xff] %v10754_v26  ;;  %14245 = vst [vmem:[#allocation32_spill] sm:$0xff] %v10761_v20 }
 0x342   :  { %3297 = vst.msk [vmem:[#allocation2 + $0x18] sm:$0xff] %vm3293_vm2, %v10754_v26  ;;  %v10765_v24 = vpop.permute.xlu1 %5181  ;;  %3776 = vrot.lane.b32.xlu0 %v10695_v35, %s9337_s23  ;;  %3585 = vrot.lane.b32.xlu1 %v10712_v28, %s9336_s2 }
 0x343   :  { %14246 = vst [vmem:[#allocation106_spill] sm:$0xff] %v10765_v24  ;;  %v2684_v57 = vpop.f32.mrb[68].mxu0 }
 0x344   :  { %v10772_v2 = vadd.f32 %v2684_v57, %v14247_v48  ;;  %v10774_v29 = vpop.permute.xlu0 %3109  ;;  %v2686_v40 = vpop.f32.mrb[69].mxu0  ;;  %v14250_v48 = vld [vmem:[#allocation36_spill] sm:$0xff] }
 0x345   :  { %v10778_v22 = vmax.f32 %v10335_v36, %v10774_v29  ;;  %v10781_v24 = vadd.f32 %v2686_v40, %v14248_v7  ;;  %v2688_v20 = vpop.f32.mrb[70].mxu0  ;;  %v14251_v40 = vld [vmem:[#allocation37_spill] sm:$0xff] }
 0x346   :  { %v10784_v42 = vadd.f32 %v2688_v20, %v14249_v15  ;;  %3969 = vrot.lane.b32.xlu0 %v10695_v35, %s9338_s24  ;;  %3778 = vrot.lane.b32.xlu1 %v10712_v28, %s9337_s23  ;;  %v2690_v57 = vpop.f32.mrb[71].mxu0 }
 0x347   :  { %v10791_v10 = vadd.f32 %v2690_v57, %v14250_v48  ;;  %v10793_v38 = vpop.permute.xlu1 %5185  ;;  %3298 = vst.msk [vmem:[#allocation2 + $0x20] sm:$0xff] %vm3293_vm2, %v10778_v22 }
 0x348   :  { %v10797_v7 = vpop.permute.xlu0 %5183 }
 0x34a   :  { %4162 = vrot.lane.b32.xlu0 %v10695_v35, %s9339_s25  ;;  %3971 = vrot.lane.b32.xlu1 %v10712_v28, %s9338_s24 }
 0x34b   :  { %v2694_v15 = vpop.f32.mrb[72].mxu0 }
 0x34c   :  { %v10804_v20 = vadd.f32 %v2694_v15, %v14251_v40  ;;  %v10806_v57 = vpop.permute.xlu0 %3111  ;;  %v10808_v48 = vpop.permute.xlu1 %3113  ;;  %v14256_v15 = vld [vmem:[#allocation39_spill] sm:$0xff] }
 0x34d   :  { %14253 = vst [vmem:[#allocation34_spill] sm:$0xff] %v10808_v48  ;;  %v10812_v5 = vmax.f32 %v10362_v43, %v10806_v57  ;;  %v10816_v53 = vmax.f32 %v10364_v47, %v10808_v48  ;;  %v2696_v63 = vpop.f32.mrb[73].mxu0 }
 0x34e   :  { %14252 = vst [vmem:[#allocation33_spill] sm:$0xff] %v10804_v20  ;;  %v10819_v58 = vadd.f32 %v2696_v63, %v14254_v30  ;;  %v2698_v56 = vpop.f32.mrb[74].mxu0  ;;  %4355 = vrot.lane.b32.xlu0 %v10695_v35, %s9340_s26  ;;  %4164 = vrot.lane.b32.xlu1 %v10712_v28, %s9339_s25  ;;  %v2921_v30 = vadd.f32 %v10689_v19, %v10271_v0  ;;  %v14258_v63 = vld [vmem:[#allocation40_spill] sm:$0xff]  ;;  %v14266_v20 = vld [vmem:[#allocation42_spill] sm:$0xff] }
 0x34f   :  { %v10826_v40 = vadd.f32 %v2698_v56, %v14256_v15  ;;  %v2700_v49 = vpop.f32.mrb[75].mxu0  ;;  %3299 = vst.msk [vmem:[#allocation2 + $0x28] sm:$0xff] %vm3293_vm2, %v10812_v5  ;;  %3300 = vst.msk [vmem:[#allocation2 + $0x30] sm:$0xff] %vm3293_vm2, %v10816_v53  ;;  %v10855_v19 = vadd.f32 %v10698_v52, %v10276_v12 }
 0x350   :  { %14255 = vst [vmem:[#allocation35_spill] sm:$0xff] %v10819_v58  ;;  %v10835_v58 = vadd.f32 %v2700_v49, %v14258_v63  ;;  %v10837_v46 = vpop.permute.xlu0 %5187  ;;  %v10839_v47 = vpop.permute.xlu1 %3115  ;;  %v10851_v49 = vmax.f32 %v2921_v30, 0.0  ;;  %v2923_v63 = vadd.f32 %v10701_v41, %v10271_v0 }
 0x351   :  { %14257 = vst [vmem:[#allocation36_spill] sm:$0xff] %v10826_v40  ;;  %14260 = vst [vmem:[#allocation38_spill] sm:$0xff] %v10839_v47  ;;  %v10843_v56 = vmax.f32 %v10375_v34, %v10839_v47 }
 0x352   :  { %14259 = vst [vmem:[#allocation37_spill] sm:$0xff] %v10835_v58  ;;  %4548 = vrot.lane.b32.xlu0 %v10695_v35, %s9341_s29  ;;  %4357 = vrot.lane.b32.xlu1 %v10712_v28, %s9340_s26  ;;  %14261 = vst [vmem:[#allocation39_spill] sm:$0xff] %v10851_v49  ;;  %v14263_v58 = vld [vmem:[#allocation41_spill] sm:$0xff] }
 0x353   :  { %v2704_v15 = vpop.f32.mrb[76].mxu0  ;;  %3301 = vst.msk [vmem:[#allocation2 + $0x38] sm:$0xff] %vm3293_vm2, %v10843_v56  ;;  %14262 = vst [vmem:[#allocation40_spill] sm:$0xff] %v10855_v19 }
 0x354   :  { %v10860_v34 = vadd.f32 %v2704_v15, %v14263_v58  ;;  %v10862_v35 = vpop.permute.xlu1 %5189  ;;  %v10864_v40 = vpop.permute.xlu0 %3117  ;;  %v14268_v58 = vld [vmem:[#allocation43_spill] sm:$0xff] }
 0x355   :  { %14265 = vst [vmem:[#allocation107_spill] sm:$0xff] %v10864_v40  ;;  %v10868_v47 = vmax.f32 %v10391_v45, %v10864_v40  ;;  %v2706_v30 = vpop.f32.mrb[77].mxu0  ;;  %v14016_v45 = vmax.f32 %v10855_v19, 0.0 }
 0x356   :  { %14264 = vst [vmem:[#allocation41_spill] sm:$0xff] %v10860_v34  ;;  %v10871_v48 = vadd.f32 %v2706_v30, %v14266_v20  ;;  %v2708_v52 = vpop.f32.mrb[78].mxu0  ;;  %4550 = vrot.lane.b32.xlu1 %v10712_v28, %s9341_s29  ;;  %3161 = vrot.lane.b32.xlu0 %v10851_v49, %s9335_s0  ;;  %v10883_v34 = vmax.f32 %v2923_v63, 0.0  ;;  %v10887_v20 = vadd.f32 %v10715_v37, %v10276_v12  ;;  %v14272_v30 = vld [vmem:[#allocation44_spill] sm:$0xff] }
 0x357   :  { %v10878_v41 = vadd.f32 %v2708_v52, %v14268_v58  ;;  %v2710_v15 = vpop.f32.mrb[79].mxu0  ;;  %3302 = vst.msk [vmem:[#allocation2 + $0x40] sm:$0xff] %vm3293_vm2, %v10868_v47  ;;  %v14275_v58 = vld [vmem:[#allocation45_spill] sm:$0xff] }
 0x358   :  { %14267 = vst [vmem:[#allocation42_spill] sm:$0xff] %v10871_v48  ;;  %14270 = vst [vmem:[#allocation108_spill] sm:$0xff] %v10883_v34  ;;  %v10890_v28 = vadd.f32 %v2710_v15, %v14272_v30  ;;  %v10892_v48 = vpop.permute.xlu0 %5191  ;;  %v10894_v40 = vpop.permute.xlu1 %3119  ;;  %v14021_v63 = vmax.f32 %v10887_v20, 0.0 }
 0x359   :  { %14269 = vst [vmem:[#allocation43_spill] sm:$0xff] %v10878_v41  ;;  %14271 = vst [vmem:[#allocation109_spill] sm:$0xff] %v10887_v20  ;;  %v10898_v52 = vmax.f32 %v10403_v51, %v10894_v40  ;;  %v14278_v51 = vld [vmem:[#allocation46_spill] sm:$0xff] }
 0x35a   :  { %14273 = vst [vmem:[#allocation44_spill] sm:$0xff] %v10890_v28  ;;  %14274 = vst [vmem:[#allocation110_spill] sm:$0xff] %v10894_v40  ;;  %5235 = vrot.lane.b32.xlu0 %v14016_v45, %s9335_s0  ;;  %3163 = vrot.lane.b32.xlu1 %v10883_v34, %s9335_s0  ;;  %v14289_v20 = vld [vmem:[#allocation50_spill] sm:$0xff] }
 0x35b   :  { %v2714_v37 = vpop.f32.mrb[80].mxu0  ;;  %3303 = vst.msk [vmem:[#allocation2 + $0x48] sm:$0xff] %vm3293_vm2, %v10898_v52 }
 0x35c   :  { %v10909_v15 = vadd.f32 %v2714_v37, %v14275_v58  ;;  %v10911_v30 = vpop.permute.xlu1 %5193  ;;  %v10913_v28 = vpop.permute.xlu0 %3121  ;;  %v14280_v37 = vld [vmem:[#allocation47_spill] sm:$0xff] }
 0x35d   :  { %14277 = vst [vmem:[#allocation111_spill] sm:$0xff] %v10913_v28  ;;  %v10917_v19 = vmax.f32 %v10419_v50, %v10913_v28  ;;  %v2716_v45 = vpop.f32.mrb[81].mxu0  ;;  %v14282_v50 = vld [vmem:[#allocation48_spill] sm:$0xff] }
 0x35e   :  { %14276 = vst [vmem:[#allocation45_spill] sm:$0xff] %v10909_v15  ;;  %v10920_v41 = vadd.f32 %v2716_v45, %v14278_v51  ;;  %v2718_v40 = vpop.f32.mrb[82].mxu0  ;;  %3394 = vrot.lane.b32.xlu0 %v10738_v31, %s9335_s0  ;;  %5237 = vrot.lane.b32.xlu1 %v14021_v63, %s9335_s0 }
 0x35f   :  { %v10928_v58 = vadd.f32 %v2718_v40, %v14280_v37  ;;  %v2720_v15 = vpop.f32.mrb[83].mxu0  ;;  %3304 = vst.msk [vmem:[#allocation2 + $0x50] sm:$0xff] %vm3293_vm2, %v10917_v19 }
 0x360   :  { %14279 = vst [vmem:[#allocation46_spill] sm:$0xff] %v10920_v41  ;;  %v10933_v28 = vadd.f32 %v2720_v15, %v14282_v50  ;;  %v10935_v45 = vpop.permute.xlu0 %5195  ;;  %v10937_v51 = vpop.permute.xlu1 %3123  ;;  %v14285_v50 = vld [vmem:[#allocation49_spill] sm:$0xff] }
 0x361   :  { %14281 = vst [vmem:[#allocation47_spill] sm:$0xff] %v10928_v58  ;;  %14284 = vst [vmem:[#allocation112_spill] sm:$0xff] %v10937_v51  ;;  %v10941_v41 = vmax.f32 %v10431_v61, %v10937_v51 }
 0x362   :  { %14283 = vst [vmem:[#allocation48_spill] sm:$0xff] %v10933_v28  ;;  %3587 = vrot.lane.b32.xlu0 %v10738_v31, %s9336_s2  ;;  %3396 = vrot.lane.b32.xlu1 %v10754_v26, %s9335_s0 }
 0x363   :  { %v2724_v40 = vpop.f32.mrb[84].mxu0  ;;  %3305 = vst.msk [vmem:[#allocation2 + $0x58] sm:$0xff] %vm3293_vm2, %v10941_v41 }
 0x364   :  { %v10950_v15 = vadd.f32 %v2724_v40, %v14285_v50  ;;  %v10952_v37 = vpop.permute.xlu1 %5197  ;;  %v10954_v63 = vpop.permute.xlu0 %3125  ;;  %v14291_v40 = vld [vmem:[#allocation51_spill] sm:$0xff] }
 0x365   :  { %14287 = vst [vmem:[#allocation113_spill] sm:$0xff] %v10952_v37  ;;  %14288 = vst [vmem:[#allocation114_spill] sm:$0xff] %v10954_v63  ;;  %v10958_v28 = vmax.f32 %v10447_v59, %v10954_v63  ;;  %v2726_v58 = vpop.f32.mrb[85].mxu0  ;;  %v14293_v59 = vld [vmem:[#allocation52_spill] sm:$0xff] }
 0x366   :  { %14286 = vst [vmem:[#allocation49_spill] sm:$0xff] %v10950_v15  ;;  %v10961_v61 = vadd.f32 %v2726_v58, %v14289_v20  ;;  %v2728_v51 = vpop.f32.mrb[86].mxu0  ;;  %3780 = vrot.lane.b32.xlu0 %v10738_v31, %s9337_s23  ;;  %3589 = vrot.lane.b32.xlu1 %v10754_v26, %s9336_s2 }
 0x367   :  { %v10968_v50 = vadd.f32 %v2728_v51, %v14291_v40  ;;  %v2730_v15 = vpop.f32.mrb[87].mxu0  ;;  %3306 = vst.msk [vmem:[#allocation2 + $0x60] sm:$0xff] %vm3293_vm2, %v10958_v28 }
 0x368   :  { %14290 = vst [vmem:[#allocation50_spill] sm:$0xff] %v10961_v61  ;;  %v10973_v63 = vadd.f32 %v2730_v15, %v14293_v59  ;;  %v10975_v37 = vpop.permute.xlu0 %5199  ;;  %v10977_v20 = vpop.permute.xlu1 %3127  ;;  %v14297_v59 = vld [vmem:[#allocation53_spill] sm:$0xff] }
 0x369   :  { %14292 = vst [vmem:[#allocation51_spill] sm:$0xff] %v10968_v50  ;;  %14295 = vst [vmem:[#allocation115_spill] sm:$0xff] %v10975_v37  ;;  %v10981_v58 = vmax.f32 %v10459_v3, %v10977_v20  ;;  %v14301_v3 = vld [vmem:[#allocation54_spill] sm:$0xff] }
 0x36a   :  { %14294 = vst [vmem:[#allocation52_spill] sm:$0xff] %v10973_v63  ;;  %14296 = vst [vmem:[#allocation116_spill] sm:$0xff] %v10977_v20  ;;  %3973 = vrot.lane.b32.xlu0 %v10738_v31, %s9338_s24  ;;  %3782 = vrot.lane.b32.xlu1 %v10754_v26, %s9337_s23 }
 0x36b   :  { %v2734_v51 = vpop.f32.mrb[88].mxu0  ;;  %3307 = vst.msk [vmem:[#allocation2 + $0x68] sm:$0xff] %vm3293_vm2, %v10981_v58 }
 0x36c   :  { %v10990_v15 = vadd.f32 %v2734_v51, %v14297_v59  ;;  %v10992_v40 = vpop.permute.xlu1 %5201  ;;  %v10994_v63 = vpop.permute.xlu0 %3129  ;;  %v14303_v51 = vld [vmem:[#allocation55_spill] sm:$0xff] }
 0x36d   :  { %14299 = vst [vmem:[#allocation117_spill] sm:$0xff] %v10992_v40  ;;  %14300 = vst [vmem:[#allocation118_spill] sm:$0xff] %v10994_v63  ;;  %v10998_v61 = vmax.f32 %v10475_v1, %v10994_v63  ;;  %v2736_v50 = vpop.f32.mrb[89].mxu0  ;;  %v2925_v1 = vadd.f32 %v10732_v17, %v10271_v0  ;;  %v14305_v63 = vld [vmem:[#allocation56_spill] sm:$0xff] }
 0x36e   :  { %14298 = vst [vmem:[#allocation53_spill] sm:$0xff] %v10990_v15  ;;  %v11001_v20 = vadd.f32 %v2736_v50, %v14301_v3  ;;  %v2738_v37 = vpop.f32.mrb[90].mxu0  ;;  %4166 = vrot.lane.b32.xlu0 %v10738_v31, %s9339_s25  ;;  %3975 = vrot.lane.b32.xlu1 %v10754_v26, %s9338_s24 }
 0x36f   :  { %v11008_v59 = vadd.f32 %v2738_v37, %v14303_v51  ;;  %v2740_v15 = vpop.f32.mrb[91].mxu0  ;;  %3308 = vst.msk [vmem:[#allocation2 + $0x70] sm:$0xff] %vm3293_vm2, %v10998_v61  ;;  %v11031_v17 = vmax.f32 %v2925_v1, 0.0  ;;  %v14310_v51 = vld [vmem:[#allocation57_spill] sm:$0xff] }
 0x370   :  { %14302 = vst [vmem:[#allocation54_spill] sm:$0xff] %v11001_v20  ;;  %v11015_v3 = vadd.f32 %v2740_v15, %v14305_v63  ;;  %v11017_v50 = vpop.permute.xlu0 %5203  ;;  %v11019_v20 = vpop.permute.xlu1 %3131  ;;  %v11035_v63 = vadd.f32 %v10741_v25, %v10276_v12  ;;  %v2927_v15 = vadd.f32 %v10744_v55, %v10271_v0  ;;  %v14315_v55 = vld [vmem:[#allocation59_spill] sm:$0xff] }
 0x371   :  { %14304 = vst [vmem:[#allocation55_spill] sm:$0xff] %v11008_v59  ;;  %14307 = vst [vmem:[#allocation119_spill] sm:$0xff] %v11017_v50  ;;  %v11023_v40 = vmax.f32 %v10487_v8, %v11019_v20 }
 0x372   :  { %14306 = vst [vmem:[#allocation56_spill] sm:$0xff] %v11015_v3  ;;  %14308 = vst [vmem:[#allocation120_spill] sm:$0xff] %v11019_v20  ;;  %4359 = vrot.lane.b32.xlu0 %v10738_v31, %s9340_s26  ;;  %4168 = vrot.lane.b32.xlu1 %v10754_v26, %s9339_s25  ;;  %v14313_v20 = vld [vmem:[#allocation58_spill] sm:$0xff] }
 0x373   :  { %v2744_v37 = vpop.f32.mrb[92].mxu0  ;;  %3309 = vst.msk [vmem:[#allocation2 + $0x78] sm:$0xff] %vm3293_vm2, %v11023_v40  ;;  %14309 = vst [vmem:[#allocation121_spill] sm:$0xff] %v11035_v63 }
 0x374   :  { %v11040_v3 = vadd.f32 %v2744_v37, %v14310_v51  ;;  %v11042_v59 = vpop.permute.xlu1 %5205  ;;  %v11044_v31 = vpop.permute.xlu0 %3133 }
 0x375   :  { %14312 = vst [vmem:[#allocation122_spill] sm:$0xff] %v11044_v31  ;;  %v11048_v8 = vmax.f32 %v10503_v6, %v11044_v31  ;;  %v2746_v1 = vpop.f32.mrb[93].mxu0  ;;  %v11063_v6 = vmax.f32 %v2927_v15, 0.0 }
 0x376   :  { %14311 = vst [vmem:[#allocation57_spill] sm:$0xff] %v11040_v3  ;;  %v11051_v50 = vadd.f32 %v2746_v1, %v14313_v20  ;;  %v2748_v25 = vpop.f32.mrb[94].mxu0  ;;  %4361 = vrot.lane.b32.xlu1 %v10754_v26, %s9340_s26  ;;  %3165 = vrot.lane.b32.xlu0 %v11031_v17, %s9335_s0  ;;  %v14043_v3 = vmax.f32 %v11035_v63, 0.0  ;;  %v11067_v20 = vadd.f32 %v10757_v54, %v10276_v12  ;;  %v14319_v1 = vld [vmem:[#allocation60_spill] sm:$0xff] }
 0x377   :  { %v11058_v37 = vadd.f32 %v2748_v25, %v14315_v55  ;;  %v2750_v51 = vpop.f32.mrb[95].mxu0  ;;  %3310 = vst.msk [vmem:[#allocation2 + $0x80] sm:$0xff] %vm3293_vm2, %v11048_v8  ;;  %14317 = vst [vmem:[#allocation123_spill] sm:$0xff] %v11063_v6 }
 0x378   :  { %14314 = vst [vmem:[#allocation58_spill] sm:$0xff] %v11051_v50  ;;  %14318 = vst [vmem:[#allocation124_spill] sm:$0xff] %v11067_v20  ;;  %v11070_v50 = vadd.f32 %v2750_v51, %v14319_v1  ;;  %v11072_v26 = vpop.permute.xlu0 %5207  ;;  %v11074_v31 = vpop.permute.xlu1 %3135  ;;  %v14044_v54 = vmax.f32 %v11067_v20, 0.0 }
 0x379   :  { %14316 = vst [vmem:[#allocation59_spill] sm:$0xff] %v11058_v37  ;;  %v11078_v25 = vmax.f32 %v10515_v13, %v11074_v31 }
 0x37a   :  { %14320 = vst [vmem:[#allocation60_spill] sm:$0xff] %v11070_v50  ;;  %5239 = vrot.lane.b32.xlu0 %v14043_v3, %s9335_s0  ;;  %3167 = vrot.lane.b32.xlu1 %v11063_v6, %s9335_s0 }
 0x37b   :  { %3311 = vst.msk [vmem:[#allocation2 + $0x88] sm:$0xff] %vm3293_vm2, %v11078_v25 }
 0x37c   :  { %v11088_v15 = vpop.permute.xlu1 %5209  ;;  %v11090_v55 = vpop.permute.xlu0 %3137 }
 0x37d   :  { %v11094_v51 = vmax.f32 %v10531_v11, %v11090_v55 }
 0x37e   :  { %3398 = vrot.lane.b32.xlu0 %v10778_v22, %s9335_s0  ;;  %5241 = vrot.lane.b32.xlu1 %v14044_v54, %s9335_s0 }
 0x37f   :  { %3312 = vst.msk [vmem:[#allocation2 + $0x90] sm:$0xff] %vm3293_vm2, %v11094_v51 }
 0x380   :  { %v11103_v1 = vpop.permute.xlu0 %5211  ;;  %v11105_v3 = vpop.permute.xlu1 %3139 }
 0x381   :  { %14321 = vst [vmem:[#allocation125_spill] sm:$0xff] %v11105_v3  ;;  %v11109_v50 = vmax.f32 %v10543_v18, %v11105_v3 }
 0x382   :  { %3591 = vrot.lane.b32.xlu0 %v10778_v22, %s9336_s2  ;;  %3400 = vrot.lane.b32.xlu1 %v10812_v5, %s9335_s0 }
 0x383   :  { %3313 = vst.msk [vmem:[#allocation2 + $0x98] sm:$0xff] %vm3293_vm2, %v11109_v50 }
 0x384   :  { %v11117_v54 = vpop.permute.xlu1 %5213  ;;  %v11119_v37 = vpop.permute.xlu0 %3141 }
 0x385   :  { %14322 = vst [vmem:[#allocation126_spill] sm:$0xff] %v11119_v37  ;;  %v11123_v20 = vmax.f32 %v10559_v16, %v11119_v37 }
 0x386   :  { %3784 = vrot.lane.b32.xlu0 %v10778_v22, %s9337_s23  ;;  %3593 = vrot.lane.b32.xlu1 %v10812_v5, %s9336_s2 }
 0x387   :  { %3314 = vst.msk [vmem:[#allocation2 + $0xa0] sm:$0xff] %vm3293_vm2, %v11123_v20 }
 0x388   :  { %v11131_v63 = vpop.permute.xlu0 %5215  ;;  %v11133_v18 = vpop.permute.xlu1 %3143 }
 0x389   :  { %14323 = vst [vmem:[#allocation127_spill] sm:$0xff] %v11131_v63  ;;  %14324 = vst [vmem:[#allocation128_spill] sm:$0xff] %v11133_v18  ;;  %v11137_v3 = vmax.f32 %v10571_v23, %v11133_v18 }
 0x38a   :  { %3977 = vrot.lane.b32.xlu0 %v10778_v22, %s9338_s24  ;;  %3786 = vrot.lane.b32.xlu1 %v10812_v5, %s9337_s23 }
 0x38b   :  { %3315 = vst.msk [vmem:[#allocation2 + $0xa8] sm:$0xff] %vm3293_vm2, %v11137_v3 }
 0x38c   :  { %v11145_v16 = vpop.permute.xlu1 %5217  ;;  %v11147_v37 = vpop.permute.xlu0 %3145 }
 0x38d   :  { %14325 = vst [vmem:[#allocation129_spill] sm:$0xff] %v11145_v16  ;;  %14326 = vst [vmem:[#allocation130_spill] sm:$0xff] %v11147_v37  ;;  %v11151_v63 = vmax.f32 %v10587_v21, %v11147_v37 }
 0x38e   :  { %4170 = vrot.lane.b32.xlu0 %v10778_v22, %s9339_s25  ;;  %3979 = vrot.lane.b32.xlu1 %v10812_v5, %s9338_s24 }
 0x38f   :  { %3316 = vst.msk [vmem:[#allocation2 + $0xb0] sm:$0xff] %vm3293_vm2, %v11151_v63 }
 0x390   :  { %v11159_v23 = vpop.permute.xlu0 %5219  ;;  %v11161_v18 = vpop.permute.xlu1 %3147 }
 0x391   :  { %14327 = vst [vmem:[#allocation131_spill] sm:$0xff] %v11159_v23  ;;  %14328 = vst [vmem:[#allocation132_spill] sm:$0xff] %v11161_v18  ;;  %v11165_v16 = vmax.f32 %v10599_v32, %v11161_v18 }
 0x392   :  { %4363 = vrot.lane.b32.xlu0 %v10778_v22, %s9340_s26  ;;  %4172 = vrot.lane.b32.xlu1 %v10812_v5, %s9339_s25 }
 0x393   :  { %3317 = vst.msk [vmem:[#allocation2 + $0xb8] sm:$0xff] %vm3293_vm2, %v11165_v16 }
 0x394   :  { %v11173_v21 = vpop.permute.xlu1 %5221  ;;  %v11175_v37 = vpop.permute.xlu0 %3149 }
 0x395   :  { %14329 = vst [vmem:[#allocation133_spill] sm:$0xff] %v11173_v21  ;;  %14330 = vst [vmem:[#allocation134_spill] sm:$0xff] %v11175_v37  ;;  %v11179_v23 = vmax.f32 %v10615_v62, %v11175_v37 }
 0x396   :  { %4556 = vrot.lane.b32.xlu0 %v10778_v22, %s9341_s29  ;;  %4365 = vrot.lane.b32.xlu1 %v10812_v5, %s9340_s26 }
 0x397   :  { %3318 = vst.msk [vmem:[#allocation2 + $0xc0] sm:$0xff] %vm3293_vm2, %v11179_v23 }
 0x398   :  { %v11187_v32 = vpop.permute.xlu0 %5223  ;;  %v11189_v18 = vpop.permute.xlu1 %3151 }
 0x399   :  { %14331 = vst [vmem:[#allocation135_spill] sm:$0xff] %v11187_v32  ;;  %14332 = vst [vmem:[#allocation136_spill] sm:$0xff] %v11189_v18  ;;  %v11193_v21 = vmax.f32 %v10627_v4, %v11189_v18  ;;  %v14335_v4 = vmax.f32 %v10338_v27, 0.0  ;;  %v2929_v27 = vadd.f32 %v10772_v2, %v10271_v0 }
 0x39a   :  { %4749 = vrot.lane.b32.xlu0 %v10778_v22, %s9342_s30  ;;  %4558 = vrot.lane.b32.xlu1 %v10812_v5, %s9341_s29 }
 0x39b   :  { %14333 = vst [vmem:[#allocation137_spill] sm:$0xff] %v11193_v21  ;;  %3319 = vst.msk [vmem:[#allocation2 + $0xc8] sm:$0xff] %vm3293_vm2, %v11193_v21  ;;  %v5709_v18 = vmax.f32 %v14335_v4, %v10797_v7  ;;  %v14337_v4 = vmax.f32 %v10344_v39, 0.0  ;;  %v11259_v39 = vadd.f32 %v10781_v24, %v10276_v12  ;;  %v11282_v24 = vadd.f32 %v10791_v10, %v10276_v12 }
 0x39c   :  { %v11201_v62 = vpop.permute.xlu1 %5225  ;;  %v11203_v37 = vpop.permute.xlu0 %3153 }
 0x39d   :  { %14334 = vst [vmem:[#allocation138_spill] sm:$0xff] %v11201_v62  ;;  %v11207_v32 = vmax.f32 %v10643_v9, %v11203_v37  ;;  %v5276_v9 = vsel %vm5271_vm3, %v10774_v29, %v10797_v7  ;;  %v5710_v29 = vmax.f32 %v14337_v4, %v10793_v38  ;;  %14338 = vst [vmem:[#allocation140_spill] sm:$0xff] %v11259_v39 }
 0x39e   :  { %4942 = vrot.lane.b32.xlu0 %v10778_v22, %s9343_s12  ;;  %4751 = vrot.lane.b32.xlu1 %v10812_v5, %s9342_s30  ;;  %v5372_v7 = vmax.f32 %v10335_v36, %v5276_v9  ;;  %v11255_v36 = vmax.f32 %v2929_v27, 0.0  ;;  %14340 = vst [vmem:[#allocation142_spill] sm:$0xff] %v11282_v24 }
 0x39f   :  { %3320 = vst.msk [vmem:[#allocation2 + $0xd0] sm:$0xff] %vm3293_vm2, %v11207_v32 }
 0x3a0   :  { %v11218_v62 = vpop.permute.xlu0 %5227  ;;  %v11220_v21 = vpop.permute.xlu1 %3155 }
 0x3a1   :  { %14336 = vst [vmem:[#allocation139_spill] sm:$0xff] %v11220_v21  ;;  %v11227_v22 = vmax.f32 %v10655_v33, %v11220_v21 }
 0x3a2   :  { %5809 = vrot.lane.b32.xlu0 %v5709_v18, %s9344_s14  ;;  %4944 = vrot.lane.b32.xlu1 %v10812_v5, %s9343_s12  ;;  %v5277_v5 = vsel %vm5271_vm3, %v10806_v57, %v10793_v38  ;;  %v2931_v38 = vadd.f32 %v10784_v42, %v10271_v0  ;;  %v14073_v42 = vmax.f32 %v11259_v39, 0.0 }
 0x3a3   :  { %3321 = vst.msk [vmem:[#allocation2 + $0xd8] sm:$0xff] %vm3293_vm2, %v11227_v22  ;;  %v5373_v9 = vmax.f32 %v10362_v43, %v5277_v5 }
 0x3a4   :  { %v11240_v33 = vpop.permute.xlu1 %5229  ;;  %v11242_v21 = vpop.permute.xlu0 %3157  ;;  %v11278_v43 = vmax.f32 %v2931_v38, 0.0 }
 0x3a5   :  { %v11249_v18 = vmax.f32 %v10671_v14, %v11242_v21 }
 0x3a6   :  { %5472 = vrot.lane.b32.xlu0 %v5372_v7, %s9345_s15  ;;  %5811 = vrot.lane.b32.xlu1 %v5710_v29, %s9344_s14  ;;  %14339 = vst [vmem:[#allocation141_spill] sm:$0xff] %v11278_v43  ;;  %v14072_v7 = vmax.f32 %v11282_v24, 0.0  ;;  %v14347_v24 = vmax.f32 %v10367_v44, 0.0  ;;  %v14350_v44 = vld [vmem:[#allocation72_spill] sm:$0xff] }
 0x3a7   :  { %3322 = vst.msk [vmem:[#allocation2 + $0xe0] sm:$0xff] %vm3293_vm2, %v11249_v18 }
 0x3a8   :  { %v11264_v2 = vpop.permute.xlu0 %5231  ;;  %v11266_v57 = vpop.permute.xlu1 %3159  ;;  %v5711_v39 = vmax.f32 %v14347_v24, %v10837_v46 }
 0x3a9   :  { %v11270_v4 = vmax.f32 %v10683_v60, %v11266_v57 }
 0x3aa   :  { %5474 = vrot.lane.b32.xlu1 %v5373_v9, %s9345_s15  ;;  %3169 = vrot.lane.b32.xlu0 %v11255_v36, %s9335_s0 }
 0x3ab   :  { %3323 = vst.msk [vmem:[#allocation2 + $0xe8] sm:$0xff] %vm3293_vm2, %v11270_v4 }
 0x3ac   :  { %v3391_v27 = vpop.permute.xlu0 %3390  ;;  %v11284_v29 = vpop.permute.xlu1 %5233 }
 0x3ad   :  { %3535 = vst.msk [vmem:[#allocation2] sm:$0xff] %vm3534_vm4, %v3391_v27 }
 0x3ae   :  { %5243 = vrot.lane.b32.xlu0 %v14073_v42, %s9335_s0  ;;  %3171 = vrot.lane.b32.xlu1 %v11278_v43, %s9335_s0 }
 0x3b0   :  { %v3584_v5 = vpop.permute.xlu0 %3583  ;;  %v3393_v38 = vpop.permute.xlu1 %3392 }
 0x3b1   :  { %3728 = vst.msk [vmem:[#allocation2] sm:$0xff] %vm3727_vm5, %v3584_v5 }
 0x3b2   :  { %3536 = vst.msk [vmem:[#allocation2 + $0x8] sm:$0xff] %vm3534_vm4, %v3393_v38  ;;  %3402 = vrot.lane.b32.xlu0 %v10816_v53, %s9335_s0  ;;  %5245 = vrot.lane.b32.xlu1 %v14072_v7, %s9335_s0 }
 0x3b4   :  { %v3777_v10 = vpop.permute.xlu0 %3776  ;;  %v3586_v9 = vpop.permute.xlu1 %3585 }
 0x3b5   :  { %3921 = vst.msk [vmem:[#allocation2] sm:$0xff] %vm3920_vm6, %v3777_v10 }
 0x3b6   :  { %3729 = vst.msk [vmem:[#allocation2 + $0x8] sm:$0xff] %vm3727_vm5, %v3586_v9  ;;  %3595 = vrot.lane.b32.xlu0 %v10816_v53, %s9336_s2  ;;  %3404 = vrot.lane.b32.xlu1 %v10843_v56, %s9335_s0 }
 0x3b8   :  { %v3970_v27 = vpop.permute.xlu0 %3969  ;;  %v3779_v5 = vpop.permute.xlu1 %3778 }
 0x3b9   :  { %4114 = vst.msk [vmem:[#allocation2] sm:$0xff] %vm4113_vm7, %v3970_v27 }
 0x3ba   :  { %3922 = vst.msk [vmem:[#allocation2 + $0x8] sm:$0xff] %vm3920_vm6, %v3779_v5  ;;  %3788 = vrot.lane.b32.xlu0 %v10816_v53, %s9337_s23  ;;  %3597 = vrot.lane.b32.xlu1 %v10843_v56, %s9336_s2 }
 0x3bc   :  { %v4163_v38 = vpop.permute.xlu0 %4162  ;;  %v3972_v10 = vpop.permute.xlu1 %3971 }
 0x3bd   :  { %4307 = vst.msk [vmem:[#allocation2] sm:$0xff] %vm4306_vm8, %v4163_v38 }
 0x3be   :  { %4115 = vst.msk [vmem:[#allocation2 + $0x8] sm:$0xff] %vm4113_vm7, %v3972_v10  ;;  %3981 = vrot.lane.b32.xlu0 %v10816_v53, %s9338_s24  ;;  %3790 = vrot.lane.b32.xlu1 %v10843_v56, %s9337_s23 }
 0x3c0   :  { %v4356_v9 = vpop.permute.xlu0 %4355  ;;  %v4165_v27 = vpop.permute.xlu1 %4164 }
 0x3c1   :  { %4500 = vst.msk [vmem:[#allocation2] sm:$0xff] %vm4499_vm9, %v4356_v9 }
 0x3c2   :  { %4308 = vst.msk [vmem:[#allocation2 + $0x8] sm:$0xff] %vm4306_vm8, %v4165_v27  ;;  %4174 = vrot.lane.b32.xlu0 %v10816_v53, %s9339_s25  ;;  %3983 = vrot.lane.b32.xlu1 %v10843_v56, %s9338_s24 }
 0x3c4   :  { %v4549_v5 = vpop.permute.xlu0 %4548  ;;  %v4358_v38 = vpop.permute.xlu1 %4357 }
 0x3c5   :  { %4693 = vst.msk [vmem:[#allocation2] sm:$0xff] %vm4692_vm10, %v4549_v5 }
 0x3c6   :  { %4501 = vst.msk [vmem:[#allocation2 + $0x8] sm:$0xff] %vm4499_vm9, %v4358_v38  ;;  %4367 = vrot.lane.b32.xlu0 %v10816_v53, %s9340_s26  ;;  %4176 = vrot.lane.b32.xlu1 %v10843_v56, %s9339_s25 }
 0x3c8   :  { %v4551_v10 = vpop.permute.xlu1 %4550  ;;  %v11330_v9 = vpop.permute.xlu0 %3161 }
 0x3c9   :  { %14341 = vst [vmem:[#allocation143_spill] sm:$0xff] %v11330_v9  ;;  %4694 = vst.msk [vmem:[#allocation2 + $0x8] sm:$0xff] %vm4692_vm10, %v4551_v10  ;;  %v11335_v27 = vmax.f32 %v10851_v49, %v11330_v9  ;;  %v14348_v49 = vld [vmem:[#allocation34_spill] sm:$0xff] }
 0x3ca   :  { %4560 = vrot.lane.b32.xlu0 %v10816_v53, %s9341_s29  ;;  %4369 = vrot.lane.b32.xlu1 %v10843_v56, %s9340_s26  ;;  %v5278_v9 = vsel %vm5271_vm3, %v14348_v49, %v10837_v46 }
 0x3cb   :  { %14342 = vst [vmem:[#allocation144_spill] sm:$0xff] %v11335_v27  ;;  %3324 = vst.msk [vmem:[#allocation2 + $0xf0] sm:$0xff] %vm3293_vm2, %v11335_v27  ;;  %v5374_v24 = vmax.f32 %v14350_v44, %v5278_v9  ;;  %v14357_v9 = vld [vmem:[#allocation36_spill] sm:$0xff] }
 0x3cc   :  { %v11343_v5 = vpop.permute.xlu0 %5235  ;;  %v11345_v38 = vpop.permute.xlu1 %3163 }
 0x3cd   :  { %14343 = vst [vmem:[#allocation145_spill] sm:$0xff] %v11343_v5  ;;  %14344 = vst [vmem:[#allocation146_spill] sm:$0xff] %v11345_v38  ;;  %v11349_v10 = vmax.f32 %v10883_v34, %v11345_v38 }
 0x3ce   :  { %4753 = vrot.lane.b32.xlu0 %v10816_v53, %s9342_s30  ;;  %4562 = vrot.lane.b32.xlu1 %v10843_v56, %s9341_s29 }
 0x3cf   :  { %14345 = vst [vmem:[#allocation147_spill] sm:$0xff] %v11349_v10  ;;  %3325 = vst.msk [vmem:[#allocation2 + $0xf8] sm:$0xff] %vm3293_vm2, %v11349_v10 }
 0x3d0   :  { %v3395_v7 = vpop.permute.xlu0 %3394  ;;  %v11357_v42 = vpop.permute.xlu1 %5237 }
 0x3d1   :  { %14346 = vst [vmem:[#allocation148_spill] sm:$0xff] %v11357_v42  ;;  %3537 = vst.msk [vmem:[#allocation2 + $0x10] sm:$0xff] %vm3534_vm4, %v3395_v7  ;;  %v14351_v42 = vld [vmem:[#allocation74_spill] sm:$0xff] }
 0x3d2   :  { %4946 = vrot.lane.b32.xlu0 %v10816_v53, %s9343_s12  ;;  %4755 = vrot.lane.b32.xlu1 %v10843_v56, %s9342_s30  ;;  %v14349_v53 = vld [vmem:[#allocation33_spill] sm:$0xff]  ;;  %v14352_v5 = vmax.f32 %v14351_v42, 0.0 }
 0x3d3   :  { %v2933_v7 = vadd.f32 %v14349_v53, %v10271_v0 }
 0x3d4   :  { %v3588_v34 = vpop.permute.xlu0 %3587  ;;  %v3397_v38 = vpop.permute.xlu1 %3396  ;;  %v5712_v10 = vmax.f32 %v14352_v5, %v10862_v35  ;;  %v2935_v5 = vadd.f32 %v14357_v9, %v10271_v0 }
 0x3d5   :  { %3730 = vst.msk [vmem:[#allocation2 + $0x10] sm:$0xff] %vm3727_vm5, %v3588_v34  ;;  %v14353_v34 = vld [vmem:[#allocation38_spill] sm:$0xff] }
 0x3d6   :  { %3538 = vst.msk [vmem:[#allocation2 + $0x18] sm:$0xff] %vm3534_vm4, %v3397_v38  ;;  %5813 = vrot.lane.b32.xlu0 %v5711_v39, %s9344_s14  ;;  %4948 = vrot.lane.b32.xlu1 %v10843_v56, %s9343_s12  ;;  %v5279_v49 = vsel %vm5271_vm3, %v14353_v34, %v10862_v35  ;;  %v11388_v56 = vmax.f32 %v2933_v7, 0.0  ;;  %v14355_v39 = vld [vmem:[#allocation35_spill] sm:$0xff]  ;;  %v14358_v38 = vld [vmem:[#allocation73_spill] sm:$0xff] }
 0x3d7   :  { %v11392_v42 = vadd.f32 %v14355_v39, %v10276_v12  ;;  %v5375_v53 = vmax.f32 %v14358_v38, %v5279_v49  ;;  %v14360_v7 = vld [vmem:[#allocation37_spill] sm:$0xff] }
 0x3d8   :  { %v3781_v27 = vpop.permute.xlu0 %3780  ;;  %v3590_v46 = vpop.permute.xlu1 %3589  ;;  %14354 = vst [vmem:[#allocation34_spill] sm:$0xff] %v11388_v56 }
 0x3d9   :  { %3923 = vst.msk [vmem:[#allocation2 + $0x10] sm:$0xff] %vm3920_vm6, %v3781_v27  ;;  %14356 = vst [vmem:[#allocation33_spill] sm:$0xff] %v11392_v42  ;;  %v14087_v27 = vmax.f32 %v11392_v42, 0.0  ;;  %v14366_v42 = vld [vmem:[#allocation107_spill] sm:$0xff] }
 0x3da   :  { %3731 = vst.msk [vmem:[#allocation2 + $0x18] sm:$0xff] %vm3727_vm5, %v3590_v46  ;;  %5476 = vrot.lane.b32.xlu0 %v5374_v24, %s9345_s15  ;;  %5815 = vrot.lane.b32.xlu1 %v5712_v10, %s9344_s14  ;;  %v11403_v10 = vmax.f32 %v2935_v5, 0.0  ;;  %v11407_v24 = vadd.f32 %v14360_v7, %v10276_v12 }
 0x3dc   :  { %v3974_v35 = vpop.permute.xlu0 %3973  ;;  %v3783_v44 = vpop.permute.xlu1 %3782  ;;  %14359 = vst [vmem:[#allocation72_spill] sm:$0xff] %v11403_v10  ;;  %14361 = vst [vmem:[#allocation74_spill] sm:$0xff] %v11407_v24  ;;  %v14086_v49 = vmax.f32 %v11407_v24, 0.0 }
 0x3dd   :  { %4116 = vst.msk [vmem:[#allocation2 + $0x10] sm:$0xff] %vm4113_vm7, %v3974_v35 }
 0x3de   :  { %3924 = vst.msk [vmem:[#allocation2 + $0x18] sm:$0xff] %vm3920_vm6, %v3783_v44  ;;  %5478 = vrot.lane.b32.xlu1 %v5375_v53, %s9345_s15  ;;  %3173 = vrot.lane.b32.xlu0 %v11388_v56, %s9335_s0 }
 0x3e0   :  { %v4167_v46 = vpop.permute.xlu0 %4166  ;;  %v3976_v34 = vpop.permute.xlu1 %3975 }
 0x3e1   :  { %4309 = vst.msk [vmem:[#allocation2 + $0x10] sm:$0xff] %vm4306_vm8, %v4167_v46 }
 0x3e2   :  { %4117 = vst.msk [vmem:[#allocation2 + $0x18] sm:$0xff] %vm4113_vm7, %v3976_v34  ;;  %5247 = vrot.lane.b32.xlu0 %v14087_v27, %s9335_s0  ;;  %3175 = vrot.lane.b32.xlu1 %v11403_v10, %s9335_s0 }
 0x3e4   :  { %v4360_v39 = vpop.permute.xlu0 %4359  ;;  %v4169_v9 = vpop.permute.xlu1 %4168 }
 0x3e5   :  { %4502 = vst.msk [vmem:[#allocation2 + $0x10] sm:$0xff] %vm4499_vm9, %v4360_v39 }
 0x3e6   :  { %4310 = vst.msk [vmem:[#allocation2 + $0x18] sm:$0xff] %vm4306_vm8, %v4169_v9  ;;  %3406 = vrot.lane.b32.xlu0 %v10868_v47, %s9335_s0  ;;  %5249 = vrot.lane.b32.xlu1 %v14086_v49, %s9335_s0 }
 0x3e8   :  { %v4362_v5 = vpop.permute.xlu1 %4361  ;;  %v11424_v38 = vpop.permute.xlu0 %3165 }
 0x3e9   :  { %4503 = vst.msk [vmem:[#allocation2 + $0x18] sm:$0xff] %vm4499_vm9, %v4362_v5  ;;  %v11429_v53 = vmax.f32 %v11031_v17, %v11424_v38 }
 0x3ea   :  { %3599 = vrot.lane.b32.xlu0 %v10868_v47, %s9336_s2  ;;  %3408 = vrot.lane.b32.xlu1 %v10898_v52, %s9335_s0 }
 0x3eb   :  { %3326 = vst.msk [vmem:[#allocation2 + $0x100] sm:$0xff] %vm3293_vm2, %v11429_v53 }
 0x3ec   :  { %v11437_v35 = vpop.permute.xlu0 %5239  ;;  %v11439_v44 = vpop.permute.xlu1 %3167 }
 0x3ed   :  { %14362 = vst [vmem:[#allocation38_spill] sm:$0xff] %v11439_v44  ;;  %v11443_v7 = vmax.f32 %v11063_v6, %v11439_v44  ;;  %v5280_v6 = vsel %vm5271_vm3, %v14366_v42, %v10892_v48 }
 0x3ee   :  { %3792 = vrot.lane.b32.xlu0 %v10868_v47, %s9337_s23  ;;  %3601 = vrot.lane.b32.xlu1 %v10898_v52, %s9336_s2 }
 0x3ef   :  { %3327 = vst.msk [vmem:[#allocation2 + $0x108] sm:$0xff] %vm3293_vm2, %v11443_v7 }
 0x3f0   :  { %v3399_v46 = vpop.permute.xlu0 %3398  ;;  %v11451_v34 = vpop.permute.xlu1 %5241 }
 0x3f1   :  { %14363 = vst [vmem:[#allocation35_spill] sm:$0xff] %v11451_v34  ;;  %3539 = vst.msk [vmem:[#allocation2 + $0x20] sm:$0xff] %vm3534_vm4, %v3399_v46 }
 0x3f2   :  { %3985 = vrot.lane.b32.xlu0 %v10868_v47, %s9338_s24  ;;  %3794 = vrot.lane.b32.xlu1 %v10898_v52, %s9337_s23 }
 0x3f4   :  { %v3592_v39 = vpop.permute.xlu0 %3591  ;;  %v3401_v9 = vpop.permute.xlu1 %3400 }
 0x3f5   :  { %3732 = vst.msk [vmem:[#allocation2 + $0x20] sm:$0xff] %vm3727_vm5, %v3592_v39 }
 0x3f6   :  { %3540 = vst.msk [vmem:[#allocation2 + $0x28] sm:$0xff] %vm3534_vm4, %v3401_v9  ;;  %4178 = vrot.lane.b32.xlu0 %v10868_v47, %s9339_s25  ;;  %3987 = vrot.lane.b32.xlu1 %v10898_v52, %s9338_s24 }
 0x3f8   :  { %v3785_v5 = vpop.permute.xlu0 %3784  ;;  %v3594_v46 = vpop.permute.xlu1 %3593 }
 0x3f9   :  { %3925 = vst.msk [vmem:[#allocation2 + $0x20] sm:$0xff] %vm3920_vm6, %v3785_v5 }
 0x3fa   :  { %3733 = vst.msk [vmem:[#allocation2 + $0x28] sm:$0xff] %vm3727_vm5, %v3594_v46  ;;  %4371 = vrot.lane.b32.xlu0 %v10868_v47, %s9340_s26  ;;  %4180 = vrot.lane.b32.xlu1 %v10898_v52, %s9339_s25 }
 0x3fc   :  { %v3978_v39 = vpop.permute.xlu0 %3977  ;;  %v3787_v9 = vpop.permute.xlu1 %3786 }
 0x3fd   :  { %4118 = vst.msk [vmem:[#allocation2 + $0x20] sm:$0xff] %vm4113_vm7, %v3978_v39 }
 0x3fe   :  { %3926 = vst.msk [vmem:[#allocation2 + $0x28] sm:$0xff] %vm3920_vm6, %v3787_v9  ;;  %4564 = vrot.lane.b32.xlu0 %v10868_v47, %s9341_s29  ;;  %4373 = vrot.lane.b32.xlu1 %v10898_v52, %s9340_s26 }
 0x400   :  { %v4171_v5 = vpop.permute.xlu0 %4170  ;;  %v3980_v46 = vpop.permute.xlu1 %3979 }
 0x401   :  { %4311 = vst.msk [vmem:[#allocation2 + $0x20] sm:$0xff] %vm4306_vm8, %v4171_v5  ;;  %v14364_v5 = vld [vmem:[#allocation76_spill] sm:$0xff] }
 0x402   :  { %4119 = vst.msk [vmem:[#allocation2 + $0x28] sm:$0xff] %vm4113_vm7, %v3980_v46  ;;  %4757 = vrot.lane.b32.xlu0 %v10868_v47, %s9342_s30  ;;  %4566 = vrot.lane.b32.xlu1 %v10898_v52, %s9341_s29  ;;  %v14365_v46 = vmax.f32 %v14364_v5, 0.0 }
 0x404   :  { %v4364_v39 = vpop.permute.xlu0 %4363  ;;  %v4173_v9 = vpop.permute.xlu1 %4172  ;;  %v5713_v49 = vmax.f32 %v14365_v46, %v10892_v48  ;;  %v14369_v46 = vld [vmem:[#allocation78_spill] sm:$0xff] }
 0x405   :  { %4504 = vst.msk [vmem:[#allocation2 + $0x20] sm:$0xff] %vm4499_vm9, %v4364_v39  ;;  %v14370_v44 = vmax.f32 %v14369_v46, 0.0 }
 0x406   :  { %4312 = vst.msk [vmem:[#allocation2 + $0x28] sm:$0xff] %vm4306_vm8, %v4173_v9  ;;  %4950 = vrot.lane.b32.xlu0 %v10868_v47, %s9343_s12  ;;  %4759 = vrot.lane.b32.xlu1 %v10898_v52, %s9342_s30  ;;  %v14367_v47 = vld [vmem:[#allocation41_spill] sm:$0xff]  ;;  %v14368_v9 = vld [vmem:[#allocation75_spill] sm:$0xff] }
 0x407   :  { %v2937_v39 = vadd.f32 %v14367_v47, %v10271_v0  ;;  %v5376_v5 = vmax.f32 %v14368_v9, %v5280_v6  ;;  %v5714_v34 = vmax.f32 %v14370_v44, %v10911_v30  ;;  %v14375_v44 = vld [vmem:[#allocation43_spill] sm:$0xff]  ;;  %v14376_v9 = vld [vmem:[#allocation77_spill] sm:$0xff] }
 0x408   :  { %v4557_v27 = vpop.permute.xlu0 %4556  ;;  %v4366_v24 = vpop.permute.xlu1 %4365  ;;  %v2939_v47 = vadd.f32 %v14375_v44, %v10271_v0  ;;  %v14386_v0 = vld [vmem:[#allocation82_spill] sm:$0xff] }
 0x409   :  { %4697 = vst.msk [vmem:[#allocation2 + $0x20] sm:$0xff] %vm4692_vm10, %v4557_v27  ;;  %v14371_v27 = vld [vmem:[#allocation110_spill] sm:$0xff]  ;;  %v11512_v6 = vmax.f32 %v2937_v39, 0.0 }
 0x40a   :  { %4505 = vst.msk [vmem:[#allocation2 + $0x28] sm:$0xff] %vm4499_vm9, %v4366_v24  ;;  %5817 = vrot.lane.b32.xlu0 %v5713_v49, %s9344_s14  ;;  %4952 = vrot.lane.b32.xlu1 %v10898_v52, %s9343_s12  ;;  %v5281_v24 = vsel %vm5271_vm3, %v14371_v27, %v10911_v30  ;;  %v14373_v52 = vld [vmem:[#allocation42_spill] sm:$0xff]  ;;  %v11527_v39 = vmax.f32 %v2939_v47, 0.0 }
 0x40b   :  { %14372 = vst [vmem:[#allocation36_spill] sm:$0xff] %v11512_v6  ;;  %v11516_v49 = vadd.f32 %v14373_v52, %v10276_v12  ;;  %v5377_v30 = vmax.f32 %v14376_v9, %v5281_v24 }
 0x40c   :  { %v4750_v48 = vpop.permute.xlu0 %4749  ;;  %v4559_v42 = vpop.permute.xlu1 %4558  ;;  %14377 = vst [vmem:[#allocation37_spill] sm:$0xff] %v11527_v39 }
 0x40d   :  { %4890 = vst.msk [vmem:[#allocation2 + $0x20] sm:$0xff] %vm4885_vm11, %v4750_v48  ;;  %14374 = vst [vmem:[#allocation73_spill] sm:$0xff] %v11516_v49 }
 0x40e   :  { %4698 = vst.msk [vmem:[#allocation2 + $0x28] sm:$0xff] %vm4692_vm10, %v4559_v42  ;;  %5480 = vrot.lane.b32.xlu0 %v5376_v5, %s9345_s15  ;;  %5819 = vrot.lane.b32.xlu1 %v5714_v34, %s9344_s14  ;;  %v14094_v34 = vmax.f32 %v11516_v49, 0.0  ;;  %v14378_v5 = vld [vmem:[#allocation44_spill] sm:$0xff] }
 0x40f   :  { %v11531_v42 = vadd.f32 %v14378_v5, %v10276_v12 }
 0x410   :  { %v4943_v46 = vpop.permute.xlu0 %4942  ;;  %v4752_v48 = vpop.permute.xlu1 %4751 }
 0x411   :  { %5083 = vst.msk [vmem:[#allocation2 + $0x20] sm:$0xff] %vm5078_vm12, %v4943_v46  ;;  %14379 = vst [vmem:[#allocation76_spill] sm:$0xff] %v11531_v42  ;;  %v14093_v52 = vmax.f32 %v11531_v42, 0.0 }
 0x412   :  { %4891 = vst.msk [vmem:[#allocation2 + $0x28] sm:$0xff] %vm4885_vm11, %v4752_v48  ;;  %5482 = vrot.lane.b32.xlu1 %v5377_v30, %s9345_s15  ;;  %3177 = vrot.lane.b32.xlu0 %v11512_v6, %s9335_s0 }
 0x414   :  { %v5810_v27 = vpop.permute.xlu0 %5809  ;;  %v4945_v24 = vpop.permute.xlu1 %4944 }
 0x415   :  { %5084 = vst.msk [vmem:[#allocation2 + $0x28] sm:$0xff] %vm5078_vm12, %v4945_v24 }
 0x416   :  { %5251 = vrot.lane.b32.xlu0 %v14094_v34, %s9335_s0  ;;  %3179 = vrot.lane.b32.xlu1 %v11527_v39, %s9335_s0  ;;  %v9154_v34 = vld [vmem:[%s13924_s3 + $0x24] sm:$0xff]  }
 0x417   :  { %8397 = vmatprep.subr.bf16.mxu1 %v9154_v34 }
 0x418   :  { %v5473_v44 = vpop.permute.xlu0 %5472  ;;  %v5812_v47 = vpop.permute.xlu1 %5811  ;;  %8398 = vmatpush3.bf16.msra.mxu1 %v9154_v34 }
 0x419   :  { %5613 = vst.msk [vmem:[#allocation2 + $0x20] sm:$0xff] %vm5608_vm13, %v5473_v44 }
 0x41a   :  { %5950 = vst.msk [vmem:[#allocation2 + $0x20] sm:$0xff] %vm5945_vm14, %v5810_v27  ;;  %3410 = vrot.lane.b32.xlu0 %v10917_v19, %s9335_s0  ;;  %5253 = vrot.lane.b32.xlu1 %v14093_v52, %s9335_s0 }
 0x41c   :  { %v5475_v9 = vpop.permute.xlu1 %5474  ;;  %v11547_v30 = vpop.permute.xlu0 %3169 }
 0x41d   :  { %5614 = vst.msk [vmem:[#allocation2 + $0x28] sm:$0xff] %vm5608_vm13, %v5475_v9  ;;  %v11552_v46 = vmax.f32 %v11255_v36, %v11547_v30 }
 0x41e   :  { %5951 = vst.msk [vmem:[#allocation2 + $0x28] sm:$0xff] %vm5945_vm14, %v5812_v47  ;;  %3603 = vrot.lane.b32.xlu0 %v10917_v19, %s9336_s2  ;;  %3412 = vrot.lane.b32.xlu1 %v10941_v41, %s9335_s0 }
 0x41f   :  { %3328 = vst.msk [vmem:[#allocation2 + $0x110] sm:$0xff] %vm3293_vm2, %v11552_v46 }
 0x420   :  { %v11561_v48 = vpop.permute.xlu0 %5243  ;;  %v11563_v5 = vpop.permute.xlu1 %3171 }
 0x421   :  { %14380 = vst [vmem:[#allocation107_spill] sm:$0xff] %v11563_v5  ;;  %v11567_v27 = vmax.f32 %v11278_v43, %v11563_v5  ;;  %v14387_v43 = vmax.f32 %v14386_v0, 0.0  ;;  %v14389_v0 = vld [vmem:[#allocation81_spill] sm:$0xff] }
 0x422   :  { %3796 = vrot.lane.b32.xlu0 %v10917_v19, %s9337_s23  ;;  %3605 = vrot.lane.b32.xlu1 %v10941_v41, %s9336_s2 }
 0x423   :  { %3329 = vst.msk [vmem:[#allocation2 + $0x118] sm:$0xff] %vm3293_vm2, %v11567_v27 }
 0x424   :  { %v3403_v24 = vpop.permute.xlu0 %3402  ;;  %v11575_v44 = vpop.permute.xlu1 %5245 }
 0x425   :  { %3541 = vst.msk [vmem:[#allocation2 + $0x30] sm:$0xff] %vm3534_vm4, %v3403_v24 }
 0x426   :  { %3989 = vrot.lane.b32.xlu0 %v10917_v19, %s9338_s24  ;;  %3798 = vrot.lane.b32.xlu1 %v10941_v41, %s9337_s23 }
 0x428   :  { %v3596_v47 = vpop.permute.xlu0 %3595  ;;  %v3405_v9 = vpop.permute.xlu1 %3404 }
 0x429   :  { %3734 = vst.msk [vmem:[#allocation2 + $0x30] sm:$0xff] %vm3727_vm5, %v3596_v47 }
 0x42a   :  { %3542 = vst.msk [vmem:[#allocation2 + $0x38] sm:$0xff] %vm3534_vm4, %v3405_v9  ;;  %4182 = vrot.lane.b32.xlu0 %v10917_v19, %s9339_s25  ;;  %3991 = vrot.lane.b32.xlu1 %v10941_v41, %s9338_s24 }
 0x42c   :  { %v3789_v52 = vpop.permute.xlu0 %3788  ;;  %v3598_v24 = vpop.permute.xlu1 %3597 }
 0x42d   :  { %3927 = vst.msk [vmem:[#allocation2 + $0x30] sm:$0xff] %vm3920_vm6, %v3789_v52 }
 0x42e   :  { %3735 = vst.msk [vmem:[#allocation2 + $0x38] sm:$0xff] %vm3727_vm5, %v3598_v24  ;;  %4375 = vrot.lane.b32.xlu0 %v10917_v19, %s9340_s26  ;;  %4184 = vrot.lane.b32.xlu1 %v10941_v41, %s9339_s25 }
 0x430   :  { %v3982_v47 = vpop.permute.xlu0 %3981  ;;  %v3791_v9 = vpop.permute.xlu1 %3790 }
 0x431   :  { %4120 = vst.msk [vmem:[#allocation2 + $0x30] sm:$0xff] %vm4113_vm7, %v3982_v47 }
 0x432   :  { %3928 = vst.msk [vmem:[#allocation2 + $0x38] sm:$0xff] %vm3920_vm6, %v3791_v9  ;;  %4568 = vrot.lane.b32.xlu0 %v10917_v19, %s9341_s29  ;;  %4377 = vrot.lane.b32.xlu1 %v10941_v41, %s9340_s26 }
 0x434   :  { %v4175_v52 = vpop.permute.xlu0 %4174  ;;  %v3984_v24 = vpop.permute.xlu1 %3983 }
 0x435   :  { %4313 = vst.msk [vmem:[#allocation2 + $0x30] sm:$0xff] %vm4306_vm8, %v4175_v52  ;;  %v14381_v52 = vld [vmem:[#allocation80_spill] sm:$0xff] }
 0x436   :  { %4121 = vst.msk [vmem:[#allocation2 + $0x38] sm:$0xff] %vm4113_vm7, %v3984_v24  ;;  %4761 = vrot.lane.b32.xlu0 %v10917_v19, %s9342_s30  ;;  %4570 = vrot.lane.b32.xlu1 %v10941_v41, %s9341_s29  ;;  %v14382_v24 = vmax.f32 %v14381_v52, 0.0  ;;  %v14384_v52 = vld [vmem:[#allocation79_spill] sm:$0xff] }
 0x438   :  { %v4368_v47 = vpop.permute.xlu0 %4367  ;;  %v4177_v9 = vpop.permute.xlu1 %4176  ;;  %v5715_v42 = vmax.f32 %v14382_v24, %v10935_v45  ;;  %v14385_v24 = vld [vmem:[#allocation113_spill] sm:$0xff] }
 0x439   :  { %4506 = vst.msk [vmem:[#allocation2 + $0x30] sm:$0xff] %vm4499_vm9, %v4368_v47  ;;  %v14383_v47 = vld [vmem:[#allocation111_spill] sm:$0xff] }
 0x43a   :  { %4314 = vst.msk [vmem:[#allocation2 + $0x38] sm:$0xff] %vm4306_vm8, %v4177_v9  ;;  %4954 = vrot.lane.b32.xlu0 %v10917_v19, %s9343_s12  ;;  %4763 = vrot.lane.b32.xlu1 %v10941_v41, %s9342_s30  ;;  %v5282_v9 = vsel %vm5271_vm3, %v14383_v47, %v10935_v45  ;;  %v9155_v19 = vld [vmem:[%s13924_s3 + $0x2c] sm:$0xff]   ;;  %v5716_v45 = vmax.f32 %v14387_v43, %v14385_v24 }
 0x43b   :  { %8399 = vmatprep.subr.bf16.mxu1 %v9155_v19  ;;  %v5378_v34 = vmax.f32 %v14384_v52, %v5282_v9 }
 0x43c   :  { %v4561_v49 = vpop.permute.xlu0 %4560  ;;  %v4370_v12 = vpop.permute.xlu1 %4369  ;;  %8400 = vmatpush3.bf16.msra.mxu1 %v9155_v19  ;;  %v9157_v19 = vld [vmem:[%s13924_s3 + $0x3c] sm:$0xff]  }
 0x43d   :  { %4699 = vst.msk [vmem:[#allocation2 + $0x30] sm:$0xff] %vm4692_vm10, %v4561_v49 }
 0x43e   :  { %4507 = vst.msk [vmem:[#allocation2 + $0x38] sm:$0xff] %vm4499_vm9, %v4370_v12  ;;  %5821 = vrot.lane.b32.xlu0 %v5715_v42, %s9344_s14  ;;  %4956 = vrot.lane.b32.xlu1 %v10941_v41, %s9343_s12  ;;  %v14388_v12 = vld [vmem:[#allocation112_spill] sm:$0xff]  ;;  %v9156_v41 = vld [vmem:[%s13924_s3 + $0x34] sm:$0xff]  }
 0x43f   :  { %v5283_v5 = vsel %vm5271_vm3, %v14388_v12, %v14385_v24  ;;  %8401 = vmatprep.subr.bf16.mxu1 %v9156_v41 }
 0x440   :  { %v4754_v47 = vpop.permute.xlu0 %4753  ;;  %v4563_v49 = vpop.permute.xlu1 %4562  ;;  %v5379_v43 = vmax.f32 %v14389_v0, %v5283_v5  ;;  %8402 = vmatpush3.bf16.msra.mxu1 %v9156_v41  ;;  %v9158_v5 = vld [vmem:[%s13924_s3 + $0x44] ss:$0 sps:$4 sm:$0xff]  }
 0x441   :  { %4892 = vst.msk [vmem:[#allocation2 + $0x30] sm:$0xff] %vm4885_vm11, %v4754_v47  ;;  %8403 = vmatprep.subr.bf16.mxu1 %v9157_v19  ;;  %v6172_v24 = vsel %vm6170_vm15, %v9158_v5, 0 }
 0x442   :  { %4700 = vst.msk [vmem:[#allocation2 + $0x38] sm:$0xff] %vm4692_vm10, %v4563_v49  ;;  %5484 = vrot.lane.b32.xlu0 %v5378_v34, %s9345_s15  ;;  %5823 = vrot.lane.b32.xlu1 %v5716_v45, %s9344_s14 }
 0x444   :  { %v4947_v42 = vpop.permute.xlu0 %4946  ;;  %v4756_v9 = vpop.permute.xlu1 %4755  ;;  %8404 = vmatpush3.bf16.msra.mxu1 %v9157_v19 }
 0x445   :  { %5085 = vst.msk [vmem:[#allocation2 + $0x30] sm:$0xff] %vm5078_vm12, %v4947_v42  ;;  %8999 = vmatprep.subr.msk.bf16.mxu1 %vm6170_vm15, %v9158_v5  ;;  %v6004_v5 = vld [vmem:[#allocation2 + $0x28] sm:$0xff] }
 0x446   :  { %4893 = vst.msk [vmem:[#allocation2 + $0x38] sm:$0xff] %vm4885_vm11, %v4756_v9  ;;  %3414 = vrot.lane.b32.xlu0 %v10958_v28, %s9335_s0  ;;  %5486 = vrot.lane.b32.xlu1 %v5379_v43, %s9345_s15 }
 0x448   :  { %v5814_v52 = vpop.permute.xlu0 %5813  ;;  %v4949_v34 = vpop.permute.xlu1 %4948  ;;  %8406 = vmatpush3.bf16.msra.mxu1 %v6172_v24 }
 0x449   :  { %5086 = vst.msk [vmem:[#allocation2 + $0x38] sm:$0xff] %vm5078_vm12, %v4949_v34  ;;  %v6003_v34 = vld [vmem:[#allocation2 + $0x20] sm:$0xff] }
 0x44a   :  { %3607 = vrot.lane.b32.xlu0 %v10958_v28, %s9336_s2  ;;  %3416 = vrot.lane.b32.xlu1 %v10981_v58, %s9335_s0 }
 0x44c   :  { %v5477_v45 = vpop.permute.xlu0 %5476  ;;  %v5816_v47 = vpop.permute.xlu1 %5815 }
 0x44d   :  { %5615 = vst.msk [vmem:[#allocation2 + $0x30] sm:$0xff] %vm5608_vm13, %v5477_v45 }
 0x44e   :  { %5952 = vst.msk [vmem:[#allocation2 + $0x30] sm:$0xff] %vm5945_vm14, %v5814_v52  ;;  %3800 = vrot.lane.b32.xlu0 %v10958_v28, %s9337_s23  ;;  %3609 = vrot.lane.b32.xlu1 %v10981_v58, %s9336_s2 }
 0x450   :  { %v5479_v49 = vpop.permute.xlu1 %5478  ;;  %v11668_v12 = vpop.permute.xlu0 %3173 }
 0x451   :  { %14390 = vst [vmem:[#allocation41_spill] sm:$0xff] %v11668_v12  ;;  %5616 = vst.msk [vmem:[#allocation2 + $0x38] sm:$0xff] %vm5608_vm13, %v5479_v49  ;;  %v11673_v41 = vmax.f32 %v11388_v56, %v11668_v12 }
 0x452   :  { %5953 = vst.msk [vmem:[#allocation2 + $0x38] sm:$0xff] %vm5945_vm14, %v5816_v47  ;;  %3993 = vrot.lane.b32.xlu0 %v10958_v28, %s9338_s24  ;;  %3802 = vrot.lane.b32.xlu1 %v10981_v58, %s9337_s23 }
 0x453   :  { %3330 = vst.msk [vmem:[#allocation2 + $0x120] sm:$0xff] %vm3293_vm2, %v11673_v41 }
 0x454   :  { %v11682_v0 = vpop.permute.xlu0 %5247  ;;  %v11684_v43 = vpop.permute.xlu1 %3175 }
 0x455   :  { %14391 = vst [vmem:[#allocation75_spill] sm:$0xff] %v11684_v43  ;;  %v11688_v42 = vmax.f32 %v11403_v10, %v11684_v43  ;;  %v6005_v9 = vld [vmem:[#allocation2 + $0x30] sm:$0xff] }
 0x456   :  { %4186 = vrot.lane.b32.xlu0 %v10958_v28, %s9339_s25  ;;  %3995 = vrot.lane.b32.xlu1 %v10981_v58, %s9338_s24  ;;  %v6007_v45 = vmax.f32 %v6003_v34, %v6005_v9 }
 0x457   :  { %3331 = vst.msk [vmem:[#allocation2 + $0x128] sm:$0xff] %vm3293_vm2, %v11688_v42 }
 0x458   :  { %v3407_v19 = vpop.permute.xlu0 %3406  ;;  %v11696_v52 = vpop.permute.xlu1 %5249 }
 0x459   :  { %14392 = vst [vmem:[#allocation78_spill] sm:$0xff] %v11696_v52  ;;  %v6006_v24 = vld [vmem:[#allocation2 + $0x38] sm:$0xff]  ;;  %3543 = vst.msk [vmem:[#allocation2 + $0x40] sm:$0xff] %vm3534_vm4, %v3407_v19 }
 0x45a   :  { %v6008_v47 = vmax.f32 %v6004_v5, %v6006_v24  ;;  %4379 = vrot.lane.b32.xlu0 %v10958_v28, %s9340_s26  ;;  %4188 = vrot.lane.b32.xlu1 %v10981_v58, %s9339_s25  ;;  %v14394_v24 = vld [vmem:[#allocation84_spill] sm:$0xff]  ;;  %v14399_v52 = vld [vmem:[#allocation86_spill] sm:$0xff] }
 0x45b   :  { %v14400_v56 = vmax.f32 %v14399_v52, 0.0 }
 0x45c   :  { %v3600_v49 = vpop.permute.xlu0 %3599  ;;  %v3409_v10 = vpop.permute.xlu1 %3408  ;;  %v6009_v43 = vpack.c.bf16 %v6008_v47, %v6007_v45  ;;  %v14395_v45 = vmax.f32 %v14394_v24, 0.0 }
 0x45d   :  { %3736 = vst.msk [vmem:[#allocation2 + $0x40] sm:$0xff] %vm3727_vm5, %v3600_v49 }
 0x45e   :  { %3544 = vst.msk [vmem:[#allocation2 + $0x48] sm:$0xff] %vm3534_vm4, %v3409_v10  ;;  %4572 = vrot.lane.b32.xlu0 %v10958_v28, %s9341_s29  ;;  %4381 = vrot.lane.b32.xlu1 %v10981_v58, %s9340_s26 }
 0x45f   :  { %6010 = vst.msk [vmem:[#allocation3 + $0x8] sm:$0xff] %vm6001_vm0, %v6009_v43  ;;  %v14393_v43 = vld [vmem:[#allocation115_spill] sm:$0xff] }
 0x460   :  { %v3793_v9 = vpop.permute.xlu0 %3792  ;;  %v3602_v19 = vpop.permute.xlu1 %3601  ;;  %v5717_v47 = vmax.f32 %v14395_v45, %v14393_v43  ;;  %v14398_v45 = vld [vmem:[#allocation117_spill] sm:$0xff] }
 0x461   :  { %3929 = vst.msk [vmem:[#allocation2 + $0x40] sm:$0xff] %vm3920_vm6, %v3793_v9  ;;  %v5718_v12 = vmax.f32 %v14400_v56, %v14398_v45 }
 0x462   :  { %3737 = vst.msk [vmem:[#allocation2 + $0x48] sm:$0xff] %vm3727_vm5, %v3602_v19  ;;  %4765 = vrot.lane.b32.xlu0 %v10958_v28, %s9342_s30  ;;  %4574 = vrot.lane.b32.xlu1 %v10981_v58, %s9341_s29  ;;  %v14396_v19 = vld [vmem:[#allocation114_spill] sm:$0xff] }
 0x464   :  { %v3986_v10 = vpop.permute.xlu0 %3985  ;;  %v3795_v34 = vpop.permute.xlu1 %3794 }
 0x465   :  { %4122 = vst.msk [vmem:[#allocation2 + $0x40] sm:$0xff] %vm4113_vm7, %v3986_v10  ;;  %v5284_v10 = vsel %vm5271_vm3, %v14396_v19, %v14393_v43  ;;  %v14401_v43 = vld [vmem:[#allocation116_spill] sm:$0xff] }
 0x466   :  { %3930 = vst.msk [vmem:[#allocation2 + $0x48] sm:$0xff] %vm3920_vm6, %v3795_v34  ;;  %v6092_v5 = vld [vmem:[#allocation3 + $0x8] sm:$0xff]  ;;  %4958 = vrot.lane.b32.xlu0 %v10958_v28, %s9343_s12  ;;  %4767 = vrot.lane.b32.xlu1 %v10981_v58, %s9342_s30  ;;  %v14397_v28 = vld [vmem:[#allocation83_spill] sm:$0xff] }
 0x467   :  { %8407 = vmatprep.mubr.msk.bf16.mxu1 %vm6001_vm0, %v6092_v5  ;;  %v5380_v34 = vmax.f32 %v14397_v28, %v5284_v10 }
 0x468   :  { %v4179_v49 = vpop.permute.xlu0 %4178  ;;  %v3988_v9 = vpop.permute.xlu1 %3987 }
 0x469   :  { %4315 = vst.msk [vmem:[#allocation2 + $0x40] sm:$0xff] %vm4306_vm8, %v4179_v49  ;;  %v5285_v49 = vsel %vm5271_vm3, %v14401_v43, %v14398_v45 }
 0x46a   :  { %4123 = vst.msk [vmem:[#allocation2 + $0x48] sm:$0xff] %vm4113_vm7, %v3988_v9  ;;  %5825 = vrot.lane.b32.xlu0 %v5717_v47, %s9344_s14  ;;  %4960 = vrot.lane.b32.xlu1 %v10981_v58, %s9343_s12  ;;  %v14402_v9 = vld [vmem:[#allocation85_spill] sm:$0xff] }
 0x46b   :  { %v5381_v19 = vmax.f32 %v14402_v9, %v5285_v49 }
 0x46c   :  { %v4372_v5 = vpop.permute.xlu0 %4371  ;;  %v4181_v24 = vpop.permute.xlu1 %4180 }
 0x46d   :  { %4508 = vst.msk [vmem:[#allocation2 + $0x40] sm:$0xff] %vm4499_vm9, %v4372_v5 }
 0x46e   :  { %4316 = vst.msk [vmem:[#allocation2 + $0x48] sm:$0xff] %vm4306_vm8, %v4181_v24  ;;  %5488 = vrot.lane.b32.xlu0 %v5380_v34, %s9345_s15  ;;  %5827 = vrot.lane.b32.xlu1 %v5718_v12, %s9344_s14 }
 0x470   :  { %v4565_v58 = vpop.permute.xlu0 %4564  ;;  %v4374_v47 = vpop.permute.xlu1 %4373 }
 0x471   :  { %4701 = vst.msk [vmem:[#allocation2 + $0x40] sm:$0xff] %vm4692_vm10, %v4565_v58 }
 0x472   :  { %4509 = vst.msk [vmem:[#allocation2 + $0x48] sm:$0xff] %vm4499_vm9, %v4374_v47  ;;  %3418 = vrot.lane.b32.xlu0 %v10998_v61, %s9335_s0  ;;  %5490 = vrot.lane.b32.xlu1 %v5381_v19, %s9345_s15 }
 0x474   :  { %v4758_v56 = vpop.permute.xlu0 %4757  ;;  %v4567_v52 = vpop.permute.xlu1 %4566 }
 0x475   :  { %4894 = vst.msk [vmem:[#allocation2 + $0x40] sm:$0xff] %vm4885_vm11, %v4758_v56 }
 0x476   :  { %4702 = vst.msk [vmem:[#allocation2 + $0x48] sm:$0xff] %vm4692_vm10, %v4567_v52  ;;  %3611 = vrot.lane.b32.xlu0 %v10998_v61, %s9336_s2  ;;  %3420 = vrot.lane.b32.xlu1 %v11023_v40, %s9335_s0 }
 0x478   :  { %v4951_v12 = vpop.permute.xlu0 %4950  ;;  %v4760_v10 = vpop.permute.xlu1 %4759 }
 0x479   :  { %5087 = vst.msk [vmem:[#allocation2 + $0x40] sm:$0xff] %vm5078_vm12, %v4951_v12 }
 0x47a   :  { %4895 = vst.msk [vmem:[#allocation2 + $0x48] sm:$0xff] %vm4885_vm11, %v4760_v10  ;;  %3804 = vrot.lane.b32.xlu0 %v10998_v61, %s9337_s23  ;;  %3613 = vrot.lane.b32.xlu1 %v11023_v40, %s9336_s2  ;;  %v14405_v10 = vld [vmem:[#allocation119_spill] sm:$0xff] }
 0x47c   :  { %v5818_v28 = vpop.permute.xlu0 %5817  ;;  %v4953_v34 = vpop.permute.xlu1 %4952 }
 0x47d   :  { %5088 = vst.msk [vmem:[#allocation2 + $0x48] sm:$0xff] %vm5078_vm12, %v4953_v34 }
 0x47e   :  { %3997 = vrot.lane.b32.xlu0 %v10998_v61, %s9338_s24  ;;  %3806 = vrot.lane.b32.xlu1 %v11023_v40, %s9337_s23 }
 0x480   :  { %v5481_v5 = vpop.permute.xlu0 %5480  ;;  %v5820_v24 = vpop.permute.xlu1 %5819 }
 0x481   :  { %5617 = vst.msk [vmem:[#allocation2 + $0x40] sm:$0xff] %vm5608_vm13, %v5481_v5 }
 0x482   :  { %5954 = vst.msk [vmem:[#allocation2 + $0x40] sm:$0xff] %vm5945_vm14, %v5818_v28  ;;  %4190 = vrot.lane.b32.xlu0 %v10998_v61, %s9339_s25  ;;  %3999 = vrot.lane.b32.xlu1 %v11023_v40, %s9338_s24  ;;  %v14406_v28 = vld [vmem:[#allocation88_spill] sm:$0xff] }
 0x483   :  { %v14407_v34 = vmax.f32 %v14406_v28, 0.0 }
 0x484   :  { %v5483_v45 = vpop.permute.xlu1 %5482  ;;  %v11774_v43 = vpop.permute.xlu0 %3177 }
 0x485   :  { %5618 = vst.msk [vmem:[#allocation2 + $0x48] sm:$0xff] %vm5608_vm13, %v5483_v45  ;;  %v11779_v49 = vmax.f32 %v11512_v6, %v11774_v43  ;;  %v5719_v5 = vmax.f32 %v14407_v34, %v14405_v10  ;;  %v14410_v34 = vld [vmem:[#allocation90_spill] sm:$0xff] }
 0x486   :  { %5955 = vst.msk [vmem:[#allocation2 + $0x48] sm:$0xff] %vm5945_vm14, %v5820_v24  ;;  %4383 = vrot.lane.b32.xlu0 %v10998_v61, %s9340_s26  ;;  %4192 = vrot.lane.b32.xlu1 %v11023_v40, %s9339_s25 }
 0x487   :  { %3332 = vst.msk [vmem:[#allocation2 + $0x130] sm:$0xff] %vm3293_vm2, %v11779_v49 }
 0x488   :  { %v11788_v58 = vpop.permute.xlu0 %5251  ;;  %v11790_v47 = vpop.permute.xlu1 %3179 }
 0x489   :  { %14403 = vst [vmem:[#allocation110_spill] sm:$0xff] %v11790_v47  ;;  %v11794_v9 = vmax.f32 %v11527_v39, %v11790_v47  ;;  %v14411_v47 = vmax.f32 %v14410_v34, 0.0 }
 0x48a   :  { %4576 = vrot.lane.b32.xlu0 %v10998_v61, %s9341_s29  ;;  %4385 = vrot.lane.b32.xlu1 %v11023_v40, %s9340_s26 }
 0x48b   :  { %3333 = vst.msk [vmem:[#allocation2 + $0x138] sm:$0xff] %vm3293_vm2, %v11794_v9 }
 0x48c   :  { %v3411_v19 = vpop.permute.xlu0 %3410  ;;  %v11802_v56 = vpop.permute.xlu1 %5253 }
 0x48d   :  { %14404 = vst [vmem:[#allocation42_spill] sm:$0xff] %v11802_v56  ;;  %3545 = vst.msk [vmem:[#allocation2 + $0x50] sm:$0xff] %vm3534_vm4, %v3411_v19  ;;  %v14408_v19 = vld [vmem:[#allocation118_spill] sm:$0xff]  ;;  %v5720_v56 = vmax.f32 %v14411_v47, %v11042_v59 }
 0x48e   :  { %4769 = vrot.lane.b32.xlu0 %v10998_v61, %s9342_s30  ;;  %4578 = vrot.lane.b32.xlu1 %v11023_v40, %s9341_s29  ;;  %v5286_v39 = vsel %vm5271_vm3, %v14408_v19, %v14405_v10  ;;  %v14412_v10 = vld [vmem:[#allocation120_spill] sm:$0xff] }
 0x490   :  { %v3604_v52 = vpop.permute.xlu0 %3603  ;;  %v3413_v12 = vpop.permute.xlu1 %3412 }
 0x491   :  { %3738 = vst.msk [vmem:[#allocation2 + $0x50] sm:$0xff] %vm3727_vm5, %v3604_v52 }
 0x492   :  { %3546 = vst.msk [vmem:[#allocation2 + $0x58] sm:$0xff] %vm3534_vm4, %v3413_v12  ;;  %4962 = vrot.lane.b32.xlu0 %v10998_v61, %s9343_s12  ;;  %4771 = vrot.lane.b32.xlu1 %v11023_v40, %s9342_s30  ;;  %v14409_v61 = vld [vmem:[#allocation87_spill] sm:$0xff] }
 0x493   :  { %v5382_v52 = vmax.f32 %v14409_v61, %v5286_v39 }
 0x494   :  { %v3797_v24 = vpop.permute.xlu0 %3796  ;;  %v3606_v45 = vpop.permute.xlu1 %3605 }
 0x495   :  { %3931 = vst.msk [vmem:[#allocation2 + $0x50] sm:$0xff] %vm3920_vm6, %v3797_v24  ;;  %v5287_v24 = vsel %vm5271_vm3, %v14412_v10, %v11042_v59 }
 0x496   :  { %3739 = vst.msk [vmem:[#allocation2 + $0x58] sm:$0xff] %vm3727_vm5, %v3606_v45  ;;  %5829 = vrot.lane.b32.xlu0 %v5719_v5, %s9344_s14  ;;  %4964 = vrot.lane.b32.xlu1 %v11023_v40, %s9343_s12  ;;  %v14413_v5 = vld [vmem:[#allocation89_spill] sm:$0xff] }
 0x497   :  { %v5383_v45 = vmax.f32 %v14413_v5, %v5287_v24 }
 0x498   :  { %v3990_v12 = vpop.permute.xlu0 %3989  ;;  %v3799_v28 = vpop.permute.xlu1 %3798 }
 0x499   :  { %4124 = vst.msk [vmem:[#allocation2 + $0x50] sm:$0xff] %vm4113_vm7, %v3990_v12 }
 0x49a   :  { %3932 = vst.msk [vmem:[#allocation2 + $0x58] sm:$0xff] %vm3920_vm6, %v3799_v28  ;;  %5492 = vrot.lane.b32.xlu0 %v5382_v52, %s9345_s15  ;;  %5831 = vrot.lane.b32.xlu1 %v5720_v56, %s9344_s14 }
 0x49c   :  { %v4183_v40 = vpop.permute.xlu0 %4182  ;;  %v3992_v39 = vpop.permute.xlu1 %3991 }
 0x49d   :  { %4317 = vst.msk [vmem:[#allocation2 + $0x50] sm:$0xff] %vm4306_vm8, %v4183_v40 }
 0x49e   :  { %4125 = vst.msk [vmem:[#allocation2 + $0x58] sm:$0xff] %vm4113_vm7, %v3992_v39  ;;  %3422 = vrot.lane.b32.xlu0 %v11048_v8, %s9335_s0  ;;  %5494 = vrot.lane.b32.xlu1 %v5383_v45, %s9345_s15 }
 0x4a0   :  { %v4376_v47 = vpop.permute.xlu0 %4375  ;;  %v4185_v19 = vpop.permute.xlu1 %4184 }
 0x4a1   :  { %4510 = vst.msk [vmem:[#allocation2 + $0x50] sm:$0xff] %vm4499_vm9, %v4376_v47 }
 0x4a2   :  { %4318 = vst.msk [vmem:[#allocation2 + $0x58] sm:$0xff] %vm4306_vm8, %v4185_v19  ;;  %3615 = vrot.lane.b32.xlu0 %v11048_v8, %s9336_s2  ;;  %3424 = vrot.lane.b32.xlu1 %v11078_v25, %s9335_s0 }
 0x4a4   :  { %v4569_v59 = vpop.permute.xlu0 %4568  ;;  %v4378_v56 = vpop.permute.xlu1 %4377 }
 0x4a5   :  { %4703 = vst.msk [vmem:[#allocation2 + $0x50] sm:$0xff] %vm4692_vm10, %v4569_v59  ;;  %v14414_v59 = vld [vmem:[#allocation92_spill] sm:$0xff] }
 0x4a6   :  { %4511 = vst.msk [vmem:[#allocation2 + $0x58] sm:$0xff] %vm4499_vm9, %v4378_v56  ;;  %3808 = vrot.lane.b32.xlu0 %v11048_v8, %s9337_s23  ;;  %3617 = vrot.lane.b32.xlu1 %v11078_v25, %s9336_s2  ;;  %v14415_v56 = vmax.f32 %v14414_v59, 0.0 }
 0x4a8   :  { %v4762_v61 = vpop.permute.xlu0 %4761  ;;  %v4571_v52 = vpop.permute.xlu1 %4570 }
 0x4a9   :  { %4896 = vst.msk [vmem:[#allocation2 + $0x50] sm:$0xff] %vm4885_vm11, %v4762_v61  ;;  %v5721_v61 = vmax.f32 %v14415_v56, %v11072_v26 }
 0x4aa   :  { %4704 = vst.msk [vmem:[#allocation2 + $0x58] sm:$0xff] %vm4692_vm10, %v4571_v52  ;;  %4001 = vrot.lane.b32.xlu0 %v11048_v8, %s9338_s24  ;;  %3810 = vrot.lane.b32.xlu1 %v11078_v25, %s9337_s23 }
 0x4ac   :  { %v4955_v12 = vpop.permute.xlu0 %4954  ;;  %v4764_v28 = vpop.permute.xlu1 %4763 }
 0x4ad   :  { %5089 = vst.msk [vmem:[#allocation2 + $0x50] sm:$0xff] %vm5078_vm12, %v4955_v12 }
 0x4ae   :  { %4897 = vst.msk [vmem:[#allocation2 + $0x58] sm:$0xff] %vm4885_vm11, %v4764_v28  ;;  %4194 = vrot.lane.b32.xlu0 %v11048_v8, %s9339_s25  ;;  %4003 = vrot.lane.b32.xlu1 %v11078_v25, %s9338_s24  ;;  %v14416_v28 = vld [vmem:[#allocation122_spill] sm:$0xff] }
 0x4b0   :  { %v5822_v34 = vpop.permute.xlu0 %5821  ;;  %v4957_v10 = vpop.permute.xlu1 %4956 }
 0x4b1   :  { %5090 = vst.msk [vmem:[#allocation2 + $0x58] sm:$0xff] %vm5078_vm12, %v4957_v10  ;;  %v6011_v10 = vld [vmem:[#allocation2 + $0x40] sm:$0xff] }
 0x4b2   :  { %4387 = vrot.lane.b32.xlu0 %v11048_v8, %s9340_s26  ;;  %4196 = vrot.lane.b32.xlu1 %v11078_v25, %s9339_s25 }
 0x4b4   :  { %v5485_v24 = vpop.permute.xlu0 %5484  ;;  %v5824_v40 = vpop.permute.xlu1 %5823 }
 0x4b5   :  { %5619 = vst.msk [vmem:[#allocation2 + $0x50] sm:$0xff] %vm5608_vm13, %v5485_v24  ;;  %v6012_v24 = vld [vmem:[#allocation2 + $0x48] sm:$0xff] }
 0x4b6   :  { %5956 = vst.msk [vmem:[#allocation2 + $0x50] sm:$0xff] %vm5945_vm14, %v5822_v34  ;;  %4580 = vrot.lane.b32.xlu0 %v11048_v8, %s9341_s29  ;;  %4389 = vrot.lane.b32.xlu1 %v11078_v25, %s9340_s26  ;;  %v5288_v34 = vsel %vm5271_vm3, %v14416_v28, %v11072_v26  ;;  %v14418_v26 = vld [vmem:[#allocation93_spill] sm:$0xff] }
 0x4b7   :  { %v14419_v28 = vmax.f32 %v14418_v26, 0.0 }
 0x4b8   :  { %v3415_v39 = vpop.permute.xlu0 %3414  ;;  %v5487_v5 = vpop.permute.xlu1 %5486 }
 0x4b9   :  { %3547 = vst.msk [vmem:[#allocation2 + $0x60] sm:$0xff] %vm3534_vm4, %v3415_v39  ;;  %v5722_v6 = vmax.f32 %v14419_v28, %v11088_v15  ;;  %v14420_v28 = vld [vmem:[#allocation94_spill] sm:$0xff] }
 0x4ba   :  { %5620 = vst.msk [vmem:[#allocation2 + $0x58] sm:$0xff] %vm5608_vm13, %v5487_v5  ;;  %4773 = vrot.lane.b32.xlu0 %v11048_v8, %s9342_s30  ;;  %4582 = vrot.lane.b32.xlu1 %v11078_v25, %s9341_s29  ;;  %v14417_v5 = vld [vmem:[#allocation91_spill] sm:$0xff] }
 0x4bb   :  { %5957 = vst.msk [vmem:[#allocation2 + $0x58] sm:$0xff] %vm5945_vm14, %v5824_v40 }
 0x4bc   :  { %v3608_v45 = vpop.permute.xlu0 %3607  ;;  %v3417_v47 = vpop.permute.xlu1 %3416 }
 0x4bd   :  { %3740 = vst.msk [vmem:[#allocation2 + $0x60] sm:$0xff] %vm3727_vm5, %v3608_v45  ;;  %v6013_v19 = vld [vmem:[#allocation2 + $0x50] sm:$0xff]  ;;  %v5384_v45 = vmax.f32 %v14417_v5, %v5288_v34 }
 0x4be   :  { %3548 = vst.msk [vmem:[#allocation2 + $0x68] sm:$0xff] %vm3534_vm4, %v3417_v47  ;;  %4966 = vrot.lane.b32.xlu0 %v11048_v8, %s9343_s12  ;;  %4775 = vrot.lane.b32.xlu1 %v11078_v25, %s9342_s30  ;;  %v6015_v8 = vmax.f32 %v6011_v10, %v6013_v19  ;;  %v5289_v19 = vsel %vm5271_vm3, %v11074_v31, %v11088_v15 }
 0x4c0   :  { %v3801_v52 = vpop.permute.xlu0 %3800  ;;  %v3610_v12 = vpop.permute.xlu1 %3609 }
 0x4c1   :  { %3933 = vst.msk [vmem:[#allocation2 + $0x60] sm:$0xff] %vm3920_vm6, %v3801_v52  ;;  %v5385_v52 = vmax.f32 %v10515_v13, %v5289_v19  ;;  %v14421_v19 = vmax.f32 %v14420_v28, 0.0 }
 0x4c2   :  { %v6014_v40 = vld [vmem:[#allocation2 + $0x58] sm:$0xff]  ;;  %3741 = vst.msk [vmem:[#allocation2 + $0x68] sm:$0xff] %vm3727_vm5, %v3610_v12  ;;  %5833 = vrot.lane.b32.xlu0 %v5721_v61, %s9344_s14  ;;  %4968 = vrot.lane.b32.xlu1 %v11078_v25, %s9343_s12 }
 0x4c3   :  { %v6016_v39 = vmax.f32 %v6012_v24, %v6014_v40 }
 0x4c4   :  { %v3994_v59 = vpop.permute.xlu0 %3993  ;;  %v3803_v56 = vpop.permute.xlu1 %3802 }
 0x4c5   :  { %v6017_v47 = vpack.c.bf16 %v6016_v39, %v6015_v8  ;;  %4126 = vst.msk [vmem:[#allocation2 + $0x60] sm:$0xff] %vm4113_vm7, %v3994_v59 }
 0x4c6   :  { %3934 = vst.msk [vmem:[#allocation2 + $0x68] sm:$0xff] %vm3920_vm6, %v3803_v56  ;;  %5496 = vrot.lane.b32.xlu0 %v5384_v45, %s9345_s15  ;;  %5835 = vrot.lane.b32.xlu1 %v5722_v6, %s9344_s14 }
 0x4c7   :  { %6018 = vst.msk [vmem:[#allocation3 + $0x10] sm:$0xff] %vm6001_vm0, %v6017_v47 }
 0x4c8   :  { %v4187_v25 = vpop.permute.xlu0 %4186  ;;  %v3996_v61 = vpop.permute.xlu1 %3995 }
 0x4c9   :  { %4319 = vst.msk [vmem:[#allocation2 + $0x60] sm:$0xff] %vm4306_vm8, %v4187_v25  ;;  %v5723_v25 = vmax.f32 %v14421_v19, %v11103_v1 }
 0x4ca   :  { %4127 = vst.msk [vmem:[#allocation2 + $0x68] sm:$0xff] %vm4113_vm7, %v3996_v61  ;;  %3426 = vrot.lane.b32.xlu0 %v11094_v51, %s9335_s0  ;;  %5498 = vrot.lane.b32.xlu1 %v5385_v52, %s9345_s15  ;;  %v5290_v52 = vsel %vm5271_vm3, %v11090_v55, %v11103_v1  ;;  %v14424_v1 = vld [vmem:[#allocation125_spill] sm:$0xff] }
 0x4cc   :  { %v4380_v31 = vpop.permute.xlu0 %4379  ;;  %v4189_v15 = vpop.permute.xlu1 %4188 }
 0x4cd   :  { %4512 = vst.msk [vmem:[#allocation2 + $0x60] sm:$0xff] %vm4499_vm9, %v4380_v31 }
 0x4ce   :  { %4320 = vst.msk [vmem:[#allocation2 + $0x68] sm:$0xff] %vm4306_vm8, %v4189_v15  ;;  %v6093_v6 = vld [vmem:[#allocation3 + $0x10] sm:$0xff]  ;;  %3619 = vrot.lane.b32.xlu0 %v11094_v51, %s9336_s2  ;;  %3428 = vrot.lane.b32.xlu1 %v11109_v50, %s9335_s0 }
 0x4cf   :  { %8408 = vmatmul.mubr.msk.bf16.vlgmr.msra.gmra.mrb[96].mxu1 %vm6001_vm0, %v6093_v6  ;;  %v14422_v6 = vld [vmem:[#allocation96_spill] sm:$0xff] }
 0x4d0   :  { %v4573_v13 = vpop.permute.xlu0 %4572  ;;  %v4382_v12 = vpop.permute.xlu1 %4381 }
 0x4d1   :  { %4705 = vst.msk [vmem:[#allocation2 + $0x60] sm:$0xff] %vm4692_vm10, %v4573_v13  ;;  %v14423_v13 = vmax.f32 %v14422_v6, 0.0 }
 0x4d2   :  { %4513 = vst.msk [vmem:[#allocation2 + $0x68] sm:$0xff] %vm4499_vm9, %v4382_v12  ;;  %3812 = vrot.lane.b32.xlu0 %v11094_v51, %s9337_s23  ;;  %3621 = vrot.lane.b32.xlu1 %v11109_v50, %s9336_s2 }
 0x4d3   :  { %v5724_v12 = vmax.f32 %v14423_v13, %v11117_v54 }
 0x4d4   :  { %v4766_v34 = vpop.permute.xlu0 %4765  ;;  %v4575_v10 = vpop.permute.xlu1 %4574 }
 0x4d5   :  { %4898 = vst.msk [vmem:[#allocation2 + $0x60] sm:$0xff] %vm4885_vm11, %v4766_v34  ;;  %v5291_v34 = vsel %vm5271_vm3, %v14424_v1, %v11117_v54  ;;  %v14429_v1 = vld [vmem:[#allocation126_spill] sm:$0xff] }
 0x4d6   :  { %4706 = vst.msk [vmem:[#allocation2 + $0x68] sm:$0xff] %vm4692_vm10, %v4575_v10  ;;  %4005 = vrot.lane.b32.xlu0 %v11094_v51, %s9338_s24  ;;  %3814 = vrot.lane.b32.xlu1 %v11109_v50, %s9337_s23 }
 0x4d8   :  { %v4959_v24 = vpop.permute.xlu0 %4958  ;;  %v4768_v40 = vpop.permute.xlu1 %4767 }
 0x4d9   :  { %5091 = vst.msk [vmem:[#allocation2 + $0x60] sm:$0xff] %vm5078_vm12, %v4959_v24 }
 0x4da   :  { %4899 = vst.msk [vmem:[#allocation2 + $0x68] sm:$0xff] %vm4885_vm11, %v4768_v40  ;;  %4198 = vrot.lane.b32.xlu0 %v11094_v51, %s9339_s25  ;;  %4007 = vrot.lane.b32.xlu1 %v11109_v50, %s9338_s24 }
 0x4dc   :  { %v5826_v8 = vpop.permute.xlu0 %5825  ;;  %v4961_v39 = vpop.permute.xlu1 %4960 }
 0x4dd   :  { %5092 = vst.msk [vmem:[#allocation2 + $0x68] sm:$0xff] %vm5078_vm12, %v4961_v39 }
 0x4de   :  { %4391 = vrot.lane.b32.xlu0 %v11094_v51, %s9340_s26  ;;  %4200 = vrot.lane.b32.xlu1 %v11109_v50, %s9339_s25 }
 0x4e0   :  { %v5489_v5 = vpop.permute.xlu0 %5488  ;;  %v5828_v45 = vpop.permute.xlu1 %5827 }
 0x4e1   :  { %5621 = vst.msk [vmem:[#allocation2 + $0x60] sm:$0xff] %vm5608_vm13, %v5489_v5 }
 0x4e2   :  { %5958 = vst.msk [vmem:[#allocation2 + $0x60] sm:$0xff] %vm5945_vm14, %v5826_v8  ;;  %4584 = vrot.lane.b32.xlu0 %v11094_v51, %s9341_s29  ;;  %4393 = vrot.lane.b32.xlu1 %v11109_v50, %s9340_s26 }
 0x4e4   :  { %v3419_v47 = vpop.permute.xlu0 %3418  ;;  %v5491_v59 = vpop.permute.xlu1 %5490 }
 0x4e5   :  { %3549 = vst.msk [vmem:[#allocation2 + $0x70] sm:$0xff] %vm3534_vm4, %v3419_v47 }
 0x4e6   :  { %5622 = vst.msk [vmem:[#allocation2 + $0x68] sm:$0xff] %vm5608_vm13, %v5491_v59  ;;  %4777 = vrot.lane.b32.xlu0 %v11094_v51, %s9342_s30  ;;  %4586 = vrot.lane.b32.xlu1 %v11109_v50, %s9341_s29 }
 0x4e7   :  { %5959 = vst.msk [vmem:[#allocation2 + $0x68] sm:$0xff] %vm5945_vm14, %v5828_v45 }
 0x4e8   :  { %v3612_v56 = vpop.permute.xlu0 %3611  ;;  %v3421_v26 = vpop.permute.xlu1 %3420 }
 0x4e9   :  { %3742 = vst.msk [vmem:[#allocation2 + $0x70] sm:$0xff] %vm3727_vm5, %v3612_v56 }
 0x4ea   :  { %3550 = vst.msk [vmem:[#allocation2 + $0x78] sm:$0xff] %vm3534_vm4, %v3421_v26  ;;  %4970 = vrot.lane.b32.xlu0 %v11094_v51, %s9343_s12  ;;  %4779 = vrot.lane.b32.xlu1 %v11109_v50, %s9342_s30  ;;  %v5386_v51 = vmax.f32 %v10531_v11, %v5290_v52  ;;  %v14425_v11 = vld [vmem:[#allocation95_spill] sm:$0xff] }
 0x4eb   :  { %v5387_v10 = vmax.f32 %v14425_v11, %v5291_v34  ;;  %v6019_v11 = vld [vmem:[#allocation2 + $0x60] sm:$0xff] }
 0x4ec   :  { %v3805_v61 = vpop.permute.xlu0 %3804  ;;  %v3614_v31 = vpop.permute.xlu1 %3613 }
 0x4ed   :  { %3935 = vst.msk [vmem:[#allocation2 + $0x70] sm:$0xff] %vm3920_vm6, %v3805_v61 }
 0x4ee   :  { %3743 = vst.msk [vmem:[#allocation2 + $0x78] sm:$0xff] %vm3727_vm5, %v3614_v31  ;;  %5837 = vrot.lane.b32.xlu0 %v5723_v25, %s9344_s14  ;;  %4972 = vrot.lane.b32.xlu1 %v11109_v50, %s9343_s12 }
 0x4f0   :  { %v3998_v15 = vpop.permute.xlu0 %3997  ;;  %v3807_v55 = vpop.permute.xlu1 %3806 }
 0x4f1   :  { %4128 = vst.msk [vmem:[#allocation2 + $0x70] sm:$0xff] %vm4113_vm7, %v3998_v15  ;;  %v14427_v15 = vld [vmem:[#allocation98_spill] sm:$0xff] }
 0x4f2   :  { %3936 = vst.msk [vmem:[#allocation2 + $0x78] sm:$0xff] %vm3920_vm6, %v3807_v55  ;;  %5500 = vrot.lane.b32.xlu0 %v5386_v51, %s9345_s15  ;;  %5839 = vrot.lane.b32.xlu1 %v5724_v12, %s9344_s14  ;;  %v14426_v51 = vld [vmem:[#allocation127_spill] sm:$0xff]  ;;  %v14428_v6 = vmax.f32 %v14427_v15, 0.0 }
 0x4f3   :  { %v5292_v34 = vsel %vm5271_vm3, %v14429_v1, %v14426_v51 }
 0x4f4   :  { %v4191_v50 = vpop.permute.xlu0 %4190  ;;  %v4000_v24 = vpop.permute.xlu1 %3999  ;;  %v5725_v13 = vmax.f32 %v14428_v6, %v14426_v51 }
 0x4f5   :  { %4321 = vst.msk [vmem:[#allocation2 + $0x70] sm:$0xff] %vm4306_vm8, %v4191_v50 }
 0x4f6   :  { %4129 = vst.msk [vmem:[#allocation2 + $0x78] sm:$0xff] %vm4113_vm7, %v4000_v24  ;;  %3430 = vrot.lane.b32.xlu0 %v11123_v20, %s9335_s0  ;;  %5502 = vrot.lane.b32.xlu1 %v5387_v10, %s9345_s15  ;;  %v6020_v10 = vld [vmem:[#allocation2 + $0x68] sm:$0xff] }
 0x4f8   :  { %v4384_v54 = vpop.permute.xlu0 %4383  ;;  %v4193_v40 = vpop.permute.xlu1 %4192 }
 0x4f9   :  { %4514 = vst.msk [vmem:[#allocation2 + $0x70] sm:$0xff] %vm4499_vm9, %v4384_v54 }
 0x4fa   :  { %4322 = vst.msk [vmem:[#allocation2 + $0x78] sm:$0xff] %vm4306_vm8, %v4193_v40  ;;  %3623 = vrot.lane.b32.xlu0 %v11123_v20, %s9336_s2  ;;  %3432 = vrot.lane.b32.xlu1 %v11137_v3, %s9335_s0  ;;  %v14430_v40 = vld [vmem:[#allocation97_spill] sm:$0xff] }
 0x4fc   :  { %v4577_v8 = vpop.permute.xlu0 %4576  ;;  %v4386_v39 = vpop.permute.xlu1 %4385 }
 0x4fd   :  { %4707 = vst.msk [vmem:[#allocation2 + $0x70] sm:$0xff] %vm4692_vm10, %v4577_v8  ;;  %v5388_v8 = vmax.f32 %v14430_v40, %v5292_v34 }
 0x4fe   :  { %4515 = vst.msk [vmem:[#allocation2 + $0x78] sm:$0xff] %vm4499_vm9, %v4386_v39  ;;  %3816 = vrot.lane.b32.xlu0 %v11123_v20, %s9337_s23  ;;  %3625 = vrot.lane.b32.xlu1 %v11137_v3, %s9336_s2 }
 0x500   :  { %v4770_v5 = vpop.permute.xlu0 %4769  ;;  %v4579_v45 = vpop.permute.xlu1 %4578 }
 0x501   :  { %4900 = vst.msk [vmem:[#allocation2 + $0x70] sm:$0xff] %vm4885_vm11, %v4770_v5  ;;  %v14431_v5 = vld [vmem:[#allocation129_spill] sm:$0xff] }
 0x502   :  { %4708 = vst.msk [vmem:[#allocation2 + $0x78] sm:$0xff] %vm4692_vm10, %v4579_v45  ;;  %4009 = vrot.lane.b32.xlu0 %v11123_v20, %s9338_s24  ;;  %3818 = vrot.lane.b32.xlu1 %v11137_v3, %s9337_s23  ;;  %v14432_v45 = vld [vmem:[#allocation100_spill] sm:$0xff] }
 0x504   :  { %v4963_v47 = vpop.permute.xlu0 %4962  ;;  %v4772_v59 = vpop.permute.xlu1 %4771 }
 0x505   :  { %5093 = vst.msk [vmem:[#allocation2 + $0x70] sm:$0xff] %vm5078_vm12, %v4963_v47  ;;  %v14433_v47 = vmax.f32 %v14432_v45, 0.0 }
 0x506   :  { %4901 = vst.msk [vmem:[#allocation2 + $0x78] sm:$0xff] %vm4885_vm11, %v4772_v59  ;;  %4202 = vrot.lane.b32.xlu0 %v11123_v20, %s9339_s25  ;;  %4011 = vrot.lane.b32.xlu1 %v11137_v3, %s9338_s24 }
 0x507   :  { %v5726_v59 = vmax.f32 %v14433_v47, %v14431_v5 }
 0x508   :  { %v5830_v56 = vpop.permute.xlu0 %5829  ;;  %v4965_v26 = vpop.permute.xlu1 %4964 }
 0x509   :  { %5094 = vst.msk [vmem:[#allocation2 + $0x78] sm:$0xff] %vm5078_vm12, %v4965_v26 }
 0x50a   :  { %4395 = vrot.lane.b32.xlu0 %v11123_v20, %s9340_s26  ;;  %4204 = vrot.lane.b32.xlu1 %v11137_v3, %s9339_s25 }
 0x50c   :  { %v5493_v28 = vpop.permute.xlu0 %5492  ;;  %v5832_v19 = vpop.permute.xlu1 %5831 }
 0x50d   :  { %5623 = vst.msk [vmem:[#allocation2 + $0x70] sm:$0xff] %vm5608_vm13, %v5493_v28  ;;  %v14434_v28 = vld [vmem:[#allocation128_spill] sm:$0xff] }
 0x50e   :  { %5960 = vst.msk [vmem:[#allocation2 + $0x70] sm:$0xff] %vm5945_vm14, %v5830_v56  ;;  %4588 = vrot.lane.b32.xlu0 %v11123_v20, %s9341_s29  ;;  %4397 = vrot.lane.b32.xlu1 %v11137_v3, %s9340_s26 }
 0x510   :  { %v3423_v25 = vpop.permute.xlu0 %3422  ;;  %v5495_v61 = vpop.permute.xlu1 %5494 }
 0x511   :  { %3551 = vst.msk [vmem:[#allocation2 + $0x80] sm:$0xff] %vm3534_vm4, %v3423_v25  ;;  %v14435_v25 = vld [vmem:[#allocation99_spill] sm:$0xff] }
 0x512   :  { %5624 = vst.msk [vmem:[#allocation2 + $0x78] sm:$0xff] %vm5608_vm13, %v5495_v61  ;;  %4781 = vrot.lane.b32.xlu0 %v11123_v20, %s9342_s30  ;;  %4590 = vrot.lane.b32.xlu1 %v11137_v3, %s9341_s29 }
 0x513   :  { %5961 = vst.msk [vmem:[#allocation2 + $0x78] sm:$0xff] %vm5945_vm14, %v5832_v19  ;;  %v5293_v19 = vsel %vm5271_vm3, %v14434_v28, %v14431_v5  ;;  %v14437_v5 = vld [vmem:[#allocation102_spill] sm:$0xff] }
 0x514   :  { %v3616_v52 = vpop.permute.xlu0 %3615  ;;  %v3425_v31 = vpop.permute.xlu1 %3424  ;;  %v5389_v61 = vmax.f32 %v14435_v25, %v5293_v19  ;;  %v14438_v45 = vmax.f32 %v14437_v5, 0.0  ;;  %v14441_v25 = vld [vmem:[#allocation133_spill] sm:$0xff] }
 0x515   :  { %3744 = vst.msk [vmem:[#allocation2 + $0x80] sm:$0xff] %vm3727_vm5, %v3616_v52  ;;  %v6021_v12 = vld [vmem:[#allocation2 + $0x70] sm:$0xff] }
 0x516   :  { %3552 = vst.msk [vmem:[#allocation2 + $0x88] sm:$0xff] %vm3534_vm4, %v3425_v31  ;;  %4974 = vrot.lane.b32.xlu0 %v11123_v20, %s9343_s12  ;;  %4783 = vrot.lane.b32.xlu1 %v11137_v3, %s9342_s30  ;;  %v6023_v20 = vmax.f32 %v6019_v11, %v6021_v12 }
 0x518   :  { %v3809_v55 = vpop.permute.xlu0 %3808  ;;  %v3618_v50 = vpop.permute.xlu1 %3617 }
 0x519   :  { %3937 = vst.msk [vmem:[#allocation2 + $0x80] sm:$0xff] %vm3920_vm6, %v3809_v55 }
 0x51a   :  { %v6022_v24 = vld [vmem:[#allocation2 + $0x78] sm:$0xff]  ;;  %3745 = vst.msk [vmem:[#allocation2 + $0x88] sm:$0xff] %vm3727_vm5, %v3618_v50  ;;  %5841 = vrot.lane.b32.xlu0 %v5725_v13, %s9344_s14  ;;  %4976 = vrot.lane.b32.xlu1 %v11137_v3, %s9343_s12 }
 0x51b   :  { %v6024_v54 = vmax.f32 %v6020_v10, %v6022_v24 }
 0x51c   :  { %v4002_v39 = vpop.permute.xlu0 %4001  ;;  %v3811_v56 = vpop.permute.xlu1 %3810 }
 0x51d   :  { %4130 = vst.msk [vmem:[#allocation2 + $0x80] sm:$0xff] %vm4113_vm7, %v4002_v39  ;;  %v6025_v26 = vpack.c.bf16 %v6024_v54, %v6023_v20  ;;  %v14436_v39 = vld [vmem:[#allocation131_spill] sm:$0xff] }
 0x51e   :  { %3938 = vst.msk [vmem:[#allocation2 + $0x88] sm:$0xff] %vm3920_vm6, %v3811_v56  ;;  %5504 = vrot.lane.b32.xlu0 %v5388_v8, %s9345_s15  ;;  %5843 = vrot.lane.b32.xlu1 %v5726_v59, %s9344_s14  ;;  %v5727_v47 = vmax.f32 %v14438_v45, %v14436_v39  ;;  %v14439_v56 = vld [vmem:[#allocation130_spill] sm:$0xff] }
 0x51f   :  { %6026 = vst.msk [vmem:[#allocation3 + $0x18] sm:$0xff] %vm6001_vm0, %v6025_v26  ;;  %v5294_v26 = vsel %vm5271_vm3, %v14439_v56, %v14436_v39 }
 0x520   :  { %v4195_v3 = vpop.permute.xlu0 %4194  ;;  %v4004_v52 = vpop.permute.xlu1 %4003 }
 0x521   :  { %4323 = vst.msk [vmem:[#allocation2 + $0x80] sm:$0xff] %vm4306_vm8, %v4195_v3 }
 0x522   :  { %4131 = vst.msk [vmem:[#allocation2 + $0x88] sm:$0xff] %vm4113_vm7, %v4004_v52  ;;  %3434 = vrot.lane.b32.xlu0 %v11151_v63, %s9335_s0  ;;  %5506 = vrot.lane.b32.xlu1 %v5389_v61, %s9345_s15  ;;  %v14442_v61 = vld [vmem:[#allocation104_spill] sm:$0xff] }
 0x523   :  { %v14443_v52 = vmax.f32 %v14442_v61, 0.0 }
 0x524   :  { %v4388_v31 = vpop.permute.xlu0 %4387  ;;  %v4197_v51 = vpop.permute.xlu1 %4196 }
 0x525   :  { %4516 = vst.msk [vmem:[#allocation2 + $0x80] sm:$0xff] %vm4499_vm9, %v4388_v31  ;;  %v5728_v31 = vmax.f32 %v14443_v52, %v14441_v25  ;;  %v14450_v52 = vld [vmem:[#allocation134_spill] sm:$0xff] }
 0x526   :  { %4324 = vst.msk [vmem:[#allocation2 + $0x88] sm:$0xff] %vm4306_vm8, %v4197_v51  ;;  %3627 = vrot.lane.b32.xlu0 %v11151_v63, %s9336_s2  ;;  %v6094_v15 = vld [vmem:[#allocation3 + $0x18] sm:$0xff]  ;;  %3436 = vrot.lane.b32.xlu1 %v11165_v16, %s9335_s0 }
 0x527   :  { %8411 = vmatprep.mubr.msk.bf16.mxu1 %vm6001_vm0, %v6094_v15  ;;  %v14444_v15 = vld [vmem:[#allocation132_spill] sm:$0xff] }
 0x528   :  { %v4581_v6 = vpop.permute.xlu0 %4580  ;;  %v4390_v13 = vpop.permute.xlu1 %4389 }
 0x529   :  { %4709 = vst.msk [vmem:[#allocation2 + $0x80] sm:$0xff] %vm4692_vm10, %v4581_v6  ;;  %v5295_v6 = vsel %vm5271_vm3, %v14444_v15, %v14441_v25 }
 0x52a   :  { %4517 = vst.msk [vmem:[#allocation2 + $0x88] sm:$0xff] %vm4499_vm9, %v4390_v13  ;;  %3820 = vrot.lane.b32.xlu0 %v11151_v63, %s9337_s23  ;;  %3629 = vrot.lane.b32.xlu1 %v11165_v16, %s9336_s2  ;;  %v14445_v13 = vld [vmem:[#allocation103_spill] sm:$0xff] }
 0x52c   :  { %v4774_v12 = vpop.permute.xlu0 %4773  ;;  %v4583_v55 = vpop.permute.xlu1 %4582 }
 0x52d   :  { %4902 = vst.msk [vmem:[#allocation2 + $0x80] sm:$0xff] %vm4885_vm11, %v4774_v12  ;;  %v5391_v12 = vmax.f32 %v14445_v13, %v5295_v6 }
 0x52e   :  { %4710 = vst.msk [vmem:[#allocation2 + $0x88] sm:$0xff] %vm4692_vm10, %v4583_v55  ;;  %4013 = vrot.lane.b32.xlu0 %v11151_v63, %s9338_s24  ;;  %3822 = vrot.lane.b32.xlu1 %v11165_v16, %s9337_s23 }
 0x530   :  { %v4967_v1 = vpop.permute.xlu0 %4966  ;;  %v4776_v34 = vpop.permute.xlu1 %4775 }
 0x531   :  { %5095 = vst.msk [vmem:[#allocation2 + $0x80] sm:$0xff] %vm5078_vm12, %v4967_v1 }
 0x532   :  { %4903 = vst.msk [vmem:[#allocation2 + $0x88] sm:$0xff] %vm4885_vm11, %v4776_v34  ;;  %4206 = vrot.lane.b32.xlu0 %v11151_v63, %s9339_s25  ;;  %4015 = vrot.lane.b32.xlu1 %v11165_v16, %s9338_s24 }
 0x534   :  { %v5834_v50 = vpop.permute.xlu0 %5833  ;;  %v4969_v11 = vpop.permute.xlu1 %4968 }
 0x535   :  { %5096 = vst.msk [vmem:[#allocation2 + $0x88] sm:$0xff] %vm5078_vm12, %v4969_v11 }
 0x536   :  { %4399 = vrot.lane.b32.xlu0 %v11151_v63, %s9340_s26  ;;  %4208 = vrot.lane.b32.xlu1 %v11165_v16, %s9339_s25 }
 0x538   :  { %v5497_v10 = vpop.permute.xlu0 %5496  ;;  %v5836_v24 = vpop.permute.xlu1 %5835 }
 0x539   :  { %5625 = vst.msk [vmem:[#allocation2 + $0x80] sm:$0xff] %vm5608_vm13, %v5497_v10 }
 0x53a   :  { %5962 = vst.msk [vmem:[#allocation2 + $0x80] sm:$0xff] %vm5945_vm14, %v5834_v50  ;;  %4592 = vrot.lane.b32.xlu0 %v11151_v63, %s9341_s29  ;;  %4401 = vrot.lane.b32.xlu1 %v11165_v16, %s9340_s26  ;;  %v14446_v50 = vld [vmem:[#allocation137_spill] sm:$0xff] }
 0x53c   :  { %v3427_v20 = vpop.permute.xlu0 %3426  ;;  %v5499_v54 = vpop.permute.xlu1 %5498 }
 0x53d   :  { %3553 = vst.msk [vmem:[#allocation2 + $0x90] sm:$0xff] %vm3534_vm4, %v3427_v20 }
 0x53e   :  { %5626 = vst.msk [vmem:[#allocation2 + $0x88] sm:$0xff] %vm5608_vm13, %v5499_v54  ;;  %4785 = vrot.lane.b32.xlu0 %v11151_v63, %s9342_s30  ;;  %4594 = vrot.lane.b32.xlu1 %v11165_v16, %s9341_s29 }
 0x53f   :  { %5963 = vst.msk [vmem:[#allocation2 + $0x88] sm:$0xff] %vm5945_vm14, %v5836_v24 }
 0x540   :  { %v3620_v40 = vpop.permute.xlu0 %3619  ;;  %v3429_v8 = vpop.permute.xlu1 %3428 }
 0x541   :  { %3746 = vst.msk [vmem:[#allocation2 + $0x90] sm:$0xff] %vm3727_vm5, %v3620_v40  ;;  %v6027_v15 = vld [vmem:[#allocation2 + $0x80] sm:$0xff] }
 0x542   :  { %3554 = vst.msk [vmem:[#allocation2 + $0x98] sm:$0xff] %vm3534_vm4, %v3429_v8  ;;  %4978 = vrot.lane.b32.xlu0 %v11151_v63, %s9343_s12  ;;  %4787 = vrot.lane.b32.xlu1 %v11165_v16, %s9342_s30  ;;  %v14440_v63 = vld [vmem:[#allocation101_spill] sm:$0xff] }
 0x543   :  { %v5390_v19 = vmax.f32 %v14440_v63, %v5294_v26  ;;  %v14448_v63 = vld [vmem:[#allocation14_spill] sm:$0xff] }
 0x544   :  { %v3813_v59 = vpop.permute.xlu0 %3812  ;;  %v3622_v28 = vpop.permute.xlu1 %3621 }
 0x545   :  { %3939 = vst.msk [vmem:[#allocation2 + $0x90] sm:$0xff] %vm3920_vm6, %v3813_v59 }
 0x546   :  { %3747 = vst.msk [vmem:[#allocation2 + $0x98] sm:$0xff] %vm3727_vm5, %v3622_v28  ;;  %5845 = vrot.lane.b32.xlu0 %v5727_v47, %s9344_s14  ;;  %4980 = vrot.lane.b32.xlu1 %v11165_v16, %s9343_s12  ;;  %v14447_v28 = vld [vmem:[#allocation135_spill] sm:$0xff]  ;;  %v6028_v6 = vld [vmem:[#allocation2 + $0x88] sm:$0xff] }
 0x548   :  { %v4006_v3 = vpop.permute.xlu0 %4005  ;;  %v3815_v51 = vpop.permute.xlu1 %3814 }
 0x549   :  { %4132 = vst.msk [vmem:[#allocation2 + $0x90] sm:$0xff] %vm4113_vm7, %v4006_v3 }
 0x54a   :  { %3940 = vst.msk [vmem:[#allocation2 + $0x98] sm:$0xff] %vm3920_vm6, %v3815_v51  ;;  %5508 = vrot.lane.b32.xlu0 %v5390_v19, %s9345_s15  ;;  %5847 = vrot.lane.b32.xlu1 %v5728_v31, %s9344_s14  ;;  %v14449_v19 = vmax.f32 %v14448_v63, 0.0  ;;  %v5296_v31 = vsel %vm5271_vm3, %v14450_v52, %v14447_v28 }
 0x54c   :  { %v4199_v16 = vpop.permute.xlu0 %4198  ;;  %v4008_v55 = vpop.permute.xlu1 %4007  ;;  %v5729_v3 = vmax.f32 %v14449_v19, %v14447_v28 }
 0x54d   :  { %4325 = vst.msk [vmem:[#allocation2 + $0x90] sm:$0xff] %vm4306_vm8, %v4199_v16 }
 0x54e   :  { %4133 = vst.msk [vmem:[#allocation2 + $0x98] sm:$0xff] %vm4113_vm7, %v4008_v55  ;;  %3438 = vrot.lane.b32.xlu0 %v11179_v23, %s9335_s0  ;;  %5510 = vrot.lane.b32.xlu1 %v5391_v12, %s9345_s15  ;;  %v14451_v12 = vld [vmem:[#allocation13_spill] sm:$0xff] }
 0x54f   :  { %v5392_v55 = vmax.f32 %v14451_v12, %v5296_v31 }
 0x550   :  { %v4392_v1 = vpop.permute.xlu0 %4391  ;;  %v4201_v34 = vpop.permute.xlu1 %4200 }
 0x551   :  { %4518 = vst.msk [vmem:[#allocation2 + $0x90] sm:$0xff] %vm4499_vm9, %v4392_v1 }
 0x552   :  { %4326 = vst.msk [vmem:[#allocation2 + $0x98] sm:$0xff] %vm4306_vm8, %v4201_v34  ;;  %3631 = vrot.lane.b32.xlu0 %v11179_v23, %s9336_s2  ;;  %3440 = vrot.lane.b32.xlu1 %v14446_v50, %s9335_s0  ;;  %v14452_v34 = vld [vmem:[#allocation138_spill] sm:$0xff] }
 0x554   :  { %v4585_v11 = vpop.permute.xlu0 %4584  ;;  %v4394_v10 = vpop.permute.xlu1 %4393 }
 0x555   :  { %4711 = vst.msk [vmem:[#allocation2 + $0x90] sm:$0xff] %vm4692_vm10, %v4585_v11  ;;  %v14453_v11 = vld [vmem:[#allocation16_spill] sm:$0xff] }
 0x556   :  { %4519 = vst.msk [vmem:[#allocation2 + $0x98] sm:$0xff] %vm4499_vm9, %v4394_v10  ;;  %3824 = vrot.lane.b32.xlu0 %v11179_v23, %s9337_s23  ;;  %3633 = vrot.lane.b32.xlu1 %v14446_v50, %s9336_s2  ;;  %v14454_v10 = vmax.f32 %v14453_v11, 0.0 }
 0x558   :  { %v4778_v24 = vpop.permute.xlu0 %4777  ;;  %v4587_v20 = vpop.permute.xlu1 %4586 }
 0x559   :  { %4904 = vst.msk [vmem:[#allocation2 + $0x90] sm:$0xff] %vm4885_vm11, %v4778_v24  ;;  %v5730_v24 = vmax.f32 %v14454_v10, %v14452_v34 }
 0x55a   :  { %4712 = vst.msk [vmem:[#allocation2 + $0x98] sm:$0xff] %vm4692_vm10, %v4587_v20  ;;  %4017 = vrot.lane.b32.xlu0 %v11179_v23, %s9338_s24  ;;  %3826 = vrot.lane.b32.xlu1 %v14446_v50, %s9337_s23 }
 0x55c   :  { %v4971_v54 = vpop.permute.xlu0 %4970  ;;  %v4780_v40 = vpop.permute.xlu1 %4779 }
 0x55d   :  { %5097 = vst.msk [vmem:[#allocation2 + $0x90] sm:$0xff] %vm5078_vm12, %v4971_v54 }
 0x55e   :  { %4905 = vst.msk [vmem:[#allocation2 + $0x98] sm:$0xff] %vm4885_vm11, %v4780_v40  ;;  %4210 = vrot.lane.b32.xlu0 %v11179_v23, %s9339_s25  ;;  %4019 = vrot.lane.b32.xlu1 %v14446_v50, %s9338_s24  ;;  %v14455_v40 = vld [vmem:[#allocation136_spill] sm:$0xff] }
 0x560   :  { %v5838_v8 = vpop.permute.xlu0 %5837  ;;  %v4973_v39 = vpop.permute.xlu1 %4972 }
 0x561   :  { %5098 = vst.msk [vmem:[#allocation2 + $0x98] sm:$0xff] %vm5078_vm12, %v4973_v39  ;;  %v14456_v39 = vld [vmem:[#allocation15_spill] sm:$0xff] }
 0x562   :  { %4403 = vrot.lane.b32.xlu0 %v11179_v23, %s9340_s26  ;;  %4212 = vrot.lane.b32.xlu1 %v14446_v50, %s9339_s25 }
 0x564   :  { %v5501_v5 = vpop.permute.xlu0 %5500  ;;  %v5840_v45 = vpop.permute.xlu1 %5839 }
 0x565   :  { %5627 = vst.msk [vmem:[#allocation2 + $0x90] sm:$0xff] %vm5608_vm13, %v5501_v5 }
 0x566   :  { %5964 = vst.msk [vmem:[#allocation2 + $0x90] sm:$0xff] %vm5945_vm14, %v5838_v8  ;;  %4596 = vrot.lane.b32.xlu0 %v11179_v23, %s9341_s29  ;;  %4405 = vrot.lane.b32.xlu1 %v14446_v50, %s9340_s26  ;;  %v5297_v8 = vsel %vm5271_vm3, %v14455_v40, %v14452_v34  ;;  %v5298_v34 = vsel %vm5271_vm3, %v11203_v37, %v11218_v62  ;;  %v14462_v37 = vld [vmem:[#allocation139_spill] sm:$0xff] }
 0x567   :  { %v5393_v5 = vmax.f32 %v14456_v39, %v5297_v8  ;;  %v5299_v8 = vsel %vm5271_vm3, %v14462_v37, %v11240_v33  ;;  %v5301_v37 = vsel %vm5271_vm3, %v11266_v57, %v11284_v29 }
 0x568   :  { %v3431_v47 = vpop.permute.xlu0 %3430  ;;  %v5503_v59 = vpop.permute.xlu1 %5502 }
 0x569   :  { %3555 = vst.msk [vmem:[#allocation2 + $0xa0] sm:$0xff] %vm3534_vm4, %v3431_v47 }
 0x56a   :  { %5628 = vst.msk [vmem:[#allocation2 + $0x98] sm:$0xff] %vm5608_vm13, %v5503_v59  ;;  %4789 = vrot.lane.b32.xlu0 %v11179_v23, %s9342_s30  ;;  %4598 = vrot.lane.b32.xlu1 %v14446_v50, %s9341_s29 }
 0x56b   :  { %5965 = vst.msk [vmem:[#allocation2 + $0x98] sm:$0xff] %vm5945_vm14, %v5840_v45 }
 0x56c   :  { %v3624_v56 = vpop.permute.xlu0 %3623  ;;  %v3433_v26 = vpop.permute.xlu1 %3432 }
 0x56d   :  { %3748 = vst.msk [vmem:[#allocation2 + $0xa0] sm:$0xff] %vm3727_vm5, %v3624_v56  ;;  %v6029_v25 = vld [vmem:[#allocation2 + $0x90] sm:$0xff] }
 0x56e   :  { %3556 = vst.msk [vmem:[#allocation2 + $0xa8] sm:$0xff] %vm3534_vm4, %v3433_v26  ;;  %4982 = vrot.lane.b32.xlu0 %v11179_v23, %s9343_s12  ;;  %4791 = vrot.lane.b32.xlu1 %v14446_v50, %s9342_s30  ;;  %v6031_v23 = vmax.f32 %v6027_v15, %v6029_v25 }
 0x570   :  { %v3817_v61 = vpop.permute.xlu0 %3816  ;;  %v3626_v51 = vpop.permute.xlu1 %3625 }
 0x571   :  { %3941 = vst.msk [vmem:[#allocation2 + $0xa0] sm:$0xff] %vm3920_vm6, %v3817_v61 }
 0x572   :  { %v6030_v16 = vld [vmem:[#allocation2 + $0x98] sm:$0xff]  ;;  %3749 = vst.msk [vmem:[#allocation2 + $0xa8] sm:$0xff] %vm3727_vm5, %v3626_v51  ;;  %5849 = vrot.lane.b32.xlu0 %v5729_v3, %s9344_s14  ;;  %4984 = vrot.lane.b32.xlu1 %v14446_v50, %s9343_s12 }
 0x573   :  { %v6032_v13 = vmax.f32 %v6028_v6, %v6030_v16 }
 0x574   :  { %v4010_v1 = vpop.permute.xlu0 %4009  ;;  %v3819_v20 = vpop.permute.xlu1 %3818 }
 0x575   :  { %4134 = vst.msk [vmem:[#allocation2 + $0xa0] sm:$0xff] %vm4113_vm7, %v4010_v1  ;;  %v6033_v54 = vpack.c.bf16 %v6032_v13, %v6031_v23  ;;  %v14457_v13 = vld [vmem:[#allocation18_spill] sm:$0xff] }
 0x576   :  { %3942 = vst.msk [vmem:[#allocation2 + $0xa8] sm:$0xff] %vm3920_vm6, %v3819_v20  ;;  %5512 = vrot.lane.b32.xlu0 %v5392_v55, %s9345_s15  ;;  %5851 = vrot.lane.b32.xlu1 %v5730_v24, %s9344_s14  ;;  %v14458_v12 = vmax.f32 %v14457_v13, 0.0  ;;  %v14460_v20 = vld [vmem:[#allocation20_spill] sm:$0xff] }
 0x577   :  { %6034 = vst.msk [vmem:[#allocation3 + $0x20] sm:$0xff] %vm6001_vm0, %v6033_v54  ;;  %v14461_v54 = vmax.f32 %v14460_v20, 0.0 }
 0x578   :  { %v4203_v50 = vpop.permute.xlu0 %4202  ;;  %v4012_v45 = vpop.permute.xlu1 %4011  ;;  %v5731_v55 = vmax.f32 %v14458_v12, %v11218_v62 }
 0x579   :  { %4327 = vst.msk [vmem:[#allocation2 + $0xa0] sm:$0xff] %vm4306_vm8, %v4203_v50  ;;  %v5732_v40 = vmax.f32 %v14461_v54, %v11240_v33  ;;  %v14463_v50 = vld [vmem:[#allocation19_spill] sm:$0xff] }
 0x57a   :  { %4135 = vst.msk [vmem:[#allocation2 + $0xa8] sm:$0xff] %vm4113_vm7, %v4012_v45  ;;  %3442 = vrot.lane.b32.xlu0 %v11207_v32, %s9335_s0  ;;  %5514 = vrot.lane.b32.xlu1 %v5393_v5, %s9345_s15  ;;  %v5395_v39 = vmax.f32 %v14463_v50, %v5299_v8  ;;  %v14469_v50 = vld [vmem:[#allocation147_spill] sm:$0xff] }
 0x57c   :  { %v4396_v47 = vpop.permute.xlu0 %4395  ;;  %v4205_v59 = vpop.permute.xlu1 %4204 }
 0x57d   :  { %4520 = vst.msk [vmem:[#allocation2 + $0xa0] sm:$0xff] %vm4499_vm9, %v4396_v47 }
 0x57e   :  { %4328 = vst.msk [vmem:[#allocation2 + $0xa8] sm:$0xff] %vm4306_vm8, %v4205_v59  ;;  %3635 = vrot.lane.b32.xlu0 %v11207_v32, %s9336_s2  ;;  %v6095_v56 = vld [vmem:[#allocation3 + $0x20] sm:$0xff]  ;;  %3444 = vrot.lane.b32.xlu1 %v11227_v22, %s9335_s0 }
 0x57f   :  { %8412 = vmatmul.mubr.msk.bf16.gmra.mrb[100].mxu1 %vm6001_vm0, %v6095_v56 }
 0x580   :  { %v4589_v26 = vpop.permute.xlu0 %4588  ;;  %v4398_v28 = vpop.permute.xlu1 %4397 }
 0x581   :  { %4713 = vst.msk [vmem:[#allocation2 + $0xa0] sm:$0xff] %vm4692_vm10, %v4589_v26 }
 0x582   :  { %4521 = vst.msk [vmem:[#allocation2 + $0xa8] sm:$0xff] %vm4499_vm9, %v4398_v28  ;;  %3828 = vrot.lane.b32.xlu0 %v11207_v32, %s9337_s23  ;;  %3637 = vrot.lane.b32.xlu1 %v11227_v22, %s9336_s2 }
 0x584   :  { %v4782_v63 = vpop.permute.xlu0 %4781  ;;  %v4591_v19 = vpop.permute.xlu1 %4590 }
 0x585   :  { %4906 = vst.msk [vmem:[#allocation2 + $0xa0] sm:$0xff] %vm4885_vm11, %v4782_v63 }
 0x586   :  { %4714 = vst.msk [vmem:[#allocation2 + $0xa8] sm:$0xff] %vm4692_vm10, %v4591_v19  ;;  %4021 = vrot.lane.b32.xlu0 %v11207_v32, %s9338_s24  ;;  %3830 = vrot.lane.b32.xlu1 %v11227_v22, %s9337_s23 }
 0x588   :  { %v4975_v3 = vpop.permute.xlu0 %4974  ;;  %v4784_v25 = vpop.permute.xlu1 %4783 }
 0x589   :  { %5099 = vst.msk [vmem:[#allocation2 + $0xa0] sm:$0xff] %vm5078_vm12, %v4975_v3 }
 0x58a   :  { %4907 = vst.msk [vmem:[#allocation2 + $0xa8] sm:$0xff] %vm4885_vm11, %v4784_v25  ;;  %4214 = vrot.lane.b32.xlu0 %v11207_v32, %s9339_s25  ;;  %4023 = vrot.lane.b32.xlu1 %v11227_v22, %s9338_s24 }
 0x58c   :  { %v5842_v61 = vpop.permute.xlu0 %5841  ;;  %v4977_v52 = vpop.permute.xlu1 %4976 }
 0x58d   :  { %5100 = vst.msk [vmem:[#allocation2 + $0xa8] sm:$0xff] %vm5078_vm12, %v4977_v52 }
 0x58e   :  { %4407 = vrot.lane.b32.xlu0 %v11207_v32, %s9340_s26  ;;  %4216 = vrot.lane.b32.xlu1 %v11227_v22, %s9339_s25 }
 0x590   :  { %v5505_v31 = vpop.permute.xlu0 %5504  ;;  %v5844_v51 = vpop.permute.xlu1 %5843 }
 0x591   :  { %5629 = vst.msk [vmem:[#allocation2 + $0xa0] sm:$0xff] %vm5608_vm13, %v5505_v31 }
 0x592   :  { %5966 = vst.msk [vmem:[#allocation2 + $0xa0] sm:$0xff] %vm5945_vm14, %v5842_v61  ;;  %4600 = vrot.lane.b32.xlu0 %v11207_v32, %s9341_s29  ;;  %4409 = vrot.lane.b32.xlu1 %v11227_v22, %s9340_s26 }
 0x594   :  { %v3435_v15 = vpop.permute.xlu0 %3434  ;;  %v5507_v6 = vpop.permute.xlu1 %5506 }
 0x595   :  { %3557 = vst.msk [vmem:[#allocation2 + $0xb0] sm:$0xff] %vm3534_vm4, %v3435_v15 }
 0x596   :  { %5630 = vst.msk [vmem:[#allocation2 + $0xa8] sm:$0xff] %vm5608_vm13, %v5507_v6  ;;  %4793 = vrot.lane.b32.xlu0 %v11207_v32, %s9342_s30  ;;  %4602 = vrot.lane.b32.xlu1 %v11227_v22, %s9341_s29  ;;  %v14464_v6 = vld [vmem:[#allocation21_spill] sm:$0xff] }
 0x597   :  { %5967 = vst.msk [vmem:[#allocation2 + $0xa8] sm:$0xff] %vm5945_vm14, %v5844_v51 }
 0x598   :  { %v3628_v16 = vpop.permute.xlu0 %3627  ;;  %v3437_v23 = vpop.permute.xlu1 %3436 }
 0x599   :  { %3750 = vst.msk [vmem:[#allocation2 + $0xb0] sm:$0xff] %vm3727_vm5, %v3628_v16  ;;  %v14465_v16 = vmax.f32 %v14464_v6, 0.0 }
 0x59a   :  { %3558 = vst.msk [vmem:[#allocation2 + $0xb8] sm:$0xff] %vm3534_vm4, %v3437_v23  ;;  %4986 = vrot.lane.b32.xlu0 %v11207_v32, %s9343_s12  ;;  %4795 = vrot.lane.b32.xlu1 %v11227_v22, %s9342_s30  ;;  %v14459_v32 = vld [vmem:[#allocation17_spill] sm:$0xff] }
 0x59b   :  { %v5394_v10 = vmax.f32 %v14459_v32, %v5298_v34  ;;  %v5733_v23 = vmax.f32 %v14465_v16, %v11264_v2  ;;  %v6035_v34 = vld [vmem:[#allocation2 + $0xa0] sm:$0xff] }
 0x59c   :  { %v3821_v1 = vpop.permute.xlu0 %3820  ;;  %v3630_v11 = vpop.permute.xlu1 %3629  ;;  %v14473_v16 = vld [vmem:[#allocation143_spill] sm:$0xff] }
 0x59d   :  { %3943 = vst.msk [vmem:[#allocation2 + $0xb0] sm:$0xff] %vm3920_vm6, %v3821_v1 }
 0x59e   :  { %3751 = vst.msk [vmem:[#allocation2 + $0xb8] sm:$0xff] %vm3727_vm5, %v3630_v11  ;;  %5853 = vrot.lane.b32.xlu0 %v5731_v55, %s9344_s14  ;;  %4988 = vrot.lane.b32.xlu1 %v11227_v22, %s9343_s12  ;;  %v5300_v55 = vsel %vm5271_vm3, %v11242_v21, %v11264_v2  ;;  %v6036_v11 = vld [vmem:[#allocation2 + $0xa8] sm:$0xff]  ;;  %v14466_v21 = vld [vmem:[#allocation22_spill] sm:$0xff] }
 0x59f   :  { %v14467_v2 = vmax.f32 %v14466_v21, 0.0 }
 0x5a0   :  { %v4014_v24 = vpop.permute.xlu0 %4013  ;;  %v3823_v62 = vpop.permute.xlu1 %3822 }
 0x5a1   :  { %4136 = vst.msk [vmem:[#allocation2 + $0xb0] sm:$0xff] %vm4113_vm7, %v4014_v24  ;;  %v5396_v24 = vmax.f32 %v10671_v14, %v5300_v55  ;;  %v5734_v54 = vmax.f32 %v14467_v2, %v11284_v29  ;;  %v14479_v2 = vld [vmem:[#allocation108_spill] sm:$0xff] }
 0x5a2   :  { %3944 = vst.msk [vmem:[#allocation2 + $0xb8] sm:$0xff] %vm3920_vm6, %v3823_v62  ;;  %5516 = vrot.lane.b32.xlu0 %v5394_v10, %s9345_s15  ;;  %5855 = vrot.lane.b32.xlu1 %v5732_v40, %s9344_s14 }
 0x5a4   :  { %v4207_v22 = vpop.permute.xlu0 %4206  ;;  %v4016_v5 = vpop.permute.xlu1 %4015 }
 0x5a5   :  { %4329 = vst.msk [vmem:[#allocation2 + $0xb0] sm:$0xff] %vm4306_vm8, %v4207_v22  ;;  %v14468_v22 = vld [vmem:[#allocation144_spill] sm:$0xff] }
 0x5a6   :  { %4137 = vst.msk [vmem:[#allocation2 + $0xb8] sm:$0xff] %vm4113_vm7, %v4016_v5  ;;  %3446 = vrot.lane.b32.xlu0 %v11249_v18, %s9335_s0  ;;  %5518 = vrot.lane.b32.xlu1 %v5395_v39, %s9345_s15 }
 0x5a8   :  { %v4400_v33 = vpop.permute.xlu0 %4399  ;;  %v4209_v45 = vpop.permute.xlu1 %4208 }
 0x5a9   :  { %4522 = vst.msk [vmem:[#allocation2 + $0xb0] sm:$0xff] %vm4499_vm9, %v4400_v33 }
 0x5aa   :  { %4330 = vst.msk [vmem:[#allocation2 + $0xb8] sm:$0xff] %vm4306_vm8, %v4209_v45  ;;  %3639 = vrot.lane.b32.xlu0 %v11249_v18, %s9336_s2  ;;  %3448 = vrot.lane.b32.xlu1 %v11270_v4, %s9335_s0 }
 0x5ac   :  { %v4593_v47 = vpop.permute.xlu0 %4592  ;;  %v4402_v59 = vpop.permute.xlu1 %4401 }
 0x5ad   :  { %4715 = vst.msk [vmem:[#allocation2 + $0xb0] sm:$0xff] %vm4692_vm10, %v4593_v47 }
 0x5ae   :  { %4523 = vst.msk [vmem:[#allocation2 + $0xb8] sm:$0xff] %vm4499_vm9, %v4402_v59  ;;  %3832 = vrot.lane.b32.xlu0 %v11249_v18, %s9337_s23  ;;  %3641 = vrot.lane.b32.xlu1 %v11270_v4, %s9336_s2 }
 0x5b0   :  { %v4786_v56 = vpop.permute.xlu0 %4785  ;;  %v4595_v26 = vpop.permute.xlu1 %4594 }
 0x5b1   :  { %4908 = vst.msk [vmem:[#allocation2 + $0xb0] sm:$0xff] %vm4885_vm11, %v4786_v56 }
 0x5b2   :  { %4716 = vst.msk [vmem:[#allocation2 + $0xb8] sm:$0xff] %vm4692_vm10, %v4595_v26  ;;  %4025 = vrot.lane.b32.xlu0 %v11249_v18, %s9338_s24  ;;  %3834 = vrot.lane.b32.xlu1 %v11270_v4, %s9337_s23 }
 0x5b4   :  { %v4979_v28 = vpop.permute.xlu0 %4978  ;;  %v4788_v63 = vpop.permute.xlu1 %4787 }
 0x5b5   :  { %5101 = vst.msk [vmem:[#allocation2 + $0xb0] sm:$0xff] %vm5078_vm12, %v4979_v28 }
 0x5b6   :  { %4909 = vst.msk [vmem:[#allocation2 + $0xb8] sm:$0xff] %vm4885_vm11, %v4788_v63  ;;  %4218 = vrot.lane.b32.xlu0 %v11249_v18, %s9339_s25  ;;  %4027 = vrot.lane.b32.xlu1 %v11270_v4, %s9338_s24 }
 0x5b8   :  { %v5846_v19 = vpop.permute.xlu0 %5845  ;;  %v4981_v3 = vpop.permute.xlu1 %4980 }
 0x5b9   :  { %5102 = vst.msk [vmem:[#allocation2 + $0xb8] sm:$0xff] %vm5078_vm12, %v4981_v3 }
 0x5ba   :  { %4411 = vrot.lane.b32.xlu0 %v11249_v18, %s9340_s26  ;;  %4220 = vrot.lane.b32.xlu1 %v11270_v4, %s9339_s25 }
 0x5bc   :  { %v5509_v25 = vpop.permute.xlu0 %5508  ;;  %v5848_v61 = vpop.permute.xlu1 %5847 }
 0x5bd   :  { %5631 = vst.msk [vmem:[#allocation2 + $0xb0] sm:$0xff] %vm5608_vm13, %v5509_v25 }
 0x5be   :  { %5968 = vst.msk [vmem:[#allocation2 + $0xb0] sm:$0xff] %vm5945_vm14, %v5846_v19  ;;  %4604 = vrot.lane.b32.xlu0 %v11249_v18, %s9341_s29  ;;  %4413 = vrot.lane.b32.xlu1 %v11270_v4, %s9340_s26 }
 0x5c0   :  { %v3439_v52 = vpop.permute.xlu0 %3438  ;;  %v5511_v31 = vpop.permute.xlu1 %5510 }
 0x5c1   :  { %3559 = vst.msk [vmem:[#allocation2 + $0xc0] sm:$0xff] %vm3534_vm4, %v3439_v52  ;;  %v14470_v52 = vld [vmem:[#allocation145_spill] sm:$0xff] }
 0x5c2   :  { %5632 = vst.msk [vmem:[#allocation2 + $0xb8] sm:$0xff] %vm5608_vm13, %v5511_v31  ;;  %4797 = vrot.lane.b32.xlu0 %v11249_v18, %s9342_s30  ;;  %4606 = vrot.lane.b32.xlu1 %v11270_v4, %s9341_s29  ;;  %v14471_v31 = vld [vmem:[#allocation40_spill] sm:$0xff] }
 0x5c3   :  { %5969 = vst.msk [vmem:[#allocation2 + $0xb8] sm:$0xff] %vm5945_vm14, %v5848_v61 }
 0x5c4   :  { %v3632_v51 = vpop.permute.xlu0 %3631  ;;  %v3441_v15 = vpop.permute.xlu1 %3440 }
 0x5c5   :  { %3752 = vst.msk [vmem:[#allocation2 + $0xc0] sm:$0xff] %vm3727_vm5, %v3632_v51  ;;  %v6037_v13 = vld [vmem:[#allocation2 + $0xb0] sm:$0xff]  ;;  %v14472_v51 = vmax.f32 %v14471_v31, 0.0 }
 0x5c6   :  { %3560 = vst.msk [vmem:[#allocation2 + $0xc8] sm:$0xff] %vm3534_vm4, %v3441_v15  ;;  %4990 = vrot.lane.b32.xlu0 %v11249_v18, %s9343_s12  ;;  %4799 = vrot.lane.b32.xlu1 %v11270_v4, %s9342_s30  ;;  %v6039_v18 = vmax.f32 %v6035_v34, %v6037_v13  ;;  %v14475_v34 = vld [vmem:[#allocation148_spill] sm:$0xff] }
 0x5c7   :  { %v5735_v15 = vmax.f32 %v14472_v51, %v14470_v52 }
 0x5c8   :  { %v3825_v12 = vpop.permute.xlu0 %3824  ;;  %v3634_v1 = vpop.permute.xlu1 %3633 }
 0x5c9   :  { %3945 = vst.msk [vmem:[#allocation2 + $0xc0] sm:$0xff] %vm3920_vm6, %v3825_v12  ;;  %v14474_v12 = vld [vmem:[#allocation39_spill] sm:$0xff] }
 0x5ca   :  { %v6038_v32 = vld [vmem:[#allocation2 + $0xb8] sm:$0xff]  ;;  %3753 = vst.msk [vmem:[#allocation2 + $0xc8] sm:$0xff] %vm3727_vm5, %v3634_v1  ;;  %5857 = vrot.lane.b32.xlu0 %v5733_v23, %s9344_s14  ;;  %4992 = vrot.lane.b32.xlu1 %v11270_v4, %s9343_s12  ;;  %v5397_v4 = vmax.f32 %v10683_v60, %v5301_v37  ;;  %v5302_v23 = vsel %vm5271_vm3, %v14473_v16, %v14470_v52  ;;  %v14482_v16 = vld [vmem:[#allocation35_spill] sm:$0xff] }
 0x5cb   :  { %v6040_v10 = vmax.f32 %v6036_v11, %v6038_v32  ;;  %v5398_v55 = vmax.f32 %v14474_v12, %v5302_v23  ;;  %v14476_v11 = vld [vmem:[#allocation109_spill] sm:$0xff] }
 0x5cc   :  { %v4018_v20 = vpop.permute.xlu0 %4017  ;;  %v3827_v40 = vpop.permute.xlu1 %3826  ;;  %v14477_v32 = vmax.f32 %v14476_v11, 0.0 }
 0x5cd   :  { %4138 = vst.msk [vmem:[#allocation2 + $0xc0] sm:$0xff] %vm4113_vm7, %v4018_v20  ;;  %v6041_v62 = vpack.c.bf16 %v6040_v10, %v6039_v18 }
 0x5ce   :  { %3946 = vst.msk [vmem:[#allocation2 + $0xc8] sm:$0xff] %vm3920_vm6, %v3827_v40  ;;  %5520 = vrot.lane.b32.xlu0 %v5396_v24, %s9345_s15  ;;  %5859 = vrot.lane.b32.xlu1 %v5734_v54, %s9344_s14  ;;  %v5736_v18 = vmax.f32 %v14477_v32, %v14475_v34  ;;  %v14478_v24 = vld [vmem:[#allocation146_spill] sm:$0xff] }
 0x5cf   :  { %6042 = vst.msk [vmem:[#allocation3 + $0x28] sm:$0xff] %vm6001_vm0, %v6041_v62  ;;  %v5303_v20 = vsel %vm5271_vm3, %v14478_v24, %v14475_v34 }
 0x5d0   :  { %v4211_v14 = vpop.permute.xlu0 %4210  ;;  %v4020_v8 = vpop.permute.xlu1 %4019  ;;  %v5399_v54 = vmax.f32 %v14479_v2, %v5303_v20 }
 0x5d1   :  { %4331 = vst.msk [vmem:[#allocation2 + $0xc0] sm:$0xff] %vm4306_vm8, %v4211_v14 }
 0x5d2   :  { %4139 = vst.msk [vmem:[#allocation2 + $0xc8] sm:$0xff] %vm4113_vm7, %v4020_v8  ;;  %3450 = vrot.lane.b32.xlu0 %v14468_v22, %s9335_s0  ;;  %5522 = vrot.lane.b32.xlu1 %v5397_v4, %s9345_s15 }
 0x5d4   :  { %v4404_v57 = vpop.permute.xlu0 %4403  ;;  %v4213_v29 = vpop.permute.xlu1 %4212 }
 0x5d5   :  { %4524 = vst.msk [vmem:[#allocation2 + $0xc0] sm:$0xff] %vm4499_vm9, %v4404_v57 }
 0x5d6   :  { %4332 = vst.msk [vmem:[#allocation2 + $0xc8] sm:$0xff] %vm4306_vm8, %v4213_v29  ;;  %3643 = vrot.lane.b32.xlu0 %v14468_v22, %s9336_s2  ;;  %v6096_v60 = vld [vmem:[#allocation3 + $0x28] sm:$0xff]  ;;  %3452 = vrot.lane.b32.xlu1 %v14469_v50, %s9335_s0 }
 0x5d7   :  { %8415 = vmatprep.mubr.msk.bf16.mxu1 %vm6001_vm0, %v6096_v60 }
 0x5d8   :  { %v4597_v39 = vpop.permute.xlu0 %4596  ;;  %v4406_v5 = vpop.permute.xlu1 %4405 }
 0x5d9   :  { %4717 = vst.msk [vmem:[#allocation2 + $0xc0] sm:$0xff] %vm4692_vm10, %v4597_v39 }
 0x5da   :  { %4525 = vst.msk [vmem:[#allocation2 + $0xc8] sm:$0xff] %vm4499_vm9, %v4406_v5  ;;  %3836 = vrot.lane.b32.xlu0 %v14468_v22, %s9337_s23  ;;  %3645 = vrot.lane.b32.xlu1 %v14469_v50, %s9336_s2 }
 0x5dc   :  { %v4790_v33 = vpop.permute.xlu0 %4789  ;;  %v4599_v45 = vpop.permute.xlu1 %4598 }
 0x5dd   :  { %4910 = vst.msk [vmem:[#allocation2 + $0xc0] sm:$0xff] %vm4885_vm11, %v4790_v33 }
 0x5de   :  { %4718 = vst.msk [vmem:[#allocation2 + $0xc8] sm:$0xff] %vm4692_vm10, %v4599_v45  ;;  %4029 = vrot.lane.b32.xlu0 %v14468_v22, %s9338_s24  ;;  %3838 = vrot.lane.b32.xlu1 %v14469_v50, %s9337_s23 }
 0x5e0   :  { %v4983_v47 = vpop.permute.xlu0 %4982  ;;  %v4792_v59 = vpop.permute.xlu1 %4791 }
 0x5e1   :  { %5103 = vst.msk [vmem:[#allocation2 + $0xc0] sm:$0xff] %vm5078_vm12, %v4983_v47 }
 0x5e2   :  { %4911 = vst.msk [vmem:[#allocation2 + $0xc8] sm:$0xff] %vm4885_vm11, %v4792_v59  ;;  %4222 = vrot.lane.b32.xlu0 %v14468_v22, %s9339_s25  ;;  %4031 = vrot.lane.b32.xlu1 %v14469_v50, %s9338_s24 }
 0x5e4   :  { %v5850_v56 = vpop.permute.xlu0 %5849  ;;  %v4985_v26 = vpop.permute.xlu1 %4984 }
 0x5e5   :  { %5104 = vst.msk [vmem:[#allocation2 + $0xc8] sm:$0xff] %vm5078_vm12, %v4985_v26 }
 0x5e6   :  { %4415 = vrot.lane.b32.xlu0 %v14468_v22, %s9340_s26  ;;  %4224 = vrot.lane.b32.xlu1 %v14469_v50, %s9339_s25 }
 0x5e8   :  { %v5513_v28 = vpop.permute.xlu0 %5512  ;;  %v5852_v63 = vpop.permute.xlu1 %5851 }
 0x5e9   :  { %5633 = vst.msk [vmem:[#allocation2 + $0xc0] sm:$0xff] %vm5608_vm13, %v5513_v28 }
 0x5ea   :  { %5970 = vst.msk [vmem:[#allocation2 + $0xc0] sm:$0xff] %vm5945_vm14, %v5850_v56  ;;  %4608 = vrot.lane.b32.xlu0 %v14468_v22, %s9341_s29  ;;  %4417 = vrot.lane.b32.xlu1 %v14469_v50, %s9340_s26  ;;  %v14480_v56 = vld [vmem:[#allocation121_spill] sm:$0xff] }
 0x5eb   :  { %v14481_v26 = vmax.f32 %v14480_v56, 0.0  ;;  %v14490_v56 = vld [vmem:[#allocation142_spill] sm:$0xff] }
 0x5ec   :  { %v3443_v19 = vpop.permute.xlu0 %3442  ;;  %v5515_v3 = vpop.permute.xlu1 %5514 }
 0x5ed   :  { %3561 = vst.msk [vmem:[#allocation2 + $0xd0] sm:$0xff] %vm3534_vm4, %v3443_v19  ;;  %v5737_v28 = vmax.f32 %v14481_v26, %v11437_v35  ;;  %v14491_v26 = vmax.f32 %v14490_v56, 0.0 }
 0x5ee   :  { %5634 = vst.msk [vmem:[#allocation2 + $0xc8] sm:$0xff] %vm5608_vm13, %v5515_v3  ;;  %4801 = vrot.lane.b32.xlu0 %v14468_v22, %s9342_s30  ;;  %4610 = vrot.lane.b32.xlu1 %v14469_v50, %s9341_s29  ;;  %v5304_v3 = vsel %vm5271_vm3, %v11424_v38, %v11437_v35  ;;  %v14483_v38 = vld [vmem:[#allocation124_spill] sm:$0xff] }
 0x5ef   :  { %5971 = vst.msk [vmem:[#allocation2 + $0xc8] sm:$0xff] %vm5945_vm14, %v5852_v63  ;;  %v14484_v35 = vmax.f32 %v14483_v38, 0.0  ;;  %v14497_v38 = vld [vmem:[#allocation27_spill] sm:$0xff] }
 0x5f0   :  { %v3636_v25 = vpop.permute.xlu0 %3635  ;;  %v3445_v61 = vpop.permute.xlu1 %3444 }
 0x5f1   :  { %3754 = vst.msk [vmem:[#allocation2 + $0xd0] sm:$0xff] %vm3727_vm5, %v3636_v25  ;;  %v5738_v23 = vmax.f32 %v14484_v35, %v14482_v16  ;;  %v14498_v35 = vld [vmem:[#allocation23_spill] sm:$0xff] }
 0x5f2   :  { %3562 = vst.msk [vmem:[#allocation2 + $0xd8] sm:$0xff] %vm3534_vm4, %v3445_v61  ;;  %4994 = vrot.lane.b32.xlu0 %v14468_v22, %s9343_s12  ;;  %4803 = vrot.lane.b32.xlu1 %v14469_v50, %s9342_s30  ;;  %v6043_v61 = vld [vmem:[#allocation2 + $0xc0] sm:$0xff] }
 0x5f4   :  { %v3829_v6 = vpop.permute.xlu0 %3828  ;;  %v3638_v13 = vpop.permute.xlu1 %3637 }
 0x5f5   :  { %3947 = vst.msk [vmem:[#allocation2 + $0xd0] sm:$0xff] %vm3920_vm6, %v3829_v6 }
 0x5f6   :  { %3755 = vst.msk [vmem:[#allocation2 + $0xd8] sm:$0xff] %vm3727_vm5, %v3638_v13  ;;  %5861 = vrot.lane.b32.xlu0 %v5735_v15, %s9344_s14  ;;  %4996 = vrot.lane.b32.xlu1 %v14469_v50, %s9343_s12  ;;  %v6044_v52 = vld [vmem:[#allocation2 + $0xc8] sm:$0xff]  ;;  %v5400_v15 = vmax.f32 %v11031_v17, %v5304_v3 }
 0x5f8   :  { %v4022_v1 = vpop.permute.xlu0 %4021  ;;  %v3831_v10 = vpop.permute.xlu1 %3830 }
 0x5f9   :  { %4140 = vst.msk [vmem:[#allocation2 + $0xd0] sm:$0xff] %vm4113_vm7, %v4022_v1 }
 0x5fa   :  { %3948 = vst.msk [vmem:[#allocation2 + $0xd8] sm:$0xff] %vm3920_vm6, %v3831_v10  ;;  %5524 = vrot.lane.b32.xlu0 %v5398_v55, %s9345_s15  ;;  %5863 = vrot.lane.b32.xlu1 %v5736_v18, %s9344_s14  ;;  %v14485_v55 = vld [vmem:[#allocation38_spill] sm:$0xff] }
 0x5fb   :  { %v5305_v1 = vsel %vm5271_vm3, %v14485_v55, %v14482_v16 }
 0x5fc   :  { %v4215_v21 = vpop.permute.xlu0 %4214  ;;  %v4024_v40 = vpop.permute.xlu1 %4023 }
 0x5fd   :  { %4333 = vst.msk [vmem:[#allocation2 + $0xd0] sm:$0xff] %vm4306_vm8, %v4215_v21 }
 0x5fe   :  { %4141 = vst.msk [vmem:[#allocation2 + $0xd8] sm:$0xff] %vm4113_vm7, %v4024_v40  ;;  %3454 = vrot.lane.b32.xlu0 %v11429_v53, %s9335_s0  ;;  %5526 = vrot.lane.b32.xlu1 %v5399_v54, %s9345_s15 }
 0x600   :  { %v4408_v62 = vpop.permute.xlu0 %4407  ;;  %v4217_v37 = vpop.permute.xlu1 %4216 }
 0x601   :  { %4526 = vst.msk [vmem:[#allocation2 + $0xd0] sm:$0xff] %vm4499_vm9, %v4408_v62 }
 0x602   :  { %4334 = vst.msk [vmem:[#allocation2 + $0xd8] sm:$0xff] %vm4306_vm8, %v4217_v37  ;;  %3647 = vrot.lane.b32.xlu0 %v11429_v53, %s9336_s2  ;;  %3456 = vrot.lane.b32.xlu1 %v11443_v7, %s9335_s0 }
 0x604   :  { %v4601_v14 = vpop.permute.xlu0 %4600  ;;  %v4410_v4 = vpop.permute.xlu1 %4409 }
 0x605   :  { %4719 = vst.msk [vmem:[#allocation2 + $0xd0] sm:$0xff] %vm4692_vm10, %v4601_v14 }
 0x606   :  { %4527 = vst.msk [vmem:[#allocation2 + $0xd8] sm:$0xff] %vm4499_vm9, %v4410_v4  ;;  %3840 = vrot.lane.b32.xlu0 %v11429_v53, %s9337_s23  ;;  %3649 = vrot.lane.b32.xlu1 %v11443_v7, %s9336_s2 }
 0x608   :  { %v4794_v8 = vpop.permute.xlu0 %4793  ;;  %v4603_v22 = vpop.permute.xlu1 %4602 }
 0x609   :  { %4912 = vst.msk [vmem:[#allocation2 + $0xd0] sm:$0xff] %vm4885_vm11, %v4794_v8 }
 0x60a   :  { %4720 = vst.msk [vmem:[#allocation2 + $0xd8] sm:$0xff] %vm4692_vm10, %v4603_v22  ;;  %4033 = vrot.lane.b32.xlu0 %v11429_v53, %s9338_s24  ;;  %3842 = vrot.lane.b32.xlu1 %v11443_v7, %s9337_s23 }
 0x60c   :  { %v4987_v57 = vpop.permute.xlu0 %4986  ;;  %v4796_v29 = vpop.permute.xlu1 %4795 }
 0x60d   :  { %5105 = vst.msk [vmem:[#allocation2 + $0xd0] sm:$0xff] %vm5078_vm12, %v4987_v57 }
 0x60e   :  { %4913 = vst.msk [vmem:[#allocation2 + $0xd8] sm:$0xff] %vm4885_vm11, %v4796_v29  ;;  %4226 = vrot.lane.b32.xlu0 %v11429_v53, %s9339_s25  ;;  %4035 = vrot.lane.b32.xlu1 %v11443_v7, %s9338_s24 }
 0x610   :  { %v5854_v60 = vpop.permute.xlu0 %5853  ;;  %v4989_v50 = vpop.permute.xlu1 %4988 }
 0x611   :  { %5106 = vst.msk [vmem:[#allocation2 + $0xd8] sm:$0xff] %vm5078_vm12, %v4989_v50 }
 0x612   :  { %4419 = vrot.lane.b32.xlu0 %v11429_v53, %s9340_s26  ;;  %4228 = vrot.lane.b32.xlu1 %v11443_v7, %s9339_s25 }
 0x614   :  { %v5517_v39 = vpop.permute.xlu0 %5516  ;;  %v5856_v5 = vpop.permute.xlu1 %5855 }
 0x615   :  { %5635 = vst.msk [vmem:[#allocation2 + $0xd0] sm:$0xff] %vm5608_vm13, %v5517_v39 }
 0x616   :  { %5972 = vst.msk [vmem:[#allocation2 + $0xd0] sm:$0xff] %vm5945_vm14, %v5854_v60  ;;  %4612 = vrot.lane.b32.xlu0 %v11429_v53, %s9341_s29  ;;  %4421 = vrot.lane.b32.xlu1 %v11443_v7, %s9340_s26  ;;  %v14487_v60 = vld [vmem:[#allocation140_spill] sm:$0xff] }
 0x617   :  { %v14488_v50 = vmax.f32 %v14487_v60, 0.0 }
 0x618   :  { %v3447_v33 = vpop.permute.xlu0 %3446  ;;  %v5519_v45 = vpop.permute.xlu1 %5518 }
 0x619   :  { %3563 = vst.msk [vmem:[#allocation2 + $0xe0] sm:$0xff] %vm3534_vm4, %v3447_v33  ;;  %v5739_v39 = vmax.f32 %v14488_v50, %v11561_v48  ;;  %v5306_v33 = vsel %vm5271_vm3, %v11547_v30, %v11561_v48  ;;  %v14489_v30 = vld [vmem:[#allocation31_spill] sm:$0xff]  ;;  %v14510_v50 = vld [vmem:[#allocation70_spill] sm:$0xff] }
 0x61a   :  { %5636 = vst.msk [vmem:[#allocation2 + $0xd8] sm:$0xff] %vm5608_vm13, %v5519_v45  ;;  %4805 = vrot.lane.b32.xlu0 %v11429_v53, %s9342_s30  ;;  %4614 = vrot.lane.b32.xlu1 %v11443_v7, %s9341_s29 }
 0x61b   :  { %5973 = vst.msk [vmem:[#allocation2 + $0xd8] sm:$0xff] %vm5945_vm14, %v5856_v5 }
 0x61c   :  { %v3640_v47 = vpop.permute.xlu0 %3639  ;;  %v3449_v59 = vpop.permute.xlu1 %3448 }
 0x61d   :  { %3756 = vst.msk [vmem:[#allocation2 + $0xe0] sm:$0xff] %vm3727_vm5, %v3640_v47  ;;  %v6045_v63 = vld [vmem:[#allocation2 + $0xd0] sm:$0xff] }
 0x61e   :  { %3564 = vst.msk [vmem:[#allocation2 + $0xe8] sm:$0xff] %vm3534_vm4, %v3449_v59  ;;  %4998 = vrot.lane.b32.xlu0 %v11429_v53, %s9343_s12  ;;  %4807 = vrot.lane.b32.xlu1 %v11443_v7, %s9342_s30  ;;  %v6047_v53 = vmax.f32 %v6043_v61, %v6045_v63 }
 0x620   :  { %v3833_v19 = vpop.permute.xlu0 %3832  ;;  %v3642_v25 = vpop.permute.xlu1 %3641 }
 0x621   :  { %3949 = vst.msk [vmem:[#allocation2 + $0xe0] sm:$0xff] %vm3920_vm6, %v3833_v19  ;;  %v14493_v19 = vld [vmem:[#allocation105_spill] sm:$0xff] }
 0x622   :  { %v6046_v31 = vld [vmem:[#allocation2 + $0xd8] sm:$0xff]  ;;  %3757 = vst.msk [vmem:[#allocation2 + $0xe8] sm:$0xff] %vm3727_vm5, %v3642_v25  ;;  %5865 = vrot.lane.b32.xlu0 %v5737_v28, %s9344_s14  ;;  %5000 = vrot.lane.b32.xlu1 %v11443_v7, %s9343_s12  ;;  %v14486_v7 = vld [vmem:[#allocation123_spill] sm:$0xff]  ;;  %v5740_v28 = vmax.f32 %v14491_v26, %v11575_v44  ;;  %v14494_v25 = vld [vmem:[#allocation141_spill] sm:$0xff] }
 0x623   :  { %v6048_v51 = vmax.f32 %v6044_v52, %v6046_v31  ;;  %v5401_v34 = vmax.f32 %v14486_v7, %v5305_v1  ;;  %v14495_v31 = vld [vmem:[#allocation24_spill] sm:$0xff]  ;;  %v14501_v7 = vld [vmem:[#allocation29_spill] sm:$0xff]  ;;  %v14515_v26 = vld [vmem:[#allocation67_spill] sm:$0xff] }
 0x624   :  { %v4026_v6 = vpop.permute.xlu0 %4025  ;;  %v3835_v13 = vpop.permute.xlu1 %3834 }
 0x625   :  { %4142 = vst.msk [vmem:[#allocation2 + $0xe0] sm:$0xff] %vm4113_vm7, %v4026_v6  ;;  %v6049_v12 = vpack.c.bf16 %v6048_v51, %v6047_v53  ;;  %v14496_v51 = vld [vmem:[#allocation26_spill] sm:$0xff] }
 0x626   :  { %3950 = vst.msk [vmem:[#allocation2 + $0xe8] sm:$0xff] %vm3920_vm6, %v3835_v13  ;;  %5528 = vrot.lane.b32.xlu0 %v5400_v15, %s9345_s15  ;;  %5867 = vrot.lane.b32.xlu1 %v5738_v23, %s9344_s14  ;;  %v5272_v23 = vsel %vm5271_vm3, %v14498_v35, %v14497_v38 }
 0x627   :  { %6050 = vst.msk [vmem:[#allocation3 + $0x30] sm:$0xff] %vm6001_vm0, %v6049_v12  ;;  %v14499_v12 = vld [vmem:[#allocation64_spill] sm:$0xff] }
 0x628   :  { %v4219_v17 = vpop.permute.xlu0 %4218  ;;  %v4028_v11 = vpop.permute.xlu1 %4027  ;;  %v5368_v55 = vmax.f32 %v14499_v12, %v5272_v23 }
 0x629   :  { %4335 = vst.msk [vmem:[#allocation2 + $0xe0] sm:$0xff] %vm4306_vm8, %v4219_v17  ;;  %v14500_v17 = vld [vmem:[#allocation32_spill] sm:$0xff] }
 0x62a   :  { %4143 = vst.msk [vmem:[#allocation2 + $0xe8] sm:$0xff] %vm4113_vm7, %v4028_v11  ;;  %3458 = vrot.lane.b32.xlu0 %v11552_v46, %s9335_s0  ;;  %5530 = vrot.lane.b32.xlu1 %v5401_v34, %s9345_s15  ;;  %v5274_v34 = vsel %vm5271_vm3, %v14501_v7, %v14500_v17 }
 0x62c   :  { %v4412_v32 = vpop.permute.xlu0 %4411  ;;  %v4221_v18 = vpop.permute.xlu1 %4220 }
 0x62d   :  { %4528 = vst.msk [vmem:[#allocation2 + $0xe0] sm:$0xff] %vm4499_vm9, %v4412_v32  ;;  %v14502_v32 = vld [vmem:[#allocation28_spill] sm:$0xff] }
 0x62e   :  { %4336 = vst.msk [vmem:[#allocation2 + $0xe8] sm:$0xff] %vm4306_vm8, %v4221_v18  ;;  %3651 = vrot.lane.b32.xlu0 %v11552_v46, %s9336_s2  ;;  %v12540_v10 = vld [vmem:[#allocation3 + $0x30] sm:$0xff]  ;;  %3460 = vrot.lane.b32.xlu1 %v11567_v27, %s9335_s0 }
 0x62f   :  { %8416 = vmatmul.mubr.msk.bf16.gmra.mrb[104].mxu1 %vm6001_vm0, %v12540_v10  ;;  %v14503_v18 = vld [vmem:[#allocation25_spill] sm:$0xff] }
 0x630   :  { %v4605_v24 = vpop.permute.xlu0 %4604  ;;  %v4414_v20 = vpop.permute.xlu1 %4413 }
 0x631   :  { %4721 = vst.msk [vmem:[#allocation2 + $0xe0] sm:$0xff] %vm4692_vm10, %v4605_v24  ;;  %v5273_v24 = vsel %vm5271_vm3, %v14503_v18, %v14502_v32 }
 0x632   :  { %4529 = vst.msk [vmem:[#allocation2 + $0xe8] sm:$0xff] %vm4499_vm9, %v4414_v20  ;;  %3844 = vrot.lane.b32.xlu0 %v11552_v46, %s9337_s23  ;;  %3653 = vrot.lane.b32.xlu1 %v11567_v27, %s9336_s2  ;;  %v14504_v20 = vld [vmem:[#allocation68_spill] sm:$0xff] }
 0x634   :  { %v4798_v21 = vpop.permute.xlu0 %4797  ;;  %v4607_v2 = vpop.permute.xlu1 %4606 }
 0x635   :  { %4914 = vst.msk [vmem:[#allocation2 + $0xe0] sm:$0xff] %vm4885_vm11, %v4798_v21  ;;  %v5370_v21 = vmax.f32 %v14504_v20, %v5274_v34 }
 0x636   :  { %4722 = vst.msk [vmem:[#allocation2 + $0xe8] sm:$0xff] %vm4692_vm10, %v4607_v2  ;;  %4037 = vrot.lane.b32.xlu0 %v11552_v46, %s9338_s24  ;;  %3846 = vrot.lane.b32.xlu1 %v11567_v27, %s9337_s23 }
 0x638   :  { %v4991_v54 = vpop.permute.xlu0 %4990  ;;  %v4800_v40 = vpop.permute.xlu1 %4799 }
 0x639   :  { %5107 = vst.msk [vmem:[#allocation2 + $0xe0] sm:$0xff] %vm5078_vm12, %v4991_v54  ;;  %v14505_v54 = vld [vmem:[#allocation66_spill] sm:$0xff] }
 0x63a   :  { %4915 = vst.msk [vmem:[#allocation2 + $0xe8] sm:$0xff] %vm4885_vm11, %v4800_v40  ;;  %4230 = vrot.lane.b32.xlu0 %v11552_v46, %s9339_s25  ;;  %4039 = vrot.lane.b32.xlu1 %v11567_v27, %s9338_s24  ;;  %v5369_v40 = vmax.f32 %v14505_v54, %v5273_v24 }
 0x63c   :  { %v5858_v62 = vpop.permute.xlu0 %5857  ;;  %v4993_v37 = vpop.permute.xlu1 %4992 }
 0x63d   :  { %5108 = vst.msk [vmem:[#allocation2 + $0xe8] sm:$0xff] %vm5078_vm12, %v4993_v37  ;;  %v9159_v37 = vld [vmem:[%s13924_s3] sm:$0xff]  }
 0x63e   :  { %4423 = vrot.lane.b32.xlu0 %v11552_v46, %s9340_s26  ;;  %4232 = vrot.lane.b32.xlu1 %v11567_v27, %s9339_s25 }
 0x63f   :  { %8423 = vmatprep.subr.bf16.mxu1 %v9159_v37 }
 0x640   :  { %v5521_v14 = vpop.permute.xlu0 %5520  ;;  %v5860_v4 = vpop.permute.xlu1 %5859  ;;  %8424 = vmatpush3.bf16.msra.mxu1 %v9159_v37 }
 0x641   :  { %5637 = vst.msk [vmem:[#allocation2 + $0xe0] sm:$0xff] %vm5608_vm13, %v5521_v14  ;;  %v14506_v14 = vld [vmem:[#allocation106_spill] sm:$0xff] }
 0x642   :  { %5974 = vst.msk [vmem:[#allocation2 + $0xe0] sm:$0xff] %vm5945_vm14, %v5858_v62  ;;  %4616 = vrot.lane.b32.xlu0 %v11552_v46, %s9341_s29  ;;  %4425 = vrot.lane.b32.xlu1 %v11567_v27, %s9340_s26 }
 0x644   :  { %v3451_v8 = vpop.permute.xlu0 %3450  ;;  %v5523_v22 = vpop.permute.xlu1 %5522 }
 0x645   :  { %3565 = vst.msk [vmem:[#allocation2 + $0xf0] sm:$0xff] %vm3534_vm4, %v3451_v8 }
 0x646   :  { %5638 = vst.msk [vmem:[#allocation2 + $0xe8] sm:$0xff] %vm5608_vm13, %v5523_v22  ;;  %4809 = vrot.lane.b32.xlu0 %v11552_v46, %s9342_s30  ;;  %4618 = vrot.lane.b32.xlu1 %v11567_v27, %s9341_s29  ;;  %v14508_v22 = vld [vmem:[#allocation65_spill] sm:$0xff] }
 0x647   :  { %5975 = vst.msk [vmem:[#allocation2 + $0xe8] sm:$0xff] %vm5945_vm14, %v5860_v4  ;;  %v14507_v4 = vld [vmem:[#allocation30_spill] sm:$0xff] }
 0x648   :  { %v3644_v57 = vpop.permute.xlu0 %3643  ;;  %v3453_v29 = vpop.permute.xlu1 %3452  ;;  %v5275_v8 = vsel %vm5271_vm3, %v14507_v4, %v14506_v14 }
 0x649   :  { %3758 = vst.msk [vmem:[#allocation2 + $0xf0] sm:$0xff] %vm3727_vm5, %v3644_v57  ;;  %v14509_v57 = vmax.f32 %v14508_v22, 0.0 }
 0x64a   :  { %3566 = vst.msk [vmem:[#allocation2 + $0xf8] sm:$0xff] %vm3534_vm4, %v3453_v29  ;;  %5002 = vrot.lane.b32.xlu0 %v11552_v46, %s9343_s12  ;;  %4811 = vrot.lane.b32.xlu1 %v11567_v27, %s9342_s30  ;;  %v5402_v46 = vmax.f32 %v11255_v36, %v5306_v33  ;;  %v14492_v36 = vld [vmem:[#allocation107_spill] sm:$0xff]  ;;  %v9160_v33 = vld [vmem:[%s13924_s3 + $0x8] sm:$0xff]  }
 0x64b   :  { %v5307_v63 = vsel %vm5271_vm3, %v14492_v36, %v11575_v44  ;;  %v5705_v29 = vmax.f32 %v14509_v57, %v14497_v38  ;;  %8425 = vmatprep.subr.bf16.mxu1 %v9160_v33  ;;  %v6051_v38 = vld [vmem:[#allocation2 + $0xe0] sm:$0xff] }
 0x64c   :  { %v3837_v5 = vpop.permute.xlu0 %3836  ;;  %v3646_v45 = vpop.permute.xlu1 %3645  ;;  %v5403_v61 = vmax.f32 %v14494_v25, %v5307_v63  ;;  %8426 = vmatpush3.bf16.msra.mxu1 %v9160_v33  ;;  %v9161_v63 = vld [vmem:[%s13924_s3 + $0x10] sm:$0xff]  }
 0x64d   :  { %3951 = vst.msk [vmem:[#allocation2 + $0xf0] sm:$0xff] %vm3920_vm6, %v3837_v5  ;;  %8427 = vmatprep.subr.bf16.mxu1 %v9161_v63 }
 0x64e   :  { %3759 = vst.msk [vmem:[#allocation2 + $0xf8] sm:$0xff] %vm3727_vm5, %v3646_v45  ;;  %5869 = vrot.lane.b32.xlu0 %v5739_v39, %s9344_s14  ;;  %5004 = vrot.lane.b32.xlu1 %v11567_v27, %s9343_s12  ;;  %v5371_v39 = vmax.f32 %v14510_v50, %v5275_v8  ;;  %v14511_v45 = vld [vmem:[#allocation69_spill] sm:$0xff]  ;;  %v6052_v35 = vld [vmem:[#allocation2 + $0xe8] sm:$0xff] }
 0x64f   :  { %v14526_v50 = vld [vmem:[#allocation52_spill] sm:$0xff] }
 0x650   :  { %v4030_v47 = vpop.permute.xlu0 %4029  ;;  %v3839_v59 = vpop.permute.xlu1 %3838  ;;  %8428 = vmatpush3.bf16.msra.mxu1 %v9161_v63 }
 0x651   :  { %4144 = vst.msk [vmem:[#allocation2 + $0xf0] sm:$0xff] %vm4113_vm7, %v4030_v47 }
 0x652   :  { %3952 = vst.msk [vmem:[#allocation2 + $0xf8] sm:$0xff] %vm3920_vm6, %v3839_v59  ;;  %5532 = vrot.lane.b32.xlu0 %v5402_v46, %s9345_s15  ;;  %4554 = vrot.lane.b32.xlu1 %v14489_v30, %s9341_s29  ;;  %v14512_v46 = vmax.f32 %v14511_v45, 0.0  ;;  %v14513_v59 = vld [vmem:[#allocation62_spill] sm:$0xff] }
 0x654   :  { %v4223_v48 = vpop.permute.xlu0 %4222  ;;  %v4032_v27 = vpop.permute.xlu1 %4031  ;;  %v5707_v47 = vmax.f32 %v14512_v46, %v14500_v17 }
 0x655   :  { %4337 = vst.msk [vmem:[#allocation2 + $0xf0] sm:$0xff] %vm4306_vm8, %v4223_v48 }
 0x656   :  { %4145 = vst.msk [vmem:[#allocation2 + $0xf8] sm:$0xff] %vm4113_vm7, %v4032_v27  ;;  %4552 = vrot.lane.b32.xlu0 %v14493_v19, %s9341_s29  ;;  %5871 = vrot.lane.b32.xlu1 %v5740_v28, %s9344_s14  ;;  %v14516_v28 = vmax.f32 %v14515_v26, 0.0 }
 0x658   :  { %v4416_v3 = vpop.permute.xlu0 %4415  ;;  %v4225_v52 = vpop.permute.xlu1 %4224  ;;  %v5706_v27 = vmax.f32 %v14516_v28, %v14502_v32  ;;  %v14523_v32 = vld [vmem:[#allocation51_spill] sm:$0xff] }
 0x659   :  { %4530 = vst.msk [vmem:[#allocation2 + $0xf0] sm:$0xff] %vm4499_vm9, %v4416_v3  ;;  %v14517_v3 = vld [vmem:[#allocation49_spill] sm:$0xff]  ;;  %v2947_v18 = vadd.f32 %v14523_v32, %v14513_v59 }
 0x65a   :  { %4338 = vst.msk [vmem:[#allocation2 + $0xf8] sm:$0xff] %vm4306_vm8, %v4225_v52  ;;  %4741 = vrot.lane.b32.xlu0 %v14495_v31, %s9342_s30  ;;  %5534 = vrot.lane.b32.xlu1 %v5403_v61, %s9345_s15  ;;  %v2945_v25 = vadd.f32 %v14517_v3, %v14513_v59 }
 0x65b   :  { %v12741_v8 = vmax.f32 %v2947_v18, 0.0  ;;  %v14530_v18 = vld [vmem:[#allocation59_spill] sm:$0xff] }
 0x65c   :  { %v4609_v44 = vpop.permute.xlu0 %4608  ;;  %v4418_v53 = vpop.permute.xlu1 %4417  ;;  %v12714_v7 = vmax.f32 %v2945_v25, 0.0 }
 0x65d   :  { %4723 = vst.msk [vmem:[#allocation2 + $0xf0] sm:$0xff] %vm4692_vm10, %v4609_v44 }
 0x65e   :  { %4531 = vst.msk [vmem:[#allocation2 + $0xf8] sm:$0xff] %vm4499_vm9, %v4418_v53  ;;  %4745 = vrot.lane.b32.xlu0 %v14493_v19, %s9342_s30  ;;  %4743 = vrot.lane.b32.xlu1 %v14496_v51, %s9342_s30 }
 0x660   :  { %v4802_v15 = vpop.permute.xlu0 %4801  ;;  %v4611_v6 = vpop.permute.xlu1 %4610 }
 0x661   :  { %4916 = vst.msk [vmem:[#allocation2 + $0xf0] sm:$0xff] %vm4885_vm11, %v4802_v15 }
 0x662   :  { %4724 = vst.msk [vmem:[#allocation2 + $0xf8] sm:$0xff] %vm4692_vm10, %v4611_v6  ;;  %4934 = vrot.lane.b32.xlu0 %v14495_v31, %s9343_s12  ;;  %4747 = vrot.lane.b32.xlu1 %v14489_v30, %s9342_s30  ;;  %v14518_v31 = vld [vmem:[#allocation71_spill] sm:$0xff] }
 0x663   :  { %v14519_v44 = vmax.f32 %v14518_v31, 0.0 }
 0x664   :  { %v4995_v16 = vpop.permute.xlu0 %4994  ;;  %v4804_v13 = vpop.permute.xlu1 %4803 }
 0x665   :  { %5109 = vst.msk [vmem:[#allocation2 + $0xf0] sm:$0xff] %vm5078_vm12, %v4995_v16  ;;  %v5708_v53 = vmax.f32 %v14519_v44, %v14506_v14  ;;  %v9162_v16 = vld [vmem:[%s13924_s3 + $0x18] sm:$0xff]   ;;  %v14525_v14 = vld [vmem:[#allocation48_spill] sm:$0xff]  ;;  %v14527_v44 = vld [vmem:[#allocation53_spill] sm:$0xff] }
 0x666   :  { %4917 = vst.msk [vmem:[#allocation2 + $0xf8] sm:$0xff] %vm4885_vm11, %v4804_v13  ;;  %4938 = vrot.lane.b32.xlu0 %v14493_v19, %s9343_s12  ;;  %4936 = vrot.lane.b32.xlu1 %v14496_v51, %s9343_s12  ;;  %v14520_v51 = vld [vmem:[#allocation47_spill] sm:$0xff] }
 0x667   :  { %v2943_v15 = vadd.f32 %v14520_v51, %v14513_v59  ;;  %8429 = vmatprep.subr.bf16.mxu1 %v9162_v16 }
 0x668   :  { %v5862_v1 = vpop.permute.xlu0 %5861  ;;  %v4997_v11 = vpop.permute.xlu1 %4996  ;;  %8430 = vmatpush3.bf16.msra.mxu1 %v9162_v16  ;;  %v14528_v16 = vld [vmem:[#allocation57_spill] sm:$0xff] }
 0x669   :  { %5110 = vst.msk [vmem:[#allocation2 + $0xf8] sm:$0xff] %vm5078_vm12, %v4997_v11  ;;  %v12716_v11 = vmax.f32 %v2943_v15, 0.0 }
 0x66a   :  { %5464 = vrot.lane.b32.xlu0 %v5368_v55, %s9345_s15  ;;  %4940 = vrot.lane.b32.xlu1 %v14489_v30, %s9343_s12  ;;  %v14514_v30 = vld [vmem:[#allocation45_spill] sm:$0xff]  ;;  %v14521_v55 = vld [vmem:[#allocation63_spill] sm:$0xff] }
 0x66b   :  { %v2941_v48 = vadd.f32 %v14514_v30, %v14513_v59  ;;  %v12739_v4 = vadd.f32 %v14525_v14, %v14521_v55 }
 0x66c   :  { %v5525_v2 = vpop.permute.xlu0 %5524  ;;  %v5864_v62 = vpop.permute.xlu1 %5863 }
 0x66d   :  { %5639 = vst.msk [vmem:[#allocation2 + $0xf0] sm:$0xff] %vm5608_vm13, %v5525_v2  ;;  %v12693_v19 = vmax.f32 %v2941_v48, 0.0 }
 0x66e   :  { %5976 = vst.msk [vmem:[#allocation2 + $0xf0] sm:$0xff] %vm5945_vm14, %v5862_v1  ;;  %5468 = vrot.lane.b32.xlu0 %v5370_v21, %s9345_s15  ;;  %5466 = vrot.lane.b32.xlu1 %v5369_v40, %s9345_s15  ;;  %v14522_v1 = vld [vmem:[#allocation46_spill] sm:$0xff]  ;;  %v9163_v21 = vld [vmem:[%s13924_s3 + $0x20] ss:$0 sps:$4 sm:$0xff]  }
 0x66f   :  { %v12712_v17 = vadd.f32 %v14522_v1, %v14521_v55  ;;  %9000 = vmatprep.subr.msk.bf16.mxu1 %vm6170_vm15, %v9163_v21  ;;  %v6302_v2 = vsel %vm6170_vm15, %v9163_v21, 0  ;;  %v14524_v40 = vld [vmem:[#allocation50_spill] sm:$0xff] }
 0x670   :  { %v3455_v60 = vpop.permute.xlu0 %3454  ;;  %v5527_v5 = vpop.permute.xlu1 %5526  ;;  %8432 = vmatpush3.bf16.msra.mxu1 %v6302_v2 }
 0x671   :  { %3567 = vst.msk [vmem:[#allocation2 + $0x100] sm:$0xff] %vm3534_vm4, %v3455_v60  ;;  %v3038_v54 = vmax.f32 %v12712_v17, 0.0  ;;  %v3040_v60 = vmax.f32 %v12739_v4, 0.0  ;;  %v13264_v17 = vld [vmem:[%s13924_s3 + $0x90] sm:$0xff]  }
 0x672   :  { %5640 = vst.msk [vmem:[#allocation2 + $0xf8] sm:$0xff] %vm5608_vm13, %v5527_v5  ;;  %5801 = vrot.lane.b32.xlu0 %v5705_v29, %s9344_s14  ;;  %5470 = vrot.lane.b32.xlu1 %v5371_v39, %s9345_s15  ;;  %v12754_v39 = vadd.f32 %v14526_v50, %v14521_v55 }
 0x673   :  { %5977 = vst.msk [vmem:[#allocation2 + $0xf8] sm:$0xff] %vm5945_vm14, %v5864_v62  ;;  %v12735_v62 = vadd.f32 %v14524_v40, %v14521_v55 }
 0x674   :  { %v3648_v56 = vpop.permute.xlu0 %3647  ;;  %v3457_v36 = vpop.permute.xlu1 %3456  ;;  %v3044_v46 = vmax.f32 %v12754_v39, 0.0 }
 0x675   :  { %3760 = vst.msk [vmem:[#allocation2 + $0x100] sm:$0xff] %vm3727_vm5, %v3648_v56  ;;  %v6053_v61 = vld [vmem:[#allocation2 + $0xf0] sm:$0xff]  ;;  %v3042_v57 = vmax.f32 %v12735_v62, 0.0  ;;  %v12780_v56 = vld [vmem:[%s13924_s3 + $0x48] sm:$0xff]  }
 0x676   :  { %3568 = vst.msk [vmem:[#allocation2 + $0x108] sm:$0xff] %vm3534_vm4, %v3457_v36  ;;  %5805 = vrot.lane.b32.xlu0 %v5707_v47, %s9344_s14  ;;  %5803 = vrot.lane.b32.xlu1 %v5706_v27, %s9344_s14  ;;  %v6055_v13 = vmax.f32 %v6051_v38, %v6053_v61  ;;  %v2953_v38 = vadd.f32 %v14528_v16, %v14513_v59  ;;  %v14532_v16 = vld [vmem:[#allocation34_spill] sm:$0xff] }
 0x677   :  { %8449 = vmatprep.subr.bf16.mxu1 %v12780_v56 }
 0x678   :  { %v3841_v52 = vpop.permute.xlu0 %3840  ;;  %v3650_v6 = vpop.permute.xlu1 %3649  ;;  %v12838_v1 = vmax.f32 %v2953_v38, 0.0 }
 0x679   :  { %3953 = vst.msk [vmem:[#allocation2 + $0x100] sm:$0xff] %vm3920_vm6, %v3841_v52 }
 0x67a   :  { %v6054_v23 = vld [vmem:[#allocation2 + $0xf8] sm:$0xff]  ;;  %3761 = vst.msk [vmem:[#allocation2 + $0x108] sm:$0xff] %vm3727_vm5, %v3650_v6  ;;  %3181 = vrot.lane.b32.xlu0 %v12693_v19, %s9335_s0  ;;  %5807 = vrot.lane.b32.xlu1 %v5708_v53, %s9344_s14  ;;  %v2949_v53 = vadd.f32 %v14527_v44, %v14513_v59 }
 0x67b   :  { %v6056_v12 = vmax.f32 %v6052_v35, %v6054_v23  ;;  %v14529_v23 = vld [vmem:[#allocation55_spill] sm:$0xff] }
 0x67c   :  { %v4034_v34 = vpop.permute.xlu0 %4033  ;;  %v3843_v24 = vpop.permute.xlu1 %3842  ;;  %v12826_v6 = vmax.f32 %v2949_v53, 0.0 }
 0x67d   :  { %4146 = vst.msk [vmem:[#allocation2 + $0x100] sm:$0xff] %vm4113_vm7, %v4034_v34  ;;  %v6057_v20 = vpack.c.bf16 %v6056_v12, %v6055_v13  ;;  %v2951_v13 = vadd.f32 %v14529_v23, %v14513_v59  ;;  %v5310_v23 = vsel %vm5271_vm3, %v11774_v43, %v11788_v58 }
 0x67e   :  { %3954 = vst.msk [vmem:[#allocation2 + $0x108] sm:$0xff] %vm3920_vm6, %v3843_v24  ;;  %3185 = vrot.lane.b32.xlu0 %v12714_v7, %s9335_s0  ;;  %3183 = vrot.lane.b32.xlu1 %v12716_v11, %s9335_s0  ;;  %v2955_v24 = vadd.f32 %v14530_v18, %v14513_v59  ;;  %v14534_v18 = vld [vmem:[#allocation75_spill] sm:$0xff] }
 0x67f   :  { %6058 = vst.msk [vmem:[#allocation3 + $0x38] sm:$0xff] %vm6001_vm0, %v6057_v20  ;;  %v12840_v32 = vmax.f32 %v2951_v13, 0.0 }
 0x680   :  { %v4227_v37 = vpop.permute.xlu0 %4226  ;;  %v4036_v22 = vpop.permute.xlu1 %4035  ;;  %v12850_v2 = vmax.f32 %v2955_v24, 0.0 }
 0x681   :  { %4339 = vst.msk [vmem:[#allocation2 + $0x100] sm:$0xff] %vm4306_vm8, %v4227_v37 }
 0x682   :  { %4147 = vst.msk [vmem:[#allocation2 + $0x108] sm:$0xff] %vm4113_vm7, %v4036_v22  ;;  %5255 = vrot.lane.b32.xlu0 %v3038_v54, %s9335_s0  ;;  %3187 = vrot.lane.b32.xlu1 %v12741_v8, %s9335_s0 }
 0x684   :  { %v4420_v29 = vpop.permute.xlu0 %4419  ;;  %v4229_v5 = vpop.permute.xlu1 %4228 }
 0x685   :  { %4532 = vst.msk [vmem:[#allocation2 + $0x100] sm:$0xff] %vm4499_vm9, %v4420_v29 }
 0x686   :  { %4340 = vst.msk [vmem:[#allocation2 + $0x108] sm:$0xff] %vm4306_vm8, %v4229_v5  ;;  %v12758_v33 = vld [vmem:[#allocation3 + $0x38] sm:$0xff]  ;;  %5259 = vrot.lane.b32.xlu0 %v3042_v57, %s9335_s0  ;;  %5257 = vrot.lane.b32.xlu1 %v3040_v60, %s9335_s0 }
 0x687   :  { %8419 = vmatprep.mubr.msk.bf16.mxu1 %vm6001_vm0, %v12758_v33 }
 0x688   :  { %v4613_v45 = vpop.permute.xlu0 %4612  ;;  %v4422_v47 = vpop.permute.xlu1 %4421 }
 0x689   :  { %4725 = vst.msk [vmem:[#allocation2 + $0x100] sm:$0xff] %vm4692_vm10, %v4613_v45 }
 0x68a   :  { %4533 = vst.msk [vmem:[#allocation2 + $0x108] sm:$0xff] %vm4499_vm9, %v4422_v47  ;;  %3462 = vrot.lane.b32.xlu0 %v11673_v41, %s9335_s0  ;;  %5261 = vrot.lane.b32.xlu1 %v3044_v46, %s9335_s0 }
 0x68c   :  { %v4806_v30 = vpop.permute.xlu0 %4805  ;;  %v4615_v48 = vpop.permute.xlu1 %4614 }
 0x68d   :  { %4918 = vst.msk [vmem:[#allocation2 + $0x100] sm:$0xff] %vm4885_vm11, %v4806_v30 }
 0x68e   :  { %4726 = vst.msk [vmem:[#allocation2 + $0x108] sm:$0xff] %vm4692_vm10, %v4615_v48  ;;  %3466 = vrot.lane.b32.xlu0 %v11779_v49, %s9335_s0  ;;  %3464 = vrot.lane.b32.xlu1 %v11688_v42, %s9335_s0 }
 0x690   :  { %v4999_v26 = vpop.permute.xlu0 %4998  ;;  %v4808_v28 = vpop.permute.xlu1 %4807 }
 0x691   :  { %5111 = vst.msk [vmem:[#allocation2 + $0x100] sm:$0xff] %vm5078_vm12, %v4999_v26 }
 0x692   :  { %4919 = vst.msk [vmem:[#allocation2 + $0x108] sm:$0xff] %vm4885_vm11, %v4808_v28  ;;  %3655 = vrot.lane.b32.xlu0 %v11673_v41, %s9336_s2  ;;  %3468 = vrot.lane.b32.xlu1 %v11794_v9, %s9335_s0 }
 0x694   :  { %v5866_v27 = vpop.permute.xlu0 %5865  ;;  %v5001_v36 = vpop.permute.xlu1 %5000 }
 0x695   :  { %5112 = vst.msk [vmem:[#allocation2 + $0x108] sm:$0xff] %vm5078_vm12, %v5001_v36 }
 0x696   :  { %3659 = vrot.lane.b32.xlu0 %v11779_v49, %s9336_s2  ;;  %3657 = vrot.lane.b32.xlu1 %v11688_v42, %s9336_s2 }
 0x698   :  { %v5529_v63 = vpop.permute.xlu0 %5528  ;;  %v5868_v3 = vpop.permute.xlu1 %5867 }
 0x699   :  { %5641 = vst.msk [vmem:[#allocation2 + $0x100] sm:$0xff] %vm5608_vm13, %v5529_v63 }
 0x69a   :  { %5978 = vst.msk [vmem:[#allocation2 + $0x100] sm:$0xff] %vm5945_vm14, %v5866_v27  ;;  %3848 = vrot.lane.b32.xlu0 %v11673_v41, %s9337_s23  ;;  %3661 = vrot.lane.b32.xlu1 %v11794_v9, %s9336_s2 }
 0x69c   :  { %v3459_v25 = vpop.permute.xlu0 %3458  ;;  %v5531_v61 = vpop.permute.xlu1 %5530 }
 0x69d   :  { %3569 = vst.msk [vmem:[#allocation2 + $0x110] sm:$0xff] %vm3534_vm4, %v3459_v25 }
 0x69e   :  { %5642 = vst.msk [vmem:[#allocation2 + $0x108] sm:$0xff] %vm5608_vm13, %v5531_v61  ;;  %3852 = vrot.lane.b32.xlu0 %v11779_v49, %s9337_s23  ;;  %3850 = vrot.lane.b32.xlu1 %v11688_v42, %s9337_s23  ;;  %v14531_v61 = vld [vmem:[#allocation41_spill] sm:$0xff] }
 0x69f   :  { %5979 = vst.msk [vmem:[#allocation2 + $0x108] sm:$0xff] %vm5945_vm14, %v5868_v3 }
 0x6a0   :  { %v3652_v52 = vpop.permute.xlu0 %3651  ;;  %v3461_v31 = vpop.permute.xlu1 %3460 }
 0x6a1   :  { %3762 = vst.msk [vmem:[#allocation2 + $0x110] sm:$0xff] %vm3727_vm5, %v3652_v52  ;;  %v5308_v52 = vsel %vm5271_vm3, %v14531_v61, %v11682_v0  ;;  %v6059_v44 = vld [vmem:[#allocation2 + $0x100] sm:$0xff] }
 0x6a2   :  { %3570 = vst.msk [vmem:[#allocation2 + $0x118] sm:$0xff] %vm3534_vm4, %v3461_v31  ;;  %4041 = vrot.lane.b32.xlu0 %v11673_v41, %s9338_s24  ;;  %3854 = vrot.lane.b32.xlu1 %v11794_v9, %s9337_s23  ;;  %v5404_v38 = vmax.f32 %v14532_v16, %v5308_v52 }
 0x6a4   :  { %v3845_v51 = vpop.permute.xlu0 %3844  ;;  %v3654_v15 = vpop.permute.xlu1 %3653 }
 0x6a5   :  { %3955 = vst.msk [vmem:[#allocation2 + $0x110] sm:$0xff] %vm3920_vm6, %v3845_v51 }
 0x6a6   :  { %3763 = vst.msk [vmem:[#allocation2 + $0x118] sm:$0xff] %vm3727_vm5, %v3654_v15  ;;  %4045 = vrot.lane.b32.xlu0 %v11779_v49, %s9338_s24  ;;  %4043 = vrot.lane.b32.xlu1 %v11688_v42, %s9338_s24  ;;  %v6060_v53 = vld [vmem:[#allocation2 + $0x108] sm:$0xff] }
 0x6a8   :  { %v4038_v35 = vpop.permute.xlu0 %4037  ;;  %v3847_v12 = vpop.permute.xlu1 %3846 }
 0x6a9   :  { %4148 = vst.msk [vmem:[#allocation2 + $0x110] sm:$0xff] %vm4113_vm7, %v4038_v35 }
 0x6aa   :  { %3956 = vst.msk [vmem:[#allocation2 + $0x118] sm:$0xff] %vm3920_vm6, %v3847_v12  ;;  %3189 = vrot.lane.b32.xlu0 %v12826_v6, %s9335_s0  ;;  %4047 = vrot.lane.b32.xlu1 %v11794_v9, %s9338_s24 }
 0x6ac   :  { %v4231_v34 = vpop.permute.xlu0 %4230  ;;  %v4040_v20 = vpop.permute.xlu1 %4039 }
 0x6ad   :  { %4341 = vst.msk [vmem:[#allocation2 + $0x110] sm:$0xff] %vm4306_vm8, %v4231_v34  ;;  %v14533_v34 = vld [vmem:[#allocation78_spill] sm:$0xff] }
 0x6ae   :  { %4149 = vst.msk [vmem:[#allocation2 + $0x118] sm:$0xff] %vm4113_vm7, %v4040_v20  ;;  %3193 = vrot.lane.b32.xlu0 %v12838_v1, %s9335_s0  ;;  %3191 = vrot.lane.b32.xlu1 %v12840_v32, %s9335_s0  ;;  %v14536_v20 = vld [vmem:[#allocation72_spill] sm:$0xff] }
 0x6b0   :  { %v4424_v21 = vpop.permute.xlu0 %4423  ;;  %v4233_v40 = vpop.permute.xlu1 %4232 }
 0x6b1   :  { %4534 = vst.msk [vmem:[#allocation2 + $0x110] sm:$0xff] %vm4499_vm9, %v4424_v21 }
 0x6b2   :  { %4342 = vst.msk [vmem:[#allocation2 + $0x118] sm:$0xff] %vm4306_vm8, %v4233_v40  ;;  %4234 = vrot.lane.b32.xlu0 %v11673_v41, %s9339_s25  ;;  %3195 = vrot.lane.b32.xlu1 %v12850_v2, %s9335_s0 }
 0x6b4   :  { %v4617_v59 = vpop.permute.xlu0 %4616  ;;  %v4426_v37 = vpop.permute.xlu1 %4425 }
 0x6b5   :  { %4727 = vst.msk [vmem:[#allocation2 + $0x110] sm:$0xff] %vm4692_vm10, %v4617_v59  ;;  %v14537_v59 = vld [vmem:[#allocation42_spill] sm:$0xff] }
 0x6b6   :  { %4535 = vst.msk [vmem:[#allocation2 + $0x118] sm:$0xff] %vm4499_vm9, %v4426_v37  ;;  %4238 = vrot.lane.b32.xlu0 %v11779_v49, %s9339_s25  ;;  %4236 = vrot.lane.b32.xlu1 %v11688_v42, %s9339_s25  ;;  %v14538_v37 = vld [vmem:[#allocation110_spill] sm:$0xff] }
 0x6b8   :  { %v4810_v14 = vpop.permute.xlu0 %4809  ;;  %v4619_v22 = vpop.permute.xlu1 %4618 }
 0x6b9   :  { %4920 = vst.msk [vmem:[#allocation2 + $0x110] sm:$0xff] %vm4885_vm11, %v4810_v14  ;;  %v5311_v14 = vsel %vm5271_vm3, %v14538_v37, %v14537_v59 }
 0x6ba   :  { %4728 = vst.msk [vmem:[#allocation2 + $0x118] sm:$0xff] %vm4692_vm10, %v4619_v22  ;;  %4427 = vrot.lane.b32.xlu0 %v11673_v41, %s9340_s26  ;;  %4240 = vrot.lane.b32.xlu1 %v11794_v9, %s9339_s25 }
 0x6bc   :  { %v5003_v29 = vpop.permute.xlu0 %5002  ;;  %v4812_v50 = vpop.permute.xlu1 %4811 }
 0x6bd   :  { %5113 = vst.msk [vmem:[#allocation2 + $0x110] sm:$0xff] %vm5078_vm12, %v5003_v29 }
 0x6be   :  { %4921 = vst.msk [vmem:[#allocation2 + $0x118] sm:$0xff] %vm4885_vm11, %v4812_v50  ;;  %4431 = vrot.lane.b32.xlu0 %v11779_v49, %s9340_s26  ;;  %4429 = vrot.lane.b32.xlu1 %v11688_v42, %s9340_s26 }
 0x6c0   :  { %v5870_v5 = vpop.permute.xlu0 %5869  ;;  %v5005_v45 = vpop.permute.xlu1 %5004 }
 0x6c1   :  { %5114 = vst.msk [vmem:[#allocation2 + $0x118] sm:$0xff] %vm5078_vm12, %v5005_v45 }
 0x6c2   :  { %4620 = vrot.lane.b32.xlu0 %v11673_v41, %s9341_s29  ;;  %4433 = vrot.lane.b32.xlu1 %v11794_v9, %s9340_s26 }
 0x6c4   :  { %v5533_v47 = vpop.permute.xlu0 %5532  ;;  %v4555_v30 = vpop.permute.xlu1 %4554 }
 0x6c5   :  { %5643 = vst.msk [vmem:[#allocation2 + $0x110] sm:$0xff] %vm5608_vm13, %v5533_v47 }
 0x6c6   :  { %5980 = vst.msk [vmem:[#allocation2 + $0x110] sm:$0xff] %vm5945_vm14, %v5870_v5  ;;  %4624 = vrot.lane.b32.xlu0 %v11779_v49, %s9341_s29  ;;  %4622 = vrot.lane.b32.xlu1 %v11688_v42, %s9341_s29  ;;  %v14541_v5 = vld [vmem:[#allocation37_spill] sm:$0xff] }
 0x6c7   :  { %4696 = vst.msk [vmem:[#allocation2 + $0x18] sm:$0xff] %vm4692_vm10, %v4555_v30  ;;  %v5407_v45 = vmax.f32 %v14541_v5, %v5311_v14 }
 0x6c8   :  { %v4553_v48 = vpop.permute.xlu0 %4552  ;;  %v5872_v26 = vpop.permute.xlu1 %5871 }
 0x6c9   :  { %4695 = vst.msk [vmem:[#allocation2 + $0x10] sm:$0xff] %vm4692_vm10, %v4553_v48  ;;  %v14542_v48 = vld [vmem:[#allocation54_spill] sm:$0xff] }
 0x6ca   :  { %4813 = vrot.lane.b32.xlu0 %v11673_v41, %s9342_s30  ;;  %4626 = vrot.lane.b32.xlu1 %v11794_v9, %s9341_s29 }
 0x6cc   :  { %v4742_v28 = vpop.permute.xlu0 %4741  ;;  %v5535_v27 = vpop.permute.xlu1 %5534 }
 0x6cd   :  { %4886 = vst.msk [vmem:[#allocation2] sm:$0xff] %vm4885_vm11, %v4742_v28  ;;  %v6061_v3 = vld [vmem:[#allocation2 + $0x110] sm:$0xff] }
 0x6ce   :  { %5644 = vst.msk [vmem:[#allocation2 + $0x118] sm:$0xff] %vm5608_vm13, %v5535_v27  ;;  %4817 = vrot.lane.b32.xlu0 %v11779_v49, %s9342_s30  ;;  %4815 = vrot.lane.b32.xlu1 %v11688_v42, %s9342_s30 }
 0x6cf   :  { %5981 = vst.msk [vmem:[#allocation2 + $0x118] sm:$0xff] %vm5945_vm14, %v5872_v26  ;;  %v14543_v26 = vld [vmem:[#allocation73_spill] sm:$0xff] }
 0x6d0   :  { %v4746_v36 = vpop.permute.xlu0 %4745  ;;  %v4744_v63 = vpop.permute.xlu1 %4743  ;;  %v14544_v28 = vmax.f32 %v14543_v26, 0.0 }
 0x6d1   :  { %4888 = vst.msk [vmem:[#allocation2 + $0x10] sm:$0xff] %vm4885_vm11, %v4746_v36  ;;  %4887 = vst.msk [vmem:[#allocation2 + $0x8] sm:$0xff] %vm4885_vm11, %v4744_v63  ;;  %v14545_v63 = vld [vmem:[#allocation74_spill] sm:$0xff] }
 0x6d2   :  { %5006 = vrot.lane.b32.xlu0 %v11673_v41, %s9343_s12  ;;  %4819 = vrot.lane.b32.xlu1 %v11794_v9, %s9342_s30  ;;  %v6063_v41 = vmax.f32 %v6059_v44, %v6061_v3  ;;  %v5743_v27 = vmax.f32 %v14544_v28, %v11788_v58  ;;  %v14546_v3 = vmax.f32 %v14545_v63, 0.0  ;;  %v9165_v63 = vld [vmem:[%s13924_s3 + $0x50] sm:$0xff]  }
 0x6d4   :  { %v4935_v25 = vpop.permute.xlu0 %4934  ;;  %v4748_v31 = vpop.permute.xlu1 %4747 }
 0x6d5   :  { %5079 = vst.msk [vmem:[#allocation2] sm:$0xff] %vm5078_vm12, %v4935_v25  ;;  %v5742_v25 = vmax.f32 %v14546_v3, %v14533_v34  ;;  %v9251_v3 = vld [vmem:[#allocation3 + $0x8] sm:$0xff] }
 0x6d6   :  { %v6062_v51 = vld [vmem:[#allocation2 + $0x118] sm:$0xff]  ;;  %4889 = vst.msk [vmem:[#allocation2 + $0x18] sm:$0xff] %vm4885_vm11, %v4748_v31  ;;  %5010 = vrot.lane.b32.xlu0 %v11779_v49, %s9343_s12  ;;  %5008 = vrot.lane.b32.xlu1 %v11688_v42, %s9343_s12  ;;  %v5309_v49 = vsel %vm5271_vm3, %v14534_v18, %v14533_v34  ;;  %v14535_v42 = vld [vmem:[#allocation36_spill] sm:$0xff] }
 0x6d7   :  { %v6064_v15 = vmax.f32 %v6060_v53, %v6062_v51  ;;  %v5406_v24 = vmax.f32 %v14535_v42, %v5310_v23  ;;  %v5405_v21 = vmax.f32 %v14536_v20, %v5309_v49  ;;  %v14547_v31 = vld [vmem:[#allocation58_spill] sm:$0xff]  ;;  %v14548_v53 = vld [vmem:[#allocation56_spill] sm:$0xff] }
 0x6d8   :  { %v4939_v35 = vpop.permute.xlu0 %4938  ;;  %v4937_v13 = vpop.permute.xlu1 %4936  ;;  %v12966_v44 = vadd.f32 %v14547_v31, %v14521_v55  ;;  %v12970_v51 = vadd.f32 %v14548_v53, %v14521_v55 }
 0x6d9   :  { %5081 = vst.msk [vmem:[#allocation2 + $0x10] sm:$0xff] %vm5078_vm12, %v4939_v35  ;;  %v6065_v12 = vpack.c.bf16 %v6064_v15, %v6063_v41  ;;  %5080 = vst.msk [vmem:[#allocation2 + $0x8] sm:$0xff] %vm5078_vm12, %v4937_v13  ;;  %v14549_v41 = vld [vmem:[#allocation76_spill] sm:$0xff] }
 0x6da   :  { %5536 = vrot.lane.b32.xlu0 %v5404_v38, %s9345_s15  ;;  %5012 = vrot.lane.b32.xlu1 %v11794_v9, %s9343_s12  ;;  %v14539_v9 = vld [vmem:[#allocation33_spill] sm:$0xff]  ;;  %v14550_v15 = vmax.f32 %v14549_v41, 0.0  ;;  %v3050_v35 = vmax.f32 %v12966_v44, 0.0  ;;  %v3048_v13 = vmax.f32 %v12970_v51, 0.0  ;;  %v9167_v41 = vld [vmem:[%s13924_s3 + $0x60] sm:$0xff]  }
 0x6db   :  { %6066 = vst.msk [vmem:[#allocation3 + $0x40] sm:$0xff] %vm6001_vm0, %v6065_v12  ;;  %v14540_v22 = vmax.f32 %v14539_v9, 0.0  ;;  %v14551_v12 = vld [vmem:[#allocation60_spill] sm:$0xff] }
 0x6dc   :  { %v5465_v43 = vpop.permute.xlu0 %5464  ;;  %v4941_v40 = vpop.permute.xlu1 %4940  ;;  %v5744_v16 = vmax.f32 %v14550_v15, %v14537_v59  ;;  %v12987_v34 = vadd.f32 %v14551_v12, %v14521_v55  ;;  %v9253_v15 = vld [vmem:[#allocation3 + $0x18] sm:$0xff] }
 0x6dd   :  { %5609 = vst.msk [vmem:[#allocation2] sm:$0xff] %vm5608_vm13, %v5465_v43  ;;  %v5741_v29 = vmax.f32 %v14540_v22, %v11682_v0  ;;  %v12951_v0 = vadd.f32 %v14542_v48, %v14521_v55 }
 0x6de   :  { %5082 = vst.msk [vmem:[#allocation2 + $0x18] sm:$0xff] %vm5078_vm12, %v4941_v40  ;;  %5540 = vrot.lane.b32.xlu0 %v5406_v24, %s9345_s15  ;;  %5538 = vrot.lane.b32.xlu1 %v5405_v21, %s9345_s15  ;;  %v3052_v42 = vmax.f32 %v12987_v34, 0.0 }
 0x6df   :  { %v3046_v52 = vmax.f32 %v12951_v0, 0.0 }
 0x6e0   :  { %v5469_v50 = vpop.permute.xlu0 %5468  ;;  %v5467_v47 = vpop.permute.xlu1 %5466 }
 0x6e1   :  { %5611 = vst.msk [vmem:[#allocation2 + $0x10] sm:$0xff] %vm5608_vm13, %v5469_v50  ;;  %5610 = vst.msk [vmem:[#allocation2 + $0x8] sm:$0xff] %vm5608_vm13, %v5467_v47 }
 0x6e2   :  { %v12943_v30 = vld [vmem:[#allocation3 + $0x40] sm:$0xff]  ;;  %5873 = vrot.lane.b32.xlu0 %v5741_v29, %s9344_s14  ;;  %5542 = vrot.lane.b32.xlu1 %v5407_v45, %s9345_s15 }
 0x6e3   :  { %8420 = vmatmul.mubr.msk.bf16.gmra.mrb[108].mxu1 %vm6001_vm0, %v12943_v30 }
 0x6e4   :  { %v5802_v36 = vpop.permute.xlu0 %5801  ;;  %v5471_v61 = vpop.permute.xlu1 %5470 }
 0x6e5   :  { %5946 = vst.msk [vmem:[#allocation2] sm:$0xff] %vm5945_vm14, %v5802_v36 }
 0x6e6   :  { %5612 = vst.msk [vmem:[#allocation2 + $0x18] sm:$0xff] %vm5608_vm13, %v5471_v61  ;;  %5877 = vrot.lane.b32.xlu0 %v5743_v27, %s9344_s14  ;;  %5875 = vrot.lane.b32.xlu1 %v5742_v25, %s9344_s14  ;;  %v9252_v25 = vld [vmem:[#allocation3 + $0x10] sm:$0xff] }
 0x6e8   :  { %v5806_v58 = vpop.permute.xlu0 %5805  ;;  %v5804_v38 = vpop.permute.xlu1 %5803 }
 0x6e9   :  { %5948 = vst.msk [vmem:[#allocation2 + $0x10] sm:$0xff] %vm5945_vm14, %v5806_v58  ;;  %5947 = vst.msk [vmem:[#allocation2 + $0x8] sm:$0xff] %vm5945_vm14, %v5804_v38  ;;  %v9166_v58 = vld [vmem:[%s13924_s3 + $0x58] sm:$0xff]  }
 0x6ea   :  { %5263 = vrot.lane.b32.xlu0 %v3046_v52, %s9335_s0  ;;  %5879 = vrot.lane.b32.xlu1 %v5744_v16, %s9344_s14  ;;  %v9254_v16 = vld [vmem:[#allocation3 + $0x20] sm:$0xff] }
 0x6ec   :  { %v12982_v23 = vpop.permute.xlu0 %3181  ;;  %v5808_v18 = vpop.permute.xlu1 %5807  ;;  %v5994_v59 = vld [vmem:[#allocation2] sm:$0xff] }
 0x6ed   :  { %v12991_v49 = vmax.f32 %v12693_v19, %v12982_v23  ;;  %5949 = vst.msk [vmem:[#allocation2 + $0x18] sm:$0xff] %vm5945_vm14, %v5808_v18  ;;  %v9168_v18 = vld [vmem:[%s13924_s3 + $0x68] ss:$0 sps:$4 sm:$0xff]  }
 0x6ee   :  { %5267 = vrot.lane.b32.xlu0 %v3050_v35, %s9335_s0  ;;  %5265 = vrot.lane.b32.xlu1 %v3048_v13, %s9335_s0 }
 0x6ef   :  { %3334 = vst.msk [vmem:[#allocation2 + $0x140] sm:$0xff] %vm3293_vm2, %v12991_v49 }
 0x6f0   :  { %v13002_v55 = vpop.permute.xlu0 %3185  ;;  %v13005_v24 = vpop.permute.xlu1 %3183  ;;  %v5996_v21 = vld [vmem:[#allocation2 + $0x10] sm:$0xff]  ;;  %v5995_v37 = vld [vmem:[#allocation2 + $0x8] sm:$0xff] }
 0x6f1   :  { %v13009_v43 = vmax.f32 %v12714_v7, %v13002_v55  ;;  %v13013_v20 = vmax.f32 %v12716_v11, %v13005_v24  ;;  %v5998_v22 = vmax.f32 %v5994_v59, %v5996_v21 }
 0x6f2   :  { %3470 = vrot.lane.b32.xlu0 %v12991_v49, %s9335_s0  ;;  %5269 = vrot.lane.b32.xlu1 %v3052_v42, %s9335_s0 }
 0x6f3   :  { %3336 = vst.msk [vmem:[#allocation2 + $0x150] sm:$0xff] %vm3293_vm2, %v13009_v43  ;;  %3335 = vst.msk [vmem:[#allocation2 + $0x148] sm:$0xff] %vm3293_vm2, %v13013_v20 }
 0x6f4   :  { %v13024_v40 = vpop.permute.xlu0 %5255  ;;  %v5997_v14 = vld [vmem:[#allocation2 + $0x18] sm:$0xff]  ;;  %v13026_v9 = vpop.permute.xlu1 %3187 }
 0x6f5   :  { %v5999_v29 = vmax.f32 %v5995_v37, %v5997_v14  ;;  %v13030_v50 = vmax.f32 %v12741_v8, %v13026_v9  ;;  %v6471_v37 = vsel %vm6170_vm15, %v9168_v18, 0  ;;  %v9169_v14 = vld [vmem:[%s13924_s3 + $0x6c] sm:$0xff]  }
 0x6f6   :  { %3474 = vrot.lane.b32.xlu0 %v13009_v43, %s9335_s0  ;;  %3472 = vrot.lane.b32.xlu1 %v13013_v20, %s9335_s0 }
 0x6f7   :  { %v6000_v5 = vpack.c.bf16 %v5999_v29, %v5998_v22  ;;  %3337 = vst.msk [vmem:[#allocation2 + $0x158] sm:$0xff] %vm3293_vm2, %v13030_v50  ;;  %v9255_v22 = vld [vmem:[#allocation3 + $0x28] sm:$0xff] }
 0x6f8   :  { %v13038_v45 = vpop.permute.xlu0 %5259  ;;  %v13040_v47 = vpop.permute.xlu1 %5257 }
 0x6f9   :  { %6002 = vst.msk [vmem:[#allocation3] sm:$0xff] %vm6001_vm0, %v6000_v5 }
 0x6fa   :  { %3663 = vrot.lane.b32.xlu0 %v12991_v49, %s9336_s2  ;;  %3476 = vrot.lane.b32.xlu1 %v13030_v50, %s9335_s0 }
 0x6fc   :  { %v3463_v48 = vpop.permute.xlu0 %3462  ;;  %v13048_v26 = vpop.permute.xlu1 %5261 }
 0x6fd   :  { %3571 = vst.msk [vmem:[#allocation2 + $0x120] sm:$0xff] %vm3534_vm4, %v3463_v48 }
 0x6fe   :  { %3667 = vrot.lane.b32.xlu0 %v13009_v43, %s9336_s2  ;;  %3665 = vrot.lane.b32.xlu1 %v13013_v20, %s9336_s2 }
 0x700   :  { %v3467_v28 = vpop.permute.xlu0 %3466  ;;  %v3465_v27 = vpop.permute.xlu1 %3464  ;;  %v6091_v36 = vld [vmem:[#allocation3] sm:$0xff] }
 0x701   :  { %3573 = vst.msk [vmem:[#allocation2 + $0x130] sm:$0xff] %vm3534_vm4, %v3467_v28  ;;  %3572 = vst.msk [vmem:[#allocation2 + $0x128] sm:$0xff] %vm3534_vm4, %v3465_v27  ;;  %8433 = vmatprep.mubr.msk.bf16.mxu1 %vm6001_vm0, %v6091_v36 }
 0x702   :  { %3856 = vrot.lane.b32.xlu0 %v12991_v49, %s9337_s23  ;;  %8434 = vmatmul.mubr.msk.bf16.vlgmr.msra.gmra.mrb[96].mxu1 %vm6001_vm0, %v9251_v3 }
 0x703   :  { %3669 = vrot.lane.b32.xlu1 %v13030_v50, %s9336_s2  ;;  %8437 = vmatprep.mubr.msk.bf16.mxu1 %vm6001_vm0, %v9252_v25 }
 0x704   :  { %v3656_v61 = vpop.permute.xlu0 %3655  ;;  %8450 = vmatpush3.bf16.msra.mxu1 %v12780_v56  ;;  %v3469_v31 = vpop.permute.xlu1 %3468 }
 0x705   :  { %3764 = vst.msk [vmem:[#allocation2 + $0x120] sm:$0xff] %vm3727_vm5, %v3656_v61  ;;  %8451 = vmatprep.subr.bf16.mxu1 %v9165_v63 }
 0x706   :  { %3574 = vst.msk [vmem:[#allocation2 + $0x138] sm:$0xff] %vm3534_vm4, %v3469_v31  ;;  %3860 = vrot.lane.b32.xlu0 %v13009_v43, %s9337_s23  ;;  %v9170_v31 = vld [vmem:[%s13924_s3 + $0x74] sm:$0xff]  }
 0x707   :  { %3858 = vrot.lane.b32.xlu1 %v13013_v20, %s9337_s23 }
 0x708   :  { %v3660_v53 = vpop.permute.xlu0 %3659  ;;  %8452 = vmatpush3.bf16.msra.mxu1 %v9165_v63  ;;  %v3658_v56 = vpop.permute.xlu1 %3657 }
 0x709   :  { %3766 = vst.msk [vmem:[#allocation2 + $0x130] sm:$0xff] %vm3727_vm5, %v3660_v53  ;;  %8453 = vmatprep.subr.bf16.mxu1 %v9166_v58  ;;  %3765 = vst.msk [vmem:[#allocation2 + $0x128] sm:$0xff] %vm3727_vm5, %v3658_v56  ;;  %v13153_v53 = vld [vmem:[#allocation3 + $0x18] sm:$0xff]  ;;  %v13163_v56 = vld [vmem:[#allocation3 + $0x20] sm:$0xff] }
 0x70a   :  { %4049 = vrot.lane.b32.xlu0 %v12991_v49, %s9338_s24  ;;  %8438 = vmatmul.mubr.msk.bf16.gmra.mrb[100].mxu1 %vm6001_vm0, %v9253_v15 }
 0x70b   :  { %3862 = vrot.lane.b32.xlu1 %v13030_v50, %s9337_s23  ;;  %8441 = vmatprep.mubr.msk.bf16.mxu1 %vm6001_vm0, %v9254_v16  ;;  %v9171_v16 = vld [vmem:[%s13924_s3 + $0x7c] sm:$0xff]  }
 0x70c   :  { %v3849_v38 = vpop.permute.xlu0 %3848  ;;  %8454 = vmatpush3.bf16.msra.mxu1 %v9166_v58  ;;  %v3662_v12 = vpop.permute.xlu1 %3661 }
 0x70d   :  { %3957 = vst.msk [vmem:[#allocation2 + $0x120] sm:$0xff] %vm3920_vm6, %v3849_v38  ;;  %8455 = vmatprep.subr.bf16.mxu1 %v9167_v41 }
 0x70e   :  { %3767 = vst.msk [vmem:[#allocation2 + $0x138] sm:$0xff] %vm3727_vm5, %v3662_v12  ;;  %4053 = vrot.lane.b32.xlu0 %v13009_v43, %s9338_s24 }
 0x70f   :  { %4051 = vrot.lane.b32.xlu1 %v13013_v20, %s9338_s24 }
 0x710   :  { %v3853_v21 = vpop.permute.xlu0 %3852  ;;  %8456 = vmatpush3.bf16.msra.mxu1 %v9167_v41  ;;  %v3851_v59 = vpop.permute.xlu1 %3850 }
 0x711   :  { %3959 = vst.msk [vmem:[#allocation2 + $0x130] sm:$0xff] %vm3920_vm6, %v3853_v21  ;;  %9001 = vmatprep.subr.msk.bf16.mxu1 %vm6170_vm15, %v9168_v18  ;;  %3958 = vst.msk [vmem:[#allocation2 + $0x128] sm:$0xff] %vm3920_vm6, %v3851_v59  ;;  %v9172_v21 = vld [vmem:[%s13924_s3 + $0x84] sm:$0xff]  }
 0x712   :  { %4242 = vrot.lane.b32.xlu0 %v12991_v49, %s9339_s25  ;;  %8442 = vmatmul.mubr.msk.bf16.gmra.mrb[104].mxu1 %vm6001_vm0, %v9255_v22  ;;  %v13190_v59 = vld [vmem:[#allocation3 + $0x28] sm:$0xff] }
 0x713   :  { %4055 = vrot.lane.b32.xlu1 %v13030_v50, %s9338_s24  ;;  %8445 = vmatprep.mubr.msk.bf16.mxu1 %vm6001_vm0, %v12540_v10  ;;  %v6401_v10 = vld [vmem:[#allocation3 + $0x10] sm:$0xff] }
 0x714   :  { %v4042_v29 = vpop.permute.xlu0 %4041  ;;  %8458 = vmatpush3.bf16.msra.mxu1 %v6471_v37  ;;  %v3855_v5 = vpop.permute.xlu1 %3854  ;;  %v9256_v37 = vld [vmem:[#allocation3 + $0x30] sm:$0xff] }
 0x715   :  { %4150 = vst.msk [vmem:[#allocation2 + $0x120] sm:$0xff] %vm4113_vm7, %v4042_v29  ;;  %8475 = vmatprep.subr.bf16.mxu1 %v9169_v14  ;;  %v9173_v29 = vld [vmem:[%s13924_s3 + $0x8c] ss:$0 sps:$4 sm:$0xff]  }
 0x716   :  { %3960 = vst.msk [vmem:[#allocation2 + $0x138] sm:$0xff] %vm3920_vm6, %v3855_v5  ;;  %4246 = vrot.lane.b32.xlu0 %v13009_v43, %s9339_s25 }
 0x717   :  { %4244 = vrot.lane.b32.xlu1 %v13013_v20, %s9339_s25 }
 0x718   :  { %v4046_v48 = vpop.permute.xlu0 %4045  ;;  %v4044_v28 = vpop.permute.xlu1 %4043 }
 0x719   :  { %4152 = vst.msk [vmem:[#allocation2 + $0x130] sm:$0xff] %vm4113_vm7, %v4046_v48  ;;  %4151 = vst.msk [vmem:[#allocation2 + $0x128] sm:$0xff] %vm4113_vm7, %v4044_v28  ;;  %v6656_v28 = vsel %vm6170_vm15, %v9173_v29, 0 }
 0x71a   :  { %4435 = vrot.lane.b32.xlu0 %v12991_v49, %s9340_s26  ;;  %8446 = vmatmul.mubr.msk.bf16.gmra.mrb[108].mxu1 %vm6001_vm0, %v12758_v33 }
 0x71b   :  { %4248 = vrot.lane.b32.xlu1 %v13030_v50, %s9339_s25  ;;  %8459 = vmatprep.mubr.msk.bf16.mxu1 %vm6001_vm0, %v6401_v10 }
 0x71c   :  { %v13125_v27 = vpop.permute.xlu0 %3189  ;;  %v4048_v36 = vpop.permute.xlu1 %4047 }
 0x71d   :  { %v13129_v63 = vmax.f32 %v12826_v6, %v13125_v27  ;;  %4153 = vst.msk [vmem:[#allocation2 + $0x138] sm:$0xff] %vm4113_vm7, %v4048_v36  ;;  %v5312_v36 = vsel %vm5271_vm3, %v12982_v23, %v13024_v40 }
 0x71e   :  { %4439 = vrot.lane.b32.xlu0 %v13009_v43, %s9340_s26 }
 0x71f   :  { %3338 = vst.msk [vmem:[#allocation2 + $0x160] sm:$0xff] %vm3293_vm2, %v13129_v63  ;;  %4437 = vrot.lane.b32.xlu1 %v13013_v20, %s9340_s26 }
 0x720   :  { %v13138_v3 = vpop.permute.xlu0 %3193  ;;  %v13140_v25 = vpop.permute.xlu1 %3191 }
 0x721   :  { %v13144_v61 = vmax.f32 %v12838_v1, %v13138_v3  ;;  %v13151_v58 = vmax.f32 %v12840_v32, %v13140_v25 }
 0x722   :  { %4628 = vrot.lane.b32.xlu0 %v12991_v49, %s9341_s29  ;;  %8460 = vmatmul.mubr.msk.bf16.vlgmr.msra.gmra.mrb[96].mxu1 %vm6001_vm0, %v13153_v53 }
 0x723   :  { %3340 = vst.msk [vmem:[#allocation2 + $0x170] sm:$0xff] %vm3293_vm2, %v13144_v61  ;;  %4441 = vrot.lane.b32.xlu1 %v13030_v50, %s9340_s26  ;;  %3339 = vst.msk [vmem:[#allocation2 + $0x168] sm:$0xff] %vm3293_vm2, %v13151_v58  ;;  %8463 = vmatprep.mubr.msk.bf16.mxu1 %vm6001_vm0, %v13163_v56 }
 0x724   :  { %v4235_v41 = vpop.permute.xlu0 %4234  ;;  %8476 = vmatpush3.bf16.msra.mxu1 %v9169_v14  ;;  %v13170_v15 = vpop.permute.xlu1 %3195 }
 0x725   :  { %4343 = vst.msk [vmem:[#allocation2 + $0x120] sm:$0xff] %vm4306_vm8, %v4235_v41  ;;  %8477 = vmatprep.subr.bf16.mxu1 %v9170_v31  ;;  %v13177_v38 = vmax.f32 %v12850_v2, %v13170_v15  ;;  %v5314_v41 = vsel %vm5271_vm3, %v13002_v55, %v13038_v45 }
 0x726   :  { %4632 = vrot.lane.b32.xlu0 %v13009_v43, %s9341_s29 }
 0x727   :  { %4630 = vrot.lane.b32.xlu1 %v13013_v20, %s9341_s29  ;;  %3341 = vst.msk [vmem:[#allocation2 + $0x178] sm:$0xff] %vm3293_vm2, %v13177_v38  ;;  %vm7156_vm2 = vcmask 261248  }
 0x728   :  { %v4239_v12 = vpop.permute.xlu0 %4238  ;;  %8478 = vmatpush3.bf16.msra.mxu1 %v9170_v31  ;;  %v4237_v18 = vpop.permute.xlu1 %4236 }
 0x729   :  { %4345 = vst.msk [vmem:[#allocation2 + $0x130] sm:$0xff] %vm4306_vm8, %v4239_v12  ;;  %8479 = vmatprep.subr.bf16.mxu1 %v9171_v16  ;;  %4344 = vst.msk [vmem:[#allocation2 + $0x128] sm:$0xff] %vm4306_vm8, %v4237_v18  ;;  %v5315_v12 = vsel %vm5271_vm3, %v13026_v9, %v13048_v26  ;;  %v5747_v9 = vmax.f32 %v3042_v57, %v13038_v45  ;;  %v5748_v57 = vmax.f32 %v3044_v46, %v13048_v26 }
 0x72a   :  { %4821 = vrot.lane.b32.xlu0 %v12991_v49, %s9342_s30  ;;  %8464 = vmatmul.mubr.msk.bf16.gmra.mrb[100].mxu1 %vm6001_vm0, %v13190_v59 }
 0x72b   :  { %4634 = vrot.lane.b32.xlu1 %v13030_v50, %s9341_s29  ;;  %8467 = vmatprep.mubr.msk.bf16.mxu1 %vm6001_vm0, %v9256_v37 }
 0x72c   :  { %v4428_v14 = vpop.permute.xlu0 %4427  ;;  %8480 = vmatpush3.bf16.msra.mxu1 %v9171_v16  ;;  %v4241_v22 = vpop.permute.xlu1 %4240  ;;  %v5313_v16 = vsel %vm5271_vm3, %v13005_v24, %v13040_v47 }
 0x72d   :  { %4536 = vst.msk [vmem:[#allocation2 + $0x120] sm:$0xff] %vm4499_vm9, %v4428_v14  ;;  %8481 = vmatprep.subr.bf16.mxu1 %v9172_v21 }
 0x72e   :  { %4346 = vst.msk [vmem:[#allocation2 + $0x138] sm:$0xff] %vm4306_vm8, %v4241_v22  ;;  %4825 = vrot.lane.b32.xlu0 %v13009_v43, %s9342_s30 }
 0x72f   :  { %4823 = vrot.lane.b32.xlu1 %v13013_v20, %s9342_s30 }
 0x730   :  { %v4432_v5 = vpop.permute.xlu0 %4431  ;;  %8482 = vmatpush3.bf16.msra.mxu1 %v9172_v21  ;;  %v4430_v48 = vpop.permute.xlu1 %4429 }
 0x731   :  { %4538 = vst.msk [vmem:[#allocation2 + $0x130] sm:$0xff] %vm4499_vm9, %v4432_v5  ;;  %9002 = vmatprep.subr.msk.bf16.mxu1 %vm6170_vm15, %v9173_v29  ;;  %4537 = vst.msk [vmem:[#allocation2 + $0x128] sm:$0xff] %vm4499_vm9, %v4430_v48 }
 0x732   :  { %5014 = vrot.lane.b32.xlu0 %v12991_v49, %s9343_s12  ;;  %8468 = vmatmul.mubr.msk.bf16.gmra.mrb[104].mxu1 %vm6001_vm0, %v12758_v33  ;;  %v5408_v33 = vmax.f32 %v12693_v19, %v5312_v36  ;;  %v5410_v19 = vmax.f32 %v12714_v7, %v5314_v41  ;;  %v5745_v7 = vmax.f32 %v3038_v54, %v13024_v40 }
 0x733   :  { %4827 = vrot.lane.b32.xlu1 %v13030_v50, %s9342_s30  ;;  %8471 = vmatprep.mubr.msk.bf16.mxu1 %vm6001_vm0, %v12943_v30  ;;  %v5746_v54 = vmax.f32 %v3040_v60, %v13040_v47 }
 0x734   :  { %v4621_v10 = vpop.permute.xlu0 %4620  ;;  %8484 = vmatpush3.bf16.msra.mxu1 %v6656_v28  ;;  %v4434_v31 = vpop.permute.xlu1 %4433 }
 0x735   :  { %4729 = vst.msk [vmem:[#allocation2 + $0x120] sm:$0xff] %vm4692_vm10, %v4621_v10  ;;  %8501 = vmatprep.subr.bf16.mxu1 %v13264_v17 }
 0x736   :  { %4539 = vst.msk [vmem:[#allocation2 + $0x138] sm:$0xff] %vm4499_vm9, %v4434_v31  ;;  %5018 = vrot.lane.b32.xlu0 %v13009_v43, %s9343_s12 }
 0x737   :  { %5016 = vrot.lane.b32.xlu1 %v13013_v20, %s9343_s12  ;;  %v5409_v20 = vmax.f32 %v12716_v11, %v5313_v16  ;;  %v5411_v11 = vmax.f32 %v12741_v8, %v5315_v12 }
 0x738   :  { %v4625_v49 = vpop.permute.xlu0 %4624  ;;  %v4623_v23 = vpop.permute.xlu1 %4622 }
 0x739   :  { %4731 = vst.msk [vmem:[#allocation2 + $0x130] sm:$0xff] %vm4692_vm10, %v4625_v49  ;;  %4730 = vst.msk [vmem:[#allocation2 + $0x128] sm:$0xff] %vm4692_vm10, %v4623_v23 }
 0x73a   :  { %5544 = vrot.lane.b32.xlu0 %v5408_v33, %s9345_s15 }
 0x73b   :  { %5020 = vrot.lane.b32.xlu1 %v13030_v50, %s9343_s12 }
 0x73c   :  { %v4814_v43 = vpop.permute.xlu0 %4813  ;;  %v4627_v55 = vpop.permute.xlu1 %4626 }
 0x73d   :  { %4922 = vst.msk [vmem:[#allocation2 + $0x120] sm:$0xff] %vm4885_vm11, %v4814_v43 }
 0x73e   :  { %4732 = vst.msk [vmem:[#allocation2 + $0x138] sm:$0xff] %vm4692_vm10, %v4627_v55  ;;  %5548 = vrot.lane.b32.xlu0 %v5410_v19, %s9345_s15 }
 0x73f   :  { %5546 = vrot.lane.b32.xlu1 %v5409_v20, %s9345_s15 }
 0x740   :  { %v4818_v24 = vpop.permute.xlu0 %4817  ;;  %v4816_v50 = vpop.permute.xlu1 %4815 }
 0x741   :  { %4924 = vst.msk [vmem:[#allocation2 + $0x130] sm:$0xff] %vm4885_vm11, %v4818_v24  ;;  %4923 = vst.msk [vmem:[#allocation2 + $0x128] sm:$0xff] %vm4885_vm11, %v4816_v50 }
 0x742   :  { %5881 = vrot.lane.b32.xlu0 %v5745_v7, %s9344_s14 }
 0x743   :  { %5550 = vrot.lane.b32.xlu1 %v5411_v11, %s9345_s15 }
 0x744   :  { %v5007_v18 = vpop.permute.xlu0 %5006  ;;  %v4820_v8 = vpop.permute.xlu1 %4819 }
 0x745   :  { %5115 = vst.msk [vmem:[#allocation2 + $0x120] sm:$0xff] %vm5078_vm12, %v5007_v18 }
 0x746   :  { %4925 = vst.msk [vmem:[#allocation2 + $0x138] sm:$0xff] %vm4885_vm11, %v4820_v8  ;;  %5885 = vrot.lane.b32.xlu0 %v5747_v9, %s9344_s14 }
 0x747   :  { %5883 = vrot.lane.b32.xlu1 %v5746_v54, %s9344_s14  ;;  %v9176_v54 = vld [vmem:[%s13924_s3 + $0xa0] sm:$0xff]  }
 0x748   :  { %v5011_v62 = vpop.permute.xlu0 %5010  ;;  %v5009_v4 = vpop.permute.xlu1 %5008 }
 0x749   :  { %5117 = vst.msk [vmem:[#allocation2 + $0x130] sm:$0xff] %vm5078_vm12, %v5011_v62  ;;  %5116 = vst.msk [vmem:[#allocation2 + $0x128] sm:$0xff] %vm5078_vm12, %v5009_v4  ;;  %v13383_v62 = vld [vmem:[#allocation3 + $0x30] sm:$0xff]  ;;  %v13393_v4 = vld [vmem:[#allocation3 + $0x38] sm:$0xff] }
 0x74a   :  { %3478 = vrot.lane.b32.xlu0 %v13129_v63, %s9335_s0 }
 0x74b   :  { %5887 = vrot.lane.b32.xlu1 %v5748_v57, %s9344_s14  ;;  %v9177_v57 = vld [vmem:[%s13924_s3 + $0xa8] sm:$0xff]  }
 0x74c   :  { %v5537_v60 = vpop.permute.xlu0 %5536  ;;  %v5013_v40 = vpop.permute.xlu1 %5012 }
 0x74d   :  { %5645 = vst.msk [vmem:[#allocation2 + $0x120] sm:$0xff] %vm5608_vm13, %v5537_v60 }
 0x74e   :  { %5118 = vst.msk [vmem:[#allocation2 + $0x138] sm:$0xff] %vm5078_vm12, %v5013_v40  ;;  %3482 = vrot.lane.b32.xlu0 %v13144_v61, %s9335_s0 }
 0x74f   :  { %3480 = vrot.lane.b32.xlu1 %v13151_v58, %s9335_s0 }
 0x750   :  { %v5541_v39 = vpop.permute.xlu0 %5540  ;;  %v5539_v46 = vpop.permute.xlu1 %5538 }
 0x751   :  { %5647 = vst.msk [vmem:[#allocation2 + $0x130] sm:$0xff] %vm5608_vm13, %v5541_v39  ;;  %5646 = vst.msk [vmem:[#allocation2 + $0x128] sm:$0xff] %vm5608_vm13, %v5539_v46  ;;  %v9178_v39 = vld [vmem:[%s13924_s3 + $0xb0] ss:$0 sps:$4 sm:$0xff]  }
 0x752   :  { %3671 = vrot.lane.b32.xlu0 %v13129_v63, %s9336_s2 }
 0x753   :  { %3484 = vrot.lane.b32.xlu1 %v13177_v38, %s9335_s0 }
 0x754   :  { %v5874_v45 = vpop.permute.xlu0 %5873  ;;  %v5543_v47 = vpop.permute.xlu1 %5542 }
 0x755   :  { %5982 = vst.msk [vmem:[#allocation2 + $0x120] sm:$0xff] %vm5945_vm14, %v5874_v45 }
 0x756   :  { %5648 = vst.msk [vmem:[#allocation2 + $0x138] sm:$0xff] %vm5608_vm13, %v5543_v47  ;;  %3675 = vrot.lane.b32.xlu0 %v13144_v61, %s9336_s2  ;;  %v6841_v47 = vsel %vm6170_vm15, %v9178_v39, 0 }
 0x757   :  { %3673 = vrot.lane.b32.xlu1 %v13151_v58, %s9336_s2 }
 0x758   :  { %v5878_v26 = vpop.permute.xlu0 %5877  ;;  %v5876_v21 = vpop.permute.xlu1 %5875 }
 0x759   :  { %5984 = vst.msk [vmem:[#allocation2 + $0x130] sm:$0xff] %vm5945_vm14, %v5878_v26  ;;  %5983 = vst.msk [vmem:[#allocation2 + $0x128] sm:$0xff] %vm5945_vm14, %v5876_v21 }
 0x75a   :  { %3864 = vrot.lane.b32.xlu0 %v13129_v63, %s9337_s23 }
 0x75b   :  { %3677 = vrot.lane.b32.xlu1 %v13177_v38, %s9336_s2 }
 0x75c   :  { %v13306_v37 = vpop.permute.xlu0 %5263  ;;  %v5880_v14 = vpop.permute.xlu1 %5879  ;;  %v6067_v28 = vld [vmem:[#allocation2 + $0x120] sm:$0xff] }
 0x75d   :  { %5985 = vst.msk [vmem:[#allocation2 + $0x138] sm:$0xff] %vm5945_vm14, %v5880_v14  ;;  %v5316_v21 = vsel %vm5271_vm3, %v13125_v27, %v13306_v37 }
 0x75e   :  { %3868 = vrot.lane.b32.xlu0 %v13144_v61, %s9337_s23 }
 0x75f   :  { %3866 = vrot.lane.b32.xlu1 %v13151_v58, %s9337_s23 }
 0x760   :  { %v13313_v22 = vpop.permute.xlu0 %5267  ;;  %v13315_v29 = vpop.permute.xlu1 %5265  ;;  %v6069_v5 = vld [vmem:[#allocation2 + $0x130] sm:$0xff]  ;;  %v6068_v10 = vld [vmem:[#allocation2 + $0x128] sm:$0xff] }
 0x761   :  { %v6071_v33 = vmax.f32 %v6067_v28, %v6069_v5  ;;  %v5318_v5 = vsel %vm5271_vm3, %v13138_v3, %v13313_v22  ;;  %v5750_v0 = vmax.f32 %v3048_v13, %v13315_v29 }
 0x762   :  { %4057 = vrot.lane.b32.xlu0 %v13129_v63, %s9338_s24 }
 0x763   :  { %3870 = vrot.lane.b32.xlu1 %v13177_v38, %s9337_s23 }
 0x764   :  { %v3471_v48 = vpop.permute.xlu0 %3470  ;;  %v6070_v36 = vld [vmem:[#allocation2 + $0x138] sm:$0xff]  ;;  %v13322_v31 = vpop.permute.xlu1 %5269 }
 0x765   :  { %3575 = vst.msk [vmem:[#allocation2 + $0x140] sm:$0xff] %vm3534_vm4, %v3471_v48  ;;  %v6072_v49 = vmax.f32 %v6068_v10, %v6070_v36  ;;  %v5317_v48 = vsel %vm5271_vm3, %v13140_v25, %v13315_v29  ;;  %v5319_v28 = vsel %vm5271_vm3, %v13170_v15, %v13322_v31  ;;  %v5751_v15 = vmax.f32 %v3050_v35, %v13313_v22 }
 0x766   :  { %4061 = vrot.lane.b32.xlu0 %v13144_v61, %s9338_s24  ;;  %v5752_v44 = vmax.f32 %v3052_v42, %v13322_v31  ;;  %vm7221_vm3 = vcmask 392448  }
 0x767   :  { %4059 = vrot.lane.b32.xlu1 %v13151_v58, %s9338_s24  ;;  %v6073_v41 = vpack.c.bf16 %v6072_v49, %v6071_v33 }
 0x768   :  { %v3475_v23 = vpop.permute.xlu0 %3474  ;;  %v3473_v16 = vpop.permute.xlu1 %3472 }
 0x769   :  { %3577 = vst.msk [vmem:[#allocation2 + $0x150] sm:$0xff] %vm3534_vm4, %v3475_v23  ;;  %3576 = vst.msk [vmem:[#allocation2 + $0x148] sm:$0xff] %vm3534_vm4, %v3473_v16 }
 0x76a   :  { %6074 = vst.msk [vmem:[#allocation3 + $0x48] sm:$0xff] %vm6001_vm0, %v6073_v41  ;;  %4250 = vrot.lane.b32.xlu0 %v13129_v63, %s9339_s25 }
 0x76b   :  { %4063 = vrot.lane.b32.xlu1 %v13177_v38, %s9338_s24 }
 0x76c   :  { %v3664_v19 = vpop.permute.xlu0 %3663  ;;  %v3477_v43 = vpop.permute.xlu1 %3476 }
 0x76d   :  { %3768 = vst.msk [vmem:[#allocation2 + $0x140] sm:$0xff] %vm3727_vm5, %v3664_v19 }
 0x76e   :  { %3578 = vst.msk [vmem:[#allocation2 + $0x158] sm:$0xff] %vm3534_vm4, %v3477_v43  ;;  %4254 = vrot.lane.b32.xlu0 %v13144_v61, %s9339_s25 }
 0x76f   :  { %4252 = vrot.lane.b32.xlu1 %v13151_v58, %s9339_s25 }
 0x770   :  { %v3668_v20 = vpop.permute.xlu0 %3667  ;;  %v3666_v55 = vpop.permute.xlu1 %3665 }
 0x771   :  { %3770 = vst.msk [vmem:[#allocation2 + $0x150] sm:$0xff] %vm3727_vm5, %v3668_v20  ;;  %v13342_v12 = vld [vmem:[#allocation3 + $0x48] sm:$0xff]  ;;  %3769 = vst.msk [vmem:[#allocation2 + $0x148] sm:$0xff] %vm3727_vm5, %v3666_v55 }
 0x772   :  { %8472 = vmatmul.mubr.msk.bf16.gmra.mrb[108].mxu1 %vm6001_vm0, %v13342_v12  ;;  %4443 = vrot.lane.b32.xlu0 %v13129_v63, %s9340_s26 }
 0x773   :  { %8485 = vmatprep.mubr.msk.bf16.mxu1 %vm6001_vm0, %v13153_v53  ;;  %4256 = vrot.lane.b32.xlu1 %v13177_v38, %s9339_s25  ;;  %v9175_v53 = vld [vmem:[%s13924_s3 + $0x98] sm:$0xff]  }
 0x774   :  { %v3857_v7 = vpop.permute.xlu0 %3856 }
 0x775   :  { %3961 = vst.msk [vmem:[#allocation2 + $0x140] sm:$0xff] %vm3920_vm6, %v3857_v7  ;;  %v3670_v24 = vpop.permute.xlu1 %3669 }
 0x776   :  { %3771 = vst.msk [vmem:[#allocation2 + $0x158] sm:$0xff] %vm3727_vm5, %v3670_v24  ;;  %4447 = vrot.lane.b32.xlu0 %v13144_v61, %s9340_s26 }
 0x777   :  { %4445 = vrot.lane.b32.xlu1 %v13151_v58, %s9340_s26 }
 0x778   :  { %v3861_v11 = vpop.permute.xlu0 %3860 }
 0x779   :  { %3963 = vst.msk [vmem:[#allocation2 + $0x150] sm:$0xff] %vm3920_vm6, %v3861_v11  ;;  %v3859_v50 = vpop.permute.xlu1 %3858 }
 0x77a   :  { %3962 = vst.msk [vmem:[#allocation2 + $0x148] sm:$0xff] %vm3920_vm6, %v3859_v50  ;;  %8486 = vmatmul.mubr.msk.bf16.vlgmr.msra.gmra.mrb[96].mxu1 %vm6001_vm0, %v13163_v56  ;;  %4636 = vrot.lane.b32.xlu0 %v13129_v63, %s9341_s29 }
 0x77b   :  { %8489 = vmatprep.mubr.msk.bf16.mxu1 %vm6001_vm0, %v13190_v59  ;;  %4449 = vrot.lane.b32.xlu1 %v13177_v38, %s9340_s26 }
 0x77c   :  { %v4050_v9 = vpop.permute.xlu0 %4049  ;;  %8502 = vmatpush3.bf16.msra.mxu1 %v13264_v17 }
 0x77d   :  { %4154 = vst.msk [vmem:[#allocation2 + $0x140] sm:$0xff] %vm4113_vm7, %v4050_v9  ;;  %v3863_v18 = vpop.permute.xlu1 %3862  ;;  %8503 = vmatprep.subr.bf16.mxu1 %v9175_v53 }
 0x77e   :  { %3964 = vst.msk [vmem:[#allocation2 + $0x158] sm:$0xff] %vm3920_vm6, %v3863_v18  ;;  %4640 = vrot.lane.b32.xlu0 %v13144_v61, %s9341_s29 }
 0x77f   :  { %4638 = vrot.lane.b32.xlu1 %v13151_v58, %s9341_s29 }
 0x780   :  { %v4054_v8 = vpop.permute.xlu0 %4053  ;;  %8504 = vmatpush3.bf16.msra.mxu1 %v9175_v53 }
 0x781   :  { %4156 = vst.msk [vmem:[#allocation2 + $0x150] sm:$0xff] %vm4113_vm7, %v4054_v8  ;;  %v4052_v17 = vpop.permute.xlu1 %4051  ;;  %8505 = vmatprep.subr.bf16.mxu1 %v9176_v54 }
 0x782   :  { %4155 = vst.msk [vmem:[#allocation2 + $0x148] sm:$0xff] %vm4113_vm7, %v4052_v17  ;;  %8490 = vmatmul.mubr.msk.bf16.gmra.mrb[100].mxu1 %vm6001_vm0, %v13383_v62  ;;  %4829 = vrot.lane.b32.xlu0 %v13129_v63, %s9342_s30 }
 0x783   :  { %8493 = vmatprep.mubr.msk.bf16.mxu1 %vm6001_vm0, %v13393_v4  ;;  %4642 = vrot.lane.b32.xlu1 %v13177_v38, %s9341_s29 }
 0x784   :  { %v4243_v60 = vpop.permute.xlu0 %4242  ;;  %8506 = vmatpush3.bf16.msra.mxu1 %v9176_v54 }
 0x785   :  { %4347 = vst.msk [vmem:[#allocation2 + $0x140] sm:$0xff] %vm4306_vm8, %v4243_v60  ;;  %v4056_v40 = vpop.permute.xlu1 %4055  ;;  %8507 = vmatprep.subr.bf16.mxu1 %v9177_v57 }
 0x786   :  { %4157 = vst.msk [vmem:[#allocation2 + $0x158] sm:$0xff] %vm4113_vm7, %v4056_v40  ;;  %4833 = vrot.lane.b32.xlu0 %v13144_v61, %s9342_s30 }
 0x787   :  { %4831 = vrot.lane.b32.xlu1 %v13151_v58, %s9342_s30 }
 0x788   :  { %v4247_v46 = vpop.permute.xlu0 %4246  ;;  %8508 = vmatpush3.bf16.msra.mxu1 %v9177_v57 }
 0x789   :  { %4349 = vst.msk [vmem:[#allocation2 + $0x150] sm:$0xff] %vm4306_vm8, %v4247_v46  ;;  %v4245_v45 = vpop.permute.xlu1 %4244  ;;  %9003 = vmatprep.subr.msk.bf16.mxu1 %vm6170_vm15, %v9178_v39 }
 0x78a   :  { %4348 = vst.msk [vmem:[#allocation2 + $0x148] sm:$0xff] %vm4306_vm8, %v4245_v45  ;;  %8494 = vmatmul.mubr.msk.bf16.gmra.mrb[104].mxu1 %vm6001_vm0, %v12943_v30  ;;  %5022 = vrot.lane.b32.xlu0 %v13129_v63, %s9343_s12  ;;  %v5412_v30 = vmax.f32 %v12826_v6, %v5316_v21  ;;  %v5414_v6 = vmax.f32 %v12838_v1, %v5318_v5 }
 0x78b   :  { %8497 = vmatprep.mubr.msk.bf16.mxu1 %vm6001_vm0, %v13342_v12  ;;  %4835 = vrot.lane.b32.xlu1 %v13177_v38, %s9342_s30  ;;  %v5749_v1 = vmax.f32 %v3046_v52, %v13306_v37 }
 0x78c   :  { %v4436_v26 = vpop.permute.xlu0 %4435  ;;  %8510 = vmatpush3.bf16.msra.mxu1 %v6841_v47 }
 0x78d   :  { %4540 = vst.msk [vmem:[#allocation2 + $0x140] sm:$0xff] %vm4499_vm9, %v4436_v26  ;;  %v4249_v14 = vpop.permute.xlu1 %4248 }
 0x78e   :  { %4350 = vst.msk [vmem:[#allocation2 + $0x158] sm:$0xff] %vm4306_vm8, %v4249_v14  ;;  %5026 = vrot.lane.b32.xlu0 %v13144_v61, %s9343_s12 }
 0x78f   :  { %5024 = vrot.lane.b32.xlu1 %v13151_v58, %s9343_s12  ;;  %v5413_v58 = vmax.f32 %v12840_v32, %v5317_v48  ;;  %v5415_v32 = vmax.f32 %v12850_v2, %v5319_v28 }
 0x790   :  { %v4440_v63 = vpop.permute.xlu0 %4439 }
 0x791   :  { %4542 = vst.msk [vmem:[#allocation2 + $0x150] sm:$0xff] %vm4499_vm9, %v4440_v63  ;;  %v4438_v27 = vpop.permute.xlu1 %4437  ;;  %v6775_v63 = vld [vmem:[#allocation3 + $0x40] sm:$0xff] }
 0x792   :  { %4541 = vst.msk [vmem:[#allocation2 + $0x148] sm:$0xff] %vm4499_vm9, %v4438_v27  ;;  %5552 = vrot.lane.b32.xlu0 %v5412_v30, %s9345_s15 }
 0x793   :  { %5028 = vrot.lane.b32.xlu1 %v13177_v38, %s9343_s12  ;;  %s9346_s12 = smov 112  }
 0x794   :  { %v4629_v61 = vpop.permute.xlu0 %4628 }
 0x795   :  { %4733 = vst.msk [vmem:[#allocation2 + $0x140] sm:$0xff] %vm4692_vm10, %v4629_v61  ;;  %v4442_v3 = vpop.permute.xlu1 %4441 }
 0x796   :  { %4543 = vst.msk [vmem:[#allocation2 + $0x158] sm:$0xff] %vm4499_vm9, %v4442_v3  ;;  %5556 = vrot.lane.b32.xlu0 %v5414_v6, %s9345_s15 }
 0x797   :  { %5554 = vrot.lane.b32.xlu1 %v5413_v58, %s9345_s15 }
 0x798   :  { %v4633_v25 = vpop.permute.xlu0 %4632 }
 0x799   :  { %4735 = vst.msk [vmem:[#allocation2 + $0x150] sm:$0xff] %vm4692_vm10, %v4633_v25  ;;  %v4631_v38 = vpop.permute.xlu1 %4630 }
 0x79a   :  { %4734 = vst.msk [vmem:[#allocation2 + $0x148] sm:$0xff] %vm4692_vm10, %v4631_v38  ;;  %5889 = vrot.lane.b32.xlu0 %v5749_v1, %s9344_s14 }
 0x79b   :  { %5558 = vrot.lane.b32.xlu1 %v5415_v32, %s9345_s15 }
 0x79c   :  { %v4822_v10 = vpop.permute.xlu0 %4821 }
 0x79d   :  { %4926 = vst.msk [vmem:[#allocation2 + $0x140] sm:$0xff] %vm4885_vm11, %v4822_v10  ;;  %v4635_v2 = vpop.permute.xlu1 %4634 }
 0x79e   :  { %4736 = vst.msk [vmem:[#allocation2 + $0x158] sm:$0xff] %vm4692_vm10, %v4635_v2  ;;  %5893 = vrot.lane.b32.xlu0 %v5751_v15, %s9344_s14 }
 0x79f   :  { %5891 = vrot.lane.b32.xlu1 %v5750_v0, %s9344_s14 }
 0x7a0   :  { %v4826_v52 = vpop.permute.xlu0 %4825 }
 0x7a1   :  { %4928 = vst.msk [vmem:[#allocation2 + $0x150] sm:$0xff] %vm4885_vm11, %v4826_v52  ;;  %v4824_v35 = vpop.permute.xlu1 %4823 }
 0x7a2   :  { %4927 = vst.msk [vmem:[#allocation2 + $0x148] sm:$0xff] %vm4885_vm11, %v4824_v35 }
 0x7a3   :  { %5895 = vrot.lane.b32.xlu1 %v5752_v44, %s9344_s14 }
 0x7a4   :  { %v5015_v51 = vpop.permute.xlu0 %5014 }
 0x7a5   :  { %5119 = vst.msk [vmem:[#allocation2 + $0x140] sm:$0xff] %vm5078_vm12, %v5015_v51  ;;  %v4828_v13 = vpop.permute.xlu1 %4827 }
 0x7a6   :  { %4929 = vst.msk [vmem:[#allocation2 + $0x158] sm:$0xff] %vm4885_vm11, %v4828_v13 }
 0x7a8   :  { %v5019_v37 = vpop.permute.xlu0 %5018 }
 0x7a9   :  { %5121 = vst.msk [vmem:[#allocation2 + $0x150] sm:$0xff] %vm5078_vm12, %v5019_v37  ;;  %v5017_v22 = vpop.permute.xlu1 %5016 }
 0x7aa   :  { %5120 = vst.msk [vmem:[#allocation2 + $0x148] sm:$0xff] %vm5078_vm12, %v5017_v22 }
 0x7ac   :  { %v5545_v34 = vpop.permute.xlu0 %5544 }
 0x7ad   :  { %5649 = vst.msk [vmem:[#allocation2 + $0x140] sm:$0xff] %vm5608_vm13, %v5545_v34  ;;  %v5021_v42 = vpop.permute.xlu1 %5020 }
 0x7ae   :  { %5122 = vst.msk [vmem:[#allocation2 + $0x158] sm:$0xff] %vm5078_vm12, %v5021_v42 }
 0x7b0   :  { %v5549_v29 = vpop.permute.xlu0 %5548 }
 0x7b1   :  { %5651 = vst.msk [vmem:[#allocation2 + $0x150] sm:$0xff] %vm5608_vm13, %v5549_v29  ;;  %v5547_v36 = vpop.permute.xlu1 %5546 }
 0x7b2   :  { %5650 = vst.msk [vmem:[#allocation2 + $0x148] sm:$0xff] %vm5608_vm13, %v5547_v36 }
 0x7b4   :  { %v5882_v31 = vpop.permute.xlu0 %5881 }
 0x7b5   :  { %5986 = vst.msk [vmem:[#allocation2 + $0x140] sm:$0xff] %vm5945_vm14, %v5882_v31  ;;  %v5551_v33 = vpop.permute.xlu1 %5550 }
 0x7b6   :  { %5652 = vst.msk [vmem:[#allocation2 + $0x158] sm:$0xff] %vm5608_vm13, %v5551_v33 }
 0x7b8   :  { %v5886_v49 = vpop.permute.xlu0 %5885 }
 0x7b9   :  { %5988 = vst.msk [vmem:[#allocation2 + $0x150] sm:$0xff] %vm5945_vm14, %v5886_v49  ;;  %v5884_v41 = vpop.permute.xlu1 %5883 }
 0x7ba   :  { %5987 = vst.msk [vmem:[#allocation2 + $0x148] sm:$0xff] %vm5945_vm14, %v5884_v41 }
 0x7bc   :  { %v3479_v23 = vpop.permute.xlu0 %3478  ;;  %v6075_v7 = vld [vmem:[#allocation2 + $0x140] sm:$0xff] }
 0x7bd   :  { %3579 = vst.msk [vmem:[#allocation2 + $0x160] sm:$0xff] %vm3534_vm4, %v3479_v23  ;;  %v5888_v16 = vpop.permute.xlu1 %5887 }
 0x7be   :  { %5989 = vst.msk [vmem:[#allocation2 + $0x158] sm:$0xff] %vm5945_vm14, %v5888_v16 }
 0x7c0   :  { %v3483_v19 = vpop.permute.xlu0 %3482  ;;  %v6077_v20 = vld [vmem:[#allocation2 + $0x150] sm:$0xff] }
 0x7c1   :  { %3581 = vst.msk [vmem:[#allocation2 + $0x170] sm:$0xff] %vm3534_vm4, %v3483_v19  ;;  %v3481_v43 = vpop.permute.xlu1 %3480  ;;  %v6076_v24 = vld [vmem:[#allocation2 + $0x148] sm:$0xff]  ;;  %v6079_v53 = vmax.f32 %v6075_v7, %v6077_v20  ;;  %v8242_v19 = vld [vmem:[%s13925_s4] ss:$0 sm:$0xff]  ;;  %s9347_s4 = smov 96  }
 0x7c2   :  { %3580 = vst.msk [vmem:[#allocation2 + $0x168] sm:$0xff] %vm3534_vm4, %v3481_v43 }
 0x7c4   :  { %v3672_v55 = vpop.permute.xlu0 %3671 }
 0x7c5   :  { %v6078_v11 = vld [vmem:[#allocation2 + $0x158] sm:$0xff]  ;;  %3772 = vst.msk [vmem:[#allocation2 + $0x160] sm:$0xff] %vm3727_vm5, %v3672_v55  ;;  %v3485_v50 = vpop.permute.xlu1 %3484 }
 0x7c6   :  { %v6080_v9 = vmax.f32 %v6076_v24, %v6078_v11  ;;  %3582 = vst.msk [vmem:[#allocation2 + $0x178] sm:$0xff] %vm3534_vm4, %v3485_v50  ;;  %vm7286_vm4 = vcmask 523648  }
 0x7c8   :  { %v6081_v18 = vpack.c.bf16 %v6080_v9, %v6079_v53  ;;  %v3676_v54 = vpop.permute.xlu0 %3675 }
 0x7c9   :  { %3774 = vst.msk [vmem:[#allocation2 + $0x170] sm:$0xff] %vm3727_vm5, %v3676_v54  ;;  %v3674_v8 = vpop.permute.xlu1 %3673 }
 0x7ca   :  { %6082 = vst.msk [vmem:[#allocation3 + $0x50] sm:$0xff] %vm6001_vm0, %v6081_v18 }
 0x7cb   :  { %3773 = vst.msk [vmem:[#allocation2 + $0x168] sm:$0xff] %vm3727_vm5, %v3674_v8 }
 0x7cc   :  { %v3865_v17 = vpop.permute.xlu0 %3864 }
 0x7cd   :  { %3965 = vst.msk [vmem:[#allocation2 + $0x160] sm:$0xff] %vm3920_vm6, %v3865_v17  ;;  %v3678_v57 = vpop.permute.xlu1 %3677 }
 0x7ce   :  { %3775 = vst.msk [vmem:[#allocation2 + $0x178] sm:$0xff] %vm3727_vm5, %v3678_v57  ;;  %vm7310_vm5 = vcmask 523264  }
 0x7d0   :  { %v3869_v60 = vpop.permute.xlu0 %3868 }
 0x7d1   :  { %3967 = vst.msk [vmem:[#allocation2 + $0x170] sm:$0xff] %vm3920_vm6, %v3869_v60  ;;  %v3867_v40 = vpop.permute.xlu1 %3866  ;;  %v6593_v39 = vld [vmem:[#allocation3 + $0x50] sm:$0xff] }
 0x7d2   :  { %3966 = vst.msk [vmem:[#allocation2 + $0x168] sm:$0xff] %vm3920_vm6, %v3867_v40  ;;  %8498 = vmatmul.mubr.msk.bf16.gmra.mrb[108].mxu1 %vm6001_vm0, %v6593_v39 }
 0x7d3   :  { %8511 = vmatprep.mubr.msk.bf16.mxu1 %vm6001_vm0, %v13163_v56 }
 0x7d4   :  { %v4058_v46 = vpop.permute.xlu0 %4057 }
 0x7d5   :  { %4158 = vst.msk [vmem:[#allocation2 + $0x160] sm:$0xff] %vm4113_vm7, %v4058_v46  ;;  %v3871_v45 = vpop.permute.xlu1 %3870 }
 0x7d6   :  { %3968 = vst.msk [vmem:[#allocation2 + $0x178] sm:$0xff] %vm3920_vm6, %v3871_v45  ;;  %vm7323_vm6 = vcmask 1048064  }
 0x7d8   :  { %v4062_v47 = vpop.permute.xlu0 %4061 }
 0x7d9   :  { %4160 = vst.msk [vmem:[#allocation2 + $0x170] sm:$0xff] %vm4113_vm7, %v4062_v47  ;;  %v4060_v26 = vpop.permute.xlu1 %4059 }
 0x7da   :  { %4159 = vst.msk [vmem:[#allocation2 + $0x168] sm:$0xff] %vm4113_vm7, %v4060_v26  ;;  %8512 = vmatmul.mubr.msk.bf16.vlgmr.msra.gmra.mrb[96].mxu1 %vm6001_vm0, %v13190_v59 }
 0x7db   :  { %8515 = vmatprep.mubr.msk.bf16.mxu1 %vm6001_vm0, %v13383_v62 }
 0x7dc   :  { %v4251_v21 = vpop.permute.xlu0 %4250 }
 0x7dd   :  { %4351 = vst.msk [vmem:[#allocation2 + $0x160] sm:$0xff] %vm4306_vm8, %v4251_v21  ;;  %v4064_v56 = vpop.permute.xlu1 %4063 }
 0x7de   :  { %4161 = vst.msk [vmem:[#allocation2 + $0x178] sm:$0xff] %vm4113_vm7, %v4064_v56  ;;  %vm9349_vm7 = vmmov 0  }
 0x7e0   :  { %v4255_v14 = vpop.permute.xlu0 %4254 }
 0x7e1   :  { %4353 = vst.msk [vmem:[#allocation2 + $0x170] sm:$0xff] %vm4306_vm8, %v4255_v14  ;;  %v4253_v30 = vpop.permute.xlu1 %4252 }
 0x7e2   :  { %4352 = vst.msk [vmem:[#allocation2 + $0x168] sm:$0xff] %vm4306_vm8, %v4253_v30  ;;  %8516 = vmatmul.mubr.msk.bf16.gmra.mrb[100].mxu1 %vm6001_vm0, %v13393_v4 }
 0x7e3   :  { %8519 = vmatprep.mubr.msk.bf16.mxu1 %vm6001_vm0, %v6775_v63 }
 0x7e4   :  { %v4444_v59 = vpop.permute.xlu0 %4443 }
 0x7e5   :  { %4544 = vst.msk [vmem:[#allocation2 + $0x160] sm:$0xff] %vm4499_vm9, %v4444_v59  ;;  %v4257_v62 = vpop.permute.xlu1 %4256 }
 0x7e6   :  { %4354 = vst.msk [vmem:[#allocation2 + $0x178] sm:$0xff] %vm4306_vm8, %v4257_v62 }
 0x7e8   :  { %v4448_v5 = vpop.permute.xlu0 %4447 }
 0x7e9   :  { %4546 = vst.msk [vmem:[#allocation2 + $0x170] sm:$0xff] %vm4499_vm9, %v4448_v5  ;;  %v4446_v27 = vpop.permute.xlu1 %4445 }
 0x7ea   :  { %4545 = vst.msk [vmem:[#allocation2 + $0x168] sm:$0xff] %vm4499_vm9, %v4446_v27  ;;  %8520 = vmatmul.mubr.msk.bf16.gmra.mrb[104].mxu1 %vm6001_vm0, %v13342_v12 }
 0x7eb   :  { %8523 = vmatprep.mubr.msk.bf16.mxu1 %vm6001_vm0, %v6593_v39 }
 0x7ec   :  { %v4637_v4 = vpop.permute.xlu0 %4636 }
 0x7ed   :  { %4737 = vst.msk [vmem:[#allocation2 + $0x160] sm:$0xff] %vm4692_vm10, %v4637_v4  ;;  %v4450_v48 = vpop.permute.xlu1 %4449 }
 0x7ee   :  { %4547 = vst.msk [vmem:[#allocation2 + $0x178] sm:$0xff] %vm4499_vm9, %v4450_v48 }
 0x7f0   :  { %v4641_v6 = vpop.permute.xlu0 %4640 }
 0x7f1   :  { %4739 = vst.msk [vmem:[#allocation2 + $0x170] sm:$0xff] %vm4692_vm10, %v4641_v6  ;;  %v4639_v61 = vpop.permute.xlu1 %4638 }
 0x7f2   :  { %4738 = vst.msk [vmem:[#allocation2 + $0x168] sm:$0xff] %vm4692_vm10, %v4639_v61 }
 0x7f4   :  { %v4830_v58 = vpop.permute.xlu0 %4829 }
 0x7f5   :  { %4930 = vst.msk [vmem:[#allocation2 + $0x160] sm:$0xff] %vm4885_vm11, %v4830_v58  ;;  %v4643_v3 = vpop.permute.xlu1 %4642 }
 0x7f6   :  { %4740 = vst.msk [vmem:[#allocation2 + $0x178] sm:$0xff] %vm4692_vm10, %v4643_v3 }
 0x7f8   :  { %v4834_v12 = vpop.permute.xlu0 %4833 }
 0x7f9   :  { %4932 = vst.msk [vmem:[#allocation2 + $0x170] sm:$0xff] %vm4885_vm11, %v4834_v12  ;;  %v4832_v28 = vpop.permute.xlu1 %4831 }
 0x7fa   :  { %4931 = vst.msk [vmem:[#allocation2 + $0x168] sm:$0xff] %vm4885_vm11, %v4832_v28 }
 0x7fc   :  { %v5023_v1 = vpop.permute.xlu0 %5022 }
 0x7fd   :  { %5123 = vst.msk [vmem:[#allocation2 + $0x160] sm:$0xff] %vm5078_vm12, %v5023_v1  ;;  %v4836_v25 = vpop.permute.xlu1 %4835 }
 0x7fe   :  { %4933 = vst.msk [vmem:[#allocation2 + $0x178] sm:$0xff] %vm4885_vm11, %v4836_v25 }
 0x800   :  { %v5027_v32 = vpop.permute.xlu0 %5026 }
 0x801   :  { %5125 = vst.msk [vmem:[#allocation2 + $0x170] sm:$0xff] %vm5078_vm12, %v5027_v32  ;;  %v5025_v38 = vpop.permute.xlu1 %5024 }
 0x802   :  { %5124 = vst.msk [vmem:[#allocation2 + $0x168] sm:$0xff] %vm5078_vm12, %v5025_v38 }
 0x804   :  { %v5553_v15 = vpop.permute.xlu0 %5552 }
 0x805   :  { %5653 = vst.msk [vmem:[#allocation2 + $0x160] sm:$0xff] %vm5608_vm13, %v5553_v15  ;;  %v5029_v10 = vpop.permute.xlu1 %5028 }
 0x806   :  { %5126 = vst.msk [vmem:[#allocation2 + $0x178] sm:$0xff] %vm5078_vm12, %v5029_v10 }
 0x808   :  { %v5557_v0 = vpop.permute.xlu0 %5556 }
 0x809   :  { %5655 = vst.msk [vmem:[#allocation2 + $0x170] sm:$0xff] %vm5608_vm13, %v5557_v0  ;;  %v5555_v2 = vpop.permute.xlu1 %5554 }
 0x80a   :  { %5654 = vst.msk [vmem:[#allocation2 + $0x168] sm:$0xff] %vm5608_vm13, %v5555_v2 }
 0x80c   :  { %v5890_v52 = vpop.permute.xlu0 %5889 }
 0x80d   :  { %5990 = vst.msk [vmem:[#allocation2 + $0x160] sm:$0xff] %vm5945_vm14, %v5890_v52  ;;  %v5559_v44 = vpop.permute.xlu1 %5558 }
 0x80e   :  { %5656 = vst.msk [vmem:[#allocation2 + $0x178] sm:$0xff] %vm5608_vm13, %v5559_v44 }
 0x810   :  { %v5894_v35 = vpop.permute.xlu0 %5893 }
 0x811   :  { %5992 = vst.msk [vmem:[#allocation2 + $0x170] sm:$0xff] %vm5945_vm14, %v5894_v35  ;;  %v5892_v51 = vpop.permute.xlu1 %5891 }
 0x812   :  { %5991 = vst.msk [vmem:[#allocation2 + $0x168] sm:$0xff] %vm5945_vm14, %v5892_v51 }
 0x814   :  { %v6083_v22 = vld [vmem:[#allocation2 + $0x160] sm:$0xff] }
 0x815   :  { %v5896_v13 = vpop.permute.xlu1 %5895 }
 0x816   :  { %5993 = vst.msk [vmem:[#allocation2 + $0x178] sm:$0xff] %vm5945_vm14, %v5896_v13 }
 0x818   :  { %v6085_v37 = vld [vmem:[#allocation2 + $0x170] sm:$0xff] }
 0x819   :  { %v6084_v34 = vld [vmem:[#allocation2 + $0x168] sm:$0xff]  ;;  %v6087_v29 = vmax.f32 %v6083_v22, %v6085_v37 }
 0x81d   :  { %v6086_v42 = vld [vmem:[#allocation2 + $0x178] sm:$0xff] }
 0x81e   :  { %v6088_v36 = vmax.f32 %v6084_v34, %v6086_v42 }
 0x820   :  { %v6089_v31 = vpack.c.bf16 %v6088_v36, %v6087_v29 }
 0x822   :  { %6090 = vst.msk [vmem:[#allocation3 + $0x58] sm:$0xff] %vm6001_vm0, %v6089_v31 }
 0x829   :  { %v6778_v33 = vld [vmem:[#allocation3 + $0x58] sm:$0xff] }
 0x82a   :  { %8524 = vmatmul.mubr.msk.bf16.gmra.mrb[108].mxu1 %vm6001_vm0, %v6778_v33 }
 0x8ad   :  { %v8513_v49 = vpop.f32.mrb[96].mxu1 }
 0x8ae   :  { %v6877_v41 = vpop.f32.mrb[97].mxu1  ;;  %v13597_v1 = vadd.f32 %v8513_v49, %v8242_v19 }
 0x8af   :  { %v8514_v23 = vpop.f32.mrb[98].mxu1  ;;  %v13587_v58 = vadd.f32 %v8242_v19, %v6877_v41 }
 0x8b0   :  { %v6880_v16 = vpop.f32.mrb[99].mxu1  ;;  %v13603_v32 = vadd.f32 %v8514_v23, %v8242_v19  ;;  %v6981_v15 = vmax.f32 %v13597_v1, 0.0  ;;  %v9205_v1 = vld [vmem:[%s13926_s5 + $0x84] ss:$8 sps:$4 sm:$0xff]  }
 0x8b1   :  { %v13591_v12 = vadd.f32 %v8242_v19, %v6880_v16  ;;  %v6979_v25 = vmax.f32 %v13587_v58, 0.0  ;;  %v9199_v58 = vld [vmem:[%s13926_s5 + $0x64] ss:$8 sps:$4 sm:$0xff]  }
 0x8b2   :  { %v6982_v10 = vmax.f32 %v13603_v32, 0.0  ;;  %v9208_v32 = vld [vmem:[%s13926_s5 + $0x94] ss:$8 sps:$4 sm:$0xff]  }
 0x8b3   :  { %v6980_v38 = vmax.f32 %v13591_v12, 0.0  ;;  %v9202_v12 = vld [vmem:[%s13926_s5 + $0x74] ss:$8 sps:$4 sm:$0xff]  }
 0x8b5   :  { %v8517_v43 = vpop.f32.mrb[100].mxu1 }
 0x8b6   :  { %v13550_v20 = vadd.f32 %v8517_v43, %v8242_v19  ;;  %v6893_v55 = vpop.f32.mrb[101].mxu1 }
 0x8b7   :  { %v8518_v7 = vpop.f32.mrb[102].mxu1  ;;  %v13553_v11 = vadd.f32 %v8242_v19, %v6893_v55 }
 0x8b8   :  { %v6985_v24 = vmax.f32 %v13550_v20, 0.0  ;;  %v6970_v50 = vadd.f32 %v8518_v7, %v8242_v19  ;;  %v6896_v53 = vpop.f32.mrb[103].mxu1 }
 0x8b9   :  { %v13555_v18 = vadd.f32 %v8242_v19, %v6896_v53  ;;  %v6983_v54 = vmax.f32 %v13553_v11, 0.0 }
 0x8ba   :  { %v6986_v9 = vmax.f32 %v6970_v50, 0.0  ;;  %7023 = vrot.lane.b32.xlu0 %v6985_v24, %s9346_s12 }
 0x8bb   :  { %v6984_v17 = vmax.f32 %v13555_v18, 0.0 }
 0x8bc   :  { %7025 = vrot.lane.b32.xlu1 %v6986_v9, %s9346_s12 }
 0x8bd   :  { %v8521_v8 = vpop.f32.mrb[104].mxu1 }
 0x8be   :  { %7019 = vrot.lane.b32.xlu0 %v6983_v54, %s9346_s12  ;;  %v6909_v57 = vpop.f32.mrb[105].mxu1  ;;  %v13579_v4 = vadd.f32 %v8521_v8, %v8242_v19 }
 0x8bf   :  { %v8522_v60 = vpop.f32.mrb[106].mxu1  ;;  %v13571_v59 = vadd.f32 %v8242_v19, %v6909_v57 }
 0x8c0   :  { %7021 = vrot.lane.b32.xlu1 %v6984_v17, %s9346_s12  ;;  %v6912_v40 = vpop.f32.mrb[107].mxu1  ;;  %v13583_v6 = vadd.f32 %v8522_v60, %v8242_v19  ;;  %v6989_v3 = vmax.f32 %v13579_v4, 0.0  ;;  %v9193_v4 = vld [vmem:[%s13926_s5 + $0x44] ss:$8 sps:$4 sm:$0xff]  }
 0x8c1   :  { %v13575_v5 = vadd.f32 %v8242_v19, %v6912_v40  ;;  %v6987_v48 = vmax.f32 %v13571_v59, 0.0  ;;  %v9187_v59 = vld [vmem:[%s13926_s5 + $0x24] ss:$8 sps:$4 sm:$0xff]  }
 0x8c2   :  { %v6990_v28 = vmax.f32 %v13583_v6, 0.0  ;;  %v9196_v6 = vld [vmem:[%s13926_s5 + $0x54] ss:$8 sps:$4 sm:$0xff]  }
 0x8c3   :  { %v6988_v61 = vmax.f32 %v13575_v5, 0.0  ;;  %v9190_v5 = vld [vmem:[%s13926_s5 + $0x34] ss:$8 sps:$4 sm:$0xff]  }
 0x8fd   :  { %v8525_v39 = vpop.f32.mrb[108].mxu1 }
 0x8fe   :  { %v13563_v46 = vadd.f32 %v8525_v39, %v8242_v19  ;;  %v6925_v45 = vpop.f32.mrb[109].mxu1 }
 0x8ff   :  { %v8526_v47 = vpop.f32.mrb[110].mxu1  ;;  %v13566_v21 = vadd.f32 %v8242_v19, %v6925_v45 }
 0x900   :  { %v6993_v26 = vmax.f32 %v13563_v46, 0.0  ;;  %v6978_v56 = vadd.f32 %v8526_v47, %v8242_v19  ;;  %v6928_v14 = vpop.f32.mrb[111].mxu1 }
 0x901   :  { %v13568_v63 = vadd.f32 %v8242_v19, %v6928_v14  ;;  %v6991_v62 = vmax.f32 %v13566_v21, 0.0  ;;  %v9181_v14 = vld [vmem:[%s13926_s5 + $0x4] ss:$8 sps:$4 sm:$0xff]  }
 0x902   :  { %v6994_v30 = vmax.f32 %v6978_v56, 0.0  ;;  %7039 = vrot.lane.b32.xlu0 %v6993_v26, %s9346_s12  ;;  %v9179_v56 = vld [vmem:[%s13926_s5] ss:$8 sps:$4 sm:$0xff]   ;;  %7551 = vmatprep.subr.bf16.mxu1 %v9181_v14 }
 0x903   :  { %v6992_v27 = vmax.f32 %v13568_v63, 0.0  ;;  %7552 = vmatpush1.bf16.msra.mxu1 %v9179_v56  ;;  %v9182_v63 = vld [vmem:[%s13926_s5 + $0x10] ss:$8 sps:$4 sm:$0xff]  }
 0x904   :  { %7041 = vrot.lane.b32.xlu1 %v6994_v30, %s9346_s12 }
 0x906   :  { %7035 = vrot.lane.b32.xlu0 %v6991_v62, %s9346_s12 }
 0x908   :  { %7037 = vrot.lane.b32.xlu1 %v6992_v27, %s9346_s12 }
 0x90a   :  { %7027 = vrot.lane.b32.xlu0 %v6987_v48, %s9346_s12 }
 0x90c   :  { %7029 = vrot.lane.b32.xlu1 %v6988_v61, %s9346_s12 }
 0x90e   :  { %7031 = vrot.lane.b32.xlu0 %v6989_v3, %s9346_s12 }
 0x910   :  { %7033 = vrot.lane.b32.xlu1 %v6990_v28, %s9346_s12 }
 0x912   :  { %7011 = vrot.lane.b32.xlu0 %v6979_v25, %s9346_s12 }
 0x914   :  { %7013 = vrot.lane.b32.xlu1 %v6980_v38, %s9346_s12 }
 0x916   :  { %7015 = vrot.lane.b32.xlu0 %v6981_v15, %s9346_s12 }
 0x918   :  { %7017 = vrot.lane.b32.xlu1 %v6982_v10, %s9346_s12 }
 0x92c   :  { %v7024_v0 = vpop.permute.xlu0 %7023 }
 0x92d   :  { %v13620_v2 = vmax.f32 %v6985_v24, %v7024_v0  ;;  %v9214_v0 = vld [vmem:[%s13926_s5 + $0xb4] ss:$8 sps:$4 sm:$0xff]  }
 0x92e   :  { %v7026_v52 = vpop.permute.xlu1 %7025 }
 0x92f   :  { %v13622_v44 = vmax.f32 %v6986_v9, %v7026_v52  ;;  %7120 = vrot.lane.b32.xlu0 %v13620_v2, %s9346_s12  ;;  %7082 = vst.msk [vmem:[#allocation4 + $0x30] sm:$0xff] %vm7075_vm1, %v13620_v2  ;;  %v9217_v52 = vld [vmem:[%s13926_s5 + $0xc4] ss:$8 sps:$4 sm:$0xff]  }
 0x930   :  { %v7020_v35 = vpop.permute.xlu0 %7019 }
 0x931   :  { %v7063_v51 = vmax.f32 %v6983_v54, %v7020_v35  ;;  %7122 = vrot.lane.b32.xlu1 %v13622_v44, %s9346_s12  ;;  %7083 = vst.msk [vmem:[#allocation4 + $0x38] sm:$0xff] %vm7075_vm1, %v13622_v44 }
 0x932   :  { %v7022_v13 = vpop.permute.xlu1 %7021 }
 0x933   :  { %v7064_v37 = vmax.f32 %v6984_v17, %v7022_v13  ;;  %7185 = vrot.lane.b32.xlu0 %v13620_v2, %s9347_s4  ;;  %7080 = vst.msk [vmem:[#allocation4 + $0x20] sm:$0xff] %vm7075_vm1, %v7063_v51 }
 0x935   :  { %7187 = vrot.lane.b32.xlu1 %v13622_v44, %s9347_s4  ;;  %7081 = vst.msk [vmem:[#allocation4 + $0x28] sm:$0xff] %vm7075_vm1, %v7064_v37 }
 0x937   :  { %7116 = vrot.lane.b32.xlu0 %v7063_v51, %s9346_s12 }
 0x939   :  { %7118 = vrot.lane.b32.xlu1 %v7064_v37, %s9346_s12 }
 0x93b   :  { %7181 = vrot.lane.b32.xlu0 %v7063_v51, %s9347_s4 }
 0x93d   :  { %7183 = vrot.lane.b32.xlu1 %v7064_v37, %s9347_s4 }
 0x93f   :  { %7246 = vrot.lane.b32.xlu0 %v7063_v51, %s9342_s30 }
 0x941   :  { %7248 = vrot.lane.b32.xlu1 %v7064_v37, %s9342_s30 }
 0x974   :  { %v7040_v22 = vpop.permute.xlu0 %7039 }
 0x975   :  { %v7073_v34 = vmax.f32 %v6993_v26, %v7040_v22 }
 0x976   :  { %v7042_v42 = vpop.permute.xlu1 %7041 }
 0x977   :  { %v7074_v29 = vmax.f32 %v6994_v30, %v7042_v42  ;;  %7136 = vrot.lane.b32.xlu0 %v7073_v34, %s9346_s12  ;;  %7090 = vst.msk [vmem:[#allocation4 + $0x70] sm:$0xff] %vm7075_vm1, %v7073_v34  ;;  %v9184_v30 = vld [vmem:[%s13926_s5 + $0x14] ss:$8 sps:$4 sm:$0xff]  }
 0x978   :  { %v7036_v36 = vpop.permute.xlu0 %7035  ;;  %7553 = vmatprep.subr.bf16.mxu1 %v9184_v30 }
 0x979   :  { %v7071_v31 = vmax.f32 %v6991_v62, %v7036_v36  ;;  %7138 = vrot.lane.b32.xlu1 %v7074_v29, %s9346_s12  ;;  %7091 = vst.msk [vmem:[#allocation4 + $0x78] sm:$0xff] %vm7075_vm1, %v7074_v29  ;;  %7554 = vmatpush1.bf16.msra.mxu1 %v9182_v63  ;;  %v9185_v62 = vld [vmem:[%s13926_s5 + $0x20] ss:$8 sps:$4 sm:$0xff]  }
 0x97a   :  { %v7038_v33 = vpop.permute.xlu1 %7037  ;;  %7555 = vmatprep.subr.bf16.mxu1 %v9187_v59 }
 0x97b   :  { %v7072_v49 = vmax.f32 %v6992_v27, %v7038_v33  ;;  %7201 = vrot.lane.b32.xlu0 %v7073_v34, %s9347_s4  ;;  %7088 = vst.msk [vmem:[#allocation4 + $0x60] sm:$0xff] %vm7075_vm1, %v7071_v31  ;;  %v9188_v27 = vld [vmem:[%s13926_s5 + $0x30] ss:$8 sps:$4 sm:$0xff]  }
 0x97c   :  { %v7028_v41 = vpop.permute.xlu0 %7027 }
 0x97d   :  { %v13650_v23 = vmax.f32 %v6987_v48, %v7028_v41  ;;  %7203 = vrot.lane.b32.xlu1 %v7074_v29, %s9347_s4  ;;  %7089 = vst.msk [vmem:[#allocation4 + $0x68] sm:$0xff] %vm7075_vm1, %v7072_v49  ;;  %7556 = vmatpush1.bf16.msra.mxu1 %v9185_v62  ;;  %v9191_v48 = vld [vmem:[%s13926_s5 + $0x40] ss:$8 sps:$4 sm:$0xff]   ;;  %v9218_v41 = vld [vmem:[%s13926_s5 + $0xd0] ss:$8 sps:$4 sm:$0xff]  }
 0x97e   :  { %v7030_v16 = vpop.permute.xlu1 %7029  ;;  %7557 = vmatprep.subr.bf16.mxu1 %v9190_v5 }
 0x97f   :  { %v13654_v19 = vmax.f32 %v6988_v61, %v7030_v16  ;;  %7266 = vrot.lane.b32.xlu0 %v7073_v34, %s9342_s30  ;;  %7084 = vst.msk [vmem:[#allocation4 + $0x40] sm:$0xff] %vm7075_vm1, %v13650_v23  ;;  %v9194_v61 = vld [vmem:[%s13926_s5 + $0x50] ss:$8 sps:$4 sm:$0xff]  }
 0x980   :  { %v7032_v43 = vpop.permute.xlu0 %7031 }
 0x981   :  { %v13661_v20 = vmax.f32 %v6989_v3, %v7032_v43  ;;  %7268 = vrot.lane.b32.xlu1 %v7074_v29, %s9342_s30  ;;  %7085 = vst.msk [vmem:[#allocation4 + $0x48] sm:$0xff] %vm7075_vm1, %v13654_v19  ;;  %7558 = vmatpush1.bf16.msra.mxu1 %v9188_v27  ;;  %v9197_v3 = vld [vmem:[%s13926_s5 + $0x60] ss:$8 sps:$4 sm:$0xff]  }
 0x982   :  { %v7034_v55 = vpop.permute.xlu1 %7033  ;;  %7559 = vmatprep.subr.bf16.mxu1 %v9193_v4  ;;  %v9221_v43 = vld [vmem:[%s13926_s5 + $0xe0] ss:$8 sps:$4 sm:$0xff]  }
 0x983   :  { %v13668_v7 = vmax.f32 %v6990_v28, %v7034_v55  ;;  %7132 = vrot.lane.b32.xlu0 %v7071_v31, %s9346_s12  ;;  %7086 = vst.msk [vmem:[#allocation4 + $0x50] sm:$0xff] %vm7075_vm1, %v13661_v20  ;;  %v9200_v28 = vld [vmem:[%s13926_s5 + $0x70] ss:$8 sps:$4 sm:$0xff]   ;;  %v9226_v55 = vld [vmem:[%s13926_s5 + $0xf4] ss:$8 sps:$4 sm:$0xff]  }
 0x984   :  { %v7012_v24 = vpop.permute.xlu0 %7011 }
 0x985   :  { %v13675_v11 = vmax.f32 %v6979_v25, %v7012_v24  ;;  %7134 = vrot.lane.b32.xlu1 %v7072_v49, %s9346_s12  ;;  %7087 = vst.msk [vmem:[#allocation4 + $0x58] sm:$0xff] %vm7075_vm1, %v13668_v7  ;;  %7560 = vmatpush1.bf16.msra.mxu1 %v9191_v48  ;;  %v9203_v25 = vld [vmem:[%s13926_s5 + $0x80] ss:$8 sps:$4 sm:$0xff]  }
 0x986   :  { %v7014_v50 = vpop.permute.xlu1 %7013  ;;  %7561 = vmatprep.subr.bf16.mxu1 %v9196_v6 }
 0x987   :  { %v13682_v53 = vmax.f32 %v6980_v38, %v7014_v50  ;;  %7197 = vrot.lane.b32.xlu0 %v7071_v31, %s9347_s4  ;;  %7076 = vst.msk [vmem:[#allocation4] sm:$0xff] %vm7075_vm1, %v13675_v11  ;;  %v9206_v38 = vld [vmem:[%s13926_s5 + $0x90] ss:$8 sps:$4 sm:$0xff]  }
 0x988   :  { %v7016_v9 = vpop.permute.xlu0 %7015 }
 0x989   :  { %v13689_v18 = vmax.f32 %v6981_v15, %v7016_v9  ;;  %7199 = vrot.lane.b32.xlu1 %v7072_v49, %s9347_s4  ;;  %7077 = vst.msk [vmem:[#allocation4 + $0x8] sm:$0xff] %vm7075_vm1, %v13682_v53  ;;  %7562 = vmatpush1.bf16.msra.mxu1 %v9194_v61  ;;  %v9211_v15 = vld [vmem:[%s13926_s5 + $0xa4] ss:$8 sps:$4 sm:$0xff]  }
 0x98a   :  { %v7018_v54 = vpop.permute.xlu1 %7017  ;;  %7563 = vmatprep.subr.bf16.mxu1 %v9199_v58 }
 0x98b   :  { %v13696_v8 = vmax.f32 %v6982_v10, %v7018_v54  ;;  %7262 = vrot.lane.b32.xlu0 %v7071_v31, %s9342_s30  ;;  %7078 = vst.msk [vmem:[#allocation4 + $0x10] sm:$0xff] %vm7075_vm1, %v13689_v18  ;;  %v9209_v10 = vld [vmem:[%s13926_s5 + $0xa0] ss:$8 sps:$4 sm:$0xff]  }
 0x98d   :  { %7264 = vrot.lane.b32.xlu1 %v7072_v49, %s9342_s30  ;;  %7079 = vst.msk [vmem:[#allocation4 + $0x18] sm:$0xff] %vm7075_vm1, %v13696_v8  ;;  %7564 = vmatpush1.bf16.msra.mxu1 %v9197_v3  ;;  %v9220_v49 = vld [vmem:[%s13926_s5 + $0xd4] ss:$8 sps:$4 sm:$0xff]  }
 0x98e   :  { %7565 = vmatprep.subr.bf16.mxu1 %v9202_v12 }
 0x98f   :  { %7250 = vrot.lane.b32.xlu0 %v13620_v2, %s9342_s30  ;;  %v9212_v2 = vld [vmem:[%s13926_s5 + $0xb0] ss:$8 sps:$4 sm:$0xff]  }
 0x991   :  { %7252 = vrot.lane.b32.xlu1 %v13622_v44, %s9342_s30  ;;  %7566 = vmatpush1.bf16.msra.mxu1 %v9200_v28  ;;  %v9215_v44 = vld [vmem:[%s13926_s5 + $0xc0] ss:$8 sps:$4 sm:$0xff]  }
 0x992   :  { %7567 = vmatprep.subr.bf16.mxu1 %v9205_v1 }
 0x993   :  { %7124 = vrot.lane.b32.xlu0 %v13650_v23, %s9346_s12 }
 0x995   :  { %7126 = vrot.lane.b32.xlu1 %v13654_v19, %s9346_s12  ;;  %7568 = vmatpush1.bf16.msra.mxu1 %v9203_v25 }
 0x996   :  { %7569 = vmatprep.subr.bf16.mxu1 %v9208_v32 }
 0x997   :  { %7128 = vrot.lane.b32.xlu0 %v13661_v20, %s9346_s12 }
 0x999   :  { %7130 = vrot.lane.b32.xlu1 %v13668_v7, %s9346_s12  ;;  %7570 = vmatpush1.bf16.msra.mxu1 %v9206_v38 }
 0x99a   :  { %7571 = vmatprep.subr.bf16.mxu1 %v9211_v15 }
 0x99b   :  { %7108 = vrot.lane.b32.xlu0 %v13675_v11, %s9346_s12 }
 0x99d   :  { %7110 = vrot.lane.b32.xlu1 %v13682_v53, %s9346_s12  ;;  %7572 = vmatpush1.bf16.msra.mxu1 %v9209_v10 }
 0x99e   :  { %7573 = vmatprep.subr.bf16.mxu1 %v9214_v0 }
 0x99f   :  { %7112 = vrot.lane.b32.xlu0 %v13689_v18, %s9346_s12 }
 0x9a1   :  { %v7121_v17 = vpop.permute.xlu0 %7120  ;;  %7114 = vrot.lane.b32.xlu1 %v13696_v8, %s9346_s12  ;;  %7574 = vmatpush1.bf16.msra.mxu1 %v9212_v2 }
 0x9a2   :  { %7163 = vst.msk [vmem:[#allocation4 + $0x30] sm:$0xff] %vm7156_vm2, %v7121_v17  ;;  %7575 = vmatprep.subr.bf16.mxu1 %v9217_v52 }
 0x9a3   :  { %7189 = vrot.lane.b32.xlu0 %v13650_v23, %s9347_s4  ;;  %v7123_v57 = vpop.permute.xlu1 %7122 }
 0x9a4   :  { %7164 = vst.msk [vmem:[#allocation4 + $0x38] sm:$0xff] %vm7156_vm2, %v7123_v57 }
 0x9a5   :  { %v7186_v60 = vpop.permute.xlu0 %7185  ;;  %7191 = vrot.lane.b32.xlu1 %v13654_v19, %s9347_s4  ;;  %7576 = vmatpush1.bf16.msra.mxu1 %v9215_v44 }
 0x9a6   :  { %7228 = vst.msk [vmem:[#allocation4 + $0x30] sm:$0xff] %vm7221_vm3, %v7186_v60  ;;  %7577 = vmatprep.subr.bf16.mxu1 %v9220_v49 }
 0x9a7   :  { %7193 = vrot.lane.b32.xlu0 %v13661_v20, %s9347_s4  ;;  %v7188_v40 = vpop.permute.xlu1 %7187 }
 0x9a8   :  { %7229 = vst.msk [vmem:[#allocation4 + $0x38] sm:$0xff] %vm7221_vm3, %v7188_v40 }
 0x9a9   :  { %v7117_v39 = vpop.permute.xlu0 %7116  ;;  %7195 = vrot.lane.b32.xlu1 %v13668_v7, %s9347_s4  ;;  %7578 = vmatpush1.bf16.msra.mxu1 %v9218_v41  ;;  %v9228_v41 = vld [vmem:[#allocation8] sm:$0xff]  }
 0x9aa   :  { %7161 = vst.msk [vmem:[#allocation4 + $0x20] sm:$0xff] %vm7156_vm2, %v7117_v39 }
 0x9ab   :  { %7173 = vrot.lane.b32.xlu0 %v13675_v11, %s9347_s4  ;;  %v7119_v46 = vpop.permute.xlu1 %7118 }
 0x9ac   :  { %7162 = vst.msk [vmem:[#allocation4 + $0x28] sm:$0xff] %vm7156_vm2, %v7119_v46 }
 0x9ad   :  { %v7182_v45 = vpop.permute.xlu0 %7181  ;;  %7175 = vrot.lane.b32.xlu1 %v13682_v53, %s9347_s4 }
 0x9ae   :  { %7226 = vst.msk [vmem:[#allocation4 + $0x20] sm:$0xff] %vm7221_vm3, %v7182_v45 }
 0x9af   :  { %7177 = vrot.lane.b32.xlu0 %v13689_v18, %s9347_s4  ;;  %v7184_v47 = vpop.permute.xlu1 %7183 }
 0x9b0   :  { %7227 = vst.msk [vmem:[#allocation4 + $0x28] sm:$0xff] %vm7221_vm3, %v7184_v47  ;;  %v9227_v47 = vld [vmem:[#allocation8 + $0x40] sm:$0xff]  }
 0x9b1   :  { %v7247_v26 = vpop.permute.xlu0 %7246  ;;  %7179 = vrot.lane.b32.xlu1 %v13696_v8, %s9347_s4 }
 0x9b2   :  { %7291 = vst.msk [vmem:[#allocation4 + $0x20] sm:$0xff] %vm7286_vm4, %v7247_v26 }
 0x9b3   :  { %7254 = vrot.lane.b32.xlu0 %v13650_v23, %s9342_s30  ;;  %v7249_v21 = vpop.permute.xlu1 %7248 }
 0x9b4   :  { %7292 = vst.msk [vmem:[#allocation4 + $0x28] sm:$0xff] %vm7286_vm4, %v7249_v21 }
 0x9b5   :  { %7256 = vrot.lane.b32.xlu1 %v13654_v19, %s9342_s30  ;;  %v9223_v19 = vld [vmem:[%s13926_s5 + $0xe4] ss:$8 sps:$4 sm:$0xff]  }
 0x9b6   :  { %7579 = vmatprep.subr.bf16.mxu1 %v9223_v19  ;;  %v9230_v19 = vld [vmem:[#allocation8 + $0x8] sm:$0xff]  }
 0x9b7   :  { %7258 = vrot.lane.b32.xlu0 %v13661_v20, %s9342_s30  ;;  %7580 = vmatpush1.bf16.msra.mxu1 %v9221_v43  ;;  %v9231_v43 = vld [vmem:[#allocation8 + $0x50] sm:$0xff]  }
 0x9b8   :  { %7581 = vmatprep.subr.bf16.mxu1 %v9226_v55  ;;  %v9233_v55 = vld [vmem:[#allocation8 + $0x58] sm:$0xff]  }
 0x9b9   :  { %7260 = vrot.lane.b32.xlu1 %v13668_v7, %s9342_s30  ;;  %v9224_v7 = vld [vmem:[%s13926_s5 + $0xf0] ss:$8 sps:$4 sm:$0xff]   ;;  %v7312_v40 = vld [vmem:[#allocation4 + $0x20] sm:$0xff] }
 0x9bb   :  { %7238 = vrot.lane.b32.xlu0 %v13675_v11, %s9342_s30  ;;  %7582 = vmatpush1.bf16.msra.mxu1 %v9224_v7  ;;  %v7313_v46 = vld [vmem:[#allocation4 + $0x28] sm:$0xff] }
 0x9bc   :  { %8366 = vmatprep.subr.bf16.mxu1 %v9227_v47  ;;  %v9234_v7 = vld [vmem:[#allocation8 + $0x18] sm:$0xff]  }
 0x9bd   :  { %7240 = vrot.lane.b32.xlu1 %v13682_v53, %s9342_s30 }
 0x9bf   :  { %7242 = vrot.lane.b32.xlu0 %v13689_v18, %s9342_s30 }
 0x9c1   :  { %7244 = vrot.lane.b32.xlu1 %v13696_v8, %s9342_s30 }
 0x9e9   :  { %v7137_v35 = vpop.permute.xlu0 %7136 }
 0x9ea   :  { %7171 = vst.msk [vmem:[#allocation4 + $0x70] sm:$0xff] %vm7156_vm2, %v7137_v35 }
 0x9eb   :  { %v7139_v51 = vpop.permute.xlu1 %7138 }
 0x9ec   :  { %7172 = vst.msk [vmem:[#allocation4 + $0x78] sm:$0xff] %vm7156_vm2, %v7139_v51 }
 0x9ed   :  { %v7202_v13 = vpop.permute.xlu0 %7201 }
 0x9ee   :  { %7236 = vst.msk [vmem:[#allocation4 + $0x70] sm:$0xff] %vm7221_vm3, %v7202_v13 }
 0x9ef   :  { %v7204_v37 = vpop.permute.xlu1 %7203 }
 0x9f0   :  { %7237 = vst.msk [vmem:[#allocation4 + $0x78] sm:$0xff] %vm7221_vm3, %v7204_v37 }
 0x9f1   :  { %v7267_v22 = vpop.permute.xlu0 %7266 }
 0x9f2   :  { %7301 = vst.msk [vmem:[#allocation4 + $0x70] sm:$0xff] %vm7286_vm4, %v7267_v22 }
 0x9f3   :  { %v7269_v34 = vpop.permute.xlu1 %7268 }
 0x9f4   :  { %7302 = vst.msk [vmem:[#allocation4 + $0x78] sm:$0xff] %vm7286_vm4, %v7269_v34 }
 0x9f5   :  { %v7133_v42 = vpop.permute.xlu0 %7132 }
 0x9f6   :  { %7169 = vst.msk [vmem:[#allocation4 + $0x60] sm:$0xff] %vm7156_vm2, %v7133_v42 }
 0x9f7   :  { %v7135_v29 = vpop.permute.xlu1 %7134 }
 0x9f8   :  { %7170 = vst.msk [vmem:[#allocation4 + $0x68] sm:$0xff] %vm7156_vm2, %v7135_v29 }
 0x9f9   :  { %v7198_v36 = vpop.permute.xlu0 %7197  ;;  %v7335_v9 = vld [vmem:[#allocation4 + $0x70] sm:$0xff] }
 0x9fa   :  { %7234 = vst.msk [vmem:[#allocation4 + $0x60] sm:$0xff] %vm7221_vm3, %v7198_v36 }
 0x9fb   :  { %v7200_v31 = vpop.permute.xlu1 %7199  ;;  %v7336_v18 = vld [vmem:[#allocation4 + $0x78] sm:$0xff] }
 0x9fc   :  { %7235 = vst.msk [vmem:[#allocation4 + $0x68] sm:$0xff] %vm7221_vm3, %v7200_v31 }
 0x9fd   :  { %v7263_v33 = vpop.permute.xlu0 %7262 }
 0x9fe   :  { %7299 = vst.msk [vmem:[#allocation4 + $0x60] sm:$0xff] %vm7286_vm4, %v7263_v33 }
 0x9ff   :  { %v7265_v23 = vpop.permute.xlu1 %7264 }
 0xa00   :  { %7300 = vst.msk [vmem:[#allocation4 + $0x68] sm:$0xff] %vm7286_vm4, %v7265_v23  ;;  %v9229_v23 = vld [vmem:[#allocation8 + $0x48] sm:$0xff]  }
 0xa01   :  { %v7251_v16 = vpop.permute.xlu0 %7250 }
 0xa02   :  { %7293 = vst.msk [vmem:[#allocation4 + $0x30] sm:$0xff] %vm7286_vm4, %v7251_v16 }
 0xa03   :  { %v7253_v20 = vpop.permute.xlu1 %7252 }
 0xa04   :  { %7294 = vst.msk [vmem:[#allocation4 + $0x38] sm:$0xff] %vm7286_vm4, %v7253_v20  ;;  %v9232_v20 = vld [vmem:[#allocation8 + $0x10] sm:$0xff]  }
 0xa05   :  { %v7125_v24 = vpop.permute.xlu0 %7124  ;;  %v7333_v11 = vld [vmem:[#allocation4 + $0x60] sm:$0xff] }
 0xa06   :  { %7165 = vst.msk [vmem:[#allocation4 + $0x40] sm:$0xff] %vm7156_vm2, %v7125_v24  ;;  %v7337_v54 = vmax.f32 %v7333_v11, %v7335_v9  ;;  %v9235_v24 = vld [vmem:[#allocation8 + $0x60] sm:$0xff]   ;;  %v9239_v9 = vld [vmem:[#allocation8 + $0x70] sm:$0xff]  }
 0xa07   :  { %v7127_v50 = vpop.permute.xlu1 %7126  ;;  %v7334_v53 = vld [vmem:[#allocation4 + $0x68] sm:$0xff]  ;;  %v9236_v11 = vld [vmem:[#allocation8 + $0x20] sm:$0xff]  }
 0xa08   :  { %7166 = vst.msk [vmem:[#allocation4 + $0x48] sm:$0xff] %vm7156_vm2, %v7127_v50  ;;  %v7338_v8 = vmax.f32 %v7334_v53, %v7336_v18  ;;  %v9237_v50 = vld [vmem:[#allocation8 + $0x68] sm:$0xff]   ;;  %v9240_v18 = vld [vmem:[#allocation8 + $0x30] sm:$0xff]  }
 0xa09   :  { %v7129_v17 = vpop.permute.xlu0 %7128  ;;  %v7314_v57 = vld [vmem:[#allocation4 + $0x30] sm:$0xff]  ;;  %v9238_v53 = vld [vmem:[#allocation8 + $0x28] sm:$0xff]  }
 0xa0a   :  { %7167 = vst.msk [vmem:[#allocation4 + $0x50] sm:$0xff] %vm7156_vm2, %v7129_v17  ;;  %v7339_v60 = vpack.c.bf16 %v7338_v8, %v7337_v54  ;;  %v7316_v26 = vmax.f32 %v7312_v40, %v7314_v57  ;;  %v9241_v54 = vld [vmem:[#allocation8 + $0x78] sm:$0xff]   ;;  %v9348_v17 = vmov 0.0   ;;  %v7379_v57 = vld [vmem:[%s13927_s6] sm:$0x3] }
 0xa0b   :  { %v7131_v39 = vpop.permute.xlu1 %7130  ;;  %v7315_v45 = vld [vmem:[#allocation4 + $0x38] sm:$0xff]  ;;  %v9242_v8 = vld [vmem:[#allocation8 + $0x38] sm:$0xff]  }
 0xa0c   :  { %7168 = vst.msk [vmem:[#allocation4 + $0x58] sm:$0xff] %vm7156_vm2, %v7131_v39  ;;  %7341 = vrot.lane.b32.xlu0 %v7339_v60, %s9328_s27  ;;  %v7317_v21 = vmax.f32 %v7313_v46, %v7315_v45  ;;  %v14552_v60 = vld [vmem:[#allocation61_spill] sm:$0xff] }
 0xa0d   :  { %v7109_v56 = vpop.permute.xlu0 %7108  ;;  %v14553_v40 = vsub.s32 0, %v14552_v60  ;;  %v14554_v46 = vsub.s32 1, %v14552_v60 }
 0xa0e   :  { %7157 = vst.msk [vmem:[#allocation4] sm:$0xff] %vm7156_vm2, %v7109_v56  ;;  %v7318_v14 = vpack.c.bf16 %v7317_v21, %v7316_v26 }
 0xa0f   :  { %v7111_v30 = vpop.permute.xlu1 %7110  ;;  %v7384_v39 = vrot.slane %v7379_v57, %v14553_v40  ;;  %v7388_v45 = vrot.slane %v7379_v57, %v14554_v46 }
 0xa10   :  { %7158 = vst.msk [vmem:[#allocation4 + $0x8] sm:$0xff] %vm7156_vm2, %v7111_v30  ;;  %7320 = vrot.lane.b32.xlu1 %v7318_v14, %s9328_s27 }
 0xa11   :  { %v7113_v63 = vpop.permute.xlu0 %7112 }
 0xa12   :  { %7159 = vst.msk [vmem:[#allocation4 + $0x10] sm:$0xff] %vm7156_vm2, %v7113_v63 }
 0xa13   :  { %v7115_v59 = vpop.permute.xlu1 %7114 }
 0xa14   :  { %7160 = vst.msk [vmem:[#allocation4 + $0x18] sm:$0xff] %vm7156_vm2, %v7115_v59 }
 0xa15   :  { %v7190_v62 = vpop.permute.xlu0 %7189 }
 0xa16   :  { %7230 = vst.msk [vmem:[#allocation4 + $0x40] sm:$0xff] %vm7221_vm3, %v7190_v62 }
 0xa17   :  { %v7192_v5 = vpop.permute.xlu1 %7191 }
 0xa18   :  { %7231 = vst.msk [vmem:[#allocation4 + $0x48] sm:$0xff] %vm7221_vm3, %v7192_v5 }
 0xa19   :  { %v7194_v27 = vpop.permute.xlu0 %7193 }
 0xa1a   :  { %7232 = vst.msk [vmem:[#allocation4 + $0x50] sm:$0xff] %vm7221_vm3, %v7194_v27 }
 0xa1b   :  { %v7196_v4 = vpop.permute.xlu1 %7195 }
 0xa1c   :  { %7233 = vst.msk [vmem:[#allocation4 + $0x58] sm:$0xff] %vm7221_vm3, %v7196_v4 }
 0xa1d   :  { %v7174_v48 = vpop.permute.xlu0 %7173 }
 0xa1e   :  { %7222 = vst.msk [vmem:[#allocation4] sm:$0xff] %vm7221_vm3, %v7174_v48 }
 0xa1f   :  { %v7176_v6 = vpop.permute.xlu1 %7175 }
 0xa20   :  { %7223 = vst.msk [vmem:[#allocation4 + $0x8] sm:$0xff] %vm7221_vm3, %v7176_v6 }
 0xa21   :  { %v7178_v61 = vpop.permute.xlu0 %7177 }
 0xa22   :  { %7224 = vst.msk [vmem:[#allocation4 + $0x10] sm:$0xff] %vm7221_vm3, %v7178_v61  ;;  %v9243_v61 = vld [vmem:[#allocation10] sm:$0xff]  }
 0xa23   :  { %v7180_v58 = vpop.permute.xlu1 %7179 }
 0xa24   :  { %7225 = vst.msk [vmem:[#allocation4 + $0x18] sm:$0xff] %vm7221_vm3, %v7180_v58  ;;  %v9244_v58 = vld [vmem:[#allocation10 + $0x8] sm:$0xff]  }
 0xa25   :  { %v7255_v3 = vpop.permute.xlu0 %7254 }
 0xa26   :  { %7295 = vst.msk [vmem:[#allocation4 + $0x40] sm:$0xff] %vm7286_vm4, %v7255_v3  ;;  %v9245_v3 = vld [vmem:[#allocation10 + $0x10] sm:$0xff]  }
 0xa27   :  { %v7257_v12 = vpop.permute.xlu1 %7256 }
 0xa28   :  { %7296 = vst.msk [vmem:[#allocation4 + $0x48] sm:$0xff] %vm7286_vm4, %v7257_v12  ;;  %v9246_v12 = vld [vmem:[#allocation10 + $0x18] sm:$0xff]  }
 0xa29   :  { %v7259_v28 = vpop.permute.xlu0 %7258 }
 0xa2a   :  { %7297 = vst.msk [vmem:[#allocation4 + $0x50] sm:$0xff] %vm7286_vm4, %v7259_v28  ;;  %v9247_v28 = vld [vmem:[#allocation10 + $0x20] sm:$0xff]  }
 0xa2b   :  { %v7261_v1 = vpop.permute.xlu1 %7260 }
 0xa2c   :  { %7298 = vst.msk [vmem:[#allocation4 + $0x58] sm:$0xff] %vm7286_vm4, %v7261_v1  ;;  %v9248_v1 = vld [vmem:[#allocation10 + $0x28] sm:$0xff]  }
 0xa2d   :  { %v7239_v25 = vpop.permute.xlu0 %7238  ;;  %v7325_v0 = vld [vmem:[#allocation4 + $0x40] sm:$0xff] }
 0xa2e   :  { %7287 = vst.msk [vmem:[#allocation4] sm:$0xff] %vm7286_vm4, %v7239_v25  ;;  %v9249_v25 = vld [vmem:[#allocation10 + $0x30] sm:$0xff]  }
 0xa2f   :  { %v7241_v32 = vpop.permute.xlu1 %7240  ;;  %v7326_v2 = vld [vmem:[#allocation4 + $0x48] sm:$0xff] }
 0xa30   :  { %7288 = vst.msk [vmem:[#allocation4 + $0x8] sm:$0xff] %vm7286_vm4, %v7241_v32  ;;  %v9250_v32 = vld [vmem:[#allocation10 + $0x38] sm:$0xff]  }
 0xa31   :  { %v7243_v38 = vpop.permute.xlu0 %7242  ;;  %v7327_v15 = vld [vmem:[#allocation4 + $0x50] sm:$0xff] }
 0xa32   :  { %7289 = vst.msk [vmem:[#allocation4 + $0x10] sm:$0xff] %vm7286_vm4, %v7243_v38  ;;  %v7329_v44 = vmax.f32 %v7325_v0, %v7327_v15  ;;  %v8275_v15 = vld [vmem:[%s13929_s8] ss:$0 sm:$0xff] }
 0xa33   :  { %v7245_v10 = vpop.permute.xlu1 %7244  ;;  %v7328_v52 = vld [vmem:[#allocation4 + $0x58] sm:$0xff] }
 0xa34   :  { %7290 = vst.msk [vmem:[#allocation4 + $0x18] sm:$0xff] %vm7286_vm4, %v7245_v10  ;;  %v7330_v35 = vmax.f32 %v7326_v2, %v7328_v52 }
 0xa35   :  { %v7303_v37 = vld [vmem:[#allocation4] sm:$0xff] }
 0xa36   :  { %v7331_v51 = vpack.c.bf16 %v7330_v35, %v7329_v44 }
 0xa37   :  { %v7304_v22 = vld [vmem:[#allocation4 + $0x8] sm:$0xff] }
 0xa38   :  { %7332 = vst.msk [vmem:[#allocation5 + $0x8] sm:$0xff] %vm7310_vm5, %v7331_v51 }
 0xa39   :  { %v7305_v13 = vld [vmem:[#allocation4 + $0x10] sm:$0xff] }
 0xa3a   :  { %v7307_v42 = vmax.f32 %v7303_v37, %v7305_v13 }
 0xa3b   :  { %v7306_v34 = vld [vmem:[#allocation4 + $0x18] sm:$0xff] }
 0xa3c   :  { %v7308_v29 = vmax.f32 %v7304_v22, %v7306_v34  ;;  %v8292_v34 = vld [vmem:[%s13931_s10] ss:$0 sm:$0xff] }
 0xa3e   :  { %v7309_v36 = vpack.c.bf16 %v7308_v29, %v7307_v42 }
 0xa40   :  { %7311 = vst.msk [vmem:[#allocation5] sm:$0xff] %vm7310_vm5, %v7309_v36 }
 0xa7e   :  { %v7342_v31 = vpop.permute.xlu0 %7341 }
 0xa7f   :  { %7344 = vst.msk [vmem:[#allocation5 + $0x8] sm:$0xff] %vm7323_vm6, %v7342_v31 }
 0xa82   :  { %v7321_v33 = vpop.permute.xlu1 %7320 }
 0xa83   :  { %7324 = vst.msk [vmem:[#allocation5] sm:$0xff] %vm7323_vm6, %v7321_v33 }
 0xa86   :  { %v7346_v49 = vld [vmem:[#allocation5 + $0x8] sm:$0xff] }
 0xa87   :  { %7583 = vmatprep.mubr.bf16.mxu1 %v7346_v49 }
 0xa8a   :  { %v7345_v16 = vld [vmem:[#allocation5] sm:$0xff] }
 0xa8b   :  { %7584 = vmatmul.mubr.bf16.vlgmr.msra.gmra.mrb[112].mxu1 %v7345_v16 }
 0xa8c   :  { %8367 = vmatpush3.bf16.msra.mxu1 %v9228_v41 }
 0xa8d   :  { %8368 = vmatprep.subr.bf16.mxu1 %v9229_v23 }
 0xa90   :  { %8369 = vmatpush3.bf16.msra.mxu1 %v9230_v19 }
 0xa91   :  { %8370 = vmatprep.subr.bf16.mxu1 %v9231_v43 }
 0xa94   :  { %8371 = vmatpush3.bf16.msra.mxu1 %v9232_v20 }
 0xa95   :  { %8372 = vmatprep.subr.bf16.mxu1 %v9233_v55 }
 0xa98   :  { %8373 = vmatpush3.bf16.msra.mxu1 %v9234_v7 }
 0xa99   :  { %8374 = vmatprep.subr.bf16.mxu1 %v9235_v24 }
 0xa9c   :  { %8375 = vmatpush3.bf16.msra.mxu1 %v9236_v11 }
 0xa9d   :  { %8376 = vmatprep.subr.bf16.mxu1 %v9237_v50 }
 0xaa0   :  { %8377 = vmatpush3.bf16.msra.mxu1 %v9238_v53 }
 0xaa1   :  { %8378 = vmatprep.subr.bf16.mxu1 %v9239_v9 }
 0xaa4   :  { %8379 = vmatpush3.bf16.msra.mxu1 %v9240_v18 }
 0xaa5   :  { %8380 = vmatprep.subr.bf16.mxu1 %v9241_v54 }
 0xaa8   :  { %8381 = vmatpush3.bf16.msra.mxu1 %v9242_v8 }
 0xaa9   :  { %8527 = vmatprep.subr.bf16.mxu1 %v9348_v17 }
 0xb5e   :  { %v7585_v47 = vpop.f32.mrb[112].mxu1 }
 0xb5f   :  { %v7586_v26 = vadd.f32 %v7585_v47, %v7384_v39  ;;  %v7587_v21 = vpop.f32.mrb[113].mxu1 }
 0xb60   :  { %v7588_v56 = vadd.f32 %v7587_v21, %v7388_v45  ;;  %v7589_v14 = vpop.f32.mrb[114].mxu1 }
 0xb61   :  { %v7590_v30 = vadd.f32 %v7589_v14, %v7384_v39  ;;  %v7591_v63 = vpop.f32.mrb[115].mxu1  ;;  %v7594_v62 = vmax.f32 %v7586_v26, 0.0 }
 0xb62   :  { %v7592_v59 = vadd.f32 %v7591_v63, %v7388_v45  ;;  %v7595_v27 = vmax.f32 %v7588_v56, 0.0 }
 0xb63   :  { %v7596_v5 = vmax.f32 %v7590_v30, 0.0 }
 0xb64   :  { %v7597_v4 = vmax.f32 %v7592_v59, 0.0 }
 0xb65   :  { %v7598_v48 = vpack.c.bf16 %v7596_v5, %v7594_v62 }
 0xb66   :  { %v7599_v6 = vpack.c.bf16 %v7597_v4, %v7595_v27 }
 0xb68   :  { %7767 = vmatprep.mubr.bf16.mxu1 %v7599_v6 }
 0xb69   :  { %7768 = vmatmul.mubr.bf16.vlgmr.msra.gmra.mrb[116].mxu1 %v7598_v48 }
 0xb6a   :  { %8528 = vmatpush3.bf16.msra.mxu1 %v9243_v61  ;;  %8543 = vmatprep.mubr.msk.bf16.mxu1 %vm9349_vm7, %v9348_v17 }
 0xb6b   :  { %8529 = vmatprep.subr.bf16.mxu1 %v9348_v17 }
 0xb6e   :  { %8530 = vmatpush3.bf16.msra.mxu1 %v9244_v58 }
 0xb6f   :  { %8531 = vmatprep.subr.bf16.mxu1 %v9348_v17 }
 0xb72   :  { %8532 = vmatpush3.bf16.msra.mxu1 %v9245_v3 }
 0xb73   :  { %8533 = vmatprep.subr.bf16.mxu1 %v9348_v17 }
 0xb76   :  { %8534 = vmatpush3.bf16.msra.mxu1 %v9246_v12 }
 0xb77   :  { %8535 = vmatprep.subr.bf16.mxu1 %v9348_v17 }
 0xb7a   :  { %8536 = vmatpush3.bf16.msra.mxu1 %v9247_v28 }
 0xb7b   :  { %8537 = vmatprep.subr.bf16.mxu1 %v9348_v17 }
 0xb7e   :  { %8538 = vmatpush3.bf16.msra.mxu1 %v9248_v1 }
 0xb7f   :  { %8539 = vmatprep.subr.bf16.mxu1 %v9348_v17 }
 0xb82   :  { %8540 = vmatpush3.bf16.msra.mxu1 %v9249_v25 }
 0xb83   :  { %8541 = vmatprep.subr.bf16.mxu1 %v9348_v17 }
 0xb86   :  { %8542 = vmatpush3.bf16.msra.mxu1 %v9250_v32 }
 0xc3c   :  { %v8382_v38 = vpop.f32.mrb[116].mxu1 }
 0xc3d   :  { %v8383_v10 = vpop.f32.mrb[117].mxu1 }
 0xc3e   :  { %v8384_v0 = vadd.f32 %v8383_v10, %v8382_v38  ;;  %v8385_v2 = vpop.f32.mrb[118].mxu1 }
 0xc3f   :  { %v8386_v52 = vpop.f32.mrb[119].mxu1 }
 0xc40   :  { %v7770_v44 = vadd.f32 %v8384_v0, %v8275_v15  ;;  %v8387_v35 = vadd.f32 %v8386_v52, %v8385_v2 }
 0xc42   :  { %v7773_v51 = vadd.f32 %v8387_v35, %v8275_v15  ;;  %v7776_v13 = vmax.f32 %v7770_v44, 0.0 }
 0xc44   :  { %v7777_v37 = vmax.f32 %v7773_v51, 0.0 }
 0xc46   :  { %v7778_v22 = vpack.c.bf16 %v7777_v37, %v7776_v13 }
 0xc48   :  { %8544 = vmatmul.mubr.bf16.vlgmr.msra.gmra.mrb[120].mxu1 %v7778_v22 }
 0xd1b   :  { %v7884_v42 = vpop.f32.mrb[120].mxu1 }
 0xd1c   :  { %v7885_v29 = vadd.f32 %v8292_v34, %v7884_v42  ;;  %v8545_v36 = vpop.f32.mrb[121].mxu1 }
 0xd1d   :  { %v7887_v31 = vpop.f32.mrb[122].mxu1 }
 0xd1e   :  { %7891 = vst [vmem:[%s13932_s11] sm:$0xff] %v7885_v29  ;;  %v7888_v33 = vadd.f32 %v8292_v34, %v7887_v31  ;;  %v8546_v49 = vpop.f32.mrb[123].mxu1 }
 0xd20   :  { %7892 = vst [vmem:[%s13932_s11 + $0x8] sm:$0xff] %v7888_v33 }
 0xd21   :  { %7897 = vsyncpa [#allocation7], 1 }
 0xd22   :  { %7898 = vsyncpa [#allocation9], 1 }

</bundles_post_ra>
